<compile_context>
chip_gen: v7x
topology: tpu7x:2x2x1
jax: 0.10.0
libtpu: 0.0.40
codegen_flags: <defaults>
</compile_context>

<pallas_src>
import math
from functools import partial

import jax
import jax.numpy as jnp
from jax import lax
from jax.experimental import pallas as pl
from jax.experimental.pallas import tpu as pltpu

F32 = jnp.float32
BF16 = jnp.bfloat16
XLANE = 128
VMEM_SPEC = pl.BlockSpec(memory_space=pltpu.MemorySpace.VMEM)


def _round_up(v, m):
    return ((v + m - 1) // m) * m


def _silu(v):
    # SiLU = v * sigmoid(v); the divide goes to the EUP (approx reciprocal).
    return v * pl.reciprocal(1.0 + jnp.exp(-v), approx=True)


def _dot(a, b):
    return jnp.dot(a, b, preferred_element_type=F32)


# --------------------------------------------------------------------------
# Fused EGNN forward kernel (single program, everything VMEM-resident)
# --------------------------------------------------------------------------
def _egnn_fused_kernel(
    # graph data
    row_ref, rowT_ref, col_ref, h_ref, x_ref, eattr_ref, nmask_ref, emask_ref,
    # embedding_in / embedding_out
    wi1, bi1, wi2, bi2, wo1, bo1, wo2p, bo2p,
    # stacked GCL edge-MLP weights (L = n_layers * inv_sublayers)
    ge_w1hc, ge_w1r, ge_w1e, ge_b1hc, ge_w2, ge_b2,
    # stacked GCL node-MLP weights
    gn_w1h, gn_w1a, gn_b1, gn_w2, gn_b2,
    # stacked EquivariantUpdate coord-MLP weights (B = n_layers)
    qe_w1hc, qe_w1r, qe_w1e, qe_b1hc, qe_w2, qe_b2, qe_w3t,
    # constant lane-padding projection for x output
    xpad_proj,
    # outputs (lane-dense slabs)
    h_out_ref, x_out_ref,
    *, N, E, H, n_layers, inv_sublayers, inv_norm_factor, norm_constant,
):
    row = row_ref[...]                                    # [E, 1] int32
    col = col_ref[...]                                    # [E, 1] int32

    # ---- gather/scatter operators: built ONCE, reused everywhere (bf16, exact) ----
    # oh_both[e, n]     = 1 if row[e] == n          (n <  N)
    # oh_both[e, N + n] = 1 if col[e] == n          (n >= N half)
    ids2 = lax.broadcasted_iota(jnp.int32, (E, 2 * N), 1)
    oh_both = jnp.where((row == ids2) | (col == ids2 - N), 1.0, 0.0).astype(BF16)
    # transposed scatter operator: oh_rowT[n, e] = 1 if row[e] == n   ([N, E])
    niota = lax.broadcasted_iota(jnp.int32, (N, E), 0)
    oh_rowT = jnp.where(rowT_ref[...] == niota, 1.0, 0.0).astype(BF16)

    nmask = nmask_ref[...]                                # [N, 1]
    emask = emask_ref[...]                                # [E, 1]
    eattr = eattr_ref[...]                                # [E, 1]

    # ---- embedding_in: Linear -> SiLU -> Linear -> SiLU ----
    h = _silu(_dot(h_ref[...], wi1[...]) + bi1[...])
    h = _silu(_dot(h, wi2[...]) + bi2[...])
    x = x_ref[...]                                        # [N, 3] f32

    for i in range(n_layers):
        # ---------------- coord2diff (once per EquivariantBlock) ----------------
        # cd = x[row] - x[col] via ONE gather matmul against [x ; -x].
        # hi/lo bf16 split keeps coordinates at ~f32 accuracy through the bf16 MXU.
        x_hi = x.astype(BF16).astype(F32)
        x_lo = x - x_hi
        xs_hi = jnp.concatenate([x_hi, -x_hi], axis=0).astype(BF16)   # [2N, 3]
        xs_lo = jnp.concatenate([x_lo, -x_lo], axis=0).astype(BF16)
        cd = _dot(oh_both, xs_hi) + _dot(oh_both, xs_lo)               # [E, 3]
        radial = jnp.sum(cd * cd, axis=1, keepdims=True)               # [E, 1]
        norm = jnp.sqrt(radial + 1e-8)
        cdiff = cd * pl.reciprocal(norm + norm_constant, approx=True)  # [E, 3]

        # ---------------- inv_sublayers x GCL ----------------
        for j in range(inv_sublayers):
            l = i * inv_sublayers + j
            # Edge MLP first linear, split + packed:
            #   [h_row|h_col] projection done at NODE granularity with a packed
            #   (H, 2H) weight, then ONE gather matmul against [pr ; pc];
            #   the 1-wide radial / edge_attr columns are VPU outer products.
            prc = _dot(h, ge_w1hc[l]) + ge_b1hc[l]                     # [N, 2H]
            prc_s = jnp.concatenate([prc[:, :H], prc[:, H:]], axis=0)  # [2N, H]
            pre = (_dot(oh_both, prc_s.astype(BF16))
                   + radial * ge_w1r[l] + eattr * ge_w1e[l])           # [E, H]
            m = _silu(pre)
            m = _silu(_dot(m, ge_w2[l]) + ge_b2[l])
            ef = m * emask                         # edge_mask (attention=False)

            # unsorted_segment_sum over `row`: plain matmul with transposed one-hot
            agg = _dot(oh_rowT, ef.astype(BF16)) * inv_norm_factor     # [N, H]

            # Node MLP (split first linear: h | agg), residual, node_mask
            t = _silu(_dot(h, gn_w1h[l]) + _dot(agg, gn_w1a[l]) + gn_b1[l])
            h = (h + _dot(t, gn_w2[l]) + gn_b2[l]) * nmask

        # ---------------- EquivariantUpdate (tanh=False) ----------------
        prc = _dot(h, qe_w1hc[i]) + qe_b1hc[i]
        prc_s = jnp.concatenate([prc[:, :H], prc[:, H:]], axis=0)
        pre = (_dot(oh_both, prc_s.astype(BF16))
               + radial * qe_w1r[i] + eattr * qe_w1e[i])
        t = _silu(pre)
        t = _silu(_dot(t, qe_w2[i]) + qe_b2[i])
        # final no-bias Linear(H, 1) as VPU mul + lane reduce (no 1-wide MXU col)
        phi = jnp.sum(t * qe_w3t[i], axis=1, keepdims=True)            # [E, 1]
        trans = cdiff * phi * emask
        aggx = _dot(oh_rowT, trans.astype(BF16)) * inv_norm_factor     # [N, 3]
        x = (x + aggx) * nmask

        # EquivariantBlock's trailing node masking on h
        h = h * nmask

    # ---- embedding_out: Linear -> SiLU -> Linear (lane-dense padded output) ----
    ho = _silu(_dot(h, wo1[...]) + bo1[...])
    h_out_ref[...] = _dot(ho, wo2p[...]) + bo2p[...]        # [N, OPAD]
    x_out_ref[...] = _dot(x, xpad_proj[...])                # [N, 128] (identity pad)


# --------------------------------------------------------------------------
# Wrapper
# --------------------------------------------------------------------------
def egnn_forward(packed, h, x, row, col, edge_attr, node_mask, edge_mask,
                 *, n_layers, inv_sublayers,
                 normalization_factor=100.0, norm_constant=1.0):
    N, in_nf = h.shape
    E = int(row.shape[0])
    H = int(packed["wi1"].shape[1])
    OPAD = int(packed["wo2p"].shape[1])
    out_nf = int(packed["out_nf"])
    assert edge_attr.shape == (E, 1), "edge_feat_nf=2 => one extra edge feature"

    row2 = row.reshape(E, 1).astype(jnp.int32)
    rowT = row.reshape(1, E).astype(jnp.int32)
    col2 = col.reshape(E, 1).astype(jnp.int32)

    args = (row2, rowT, col2, h, x, edge_attr, node_mask, edge_mask,
            packed["wi1"], packed["bi1"], packed["wi2"], packed["bi2"],
            packed["wo1"], packed["bo1"], packed["wo2p"], packed["bo2p"],
            packed["ge_w1hc"], packed["ge_w1r"], packed["ge_w1e"],
            packed["ge_b1hc"], packed["ge_w2"], packed["ge_b2"],
            packed["gn_w1h"], packed["gn_w1a"], packed["gn_b1"],
            packed["gn_w2"], packed["gn_b2"],
            packed["qe_w1hc"], packed["qe_w1r"], packed["qe_w1e"],
            packed["qe_b1hc"], packed["qe_w2"], packed["qe_b2"], packed["qe_w3t"],
            packed["xpad"])

    kernel = partial(_egnn_fused_kernel, N=N, E=E, H=H,
                     n_layers=n_layers, inv_sublayers=inv_sublayers,
                     inv_norm_factor=1.0 / normalization_factor,
                     norm_constant=norm_constant)

    # ---- VMEM budget (explicit scoped limit; capped for v7x's 64 MiB VMEM) ----
    def _padded_bytes(a):
        shp = a.shape
        if len(shp) == 1:
            lead, s, ln = 1, 1, int(shp[0])
        else:
            lead = 1
            for d in shp[:-2]:
                lead *= int(d)
            s, ln = int(shp[-2]), int(shp[-1])
        return lead * _round_up(max(s, 1), 8) * _round_up(max(ln, 1), 128) * a.dtype.itemsize

    Np, Ep = _round_up(N, 8), _round_up(E, 8)
    io_bytes = sum(_padded_bytes(a) for a in args)
    io_bytes += Np * _round_up(OPAD, 128) * 4 + Np * XLANE * 4
    onehot_bytes = Ep * _round_up(2 * N, 128) * 2 + Np * _round_up(E, 128) * 2
    tmp_bytes = 12 * Ep * _round_up(2 * H, 128) * 4
    vmem_limit = int(min(56 * 2**20,
                         max(32 * 2**20, 2 * (io_bytes + onehot_bytes + tmp_bytes))))

    # ---- advisory cost estimate for the XLA scheduler ----
    L = n_layers * inv_sublayers
    f_sub = (2 * N * H * (2 * H) + 2 * E * (2 * N) * H + 2 * E * H * H
             + 2 * E * N * H + 2 * N * (2 * H) * H + 2 * N * H * H)
    f_blk = (2 * (2 * E * (2 * N) * 3) + 2 * N * H * (2 * H) + 2 * E * (2 * N) * H
             + 2 * E * H * H + 2 * E * H + 2 * E * N * 3)
    f_emb = 2 * N * (in_nf * H + 2 * H * H + H * OPAD) + 2 * N * 3 * XLANE
    flops = L * f_sub + n_layers * f_blk + f_emb
    transcendentals = L * (2 * E * H + N * H) + n_layers * (2 * E * H + 2 * E) + 3 * N * H
    bytes_accessed = (sum(int(a.size) * a.dtype.itemsize for a in args)
                      + N * OPAD * 4 + N * XLANE * 4)

    h_slab, x_slab = pl.pallas_call(
        kernel,
        out_shape=(jax.ShapeDtypeStruct((N, OPAD), F32),
                   jax.ShapeDtypeStruct((N, XLANE), F32)),
        in_specs=[VMEM_SPEC] * len(args),
        out_specs=(VMEM_SPEC, VMEM_SPEC),
        compiler_params=pltpu.CompilerParams(vmem_limit_bytes=vmem_limit),
        cost_estimate=pl.CostEstimate(flops=int(flops),
                                      transcendentals=int(transcendentals),
                                      bytes_accessed=int(bytes_accessed)),
    )(*args)
    return h_slab[:, :out_nf], x_slab[:, :3]


# --------------------------------------------------------------------------
# Parameter init (PyTorch-like) + packing into stacked, pre-split weights
# --------------------------------------------------------------------------
def init_linear(key, fan_in, fan_out):
    kw, kb = jax.random.split(key)
    bound = 1.0 / math.sqrt(fan_in)
    w = jax.random.uniform(kw, (fan_in, fan_out), F32, -bound, bound)
    b = jax.random.uniform(kb, (1, fan_out), F32, -bound, bound)
    return w, b


def init_xavier_nobias(key, fan_in, fan_out, gain):
    bound = gain * math.sqrt(6.0 / (fan_in + fan_out))
    return jax.random.uniform(key, (fan_in, fan_out), F32, -bound, bound)


def init_and_pack_params(key, in_node_nf, hidden_nf, out_node_nf,
                         n_layers, inv_sublayers):
    H = hidden_nf
    n_keys = 4 + n_layers * (inv_sublayers * 4 + 3)
    it = iter(jax.random.split(key, n_keys))

    wi1, bi1 = init_linear(next(it), in_node_nf, H)
    wi2, bi2 = init_linear(next(it), H, H)
    wo1, bo1 = init_linear(next(it), H, H)
    wo2, bo2 = init_linear(next(it), H, out_node_nf)

    # lane-dense padded output projection (zero columns -> exact)
    OPAD = _round_up(out_node_nf, XLANE)
    wo2p = jnp.zeros((H, OPAD), F32).at[:, :out_node_nf].set(wo2)
    bo2p = jnp.zeros((1, OPAD), F32).at[:, :out_node_nf].set(bo2)

    in_edge = 2 * H + 2
    gcls, eqs = [], []
    for _ in range(n_layers):
        for _ in range(inv_sublayers):
            we1, be1 = init_linear(next(it), in_edge, H)
            we2, be2 = init_linear(next(it), H, H)
            wn1, bn1 = init_linear(next(it), 2 * H, H)
            wn2, bn2 = init_linear(next(it), H, H)
            gcls.append((we1, be1, we2, be2, wn1, bn1, wn2, bn2))
        w1, b1 = init_linear(next(it), in_edge, H)
        w2, b2 = init_linear(next(it), H, H)
        w3 = init_xavier_nobias(next(it), H, 1, gain=0.001)
        eqs.append((w1, b1, w2, b2, w3))

    def pack_hc(w):   # first-linear split & pack: [W_row | W_col] -> (H, 2H)
        return jnp.concatenate([w[:H], w[H:2 * H]], axis=1)

    zeroH = jnp.zeros((1, H), F32)
    packed = dict(
        out_nf=out_node_nf,
        wi1=wi1, bi1=bi1, wi2=wi2, bi2=bi2,
        wo1=wo1, bo1=bo1, wo2p=wo2p, bo2p=bo2p,
        # GCL edge MLP: packed [h_row|h_col] weight, 1-wide radial/edge_attr cols
        ge_w1hc=jnp.stack([pack_hc(g[0]) for g in gcls]),                  # (L,H,2H)
        ge_w1r=jnp.stack([g[0][2 * H:2 * H + 1] for g in gcls]),           # (L,1,H)
        ge_w1e=jnp.stack([g[0][2 * H + 1:] for g in gcls]),                # (L,1,H)
        ge_b1hc=jnp.stack([jnp.concatenate([g[1], zeroH], axis=1) for g in gcls]),
        ge_w2=jnp.stack([g[2] for g in gcls]),
        ge_b2=jnp.stack([g[3] for g in gcls]),
        # GCL node MLP first linear split: [h | agg]
        gn_w1h=jnp.stack([g[4][:H] for g in gcls]),
        gn_w1a=jnp.stack([g[4][H:] for g in gcls]),
        gn_b1=jnp.stack([g[5] for g in gcls]),
        gn_w2=jnp.stack([g[6] for g in gcls]),
        gn_b2=jnp.stack([g[7] for g in gcls]),
        # EquivariantUpdate coord MLP
        qe_w1hc=jnp.stack([pack_hc(e[0]) for e in eqs]),
        qe_w1r=jnp.stack([e[0][2 * H:2 * H + 1] for e in eqs]),
        qe_w1e=jnp.stack([e[0][2 * H + 1:] for e in eqs]),
        qe_b1hc=jnp.stack([jnp.concatenate([e[1], zeroH], axis=1) for e in eqs]),
        qe_w2=jnp.stack([e[2] for e in eqs]),
        qe_b2=jnp.stack([e[3] for e in eqs]),
        qe_w3t=jnp.stack([e[4].T for e in eqs]),                           # (B,1,H)
        # constant (3, 128) identity projection for the lane-dense x output
        xpad=jnp.zeros((3, XLANE), F32).at[:, :3].set(jnp.eye(3, dtype=F32)),
    )
    return packed


# --------------------------------------------------------------------------
if __name__ == "__main__":
    key = jax.random.PRNGKey(0)
    N = 8            # nodes
    in_node_nf = 6
    hidden_nf = 32
    out_node_nf = in_node_nf
    n_layers = 3
    inv_sublayers = 2

    # fully connected graph without self loops -> E = N*(N-1) = 56
    rows, cols = [], []
    for a in range(N):
        for b in range(N):
            if a != b:
                rows.append(a)
                cols.append(b)
    row = jnp.array(rows, dtype=jnp.int32)
    col = jnp.array(cols, dtype=jnp.int32)
    E = row.shape[0]

    k1, k2, k3, k4 = jax.random.split(key, 4)
    h0 = jax.random.normal(k1, (N, in_node_nf), F32)
    x0 = jax.random.normal(k2, (N, 3), F32)
    edge_attr = jax.random.normal(k3, (E, 1), F32)   # edge_feat_nf=2 => 1 extra col
    node_mask = jnp.ones((N, 1), F32)
    edge_mask = jnp.ones((E, 1), F32)

    packed = init_and_pack_params(k4, in_node_nf, hidden_nf, out_node_nf,
                                  n_layers, inv_sublayers)

    h_out, x_out = egnn_forward(packed, h0, x0, row, col, edge_attr,
                                node_mask, edge_mask,
                                n_layers=n_layers, inv_sublayers=inv_sublayers)
    jax.block_until_ready((h_out, x_out))
    assert h_out.shape == (N, out_node_nf) and x_out.shape == (N, 3)
    assert bool(jnp.all(jnp.isfinite(h_out))) and bool(jnp.all(jnp.isfinite(x_out)))
    print("KERNEL_OK")
</pallas_src>

<mosaic_0001>
module attributes {stable_mosaic.version = 11 : i64} {
  func.func @_egnn_fused_kernel(%arg0: memref<56x1xi32, #tpu.memory_space<vmem>>, %arg1: memref<1x56xi32, #tpu.memory_space<vmem>>, %arg2: memref<56x1xi32, #tpu.memory_space<vmem>>, %arg3: memref<8x6xf32, #tpu.memory_space<vmem>>, %arg4: memref<8x3xf32, #tpu.memory_space<vmem>>, %arg5: memref<56x1xf32, #tpu.memory_space<vmem>>, %arg6: memref<8x1xf32, #tpu.memory_space<vmem>>, %arg7: memref<56x1xf32, #tpu.memory_space<vmem>>, %arg8: memref<6x32xf32, #tpu.memory_space<vmem>>, %arg9: memref<1x32xf32, #tpu.memory_space<vmem>>, %arg10: memref<32x32xf32, #tpu.memory_space<vmem>>, %arg11: memref<1x32xf32, #tpu.memory_space<vmem>>, %arg12: memref<32x32xf32, #tpu.memory_space<vmem>>, %arg13: memref<1x32xf32, #tpu.memory_space<vmem>>, %arg14: memref<32x128xf32, #tpu.memory_space<vmem>>, %arg15: memref<1x128xf32, #tpu.memory_space<vmem>>, %arg16: memref<6x32x64xf32, #tpu.memory_space<vmem>>, %arg17: memref<6x1x32xf32, #tpu.memory_space<vmem>>, %arg18: memref<6x1x32xf32, #tpu.memory_space<vmem>>, %arg19: memref<6x1x64xf32, #tpu.memory_space<vmem>>, %arg20: memref<6x32x32xf32, #tpu.memory_space<vmem>>, %arg21: memref<6x1x32xf32, #tpu.memory_space<vmem>>, %arg22: memref<6x32x32xf32, #tpu.memory_space<vmem>>, %arg23: memref<6x32x32xf32, #tpu.memory_space<vmem>>, %arg24: memref<6x1x32xf32, #tpu.memory_space<vmem>>, %arg25: memref<6x32x32xf32, #tpu.memory_space<vmem>>, %arg26: memref<6x1x32xf32, #tpu.memory_space<vmem>>, %arg27: memref<3x32x64xf32, #tpu.memory_space<vmem>>, %arg28: memref<3x1x32xf32, #tpu.memory_space<vmem>>, %arg29: memref<3x1x32xf32, #tpu.memory_space<vmem>>, %arg30: memref<3x1x64xf32, #tpu.memory_space<vmem>>, %arg31: memref<3x32x32xf32, #tpu.memory_space<vmem>>, %arg32: memref<3x1x32xf32, #tpu.memory_space<vmem>>, %arg33: memref<3x1x32xf32, #tpu.memory_space<vmem>>, %arg34: memref<3x128xf32, #tpu.memory_space<vmem>>, %arg35: memref<8x128xf32, #tpu.memory_space<vmem>>, %arg36: memref<8x128xf32, #tpu.memory_space<vmem>>) attributes {dimension_semantics = [], scalar_prefetch = 0 : i64, scratch_operands = 0 : i64, tpu.core_type = #tpu.core_type<tc>} {
    %c0 = arith.constant 0 : index
    %c0_0 = arith.constant 0 : index
    %0 = vector.load %arg0[%c0, %c0_0] : memref<56x1xi32, #tpu.memory_space<vmem>>, vector<56x1xi32>
    %c0_1 = arith.constant 0 : index
    %c0_2 = arith.constant 0 : index
    %1 = vector.load %arg2[%c0_1, %c0_2] : memref<56x1xi32, #tpu.memory_space<vmem>>, vector<56x1xi32>
    %2 = tpu.iota {dimensions = array<i32: 1>} : vector<56x16xi32>
    %3 = vector.broadcast %0 : vector<56x1xi32> to vector<56x16xi32>
    %4 = arith.cmpi eq, %3, %2 : vector<56x16xi32>
    %c8_i32 = arith.constant 8 : i32
    %5 = vector.broadcast %c8_i32 : i32 to vector<56x16xi32>
    %6 = arith.subi %2, %5 : vector<56x16xi32>
    %7 = vector.broadcast %1 : vector<56x1xi32> to vector<56x16xi32>
    %8 = arith.cmpi eq, %7, %6 : vector<56x16xi32>
    %9 = arith.ori %4, %8 : vector<56x16xi1>
    %cst = arith.constant 1.000000e+00 : f32
    %cst_3 = arith.constant 0.000000e+00 : f32
    %10 = vector.broadcast %cst : f32 to vector<56x16xf32>
    %11 = vector.broadcast %cst_3 : f32 to vector<56x16xf32>
    %12 = arith.select %9, %10, %11 : vector<56x16xi1>, vector<56x16xf32>
    %13 = arith.truncf %12 : vector<56x16xf32> to vector<56x16xbf16>
    %14 = tpu.iota {dimensions = array<i32: 0>} : vector<8x56xi32>
    %c0_4 = arith.constant 0 : index
    %c0_5 = arith.constant 0 : index
    %15 = vector.load %arg1[%c0_4, %c0_5] : memref<1x56xi32, #tpu.memory_space<vmem>>, vector<1x56xi32>
    %16 = vector.broadcast %15 : vector<1x56xi32> to vector<8x56xi32>
    %17 = arith.cmpi eq, %16, %14 : vector<8x56xi32>
    %cst_6 = arith.constant 1.000000e+00 : f32
    %cst_7 = arith.constant 0.000000e+00 : f32
    %18 = vector.broadcast %cst_6 : f32 to vector<8x56xf32>
    %19 = vector.broadcast %cst_7 : f32 to vector<8x56xf32>
    %20 = arith.select %17, %18, %19 : vector<8x56xi1>, vector<8x56xf32>
    %21 = arith.truncf %20 : vector<8x56xf32> to vector<8x56xbf16>
    %c0_8 = arith.constant 0 : index
    %c0_9 = arith.constant 0 : index
    %22 = vector.load %arg6[%c0_8, %c0_9] : memref<8x1xf32, #tpu.memory_space<vmem>>, vector<8x1xf32>
    %c0_10 = arith.constant 0 : index
    %c0_11 = arith.constant 0 : index
    %23 = vector.load %arg7[%c0_10, %c0_11] : memref<56x1xf32, #tpu.memory_space<vmem>>, vector<56x1xf32>
    %c0_12 = arith.constant 0 : index
    %c0_13 = arith.constant 0 : index
    %24 = vector.load %arg5[%c0_12, %c0_13] : memref<56x1xf32, #tpu.memory_space<vmem>>, vector<56x1xf32>
    %c0_14 = arith.constant 0 : index
    %c0_15 = arith.constant 0 : index
    %25 = vector.load %arg3[%c0_14, %c0_15] : memref<8x6xf32, #tpu.memory_space<vmem>>, vector<8x6xf32>
    %c0_16 = arith.constant 0 : index
    %c0_17 = arith.constant 0 : index
    %26 = vector.load %arg8[%c0_16, %c0_17] : memref<6x32xf32, #tpu.memory_space<vmem>>, vector<6x32xf32>
    %cst_18 = arith.constant dense<0.000000e+00> : vector<8x32xf32>
    %27 = tpu.matmul %25, %26, %cst_18 {dimension_numbers = #tpu.dot_dimension_numbers<[1], [0], [0], [1], [0, 0, 1, 1], [], []>} : vector<8x6xf32>, vector<6x32xf32>, vector<8x32xf32> -> vector<8x32xf32>
    %c0_19 = arith.constant 0 : index
    %c0_20 = arith.constant 0 : index
    %28 = vector.load %arg9[%c0_19, %c0_20] : memref<1x32xf32, #tpu.memory_space<vmem>>, vector<1x32xf32>
    %29 = vector.broadcast %28 : vector<1x32xf32> to vector<8x32xf32>
    %30 = arith.addf %27, %29 : vector<8x32xf32>
    %cst_21 = arith.constant 0.000000e+00 : f32
    %31 = vector.broadcast %cst_21 : f32 to vector<8x32xf32>
    %32 = arith.subf %31, %30 : vector<8x32xf32>
    %33 = math.exp %32 : vector<8x32xf32>
    %cst_22 = arith.constant 1.000000e+00 : f32
    %34 = vector.broadcast %cst_22 : f32 to vector<8x32xf32>
    %35 = arith.addf %34, %33 : vector<8x32xf32>
    %36 = tpu.reciprocal %35 {approx = true} : vector<8x32xf32> -> vector<8x32xf32>
    %37 = arith.mulf %30, %36 : vector<8x32xf32>
    %c0_23 = arith.constant 0 : index
    %c0_24 = arith.constant 0 : index
    %38 = vector.load %arg10[%c0_23, %c0_24] : memref<32x32xf32, #tpu.memory_space<vmem>>, vector<32x32xf32>
    %cst_25 = arith.constant dense<0.000000e+00> : vector<8x32xf32>
    %39 = tpu.matmul %37, %38, %cst_25 {dimension_numbers = #tpu.dot_dimension_numbers<[1], [0], [0], [1], [0, 0, 1, 1], [], []>} : vector<8x32xf32>, vector<32x32xf32>, vector<8x32xf32> -> vector<8x32xf32>
    %c0_26 = arith.constant 0 : index
    %c0_27 = arith.constant 0 : index
    %40 = vector.load %arg11[%c0_26, %c0_27] : memref<1x32xf32, #tpu.memory_space<vmem>>, vector<1x32xf32>
    %41 = vector.broadcast %40 : vector<1x32xf32> to vector<8x32xf32>
    %42 = arith.addf %39, %41 : vector<8x32xf32>
    %cst_28 = arith.constant 0.000000e+00 : f32
    %43 = vector.broadcast %cst_28 : f32 to vector<8x32xf32>
    %44 = arith.subf %43, %42 : vector<8x32xf32>
    %45 = math.exp %44 : vector<8x32xf32>
    %cst_29 = arith.constant 1.000000e+00 : f32
    %46 = vector.broadcast %cst_29 : f32 to vector<8x32xf32>
    %47 = arith.addf %46, %45 : vector<8x32xf32>
    %48 = tpu.reciprocal %47 {approx = true} : vector<8x32xf32> -> vector<8x32xf32>
    %49 = arith.mulf %42, %48 : vector<8x32xf32>
    %c0_30 = arith.constant 0 : index
    %c0_31 = arith.constant 0 : index
    %50 = vector.load %arg4[%c0_30, %c0_31] : memref<8x3xf32, #tpu.memory_space<vmem>>, vector<8x3xf32>
    %51 = arith.truncf %50 : vector<8x3xf32> to vector<8x3xbf16>
    %52 = arith.extf %51 : vector<8x3xbf16> to vector<8x3xf32>
    %53 = arith.subf %50, %52 : vector<8x3xf32>
    %cst_32 = arith.constant 0.000000e+00 : f32
    %54 = vector.broadcast %cst_32 : f32 to vector<8x3xf32>
    %55 = arith.subf %54, %52 : vector<8x3xf32>
    %56 = tpu.concatenate %52, %55 in 0 : vector<8x3xf32>, vector<8x3xf32> -> vector<16x3xf32>
    %57 = arith.truncf %56 : vector<16x3xf32> to vector<16x3xbf16>
    %cst_33 = arith.constant 0.000000e+00 : f32
    %58 = vector.broadcast %cst_33 : f32 to vector<8x3xf32>
    %59 = arith.subf %58, %53 : vector<8x3xf32>
    %60 = tpu.concatenate %53, %59 in 0 : vector<8x3xf32>, vector<8x3xf32> -> vector<16x3xf32>
    %61 = arith.truncf %60 : vector<16x3xf32> to vector<16x3xbf16>
    %cst_34 = arith.constant dense<0.000000e+00> : vector<56x3xf32>
    %62 = tpu.matmul %13, %57, %cst_34 {dimension_numbers = #tpu.dot_dimension_numbers<[1], [0], [0], [1], [0, 0, 1, 1], [], []>} : vector<56x16xbf16>, vector<16x3xbf16>, vector<56x3xf32> -> vector<56x3xf32>
    %cst_35 = arith.constant dense<0.000000e+00> : vector<56x3xf32>
    %63 = tpu.matmul %13, %61, %cst_35 {dimension_numbers = #tpu.dot_dimension_numbers<[1], [0], [0], [1], [0, 0, 1, 1], [], []>} : vector<56x16xbf16>, vector<16x3xbf16>, vector<56x3xf32> -> vector<56x3xf32>
    %64 = arith.addf %62, %63 : vector<56x3xf32>
    %65 = arith.mulf %64, %64 : vector<56x3xf32>
    %cst_36 = arith.constant dense<0.000000e+00> : vector<56xf32>
    %66 = vector.multi_reduction <add>, %65, %cst_36 [1] : vector<56x3xf32> to vector<56xf32>
    %67 = vector.shape_cast %66 : vector<56xf32> to vector<56x1xf32>
    %cst_37 = arith.constant 9.99999993E-9 : f32
    %68 = vector.broadcast %cst_37 : f32 to vector<56x1xf32>
    %69 = arith.addf %67, %68 : vector<56x1xf32>
    %70 = math.sqrt %69 : vector<56x1xf32>
    %cst_38 = arith.constant 1.000000e+00 : f32
    %71 = vector.broadcast %cst_38 : f32 to vector<56x1xf32>
    %72 = arith.addf %70, %71 : vector<56x1xf32>
    %73 = tpu.reciprocal %72 {approx = true} : vector<56x1xf32> -> vector<56x1xf32>
    %74 = vector.broadcast %73 : vector<56x1xf32> to vector<56x3xf32>
    %75 = arith.mulf %64, %74 : vector<56x3xf32>
    %c0_39 = arith.constant 0 : index
    %c0_40 = arith.constant 0 : index
    %c0_41 = arith.constant 0 : index
    %76 = vector.load %arg16[%c0_39, %c0_40, %c0_41] : memref<6x32x64xf32, #tpu.memory_space<vmem>>, vector<1x32x64xf32>
    %77 = vector.shape_cast %76 : vector<1x32x64xf32> to vector<32x64xf32>
    %cst_42 = arith.constant dense<0.000000e+00> : vector<8x64xf32>
    %78 = tpu.matmul %49, %77, %cst_42 {dimension_numbers = #tpu.dot_dimension_numbers<[1], [0], [0], [1], [0, 0, 1, 1], [], []>} : vector<8x32xf32>, vector<32x64xf32>, vector<8x64xf32> -> vector<8x64xf32>
    %c0_43 = arith.constant 0 : index
    %c0_44 = arith.constant 0 : index
    %c0_45 = arith.constant 0 : index
    %79 = vector.load %arg19[%c0_43, %c0_44, %c0_45] : memref<6x1x64xf32, #tpu.memory_space<vmem>>, vector<1x1x64xf32>
    %80 = vector.shape_cast %79 : vector<1x1x64xf32> to vector<1x64xf32>
    %81 = vector.broadcast %80 : vector<1x64xf32> to vector<8x64xf32>
    %82 = arith.addf %78, %81 : vector<8x64xf32>
    %83 = vector.extract_strided_slice %82 {offsets = [0, 0], sizes = [8, 32], strides = [1, 1]} : vector<8x64xf32> to vector<8x32xf32>
    %84 = vector.extract_strided_slice %82 {offsets = [0, 32], sizes = [8, 32], strides = [1, 1]} : vector<8x64xf32> to vector<8x32xf32>
    %85 = tpu.concatenate %83, %84 in 0 : vector<8x32xf32>, vector<8x32xf32> -> vector<16x32xf32>
    %86 = arith.truncf %85 : vector<16x32xf32> to vector<16x32xbf16>
    %cst_46 = arith.constant dense<0.000000e+00> : vector<56x32xf32>
    %87 = tpu.matmul %13, %86, %cst_46 {dimension_numbers = #tpu.dot_dimension_numbers<[1], [0], [0], [1], [0, 0, 1, 1], [], []>} : vector<56x16xbf16>, vector<16x32xbf16>, vector<56x32xf32> -> vector<56x32xf32>
    %c0_47 = arith.constant 0 : index
    %c0_48 = arith.constant 0 : index
    %c0_49 = arith.constant 0 : index
    %88 = vector.load %arg17[%c0_47, %c0_48, %c0_49] : memref<6x1x32xf32, #tpu.memory_space<vmem>>, vector<1x1x32xf32>
    %89 = vector.shape_cast %88 : vector<1x1x32xf32> to vector<1x32xf32>
    %90 = vector.broadcast %67 : vector<56x1xf32> to vector<56x32xf32>
    %91 = vector.broadcast %89 : vector<1x32xf32> to vector<56x32xf32>
    %92 = arith.mulf %90, %91 : vector<56x32xf32>
    %93 = arith.addf %87, %92 : vector<56x32xf32>
    %c0_50 = arith.constant 0 : index
    %c0_51 = arith.constant 0 : index
    %c0_52 = arith.constant 0 : index
    %94 = vector.load %arg18[%c0_50, %c0_51, %c0_52] : memref<6x1x32xf32, #tpu.memory_space<vmem>>, vector<1x1x32xf32>
    %95 = vector.shape_cast %94 : vector<1x1x32xf32> to vector<1x32xf32>
    %96 = vector.broadcast %24 : vector<56x1xf32> to vector<56x32xf32>
    %97 = vector.broadcast %95 : vector<1x32xf32> to vector<56x32xf32>
    %98 = arith.mulf %96, %97 : vector<56x32xf32>
    %99 = arith.addf %93, %98 : vector<56x32xf32>
    %cst_53 = arith.constant 0.000000e+00 : f32
    %100 = vector.broadcast %cst_53 : f32 to vector<56x32xf32>
    %101 = arith.subf %100, %99 : vector<56x32xf32>
    %102 = math.exp %101 : vector<56x32xf32>
    %cst_54 = arith.constant 1.000000e+00 : f32
    %103 = vector.broadcast %cst_54 : f32 to vector<56x32xf32>
    %104 = arith.addf %103, %102 : vector<56x32xf32>
    %105 = tpu.reciprocal %104 {approx = true} : vector<56x32xf32> -> vector<56x32xf32>
    %106 = arith.mulf %99, %105 : vector<56x32xf32>
    %c0_55 = arith.constant 0 : index
    %c0_56 = arith.constant 0 : index
    %c0_57 = arith.constant 0 : index
    %107 = vector.load %arg20[%c0_55, %c0_56, %c0_57] : memref<6x32x32xf32, #tpu.memory_space<vmem>>, vector<1x32x32xf32>
    %108 = vector.shape_cast %107 : vector<1x32x32xf32> to vector<32x32xf32>
    %cst_58 = arith.constant dense<0.000000e+00> : vector<56x32xf32>
    %109 = tpu.matmul %106, %108, %cst_58 {dimension_numbers = #tpu.dot_dimension_numbers<[1], [0], [0], [1], [0, 0, 1, 1], [], []>} : vector<56x32xf32>, vector<32x32xf32>, vector<56x32xf32> -> vector<56x32xf32>
    %c0_59 = arith.constant 0 : index
    %c0_60 = arith.constant 0 : index
    %c0_61 = arith.constant 0 : index
    %110 = vector.load %arg21[%c0_59, %c0_60, %c0_61] : memref<6x1x32xf32, #tpu.memory_space<vmem>>, vector<1x1x32xf32>
    %111 = vector.shape_cast %110 : vector<1x1x32xf32> to vector<1x32xf32>
    %112 = vector.broadcast %111 : vector<1x32xf32> to vector<56x32xf32>
    %113 = arith.addf %109, %112 : vector<56x32xf32>
    %cst_62 = arith.constant 0.000000e+00 : f32
    %114 = vector.broadcast %cst_62 : f32 to vector<56x32xf32>
    %115 = arith.subf %114, %113 : vector<56x32xf32>
    %116 = math.exp %115 : vector<56x32xf32>
    %cst_63 = arith.constant 1.000000e+00 : f32
    %117 = vector.broadcast %cst_63 : f32 to vector<56x32xf32>
    %118 = arith.addf %117, %116 : vector<56x32xf32>
    %119 = tpu.reciprocal %118 {approx = true} : vector<56x32xf32> -> vector<56x32xf32>
    %120 = arith.mulf %113, %119 : vector<56x32xf32>
    %121 = vector.broadcast %23 : vector<56x1xf32> to vector<56x32xf32>
    %122 = arith.mulf %120, %121 : vector<56x32xf32>
    %123 = arith.truncf %122 : vector<56x32xf32> to vector<56x32xbf16>
    %cst_64 = arith.constant dense<0.000000e+00> : vector<8x32xf32>
    %124 = tpu.matmul %21, %123, %cst_64 {dimension_numbers = #tpu.dot_dimension_numbers<[1], [0], [0], [1], [0, 0, 1, 1], [], []>} : vector<8x56xbf16>, vector<56x32xbf16>, vector<8x32xf32> -> vector<8x32xf32>
    %cst_65 = arith.constant 0.00999999977 : f32
    %125 = vector.broadcast %cst_65 : f32 to vector<8x32xf32>
    %126 = arith.mulf %124, %125 : vector<8x32xf32>
    %c0_66 = arith.constant 0 : index
    %c0_67 = arith.constant 0 : index
    %c0_68 = arith.constant 0 : index
    %127 = vector.load %arg22[%c0_66, %c0_67, %c0_68] : memref<6x32x32xf32, #tpu.memory_space<vmem>>, vector<1x32x32xf32>
    %128 = vector.shape_cast %127 : vector<1x32x32xf32> to vector<32x32xf32>
    %cst_69 = arith.constant dense<0.000000e+00> : vector<8x32xf32>
    %129 = tpu.matmul %49, %128, %cst_69 {dimension_numbers = #tpu.dot_dimension_numbers<[1], [0], [0], [1], [0, 0, 1, 1], [], []>} : vector<8x32xf32>, vector<32x32xf32>, vector<8x32xf32> -> vector<8x32xf32>
    %c0_70 = arith.constant 0 : index
    %c0_71 = arith.constant 0 : index
    %c0_72 = arith.constant 0 : index
    %130 = vector.load %arg23[%c0_70, %c0_71, %c0_72] : memref<6x32x32xf32, #tpu.memory_space<vmem>>, vector<1x32x32xf32>
    %131 = vector.shape_cast %130 : vector<1x32x32xf32> to vector<32x32xf32>
    %cst_73 = arith.constant dense<0.000000e+00> : vector<8x32xf32>
    %132 = tpu.matmul %126, %131, %cst_73 {dimension_numbers = #tpu.dot_dimension_numbers<[1], [0], [0], [1], [0, 0, 1, 1], [], []>} : vector<8x32xf32>, vector<32x32xf32>, vector<8x32xf32> -> vector<8x32xf32>
    %133 = arith.addf %129, %132 : vector<8x32xf32>
    %c0_74 = arith.constant 0 : index
    %c0_75 = arith.constant 0 : index
    %c0_76 = arith.constant 0 : index
    %134 = vector.load %arg24[%c0_74, %c0_75, %c0_76] : memref<6x1x32xf32, #tpu.memory_space<vmem>>, vector<1x1x32xf32>
    %135 = vector.shape_cast %134 : vector<1x1x32xf32> to vector<1x32xf32>
    %136 = vector.broadcast %135 : vector<1x32xf32> to vector<8x32xf32>
    %137 = arith.addf %133, %136 : vector<8x32xf32>
    %cst_77 = arith.constant 0.000000e+00 : f32
    %138 = vector.broadcast %cst_77 : f32 to vector<8x32xf32>
    %139 = arith.subf %138, %137 : vector<8x32xf32>
    %140 = math.exp %139 : vector<8x32xf32>
    %cst_78 = arith.constant 1.000000e+00 : f32
    %141 = vector.broadcast %cst_78 : f32 to vector<8x32xf32>
    %142 = arith.addf %141, %140 : vector<8x32xf32>
    %143 = tpu.reciprocal %142 {approx = true} : vector<8x32xf32> -> vector<8x32xf32>
    %144 = arith.mulf %137, %143 : vector<8x32xf32>
    %c0_79 = arith.constant 0 : index
    %c0_80 = arith.constant 0 : index
    %c0_81 = arith.constant 0 : index
    %145 = vector.load %arg25[%c0_79, %c0_80, %c0_81] : memref<6x32x32xf32, #tpu.memory_space<vmem>>, vector<1x32x32xf32>
    %146 = vector.shape_cast %145 : vector<1x32x32xf32> to vector<32x32xf32>
    %cst_82 = arith.constant dense<0.000000e+00> : vector<8x32xf32>
    %147 = tpu.matmul %144, %146, %cst_82 {dimension_numbers = #tpu.dot_dimension_numbers<[1], [0], [0], [1], [0, 0, 1, 1], [], []>} : vector<8x32xf32>, vector<32x32xf32>, vector<8x32xf32> -> vector<8x32xf32>
    %148 = arith.addf %49, %147 : vector<8x32xf32>
    %c0_83 = arith.constant 0 : index
    %c0_84 = arith.constant 0 : index
    %c0_85 = arith.constant 0 : index
    %149 = vector.load %arg26[%c0_83, %c0_84, %c0_85] : memref<6x1x32xf32, #tpu.memory_space<vmem>>, vector<1x1x32xf32>
    %150 = vector.shape_cast %149 : vector<1x1x32xf32> to vector<1x32xf32>
    %151 = vector.broadcast %150 : vector<1x32xf32> to vector<8x32xf32>
    %152 = arith.addf %148, %151 : vector<8x32xf32>
    %153 = vector.broadcast %22 : vector<8x1xf32> to vector<8x32xf32>
    %154 = arith.mulf %152, %153 : vector<8x32xf32>
    %c1 = arith.constant 1 : index
    %c0_86 = arith.constant 0 : index
    %c0_87 = arith.constant 0 : index
    %155 = vector.load %arg16[%c1, %c0_86, %c0_87] : memref<6x32x64xf32, #tpu.memory_space<vmem>>, vector<1x32x64xf32>
    %156 = vector.shape_cast %155 : vector<1x32x64xf32> to vector<32x64xf32>
    %cst_88 = arith.constant dense<0.000000e+00> : vector<8x64xf32>
    %157 = tpu.matmul %154, %156, %cst_88 {dimension_numbers = #tpu.dot_dimension_numbers<[1], [0], [0], [1], [0, 0, 1, 1], [], []>} : vector<8x32xf32>, vector<32x64xf32>, vector<8x64xf32> -> vector<8x64xf32>
    %c1_89 = arith.constant 1 : index
    %c0_90 = arith.constant 0 : index
    %c0_91 = arith.constant 0 : index
    %158 = vector.load %arg19[%c1_89, %c0_90, %c0_91] : memref<6x1x64xf32, #tpu.memory_space<vmem>>, vector<1x1x64xf32>
    %159 = vector.shape_cast %158 : vector<1x1x64xf32> to vector<1x64xf32>
    %160 = vector.broadcast %159 : vector<1x64xf32> to vector<8x64xf32>
    %161 = arith.addf %157, %160 : vector<8x64xf32>
    %162 = vector.extract_strided_slice %161 {offsets = [0, 0], sizes = [8, 32], strides = [1, 1]} : vector<8x64xf32> to vector<8x32xf32>
    %163 = vector.extract_strided_slice %161 {offsets = [0, 32], sizes = [8, 32], strides = [1, 1]} : vector<8x64xf32> to vector<8x32xf32>
    %164 = tpu.concatenate %162, %163 in 0 : vector<8x32xf32>, vector<8x32xf32> -> vector<16x32xf32>
    %165 = arith.truncf %164 : vector<16x32xf32> to vector<16x32xbf16>
    %cst_92 = arith.constant dense<0.000000e+00> : vector<56x32xf32>
    %166 = tpu.matmul %13, %165, %cst_92 {dimension_numbers = #tpu.dot_dimension_numbers<[1], [0], [0], [1], [0, 0, 1, 1], [], []>} : vector<56x16xbf16>, vector<16x32xbf16>, vector<56x32xf32> -> vector<56x32xf32>
    %c1_93 = arith.constant 1 : index
    %c0_94 = arith.constant 0 : index
    %c0_95 = arith.constant 0 : index
    %167 = vector.load %arg17[%c1_93, %c0_94, %c0_95] : memref<6x1x32xf32, #tpu.memory_space<vmem>>, vector<1x1x32xf32>
    %168 = vector.shape_cast %167 : vector<1x1x32xf32> to vector<1x32xf32>
    %169 = vector.broadcast %67 : vector<56x1xf32> to vector<56x32xf32>
    %170 = vector.broadcast %168 : vector<1x32xf32> to vector<56x32xf32>
    %171 = arith.mulf %169, %170 : vector<56x32xf32>
    %172 = arith.addf %166, %171 : vector<56x32xf32>
    %c1_96 = arith.constant 1 : index
    %c0_97 = arith.constant 0 : index
    %c0_98 = arith.constant 0 : index
    %173 = vector.load %arg18[%c1_96, %c0_97, %c0_98] : memref<6x1x32xf32, #tpu.memory_space<vmem>>, vector<1x1x32xf32>
    %174 = vector.shape_cast %173 : vector<1x1x32xf32> to vector<1x32xf32>
    %175 = vector.broadcast %24 : vector<56x1xf32> to vector<56x32xf32>
    %176 = vector.broadcast %174 : vector<1x32xf32> to vector<56x32xf32>
    %177 = arith.mulf %175, %176 : vector<56x32xf32>
    %178 = arith.addf %172, %177 : vector<56x32xf32>
    %cst_99 = arith.constant 0.000000e+00 : f32
    %179 = vector.broadcast %cst_99 : f32 to vector<56x32xf32>
    %180 = arith.subf %179, %178 : vector<56x32xf32>
    %181 = math.exp %180 : vector<56x32xf32>
    %cst_100 = arith.constant 1.000000e+00 : f32
    %182 = vector.broadcast %cst_100 : f32 to vector<56x32xf32>
    %183 = arith.addf %182, %181 : vector<56x32xf32>
    %184 = tpu.reciprocal %183 {approx = true} : vector<56x32xf32> -> vector<56x32xf32>
    %185 = arith.mulf %178, %184 : vector<56x32xf32>
    %c1_101 = arith.constant 1 : index
    %c0_102 = arith.constant 0 : index
    %c0_103 = arith.constant 0 : index
    %186 = vector.load %arg20[%c1_101, %c0_102, %c0_103] : memref<6x32x32xf32, #tpu.memory_space<vmem>>, vector<1x32x32xf32>
    %187 = vector.shape_cast %186 : vector<1x32x32xf32> to vector<32x32xf32>
    %cst_104 = arith.constant dense<0.000000e+00> : vector<56x32xf32>
    %188 = tpu.matmul %185, %187, %cst_104 {dimension_numbers = #tpu.dot_dimension_numbers<[1], [0], [0], [1], [0, 0, 1, 1], [], []>} : vector<56x32xf32>, vector<32x32xf32>, vector<56x32xf32> -> vector<56x32xf32>
    %c1_105 = arith.constant 1 : index
    %c0_106 = arith.constant 0 : index
    %c0_107 = arith.constant 0 : index
    %189 = vector.load %arg21[%c1_105, %c0_106, %c0_107] : memref<6x1x32xf32, #tpu.memory_space<vmem>>, vector<1x1x32xf32>
    %190 = vector.shape_cast %189 : vector<1x1x32xf32> to vector<1x32xf32>
    %191 = vector.broadcast %190 : vector<1x32xf32> to vector<56x32xf32>
    %192 = arith.addf %188, %191 : vector<56x32xf32>
    %cst_108 = arith.constant 0.000000e+00 : f32
    %193 = vector.broadcast %cst_108 : f32 to vector<56x32xf32>
    %194 = arith.subf %193, %192 : vector<56x32xf32>
    %195 = math.exp %194 : vector<56x32xf32>
    %cst_109 = arith.constant 1.000000e+00 : f32
    %196 = vector.broadcast %cst_109 : f32 to vector<56x32xf32>
    %197 = arith.addf %196, %195 : vector<56x32xf32>
    %198 = tpu.reciprocal %197 {approx = true} : vector<56x32xf32> -> vector<56x32xf32>
    %199 = arith.mulf %192, %198 : vector<56x32xf32>
    %200 = vector.broadcast %23 : vector<56x1xf32> to vector<56x32xf32>
    %201 = arith.mulf %199, %200 : vector<56x32xf32>
    %202 = arith.truncf %201 : vector<56x32xf32> to vector<56x32xbf16>
    %cst_110 = arith.constant dense<0.000000e+00> : vector<8x32xf32>
    %203 = tpu.matmul %21, %202, %cst_110 {dimension_numbers = #tpu.dot_dimension_numbers<[1], [0], [0], [1], [0, 0, 1, 1], [], []>} : vector<8x56xbf16>, vector<56x32xbf16>, vector<8x32xf32> -> vector<8x32xf32>
    %cst_111 = arith.constant 0.00999999977 : f32
    %204 = vector.broadcast %cst_111 : f32 to vector<8x32xf32>
    %205 = arith.mulf %203, %204 : vector<8x32xf32>
    %c1_112 = arith.constant 1 : index
    %c0_113 = arith.constant 0 : index
    %c0_114 = arith.constant 0 : index
    %206 = vector.load %arg22[%c1_112, %c0_113, %c0_114] : memref<6x32x32xf32, #tpu.memory_space<vmem>>, vector<1x32x32xf32>
    %207 = vector.shape_cast %206 : vector<1x32x32xf32> to vector<32x32xf32>
    %cst_115 = arith.constant dense<0.000000e+00> : vector<8x32xf32>
    %208 = tpu.matmul %154, %207, %cst_115 {dimension_numbers = #tpu.dot_dimension_numbers<[1], [0], [0], [1], [0, 0, 1, 1], [], []>} : vector<8x32xf32>, vector<32x32xf32>, vector<8x32xf32> -> vector<8x32xf32>
    %c1_116 = arith.constant 1 : index
    %c0_117 = arith.constant 0 : index
    %c0_118 = arith.constant 0 : index
    %209 = vector.load %arg23[%c1_116, %c0_117, %c0_118] : memref<6x32x32xf32, #tpu.memory_space<vmem>>, vector<1x32x32xf32>
    %210 = vector.shape_cast %209 : vector<1x32x32xf32> to vector<32x32xf32>
    %cst_119 = arith.constant dense<0.000000e+00> : vector<8x32xf32>
    %211 = tpu.matmul %205, %210, %cst_119 {dimension_numbers = #tpu.dot_dimension_numbers<[1], [0], [0], [1], [0, 0, 1, 1], [], []>} : vector<8x32xf32>, vector<32x32xf32>, vector<8x32xf32> -> vector<8x32xf32>
    %212 = arith.addf %208, %211 : vector<8x32xf32>
    %c1_120 = arith.constant 1 : index
    %c0_121 = arith.constant 0 : index
    %c0_122 = arith.constant 0 : index
    %213 = vector.load %arg24[%c1_120, %c0_121, %c0_122] : memref<6x1x32xf32, #tpu.memory_space<vmem>>, vector<1x1x32xf32>
    %214 = vector.shape_cast %213 : vector<1x1x32xf32> to vector<1x32xf32>
    %215 = vector.broadcast %214 : vector<1x32xf32> to vector<8x32xf32>
    %216 = arith.addf %212, %215 : vector<8x32xf32>
    %cst_123 = arith.constant 0.000000e+00 : f32
    %217 = vector.broadcast %cst_123 : f32 to vector<8x32xf32>
    %218 = arith.subf %217, %216 : vector<8x32xf32>
    %219 = math.exp %218 : vector<8x32xf32>
    %cst_124 = arith.constant 1.000000e+00 : f32
    %220 = vector.broadcast %cst_124 : f32 to vector<8x32xf32>
    %221 = arith.addf %220, %219 : vector<8x32xf32>
    %222 = tpu.reciprocal %221 {approx = true} : vector<8x32xf32> -> vector<8x32xf32>
    %223 = arith.mulf %216, %222 : vector<8x32xf32>
    %c1_125 = arith.constant 1 : index
    %c0_126 = arith.constant 0 : index
    %c0_127 = arith.constant 0 : index
    %224 = vector.load %arg25[%c1_125, %c0_126, %c0_127] : memref<6x32x32xf32, #tpu.memory_space<vmem>>, vector<1x32x32xf32>
    %225 = vector.shape_cast %224 : vector<1x32x32xf32> to vector<32x32xf32>
    %cst_128 = arith.constant dense<0.000000e+00> : vector<8x32xf32>
    %226 = tpu.matmul %223, %225, %cst_128 {dimension_numbers = #tpu.dot_dimension_numbers<[1], [0], [0], [1], [0, 0, 1, 1], [], []>} : vector<8x32xf32>, vector<32x32xf32>, vector<8x32xf32> -> vector<8x32xf32>
    %227 = arith.addf %154, %226 : vector<8x32xf32>
    %c1_129 = arith.constant 1 : index
    %c0_130 = arith.constant 0 : index
    %c0_131 = arith.constant 0 : index
    %228 = vector.load %arg26[%c1_129, %c0_130, %c0_131] : memref<6x1x32xf32, #tpu.memory_space<vmem>>, vector<1x1x32xf32>
    %229 = vector.shape_cast %228 : vector<1x1x32xf32> to vector<1x32xf32>
    %230 = vector.broadcast %229 : vector<1x32xf32> to vector<8x32xf32>
    %231 = arith.addf %227, %230 : vector<8x32xf32>
    %232 = vector.broadcast %22 : vector<8x1xf32> to vector<8x32xf32>
    %233 = arith.mulf %231, %232 : vector<8x32xf32>
    %c0_132 = arith.constant 0 : index
    %c0_133 = arith.constant 0 : index
    %c0_134 = arith.constant 0 : index
    %234 = vector.load %arg27[%c0_132, %c0_133, %c0_134] : memref<3x32x64xf32, #tpu.memory_space<vmem>>, vector<1x32x64xf32>
    %235 = vector.shape_cast %234 : vector<1x32x64xf32> to vector<32x64xf32>
    %cst_135 = arith.constant dense<0.000000e+00> : vector<8x64xf32>
    %236 = tpu.matmul %233, %235, %cst_135 {dimension_numbers = #tpu.dot_dimension_numbers<[1], [0], [0], [1], [0, 0, 1, 1], [], []>} : vector<8x32xf32>, vector<32x64xf32>, vector<8x64xf32> -> vector<8x64xf32>
    %c0_136 = arith.constant 0 : index
    %c0_137 = arith.constant 0 : index
    %c0_138 = arith.constant 0 : index
    %237 = vector.load %arg30[%c0_136, %c0_137, %c0_138] : memref<3x1x64xf32, #tpu.memory_space<vmem>>, vector<1x1x64xf32>
    %238 = vector.shape_cast %237 : vector<1x1x64xf32> to vector<1x64xf32>
    %239 = vector.broadcast %238 : vector<1x64xf32> to vector<8x64xf32>
    %240 = arith.addf %236, %239 : vector<8x64xf32>
    %241 = vector.extract_strided_slice %240 {offsets = [0, 0], sizes = [8, 32], strides = [1, 1]} : vector<8x64xf32> to vector<8x32xf32>
    %242 = vector.extract_strided_slice %240 {offsets = [0, 32], sizes = [8, 32], strides = [1, 1]} : vector<8x64xf32> to vector<8x32xf32>
    %243 = tpu.concatenate %241, %242 in 0 : vector<8x32xf32>, vector<8x32xf32> -> vector<16x32xf32>
    %244 = arith.truncf %243 : vector<16x32xf32> to vector<16x32xbf16>
    %cst_139 = arith.constant dense<0.000000e+00> : vector<56x32xf32>
    %245 = tpu.matmul %13, %244, %cst_139 {dimension_numbers = #tpu.dot_dimension_numbers<[1], [0], [0], [1], [0, 0, 1, 1], [], []>} : vector<56x16xbf16>, vector<16x32xbf16>, vector<56x32xf32> -> vector<56x32xf32>
    %c0_140 = arith.constant 0 : index
    %c0_141 = arith.constant 0 : index
    %c0_142 = arith.constant 0 : index
    %246 = vector.load %arg28[%c0_140, %c0_141, %c0_142] : memref<3x1x32xf32, #tpu.memory_space<vmem>>, vector<1x1x32xf32>
    %247 = vector.shape_cast %246 : vector<1x1x32xf32> to vector<1x32xf32>
    %248 = vector.broadcast %67 : vector<56x1xf32> to vector<56x32xf32>
    %249 = vector.broadcast %247 : vector<1x32xf32> to vector<56x32xf32>
    %250 = arith.mulf %248, %249 : vector<56x32xf32>
    %251 = arith.addf %245, %250 : vector<56x32xf32>
    %c0_143 = arith.constant 0 : index
    %c0_144 = arith.constant 0 : index
    %c0_145 = arith.constant 0 : index
    %252 = vector.load %arg29[%c0_143, %c0_144, %c0_145] : memref<3x1x32xf32, #tpu.memory_space<vmem>>, vector<1x1x32xf32>
    %253 = vector.shape_cast %252 : vector<1x1x32xf32> to vector<1x32xf32>
    %254 = vector.broadcast %24 : vector<56x1xf32> to vector<56x32xf32>
    %255 = vector.broadcast %253 : vector<1x32xf32> to vector<56x32xf32>
    %256 = arith.mulf %254, %255 : vector<56x32xf32>
    %257 = arith.addf %251, %256 : vector<56x32xf32>
    %cst_146 = arith.constant 0.000000e+00 : f32
    %258 = vector.broadcast %cst_146 : f32 to vector<56x32xf32>
    %259 = arith.subf %258, %257 : vector<56x32xf32>
    %260 = math.exp %259 : vector<56x32xf32>
    %cst_147 = arith.constant 1.000000e+00 : f32
    %261 = vector.broadcast %cst_147 : f32 to vector<56x32xf32>
    %262 = arith.addf %261, %260 : vector<56x32xf32>
    %263 = tpu.reciprocal %262 {approx = true} : vector<56x32xf32> -> vector<56x32xf32>
    %264 = arith.mulf %257, %263 : vector<56x32xf32>
    %c0_148 = arith.constant 0 : index
    %c0_149 = arith.constant 0 : index
    %c0_150 = arith.constant 0 : index
    %265 = vector.load %arg31[%c0_148, %c0_149, %c0_150] : memref<3x32x32xf32, #tpu.memory_space<vmem>>, vector<1x32x32xf32>
    %266 = vector.shape_cast %265 : vector<1x32x32xf32> to vector<32x32xf32>
    %cst_151 = arith.constant dense<0.000000e+00> : vector<56x32xf32>
    %267 = tpu.matmul %264, %266, %cst_151 {dimension_numbers = #tpu.dot_dimension_numbers<[1], [0], [0], [1], [0, 0, 1, 1], [], []>} : vector<56x32xf32>, vector<32x32xf32>, vector<56x32xf32> -> vector<56x32xf32>
    %c0_152 = arith.constant 0 : index
    %c0_153 = arith.constant 0 : index
    %c0_154 = arith.constant 0 : index
    %268 = vector.load %arg32[%c0_152, %c0_153, %c0_154] : memref<3x1x32xf32, #tpu.memory_space<vmem>>, vector<1x1x32xf32>
    %269 = vector.shape_cast %268 : vector<1x1x32xf32> to vector<1x32xf32>
    %270 = vector.broadcast %269 : vector<1x32xf32> to vector<56x32xf32>
    %271 = arith.addf %267, %270 : vector<56x32xf32>
    %cst_155 = arith.constant 0.000000e+00 : f32
    %272 = vector.broadcast %cst_155 : f32 to vector<56x32xf32>
    %273 = arith.subf %272, %271 : vector<56x32xf32>
    %274 = math.exp %273 : vector<56x32xf32>
    %cst_156 = arith.constant 1.000000e+00 : f32
    %275 = vector.broadcast %cst_156 : f32 to vector<56x32xf32>
    %276 = arith.addf %275, %274 : vector<56x32xf32>
    %277 = tpu.reciprocal %276 {approx = true} : vector<56x32xf32> -> vector<56x32xf32>
    %278 = arith.mulf %271, %277 : vector<56x32xf32>
    %c0_157 = arith.constant 0 : index
    %c0_158 = arith.constant 0 : index
    %c0_159 = arith.constant 0 : index
    %279 = vector.load %arg33[%c0_157, %c0_158, %c0_159] : memref<3x1x32xf32, #tpu.memory_space<vmem>>, vector<1x1x32xf32>
    %280 = vector.shape_cast %279 : vector<1x1x32xf32> to vector<1x32xf32>
    %281 = vector.broadcast %280 : vector<1x32xf32> to vector<56x32xf32>
    %282 = arith.mulf %278, %281 : vector<56x32xf32>
    %cst_160 = arith.constant dense<0.000000e+00> : vector<56xf32>
    %283 = vector.multi_reduction <add>, %282, %cst_160 [1] : vector<56x32xf32> to vector<56xf32>
    %284 = vector.shape_cast %283 : vector<56xf32> to vector<56x1xf32>
    %285 = vector.broadcast %284 : vector<56x1xf32> to vector<56x3xf32>
    %286 = arith.mulf %75, %285 : vector<56x3xf32>
    %287 = vector.broadcast %23 : vector<56x1xf32> to vector<56x3xf32>
    %288 = arith.mulf %286, %287 : vector<56x3xf32>
    %289 = arith.truncf %288 : vector<56x3xf32> to vector<56x3xbf16>
    %cst_161 = arith.constant dense<0.000000e+00> : vector<8x3xf32>
    %290 = tpu.matmul %21, %289, %cst_161 {dimension_numbers = #tpu.dot_dimension_numbers<[1], [0], [0], [1], [0, 0, 1, 1], [], []>} : vector<8x56xbf16>, vector<56x3xbf16>, vector<8x3xf32> -> vector<8x3xf32>
    %cst_162 = arith.constant 0.00999999977 : f32
    %291 = vector.broadcast %cst_162 : f32 to vector<8x3xf32>
    %292 = arith.mulf %290, %291 : vector<8x3xf32>
    %293 = arith.addf %50, %292 : vector<8x3xf32>
    %294 = vector.broadcast %22 : vector<8x1xf32> to vector<8x3xf32>
    %295 = arith.mulf %293, %294 : vector<8x3xf32>
    %296 = vector.broadcast %22 : vector<8x1xf32> to vector<8x32xf32>
    %297 = arith.mulf %233, %296 : vector<8x32xf32>
    %298 = arith.truncf %295 : vector<8x3xf32> to vector<8x3xbf16>
    %299 = arith.extf %298 : vector<8x3xbf16> to vector<8x3xf32>
    %300 = arith.subf %295, %299 : vector<8x3xf32>
    %cst_163 = arith.constant 0.000000e+00 : f32
    %301 = vector.broadcast %cst_163 : f32 to vector<8x3xf32>
    %302 = arith.subf %301, %299 : vector<8x3xf32>
    %303 = tpu.concatenate %299, %302 in 0 : vector<8x3xf32>, vector<8x3xf32> -> vector<16x3xf32>
    %304 = arith.truncf %303 : vector<16x3xf32> to vector<16x3xbf16>
    %cst_164 = arith.constant 0.000000e+00 : f32
    %305 = vector.broadcast %cst_164 : f32 to vector<8x3xf32>
    %306 = arith.subf %305, %300 : vector<8x3xf32>
    %307 = tpu.concatenate %300, %306 in 0 : vector<8x3xf32>, vector<8x3xf32> -> vector<16x3xf32>
    %308 = arith.truncf %307 : vector<16x3xf32> to vector<16x3xbf16>
    %cst_165 = arith.constant dense<0.000000e+00> : vector<56x3xf32>
    %309 = tpu.matmul %13, %304, %cst_165 {dimension_numbers = #tpu.dot_dimension_numbers<[1], [0], [0], [1], [0, 0, 1, 1], [], []>} : vector<56x16xbf16>, vector<16x3xbf16>, vector<56x3xf32> -> vector<56x3xf32>
    %cst_166 = arith.constant dense<0.000000e+00> : vector<56x3xf32>
    %310 = tpu.matmul %13, %308, %cst_166 {dimension_numbers = #tpu.dot_dimension_numbers<[1], [0], [0], [1], [0, 0, 1, 1], [], []>} : vector<56x16xbf16>, vector<16x3xbf16>, vector<56x3xf32> -> vector<56x3xf32>
    %311 = arith.addf %309, %310 : vector<56x3xf32>
    %312 = arith.mulf %311, %311 : vector<56x3xf32>
    %cst_167 = arith.constant dense<0.000000e+00> : vector<56xf32>
    %313 = vector.multi_reduction <add>, %312, %cst_167 [1] : vector<56x3xf32> to vector<56xf32>
    %314 = vector.shape_cast %313 : vector<56xf32> to vector<56x1xf32>
    %cst_168 = arith.constant 9.99999993E-9 : f32
    %315 = vector.broadcast %cst_168 : f32 to vector<56x1xf32>
    %316 = arith.addf %314, %315 : vector<56x1xf32>
    %317 = math.sqrt %316 : vector<56x1xf32>
    %cst_169 = arith.constant 1.000000e+00 : f32
    %318 = vector.broadcast %cst_169 : f32 to vector<56x1xf32>
    %319 = arith.addf %317, %318 : vector<56x1xf32>
    %320 = tpu.reciprocal %319 {approx = true} : vector<56x1xf32> -> vector<56x1xf32>
    %321 = vector.broadcast %320 : vector<56x1xf32> to vector<56x3xf32>
    %322 = arith.mulf %311, %321 : vector<56x3xf32>
    %c2 = arith.constant 2 : index
    %c0_170 = arith.constant 0 : index
    %c0_171 = arith.constant 0 : index
    %323 = vector.load %arg16[%c2, %c0_170, %c0_171] : memref<6x32x64xf32, #tpu.memory_space<vmem>>, vector<1x32x64xf32>
    %324 = vector.shape_cast %323 : vector<1x32x64xf32> to vector<32x64xf32>
    %cst_172 = arith.constant dense<0.000000e+00> : vector<8x64xf32>
    %325 = tpu.matmul %297, %324, %cst_172 {dimension_numbers = #tpu.dot_dimension_numbers<[1], [0], [0], [1], [0, 0, 1, 1], [], []>} : vector<8x32xf32>, vector<32x64xf32>, vector<8x64xf32> -> vector<8x64xf32>
    %c2_173 = arith.constant 2 : index
    %c0_174 = arith.constant 0 : index
    %c0_175 = arith.constant 0 : index
    %326 = vector.load %arg19[%c2_173, %c0_174, %c0_175] : memref<6x1x64xf32, #tpu.memory_space<vmem>>, vector<1x1x64xf32>
    %327 = vector.shape_cast %326 : vector<1x1x64xf32> to vector<1x64xf32>
    %328 = vector.broadcast %327 : vector<1x64xf32> to vector<8x64xf32>
    %329 = arith.addf %325, %328 : vector<8x64xf32>
    %330 = vector.extract_strided_slice %329 {offsets = [0, 0], sizes = [8, 32], strides = [1, 1]} : vector<8x64xf32> to vector<8x32xf32>
    %331 = vector.extract_strided_slice %329 {offsets = [0, 32], sizes = [8, 32], strides = [1, 1]} : vector<8x64xf32> to vector<8x32xf32>
    %332 = tpu.concatenate %330, %331 in 0 : vector<8x32xf32>, vector<8x32xf32> -> vector<16x32xf32>
    %333 = arith.truncf %332 : vector<16x32xf32> to vector<16x32xbf16>
    %cst_176 = arith.constant dense<0.000000e+00> : vector<56x32xf32>
    %334 = tpu.matmul %13, %333, %cst_176 {dimension_numbers = #tpu.dot_dimension_numbers<[1], [0], [0], [1], [0, 0, 1, 1], [], []>} : vector<56x16xbf16>, vector<16x32xbf16>, vector<56x32xf32> -> vector<56x32xf32>
    %c2_177 = arith.constant 2 : index
    %c0_178 = arith.constant 0 : index
    %c0_179 = arith.constant 0 : index
    %335 = vector.load %arg17[%c2_177, %c0_178, %c0_179] : memref<6x1x32xf32, #tpu.memory_space<vmem>>, vector<1x1x32xf32>
    %336 = vector.shape_cast %335 : vector<1x1x32xf32> to vector<1x32xf32>
    %337 = vector.broadcast %314 : vector<56x1xf32> to vector<56x32xf32>
    %338 = vector.broadcast %336 : vector<1x32xf32> to vector<56x32xf32>
    %339 = arith.mulf %337, %338 : vector<56x32xf32>
    %340 = arith.addf %334, %339 : vector<56x32xf32>
    %c2_180 = arith.constant 2 : index
    %c0_181 = arith.constant 0 : index
    %c0_182 = arith.constant 0 : index
    %341 = vector.load %arg18[%c2_180, %c0_181, %c0_182] : memref<6x1x32xf32, #tpu.memory_space<vmem>>, vector<1x1x32xf32>
    %342 = vector.shape_cast %341 : vector<1x1x32xf32> to vector<1x32xf32>
    %343 = vector.broadcast %24 : vector<56x1xf32> to vector<56x32xf32>
    %344 = vector.broadcast %342 : vector<1x32xf32> to vector<56x32xf32>
    %345 = arith.mulf %343, %344 : vector<56x32xf32>
    %346 = arith.addf %340, %345 : vector<56x32xf32>
    %cst_183 = arith.constant 0.000000e+00 : f32
    %347 = vector.broadcast %cst_183 : f32 to vector<56x32xf32>
    %348 = arith.subf %347, %346 : vector<56x32xf32>
    %349 = math.exp %348 : vector<56x32xf32>
    %cst_184 = arith.constant 1.000000e+00 : f32
    %350 = vector.broadcast %cst_184 : f32 to vector<56x32xf32>
    %351 = arith.addf %350, %349 : vector<56x32xf32>
    %352 = tpu.reciprocal %351 {approx = true} : vector<56x32xf32> -> vector<56x32xf32>
    %353 = arith.mulf %346, %352 : vector<56x32xf32>
    %c2_185 = arith.constant 2 : index
    %c0_186 = arith.constant 0 : index
    %c0_187 = arith.constant 0 : index
    %354 = vector.load %arg20[%c2_185, %c0_186, %c0_187] : memref<6x32x32xf32, #tpu.memory_space<vmem>>, vector<1x32x32xf32>
    %355 = vector.shape_cast %354 : vector<1x32x32xf32> to vector<32x32xf32>
    %cst_188 = arith.constant dense<0.000000e+00> : vector<56x32xf32>
    %356 = tpu.matmul %353, %355, %cst_188 {dimension_numbers = #tpu.dot_dimension_numbers<[1], [0], [0], [1], [0, 0, 1, 1], [], []>} : vector<56x32xf32>, vector<32x32xf32>, vector<56x32xf32> -> vector<56x32xf32>
    %c2_189 = arith.constant 2 : index
    %c0_190 = arith.constant 0 : index
    %c0_191 = arith.constant 0 : index
    %357 = vector.load %arg21[%c2_189, %c0_190, %c0_191] : memref<6x1x32xf32, #tpu.memory_space<vmem>>, vector<1x1x32xf32>
    %358 = vector.shape_cast %357 : vector<1x1x32xf32> to vector<1x32xf32>
    %359 = vector.broadcast %358 : vector<1x32xf32> to vector<56x32xf32>
    %360 = arith.addf %356, %359 : vector<56x32xf32>
    %cst_192 = arith.constant 0.000000e+00 : f32
    %361 = vector.broadcast %cst_192 : f32 to vector<56x32xf32>
    %362 = arith.subf %361, %360 : vector<56x32xf32>
    %363 = math.exp %362 : vector<56x32xf32>
    %cst_193 = arith.constant 1.000000e+00 : f32
    %364 = vector.broadcast %cst_193 : f32 to vector<56x32xf32>
    %365 = arith.addf %364, %363 : vector<56x32xf32>
    %366 = tpu.reciprocal %365 {approx = true} : vector<56x32xf32> -> vector<56x32xf32>
    %367 = arith.mulf %360, %366 : vector<56x32xf32>
    %368 = vector.broadcast %23 : vector<56x1xf32> to vector<56x32xf32>
    %369 = arith.mulf %367, %368 : vector<56x32xf32>
    %370 = arith.truncf %369 : vector<56x32xf32> to vector<56x32xbf16>
    %cst_194 = arith.constant dense<0.000000e+00> : vector<8x32xf32>
    %371 = tpu.matmul %21, %370, %cst_194 {dimension_numbers = #tpu.dot_dimension_numbers<[1], [0], [0], [1], [0, 0, 1, 1], [], []>} : vector<8x56xbf16>, vector<56x32xbf16>, vector<8x32xf32> -> vector<8x32xf32>
    %cst_195 = arith.constant 0.00999999977 : f32
    %372 = vector.broadcast %cst_195 : f32 to vector<8x32xf32>
    %373 = arith.mulf %371, %372 : vector<8x32xf32>
    %c2_196 = arith.constant 2 : index
    %c0_197 = arith.constant 0 : index
    %c0_198 = arith.constant 0 : index
    %374 = vector.load %arg22[%c2_196, %c0_197, %c0_198] : memref<6x32x32xf32, #tpu.memory_space<vmem>>, vector<1x32x32xf32>
    %375 = vector.shape_cast %374 : vector<1x32x32xf32> to vector<32x32xf32>
    %cst_199 = arith.constant dense<0.000000e+00> : vector<8x32xf32>
    %376 = tpu.matmul %297, %375, %cst_199 {dimension_numbers = #tpu.dot_dimension_numbers<[1], [0], [0], [1], [0, 0, 1, 1], [], []>} : vector<8x32xf32>, vector<32x32xf32>, vector<8x32xf32> -> vector<8x32xf32>
    %c2_200 = arith.constant 2 : index
    %c0_201 = arith.constant 0 : index
    %c0_202 = arith.constant 0 : index
    %377 = vector.load %arg23[%c2_200, %c0_201, %c0_202] : memref<6x32x32xf32, #tpu.memory_space<vmem>>, vector<1x32x32xf32>
    %378 = vector.shape_cast %377 : vector<1x32x32xf32> to vector<32x32xf32>
    %cst_203 = arith.constant dense<0.000000e+00> : vector<8x32xf32>
    %379 = tpu.matmul %373, %378, %cst_203 {dimension_numbers = #tpu.dot_dimension_numbers<[1], [0], [0], [1], [0, 0, 1, 1], [], []>} : vector<8x32xf32>, vector<32x32xf32>, vector<8x32xf32> -> vector<8x32xf32>
    %380 = arith.addf %376, %379 : vector<8x32xf32>
    %c2_204 = arith.constant 2 : index
    %c0_205 = arith.constant 0 : index
    %c0_206 = arith.constant 0 : index
    %381 = vector.load %arg24[%c2_204, %c0_205, %c0_206] : memref<6x1x32xf32, #tpu.memory_space<vmem>>, vector<1x1x32xf32>
    %382 = vector.shape_cast %381 : vector<1x1x32xf32> to vector<1x32xf32>
    %383 = vector.broadcast %382 : vector<1x32xf32> to vector<8x32xf32>
    %384 = arith.addf %380, %383 : vector<8x32xf32>
    %cst_207 = arith.constant 0.000000e+00 : f32
    %385 = vector.broadcast %cst_207 : f32 to vector<8x32xf32>
    %386 = arith.subf %385, %384 : vector<8x32xf32>
    %387 = math.exp %386 : vector<8x32xf32>
    %cst_208 = arith.constant 1.000000e+00 : f32
    %388 = vector.broadcast %cst_208 : f32 to vector<8x32xf32>
    %389 = arith.addf %388, %387 : vector<8x32xf32>
    %390 = tpu.reciprocal %389 {approx = true} : vector<8x32xf32> -> vector<8x32xf32>
    %391 = arith.mulf %384, %390 : vector<8x32xf32>
    %c2_209 = arith.constant 2 : index
    %c0_210 = arith.constant 0 : index
    %c0_211 = arith.constant 0 : index
    %392 = vector.load %arg25[%c2_209, %c0_210, %c0_211] : memref<6x32x32xf32, #tpu.memory_space<vmem>>, vector<1x32x32xf32>
    %393 = vector.shape_cast %392 : vector<1x32x32xf32> to vector<32x32xf32>
    %cst_212 = arith.constant dense<0.000000e+00> : vector<8x32xf32>
    %394 = tpu.matmul %391, %393, %cst_212 {dimension_numbers = #tpu.dot_dimension_numbers<[1], [0], [0], [1], [0, 0, 1, 1], [], []>} : vector<8x32xf32>, vector<32x32xf32>, vector<8x32xf32> -> vector<8x32xf32>
    %395 = arith.addf %297, %394 : vector<8x32xf32>
    %c2_213 = arith.constant 2 : index
    %c0_214 = arith.constant 0 : index
    %c0_215 = arith.constant 0 : index
    %396 = vector.load %arg26[%c2_213, %c0_214, %c0_215] : memref<6x1x32xf32, #tpu.memory_space<vmem>>, vector<1x1x32xf32>
    %397 = vector.shape_cast %396 : vector<1x1x32xf32> to vector<1x32xf32>
    %398 = vector.broadcast %397 : vector<1x32xf32> to vector<8x32xf32>
    %399 = arith.addf %395, %398 : vector<8x32xf32>
    %400 = vector.broadcast %22 : vector<8x1xf32> to vector<8x32xf32>
    %401 = arith.mulf %399, %400 : vector<8x32xf32>
    %c3 = arith.constant 3 : index
    %c0_216 = arith.constant 0 : index
    %c0_217 = arith.constant 0 : index
    %402 = vector.load %arg16[%c3, %c0_216, %c0_217] : memref<6x32x64xf32, #tpu.memory_space<vmem>>, vector<1x32x64xf32>
    %403 = vector.shape_cast %402 : vector<1x32x64xf32> to vector<32x64xf32>
    %cst_218 = arith.constant dense<0.000000e+00> : vector<8x64xf32>
    %404 = tpu.matmul %401, %403, %cst_218 {dimension_numbers = #tpu.dot_dimension_numbers<[1], [0], [0], [1], [0, 0, 1, 1], [], []>} : vector<8x32xf32>, vector<32x64xf32>, vector<8x64xf32> -> vector<8x64xf32>
    %c3_219 = arith.constant 3 : index
    %c0_220 = arith.constant 0 : index
    %c0_221 = arith.constant 0 : index
    %405 = vector.load %arg19[%c3_219, %c0_220, %c0_221] : memref<6x1x64xf32, #tpu.memory_space<vmem>>, vector<1x1x64xf32>
    %406 = vector.shape_cast %405 : vector<1x1x64xf32> to vector<1x64xf32>
    %407 = vector.broadcast %406 : vector<1x64xf32> to vector<8x64xf32>
    %408 = arith.addf %404, %407 : vector<8x64xf32>
    %409 = vector.extract_strided_slice %408 {offsets = [0, 0], sizes = [8, 32], strides = [1, 1]} : vector<8x64xf32> to vector<8x32xf32>
    %410 = vector.extract_strided_slice %408 {offsets = [0, 32], sizes = [8, 32], strides = [1, 1]} : vector<8x64xf32> to vector<8x32xf32>
    %411 = tpu.concatenate %409, %410 in 0 : vector<8x32xf32>, vector<8x32xf32> -> vector<16x32xf32>
    %412 = arith.truncf %411 : vector<16x32xf32> to vector<16x32xbf16>
    %cst_222 = arith.constant dense<0.000000e+00> : vector<56x32xf32>
    %413 = tpu.matmul %13, %412, %cst_222 {dimension_numbers = #tpu.dot_dimension_numbers<[1], [0], [0], [1], [0, 0, 1, 1], [], []>} : vector<56x16xbf16>, vector<16x32xbf16>, vector<56x32xf32> -> vector<56x32xf32>
    %c3_223 = arith.constant 3 : index
    %c0_224 = arith.constant 0 : index
    %c0_225 = arith.constant 0 : index
    %414 = vector.load %arg17[%c3_223, %c0_224, %c0_225] : memref<6x1x32xf32, #tpu.memory_space<vmem>>, vector<1x1x32xf32>
    %415 = vector.shape_cast %414 : vector<1x1x32xf32> to vector<1x32xf32>
    %416 = vector.broadcast %314 : vector<56x1xf32> to vector<56x32xf32>
    %417 = vector.broadcast %415 : vector<1x32xf32> to vector<56x32xf32>
    %418 = arith.mulf %416, %417 : vector<56x32xf32>
    %419 = arith.addf %413, %418 : vector<56x32xf32>
    %c3_226 = arith.constant 3 : index
    %c0_227 = arith.constant 0 : index
    %c0_228 = arith.constant 0 : index
    %420 = vector.load %arg18[%c3_226, %c0_227, %c0_228] : memref<6x1x32xf32, #tpu.memory_space<vmem>>, vector<1x1x32xf32>
    %421 = vector.shape_cast %420 : vector<1x1x32xf32> to vector<1x32xf32>
    %422 = vector.broadcast %24 : vector<56x1xf32> to vector<56x32xf32>
    %423 = vector.broadcast %421 : vector<1x32xf32> to vector<56x32xf32>
    %424 = arith.mulf %422, %423 : vector<56x32xf32>
    %425 = arith.addf %419, %424 : vector<56x32xf32>
    %cst_229 = arith.constant 0.000000e+00 : f32
    %426 = vector.broadcast %cst_229 : f32 to vector<56x32xf32>
    %427 = arith.subf %426, %425 : vector<56x32xf32>
    %428 = math.exp %427 : vector<56x32xf32>
    %cst_230 = arith.constant 1.000000e+00 : f32
    %429 = vector.broadcast %cst_230 : f32 to vector<56x32xf32>
    %430 = arith.addf %429, %428 : vector<56x32xf32>
    %431 = tpu.reciprocal %430 {approx = true} : vector<56x32xf32> -> vector<56x32xf32>
    %432 = arith.mulf %425, %431 : vector<56x32xf32>
    %c3_231 = arith.constant 3 : index
    %c0_232 = arith.constant 0 : index
    %c0_233 = arith.constant 0 : index
    %433 = vector.load %arg20[%c3_231, %c0_232, %c0_233] : memref<6x32x32xf32, #tpu.memory_space<vmem>>, vector<1x32x32xf32>
    %434 = vector.shape_cast %433 : vector<1x32x32xf32> to vector<32x32xf32>
    %cst_234 = arith.constant dense<0.000000e+00> : vector<56x32xf32>
    %435 = tpu.matmul %432, %434, %cst_234 {dimension_numbers = #tpu.dot_dimension_numbers<[1], [0], [0], [1], [0, 0, 1, 1], [], []>} : vector<56x32xf32>, vector<32x32xf32>, vector<56x32xf32> -> vector<56x32xf32>
    %c3_235 = arith.constant 3 : index
    %c0_236 = arith.constant 0 : index
    %c0_237 = arith.constant 0 : index
    %436 = vector.load %arg21[%c3_235, %c0_236, %c0_237] : memref<6x1x32xf32, #tpu.memory_space<vmem>>, vector<1x1x32xf32>
    %437 = vector.shape_cast %436 : vector<1x1x32xf32> to vector<1x32xf32>
    %438 = vector.broadcast %437 : vector<1x32xf32> to vector<56x32xf32>
    %439 = arith.addf %435, %438 : vector<56x32xf32>
    %cst_238 = arith.constant 0.000000e+00 : f32
    %440 = vector.broadcast %cst_238 : f32 to vector<56x32xf32>
    %441 = arith.subf %440, %439 : vector<56x32xf32>
    %442 = math.exp %441 : vector<56x32xf32>
    %cst_239 = arith.constant 1.000000e+00 : f32
    %443 = vector.broadcast %cst_239 : f32 to vector<56x32xf32>
    %444 = arith.addf %443, %442 : vector<56x32xf32>
    %445 = tpu.reciprocal %444 {approx = true} : vector<56x32xf32> -> vector<56x32xf32>
    %446 = arith.mulf %439, %445 : vector<56x32xf32>
    %447 = vector.broadcast %23 : vector<56x1xf32> to vector<56x32xf32>
    %448 = arith.mulf %446, %447 : vector<56x32xf32>
    %449 = arith.truncf %448 : vector<56x32xf32> to vector<56x32xbf16>
    %cst_240 = arith.constant dense<0.000000e+00> : vector<8x32xf32>
    %450 = tpu.matmul %21, %449, %cst_240 {dimension_numbers = #tpu.dot_dimension_numbers<[1], [0], [0], [1], [0, 0, 1, 1], [], []>} : vector<8x56xbf16>, vector<56x32xbf16>, vector<8x32xf32> -> vector<8x32xf32>
    %cst_241 = arith.constant 0.00999999977 : f32
    %451 = vector.broadcast %cst_241 : f32 to vector<8x32xf32>
    %452 = arith.mulf %450, %451 : vector<8x32xf32>
    %c3_242 = arith.constant 3 : index
    %c0_243 = arith.constant 0 : index
    %c0_244 = arith.constant 0 : index
    %453 = vector.load %arg22[%c3_242, %c0_243, %c0_244] : memref<6x32x32xf32, #tpu.memory_space<vmem>>, vector<1x32x32xf32>
    %454 = vector.shape_cast %453 : vector<1x32x32xf32> to vector<32x32xf32>
    %cst_245 = arith.constant dense<0.000000e+00> : vector<8x32xf32>
    %455 = tpu.matmul %401, %454, %cst_245 {dimension_numbers = #tpu.dot_dimension_numbers<[1], [0], [0], [1], [0, 0, 1, 1], [], []>} : vector<8x32xf32>, vector<32x32xf32>, vector<8x32xf32> -> vector<8x32xf32>
    %c3_246 = arith.constant 3 : index
    %c0_247 = arith.constant 0 : index
    %c0_248 = arith.constant 0 : index
    %456 = vector.load %arg23[%c3_246, %c0_247, %c0_248] : memref<6x32x32xf32, #tpu.memory_space<vmem>>, vector<1x32x32xf32>
    %457 = vector.shape_cast %456 : vector<1x32x32xf32> to vector<32x32xf32>
    %cst_249 = arith.constant dense<0.000000e+00> : vector<8x32xf32>
    %458 = tpu.matmul %452, %457, %cst_249 {dimension_numbers = #tpu.dot_dimension_numbers<[1], [0], [0], [1], [0, 0, 1, 1], [], []>} : vector<8x32xf32>, vector<32x32xf32>, vector<8x32xf32> -> vector<8x32xf32>
    %459 = arith.addf %455, %458 : vector<8x32xf32>
    %c3_250 = arith.constant 3 : index
    %c0_251 = arith.constant 0 : index
    %c0_252 = arith.constant 0 : index
    %460 = vector.load %arg24[%c3_250, %c0_251, %c0_252] : memref<6x1x32xf32, #tpu.memory_space<vmem>>, vector<1x1x32xf32>
    %461 = vector.shape_cast %460 : vector<1x1x32xf32> to vector<1x32xf32>
    %462 = vector.broadcast %461 : vector<1x32xf32> to vector<8x32xf32>
    %463 = arith.addf %459, %462 : vector<8x32xf32>
    %cst_253 = arith.constant 0.000000e+00 : f32
    %464 = vector.broadcast %cst_253 : f32 to vector<8x32xf32>
    %465 = arith.subf %464, %463 : vector<8x32xf32>
    %466 = math.exp %465 : vector<8x32xf32>
    %cst_254 = arith.constant 1.000000e+00 : f32
    %467 = vector.broadcast %cst_254 : f32 to vector<8x32xf32>
    %468 = arith.addf %467, %466 : vector<8x32xf32>
    %469 = tpu.reciprocal %468 {approx = true} : vector<8x32xf32> -> vector<8x32xf32>
    %470 = arith.mulf %463, %469 : vector<8x32xf32>
    %c3_255 = arith.constant 3 : index
    %c0_256 = arith.constant 0 : index
    %c0_257 = arith.constant 0 : index
    %471 = vector.load %arg25[%c3_255, %c0_256, %c0_257] : memref<6x32x32xf32, #tpu.memory_space<vmem>>, vector<1x32x32xf32>
    %472 = vector.shape_cast %471 : vector<1x32x32xf32> to vector<32x32xf32>
    %cst_258 = arith.constant dense<0.000000e+00> : vector<8x32xf32>
    %473 = tpu.matmul %470, %472, %cst_258 {dimension_numbers = #tpu.dot_dimension_numbers<[1], [0], [0], [1], [0, 0, 1, 1], [], []>} : vector<8x32xf32>, vector<32x32xf32>, vector<8x32xf32> -> vector<8x32xf32>
    %474 = arith.addf %401, %473 : vector<8x32xf32>
    %c3_259 = arith.constant 3 : index
    %c0_260 = arith.constant 0 : index
    %c0_261 = arith.constant 0 : index
    %475 = vector.load %arg26[%c3_259, %c0_260, %c0_261] : memref<6x1x32xf32, #tpu.memory_space<vmem>>, vector<1x1x32xf32>
    %476 = vector.shape_cast %475 : vector<1x1x32xf32> to vector<1x32xf32>
    %477 = vector.broadcast %476 : vector<1x32xf32> to vector<8x32xf32>
    %478 = arith.addf %474, %477 : vector<8x32xf32>
    %479 = vector.broadcast %22 : vector<8x1xf32> to vector<8x32xf32>
    %480 = arith.mulf %478, %479 : vector<8x32xf32>
    %c1_262 = arith.constant 1 : index
    %c0_263 = arith.constant 0 : index
    %c0_264 = arith.constant 0 : index
    %481 = vector.load %arg27[%c1_262, %c0_263, %c0_264] : memref<3x32x64xf32, #tpu.memory_space<vmem>>, vector<1x32x64xf32>
    %482 = vector.shape_cast %481 : vector<1x32x64xf32> to vector<32x64xf32>
    %cst_265 = arith.constant dense<0.000000e+00> : vector<8x64xf32>
    %483 = tpu.matmul %480, %482, %cst_265 {dimension_numbers = #tpu.dot_dimension_numbers<[1], [0], [0], [1], [0, 0, 1, 1], [], []>} : vector<8x32xf32>, vector<32x64xf32>, vector<8x64xf32> -> vector<8x64xf32>
    %c1_266 = arith.constant 1 : index
    %c0_267 = arith.constant 0 : index
    %c0_268 = arith.constant 0 : index
    %484 = vector.load %arg30[%c1_266, %c0_267, %c0_268] : memref<3x1x64xf32, #tpu.memory_space<vmem>>, vector<1x1x64xf32>
    %485 = vector.shape_cast %484 : vector<1x1x64xf32> to vector<1x64xf32>
    %486 = vector.broadcast %485 : vector<1x64xf32> to vector<8x64xf32>
    %487 = arith.addf %483, %486 : vector<8x64xf32>
    %488 = vector.extract_strided_slice %487 {offsets = [0, 0], sizes = [8, 32], strides = [1, 1]} : vector<8x64xf32> to vector<8x32xf32>
    %489 = vector.extract_strided_slice %487 {offsets = [0, 32], sizes = [8, 32], strides = [1, 1]} : vector<8x64xf32> to vector<8x32xf32>
    %490 = tpu.concatenate %488, %489 in 0 : vector<8x32xf32>, vector<8x32xf32> -> vector<16x32xf32>
    %491 = arith.truncf %490 : vector<16x32xf32> to vector<16x32xbf16>
    %cst_269 = arith.constant dense<0.000000e+00> : vector<56x32xf32>
    %492 = tpu.matmul %13, %491, %cst_269 {dimension_numbers = #tpu.dot_dimension_numbers<[1], [0], [0], [1], [0, 0, 1, 1], [], []>} : vector<56x16xbf16>, vector<16x32xbf16>, vector<56x32xf32> -> vector<56x32xf32>
    %c1_270 = arith.constant 1 : index
    %c0_271 = arith.constant 0 : index
    %c0_272 = arith.constant 0 : index
    %493 = vector.load %arg28[%c1_270, %c0_271, %c0_272] : memref<3x1x32xf32, #tpu.memory_space<vmem>>, vector<1x1x32xf32>
    %494 = vector.shape_cast %493 : vector<1x1x32xf32> to vector<1x32xf32>
    %495 = vector.broadcast %314 : vector<56x1xf32> to vector<56x32xf32>
    %496 = vector.broadcast %494 : vector<1x32xf32> to vector<56x32xf32>
    %497 = arith.mulf %495, %496 : vector<56x32xf32>
    %498 = arith.addf %492, %497 : vector<56x32xf32>
    %c1_273 = arith.constant 1 : index
    %c0_274 = arith.constant 0 : index
    %c0_275 = arith.constant 0 : index
    %499 = vector.load %arg29[%c1_273, %c0_274, %c0_275] : memref<3x1x32xf32, #tpu.memory_space<vmem>>, vector<1x1x32xf32>
    %500 = vector.shape_cast %499 : vector<1x1x32xf32> to vector<1x32xf32>
    %501 = vector.broadcast %24 : vector<56x1xf32> to vector<56x32xf32>
    %502 = vector.broadcast %500 : vector<1x32xf32> to vector<56x32xf32>
    %503 = arith.mulf %501, %502 : vector<56x32xf32>
    %504 = arith.addf %498, %503 : vector<56x32xf32>
    %cst_276 = arith.constant 0.000000e+00 : f32
    %505 = vector.broadcast %cst_276 : f32 to vector<56x32xf32>
    %506 = arith.subf %505, %504 : vector<56x32xf32>
    %507 = math.exp %506 : vector<56x32xf32>
    %cst_277 = arith.constant 1.000000e+00 : f32
    %508 = vector.broadcast %cst_277 : f32 to vector<56x32xf32>
    %509 = arith.addf %508, %507 : vector<56x32xf32>
    %510 = tpu.reciprocal %509 {approx = true} : vector<56x32xf32> -> vector<56x32xf32>
    %511 = arith.mulf %504, %510 : vector<56x32xf32>
    %c1_278 = arith.constant 1 : index
    %c0_279 = arith.constant 0 : index
    %c0_280 = arith.constant 0 : index
    %512 = vector.load %arg31[%c1_278, %c0_279, %c0_280] : memref<3x32x32xf32, #tpu.memory_space<vmem>>, vector<1x32x32xf32>
    %513 = vector.shape_cast %512 : vector<1x32x32xf32> to vector<32x32xf32>
    %cst_281 = arith.constant dense<0.000000e+00> : vector<56x32xf32>
    %514 = tpu.matmul %511, %513, %cst_281 {dimension_numbers = #tpu.dot_dimension_numbers<[1], [0], [0], [1], [0, 0, 1, 1], [], []>} : vector<56x32xf32>, vector<32x32xf32>, vector<56x32xf32> -> vector<56x32xf32>
    %c1_282 = arith.constant 1 : index
    %c0_283 = arith.constant 0 : index
    %c0_284 = arith.constant 0 : index
    %515 = vector.load %arg32[%c1_282, %c0_283, %c0_284] : memref<3x1x32xf32, #tpu.memory_space<vmem>>, vector<1x1x32xf32>
    %516 = vector.shape_cast %515 : vector<1x1x32xf32> to vector<1x32xf32>
    %517 = vector.broadcast %516 : vector<1x32xf32> to vector<56x32xf32>
    %518 = arith.addf %514, %517 : vector<56x32xf32>
    %cst_285 = arith.constant 0.000000e+00 : f32
    %519 = vector.broadcast %cst_285 : f32 to vector<56x32xf32>
    %520 = arith.subf %519, %518 : vector<56x32xf32>
    %521 = math.exp %520 : vector<56x32xf32>
    %cst_286 = arith.constant 1.000000e+00 : f32
    %522 = vector.broadcast %cst_286 : f32 to vector<56x32xf32>
    %523 = arith.addf %522, %521 : vector<56x32xf32>
    %524 = tpu.reciprocal %523 {approx = true} : vector<56x32xf32> -> vector<56x32xf32>
    %525 = arith.mulf %518, %524 : vector<56x32xf32>
    %c1_287 = arith.constant 1 : index
    %c0_288 = arith.constant 0 : index
    %c0_289 = arith.constant 0 : index
    %526 = vector.load %arg33[%c1_287, %c0_288, %c0_289] : memref<3x1x32xf32, #tpu.memory_space<vmem>>, vector<1x1x32xf32>
    %527 = vector.shape_cast %526 : vector<1x1x32xf32> to vector<1x32xf32>
    %528 = vector.broadcast %527 : vector<1x32xf32> to vector<56x32xf32>
    %529 = arith.mulf %525, %528 : vector<56x32xf32>
    %cst_290 = arith.constant dense<0.000000e+00> : vector<56xf32>
    %530 = vector.multi_reduction <add>, %529, %cst_290 [1] : vector<56x32xf32> to vector<56xf32>
    %531 = vector.shape_cast %530 : vector<56xf32> to vector<56x1xf32>
    %532 = vector.broadcast %531 : vector<56x1xf32> to vector<56x3xf32>
    %533 = arith.mulf %322, %532 : vector<56x3xf32>
    %534 = vector.broadcast %23 : vector<56x1xf32> to vector<56x3xf32>
    %535 = arith.mulf %533, %534 : vector<56x3xf32>
    %536 = arith.truncf %535 : vector<56x3xf32> to vector<56x3xbf16>
    %cst_291 = arith.constant dense<0.000000e+00> : vector<8x3xf32>
    %537 = tpu.matmul %21, %536, %cst_291 {dimension_numbers = #tpu.dot_dimension_numbers<[1], [0], [0], [1], [0, 0, 1, 1], [], []>} : vector<8x56xbf16>, vector<56x3xbf16>, vector<8x3xf32> -> vector<8x3xf32>
    %cst_292 = arith.constant 0.00999999977 : f32
    %538 = vector.broadcast %cst_292 : f32 to vector<8x3xf32>
    %539 = arith.mulf %537, %538 : vector<8x3xf32>
    %540 = arith.addf %295, %539 : vector<8x3xf32>
    %541 = vector.broadcast %22 : vector<8x1xf32> to vector<8x3xf32>
    %542 = arith.mulf %540, %541 : vector<8x3xf32>
    %543 = vector.broadcast %22 : vector<8x1xf32> to vector<8x32xf32>
    %544 = arith.mulf %480, %543 : vector<8x32xf32>
    %545 = arith.truncf %542 : vector<8x3xf32> to vector<8x3xbf16>
    %546 = arith.extf %545 : vector<8x3xbf16> to vector<8x3xf32>
    %547 = arith.subf %542, %546 : vector<8x3xf32>
    %cst_293 = arith.constant 0.000000e+00 : f32
    %548 = vector.broadcast %cst_293 : f32 to vector<8x3xf32>
    %549 = arith.subf %548, %546 : vector<8x3xf32>
    %550 = tpu.concatenate %546, %549 in 0 : vector<8x3xf32>, vector<8x3xf32> -> vector<16x3xf32>
    %551 = arith.truncf %550 : vector<16x3xf32> to vector<16x3xbf16>
    %cst_294 = arith.constant 0.000000e+00 : f32
    %552 = vector.broadcast %cst_294 : f32 to vector<8x3xf32>
    %553 = arith.subf %552, %547 : vector<8x3xf32>
    %554 = tpu.concatenate %547, %553 in 0 : vector<8x3xf32>, vector<8x3xf32> -> vector<16x3xf32>
    %555 = arith.truncf %554 : vector<16x3xf32> to vector<16x3xbf16>
    %cst_295 = arith.constant dense<0.000000e+00> : vector<56x3xf32>
    %556 = tpu.matmul %13, %551, %cst_295 {dimension_numbers = #tpu.dot_dimension_numbers<[1], [0], [0], [1], [0, 0, 1, 1], [], []>} : vector<56x16xbf16>, vector<16x3xbf16>, vector<56x3xf32> -> vector<56x3xf32>
    %cst_296 = arith.constant dense<0.000000e+00> : vector<56x3xf32>
    %557 = tpu.matmul %13, %555, %cst_296 {dimension_numbers = #tpu.dot_dimension_numbers<[1], [0], [0], [1], [0, 0, 1, 1], [], []>} : vector<56x16xbf16>, vector<16x3xbf16>, vector<56x3xf32> -> vector<56x3xf32>
    %558 = arith.addf %556, %557 : vector<56x3xf32>
    %559 = arith.mulf %558, %558 : vector<56x3xf32>
    %cst_297 = arith.constant dense<0.000000e+00> : vector<56xf32>
    %560 = vector.multi_reduction <add>, %559, %cst_297 [1] : vector<56x3xf32> to vector<56xf32>
    %561 = vector.shape_cast %560 : vector<56xf32> to vector<56x1xf32>
    %cst_298 = arith.constant 9.99999993E-9 : f32
    %562 = vector.broadcast %cst_298 : f32 to vector<56x1xf32>
    %563 = arith.addf %561, %562 : vector<56x1xf32>
    %564 = math.sqrt %563 : vector<56x1xf32>
    %cst_299 = arith.constant 1.000000e+00 : f32
    %565 = vector.broadcast %cst_299 : f32 to vector<56x1xf32>
    %566 = arith.addf %564, %565 : vector<56x1xf32>
    %567 = tpu.reciprocal %566 {approx = true} : vector<56x1xf32> -> vector<56x1xf32>
    %568 = vector.broadcast %567 : vector<56x1xf32> to vector<56x3xf32>
    %569 = arith.mulf %558, %568 : vector<56x3xf32>
    %c4 = arith.constant 4 : index
    %c0_300 = arith.constant 0 : index
    %c0_301 = arith.constant 0 : index
    %570 = vector.load %arg16[%c4, %c0_300, %c0_301] : memref<6x32x64xf32, #tpu.memory_space<vmem>>, vector<1x32x64xf32>
    %571 = vector.shape_cast %570 : vector<1x32x64xf32> to vector<32x64xf32>
    %cst_302 = arith.constant dense<0.000000e+00> : vector<8x64xf32>
    %572 = tpu.matmul %544, %571, %cst_302 {dimension_numbers = #tpu.dot_dimension_numbers<[1], [0], [0], [1], [0, 0, 1, 1], [], []>} : vector<8x32xf32>, vector<32x64xf32>, vector<8x64xf32> -> vector<8x64xf32>
    %c4_303 = arith.constant 4 : index
    %c0_304 = arith.constant 0 : index
    %c0_305 = arith.constant 0 : index
    %573 = vector.load %arg19[%c4_303, %c0_304, %c0_305] : memref<6x1x64xf32, #tpu.memory_space<vmem>>, vector<1x1x64xf32>
    %574 = vector.shape_cast %573 : vector<1x1x64xf32> to vector<1x64xf32>
    %575 = vector.broadcast %574 : vector<1x64xf32> to vector<8x64xf32>
    %576 = arith.addf %572, %575 : vector<8x64xf32>
    %577 = vector.extract_strided_slice %576 {offsets = [0, 0], sizes = [8, 32], strides = [1, 1]} : vector<8x64xf32> to vector<8x32xf32>
    %578 = vector.extract_strided_slice %576 {offsets = [0, 32], sizes = [8, 32], strides = [1, 1]} : vector<8x64xf32> to vector<8x32xf32>
    %579 = tpu.concatenate %577, %578 in 0 : vector<8x32xf32>, vector<8x32xf32> -> vector<16x32xf32>
    %580 = arith.truncf %579 : vector<16x32xf32> to vector<16x32xbf16>
    %cst_306 = arith.constant dense<0.000000e+00> : vector<56x32xf32>
    %581 = tpu.matmul %13, %580, %cst_306 {dimension_numbers = #tpu.dot_dimension_numbers<[1], [0], [0], [1], [0, 0, 1, 1], [], []>} : vector<56x16xbf16>, vector<16x32xbf16>, vector<56x32xf32> -> vector<56x32xf32>
    %c4_307 = arith.constant 4 : index
    %c0_308 = arith.constant 0 : index
    %c0_309 = arith.constant 0 : index
    %582 = vector.load %arg17[%c4_307, %c0_308, %c0_309] : memref<6x1x32xf32, #tpu.memory_space<vmem>>, vector<1x1x32xf32>
    %583 = vector.shape_cast %582 : vector<1x1x32xf32> to vector<1x32xf32>
    %584 = vector.broadcast %561 : vector<56x1xf32> to vector<56x32xf32>
    %585 = vector.broadcast %583 : vector<1x32xf32> to vector<56x32xf32>
    %586 = arith.mulf %584, %585 : vector<56x32xf32>
    %587 = arith.addf %581, %586 : vector<56x32xf32>
    %c4_310 = arith.constant 4 : index
    %c0_311 = arith.constant 0 : index
    %c0_312 = arith.constant 0 : index
    %588 = vector.load %arg18[%c4_310, %c0_311, %c0_312] : memref<6x1x32xf32, #tpu.memory_space<vmem>>, vector<1x1x32xf32>
    %589 = vector.shape_cast %588 : vector<1x1x32xf32> to vector<1x32xf32>
    %590 = vector.broadcast %24 : vector<56x1xf32> to vector<56x32xf32>
    %591 = vector.broadcast %589 : vector<1x32xf32> to vector<56x32xf32>
    %592 = arith.mulf %590, %591 : vector<56x32xf32>
    %593 = arith.addf %587, %592 : vector<56x32xf32>
    %cst_313 = arith.constant 0.000000e+00 : f32
    %594 = vector.broadcast %cst_313 : f32 to vector<56x32xf32>
    %595 = arith.subf %594, %593 : vector<56x32xf32>
    %596 = math.exp %595 : vector<56x32xf32>
    %cst_314 = arith.constant 1.000000e+00 : f32
    %597 = vector.broadcast %cst_314 : f32 to vector<56x32xf32>
    %598 = arith.addf %597, %596 : vector<56x32xf32>
    %599 = tpu.reciprocal %598 {approx = true} : vector<56x32xf32> -> vector<56x32xf32>
    %600 = arith.mulf %593, %599 : vector<56x32xf32>
    %c4_315 = arith.constant 4 : index
    %c0_316 = arith.constant 0 : index
    %c0_317 = arith.constant 0 : index
    %601 = vector.load %arg20[%c4_315, %c0_316, %c0_317] : memref<6x32x32xf32, #tpu.memory_space<vmem>>, vector<1x32x32xf32>
    %602 = vector.shape_cast %601 : vector<1x32x32xf32> to vector<32x32xf32>
    %cst_318 = arith.constant dense<0.000000e+00> : vector<56x32xf32>
    %603 = tpu.matmul %600, %602, %cst_318 {dimension_numbers = #tpu.dot_dimension_numbers<[1], [0], [0], [1], [0, 0, 1, 1], [], []>} : vector<56x32xf32>, vector<32x32xf32>, vector<56x32xf32> -> vector<56x32xf32>
    %c4_319 = arith.constant 4 : index
    %c0_320 = arith.constant 0 : index
    %c0_321 = arith.constant 0 : index
    %604 = vector.load %arg21[%c4_319, %c0_320, %c0_321] : memref<6x1x32xf32, #tpu.memory_space<vmem>>, vector<1x1x32xf32>
    %605 = vector.shape_cast %604 : vector<1x1x32xf32> to vector<1x32xf32>
    %606 = vector.broadcast %605 : vector<1x32xf32> to vector<56x32xf32>
    %607 = arith.addf %603, %606 : vector<56x32xf32>
    %cst_322 = arith.constant 0.000000e+00 : f32
    %608 = vector.broadcast %cst_322 : f32 to vector<56x32xf32>
    %609 = arith.subf %608, %607 : vector<56x32xf32>
    %610 = math.exp %609 : vector<56x32xf32>
    %cst_323 = arith.constant 1.000000e+00 : f32
    %611 = vector.broadcast %cst_323 : f32 to vector<56x32xf32>
    %612 = arith.addf %611, %610 : vector<56x32xf32>
    %613 = tpu.reciprocal %612 {approx = true} : vector<56x32xf32> -> vector<56x32xf32>
    %614 = arith.mulf %607, %613 : vector<56x32xf32>
    %615 = vector.broadcast %23 : vector<56x1xf32> to vector<56x32xf32>
    %616 = arith.mulf %614, %615 : vector<56x32xf32>
    %617 = arith.truncf %616 : vector<56x32xf32> to vector<56x32xbf16>
    %cst_324 = arith.constant dense<0.000000e+00> : vector<8x32xf32>
    %618 = tpu.matmul %21, %617, %cst_324 {dimension_numbers = #tpu.dot_dimension_numbers<[1], [0], [0], [1], [0, 0, 1, 1], [], []>} : vector<8x56xbf16>, vector<56x32xbf16>, vector<8x32xf32> -> vector<8x32xf32>
    %cst_325 = arith.constant 0.00999999977 : f32
    %619 = vector.broadcast %cst_325 : f32 to vector<8x32xf32>
    %620 = arith.mulf %618, %619 : vector<8x32xf32>
    %c4_326 = arith.constant 4 : index
    %c0_327 = arith.constant 0 : index
    %c0_328 = arith.constant 0 : index
    %621 = vector.load %arg22[%c4_326, %c0_327, %c0_328] : memref<6x32x32xf32, #tpu.memory_space<vmem>>, vector<1x32x32xf32>
    %622 = vector.shape_cast %621 : vector<1x32x32xf32> to vector<32x32xf32>
    %cst_329 = arith.constant dense<0.000000e+00> : vector<8x32xf32>
    %623 = tpu.matmul %544, %622, %cst_329 {dimension_numbers = #tpu.dot_dimension_numbers<[1], [0], [0], [1], [0, 0, 1, 1], [], []>} : vector<8x32xf32>, vector<32x32xf32>, vector<8x32xf32> -> vector<8x32xf32>
    %c4_330 = arith.constant 4 : index
    %c0_331 = arith.constant 0 : index
    %c0_332 = arith.constant 0 : index
    %624 = vector.load %arg23[%c4_330, %c0_331, %c0_332] : memref<6x32x32xf32, #tpu.memory_space<vmem>>, vector<1x32x32xf32>
    %625 = vector.shape_cast %624 : vector<1x32x32xf32> to vector<32x32xf32>
    %cst_333 = arith.constant dense<0.000000e+00> : vector<8x32xf32>
    %626 = tpu.matmul %620, %625, %cst_333 {dimension_numbers = #tpu.dot_dimension_numbers<[1], [0], [0], [1], [0, 0, 1, 1], [], []>} : vector<8x32xf32>, vector<32x32xf32>, vector<8x32xf32> -> vector<8x32xf32>
    %627 = arith.addf %623, %626 : vector<8x32xf32>
    %c4_334 = arith.constant 4 : index
    %c0_335 = arith.constant 0 : index
    %c0_336 = arith.constant 0 : index
    %628 = vector.load %arg24[%c4_334, %c0_335, %c0_336] : memref<6x1x32xf32, #tpu.memory_space<vmem>>, vector<1x1x32xf32>
    %629 = vector.shape_cast %628 : vector<1x1x32xf32> to vector<1x32xf32>
    %630 = vector.broadcast %629 : vector<1x32xf32> to vector<8x32xf32>
    %631 = arith.addf %627, %630 : vector<8x32xf32>
    %cst_337 = arith.constant 0.000000e+00 : f32
    %632 = vector.broadcast %cst_337 : f32 to vector<8x32xf32>
    %633 = arith.subf %632, %631 : vector<8x32xf32>
    %634 = math.exp %633 : vector<8x32xf32>
    %cst_338 = arith.constant 1.000000e+00 : f32
    %635 = vector.broadcast %cst_338 : f32 to vector<8x32xf32>
    %636 = arith.addf %635, %634 : vector<8x32xf32>
    %637 = tpu.reciprocal %636 {approx = true} : vector<8x32xf32> -> vector<8x32xf32>
    %638 = arith.mulf %631, %637 : vector<8x32xf32>
    %c4_339 = arith.constant 4 : index
    %c0_340 = arith.constant 0 : index
    %c0_341 = arith.constant 0 : index
    %639 = vector.load %arg25[%c4_339, %c0_340, %c0_341] : memref<6x32x32xf32, #tpu.memory_space<vmem>>, vector<1x32x32xf32>
    %640 = vector.shape_cast %639 : vector<1x32x32xf32> to vector<32x32xf32>
    %cst_342 = arith.constant dense<0.000000e+00> : vector<8x32xf32>
    %641 = tpu.matmul %638, %640, %cst_342 {dimension_numbers = #tpu.dot_dimension_numbers<[1], [0], [0], [1], [0, 0, 1, 1], [], []>} : vector<8x32xf32>, vector<32x32xf32>, vector<8x32xf32> -> vector<8x32xf32>
    %642 = arith.addf %544, %641 : vector<8x32xf32>
    %c4_343 = arith.constant 4 : index
    %c0_344 = arith.constant 0 : index
    %c0_345 = arith.constant 0 : index
    %643 = vector.load %arg26[%c4_343, %c0_344, %c0_345] : memref<6x1x32xf32, #tpu.memory_space<vmem>>, vector<1x1x32xf32>
    %644 = vector.shape_cast %643 : vector<1x1x32xf32> to vector<1x32xf32>
    %645 = vector.broadcast %644 : vector<1x32xf32> to vector<8x32xf32>
    %646 = arith.addf %642, %645 : vector<8x32xf32>
    %647 = vector.broadcast %22 : vector<8x1xf32> to vector<8x32xf32>
    %648 = arith.mulf %646, %647 : vector<8x32xf32>
    %c5 = arith.constant 5 : index
    %c0_346 = arith.constant 0 : index
    %c0_347 = arith.constant 0 : index
    %649 = vector.load %arg16[%c5, %c0_346, %c0_347] : memref<6x32x64xf32, #tpu.memory_space<vmem>>, vector<1x32x64xf32>
    %650 = vector.shape_cast %649 : vector<1x32x64xf32> to vector<32x64xf32>
    %cst_348 = arith.constant dense<0.000000e+00> : vector<8x64xf32>
    %651 = tpu.matmul %648, %650, %cst_348 {dimension_numbers = #tpu.dot_dimension_numbers<[1], [0], [0], [1], [0, 0, 1, 1], [], []>} : vector<8x32xf32>, vector<32x64xf32>, vector<8x64xf32> -> vector<8x64xf32>
    %c5_349 = arith.constant 5 : index
    %c0_350 = arith.constant 0 : index
    %c0_351 = arith.constant 0 : index
    %652 = vector.load %arg19[%c5_349, %c0_350, %c0_351] : memref<6x1x64xf32, #tpu.memory_space<vmem>>, vector<1x1x64xf32>
    %653 = vector.shape_cast %652 : vector<1x1x64xf32> to vector<1x64xf32>
    %654 = vector.broadcast %653 : vector<1x64xf32> to vector<8x64xf32>
    %655 = arith.addf %651, %654 : vector<8x64xf32>
    %656 = vector.extract_strided_slice %655 {offsets = [0, 0], sizes = [8, 32], strides = [1, 1]} : vector<8x64xf32> to vector<8x32xf32>
    %657 = vector.extract_strided_slice %655 {offsets = [0, 32], sizes = [8, 32], strides = [1, 1]} : vector<8x64xf32> to vector<8x32xf32>
    %658 = tpu.concatenate %656, %657 in 0 : vector<8x32xf32>, vector<8x32xf32> -> vector<16x32xf32>
    %659 = arith.truncf %658 : vector<16x32xf32> to vector<16x32xbf16>
    %cst_352 = arith.constant dense<0.000000e+00> : vector<56x32xf32>
    %660 = tpu.matmul %13, %659, %cst_352 {dimension_numbers = #tpu.dot_dimension_numbers<[1], [0], [0], [1], [0, 0, 1, 1], [], []>} : vector<56x16xbf16>, vector<16x32xbf16>, vector<56x32xf32> -> vector<56x32xf32>
    %c5_353 = arith.constant 5 : index
    %c0_354 = arith.constant 0 : index
    %c0_355 = arith.constant 0 : index
    %661 = vector.load %arg17[%c5_353, %c0_354, %c0_355] : memref<6x1x32xf32, #tpu.memory_space<vmem>>, vector<1x1x32xf32>
    %662 = vector.shape_cast %661 : vector<1x1x32xf32> to vector<1x32xf32>
    %663 = vector.broadcast %561 : vector<56x1xf32> to vector<56x32xf32>
    %664 = vector.broadcast %662 : vector<1x32xf32> to vector<56x32xf32>
    %665 = arith.mulf %663, %664 : vector<56x32xf32>
    %666 = arith.addf %660, %665 : vector<56x32xf32>
    %c5_356 = arith.constant 5 : index
    %c0_357 = arith.constant 0 : index
    %c0_358 = arith.constant 0 : index
    %667 = vector.load %arg18[%c5_356, %c0_357, %c0_358] : memref<6x1x32xf32, #tpu.memory_space<vmem>>, vector<1x1x32xf32>
    %668 = vector.shape_cast %667 : vector<1x1x32xf32> to vector<1x32xf32>
    %669 = vector.broadcast %24 : vector<56x1xf32> to vector<56x32xf32>
    %670 = vector.broadcast %668 : vector<1x32xf32> to vector<56x32xf32>
    %671 = arith.mulf %669, %670 : vector<56x32xf32>
    %672 = arith.addf %666, %671 : vector<56x32xf32>
    %cst_359 = arith.constant 0.000000e+00 : f32
    %673 = vector.broadcast %cst_359 : f32 to vector<56x32xf32>
    %674 = arith.subf %673, %672 : vector<56x32xf32>
    %675 = math.exp %674 : vector<56x32xf32>
    %cst_360 = arith.constant 1.000000e+00 : f32
    %676 = vector.broadcast %cst_360 : f32 to vector<56x32xf32>
    %677 = arith.addf %676, %675 : vector<56x32xf32>
    %678 = tpu.reciprocal %677 {approx = true} : vector<56x32xf32> -> vector<56x32xf32>
    %679 = arith.mulf %672, %678 : vector<56x32xf32>
    %c5_361 = arith.constant 5 : index
    %c0_362 = arith.constant 0 : index
    %c0_363 = arith.constant 0 : index
    %680 = vector.load %arg20[%c5_361, %c0_362, %c0_363] : memref<6x32x32xf32, #tpu.memory_space<vmem>>, vector<1x32x32xf32>
    %681 = vector.shape_cast %680 : vector<1x32x32xf32> to vector<32x32xf32>
    %cst_364 = arith.constant dense<0.000000e+00> : vector<56x32xf32>
    %682 = tpu.matmul %679, %681, %cst_364 {dimension_numbers = #tpu.dot_dimension_numbers<[1], [0], [0], [1], [0, 0, 1, 1], [], []>} : vector<56x32xf32>, vector<32x32xf32>, vector<56x32xf32> -> vector<56x32xf32>
    %c5_365 = arith.constant 5 : index
    %c0_366 = arith.constant 0 : index
    %c0_367 = arith.constant 0 : index
    %683 = vector.load %arg21[%c5_365, %c0_366, %c0_367] : memref<6x1x32xf32, #tpu.memory_space<vmem>>, vector<1x1x32xf32>
    %684 = vector.shape_cast %683 : vector<1x1x32xf32> to vector<1x32xf32>
    %685 = vector.broadcast %684 : vector<1x32xf32> to vector<56x32xf32>
    %686 = arith.addf %682, %685 : vector<56x32xf32>
    %cst_368 = arith.constant 0.000000e+00 : f32
    %687 = vector.broadcast %cst_368 : f32 to vector<56x32xf32>
    %688 = arith.subf %687, %686 : vector<56x32xf32>
    %689 = math.exp %688 : vector<56x32xf32>
    %cst_369 = arith.constant 1.000000e+00 : f32
    %690 = vector.broadcast %cst_369 : f32 to vector<56x32xf32>
    %691 = arith.addf %690, %689 : vector<56x32xf32>
    %692 = tpu.reciprocal %691 {approx = true} : vector<56x32xf32> -> vector<56x32xf32>
    %693 = arith.mulf %686, %692 : vector<56x32xf32>
    %694 = vector.broadcast %23 : vector<56x1xf32> to vector<56x32xf32>
    %695 = arith.mulf %693, %694 : vector<56x32xf32>
    %696 = arith.truncf %695 : vector<56x32xf32> to vector<56x32xbf16>
    %cst_370 = arith.constant dense<0.000000e+00> : vector<8x32xf32>
    %697 = tpu.matmul %21, %696, %cst_370 {dimension_numbers = #tpu.dot_dimension_numbers<[1], [0], [0], [1], [0, 0, 1, 1], [], []>} : vector<8x56xbf16>, vector<56x32xbf16>, vector<8x32xf32> -> vector<8x32xf32>
    %cst_371 = arith.constant 0.00999999977 : f32
    %698 = vector.broadcast %cst_371 : f32 to vector<8x32xf32>
    %699 = arith.mulf %697, %698 : vector<8x32xf32>
    %c5_372 = arith.constant 5 : index
    %c0_373 = arith.constant 0 : index
    %c0_374 = arith.constant 0 : index
    %700 = vector.load %arg22[%c5_372, %c0_373, %c0_374] : memref<6x32x32xf32, #tpu.memory_space<vmem>>, vector<1x32x32xf32>
    %701 = vector.shape_cast %700 : vector<1x32x32xf32> to vector<32x32xf32>
    %cst_375 = arith.constant dense<0.000000e+00> : vector<8x32xf32>
    %702 = tpu.matmul %648, %701, %cst_375 {dimension_numbers = #tpu.dot_dimension_numbers<[1], [0], [0], [1], [0, 0, 1, 1], [], []>} : vector<8x32xf32>, vector<32x32xf32>, vector<8x32xf32> -> vector<8x32xf32>
    %c5_376 = arith.constant 5 : index
    %c0_377 = arith.constant 0 : index
    %c0_378 = arith.constant 0 : index
    %703 = vector.load %arg23[%c5_376, %c0_377, %c0_378] : memref<6x32x32xf32, #tpu.memory_space<vmem>>, vector<1x32x32xf32>
    %704 = vector.shape_cast %703 : vector<1x32x32xf32> to vector<32x32xf32>
    %cst_379 = arith.constant dense<0.000000e+00> : vector<8x32xf32>
    %705 = tpu.matmul %699, %704, %cst_379 {dimension_numbers = #tpu.dot_dimension_numbers<[1], [0], [0], [1], [0, 0, 1, 1], [], []>} : vector<8x32xf32>, vector<32x32xf32>, vector<8x32xf32> -> vector<8x32xf32>
    %706 = arith.addf %702, %705 : vector<8x32xf32>
    %c5_380 = arith.constant 5 : index
    %c0_381 = arith.constant 0 : index
    %c0_382 = arith.constant 0 : index
    %707 = vector.load %arg24[%c5_380, %c0_381, %c0_382] : memref<6x1x32xf32, #tpu.memory_space<vmem>>, vector<1x1x32xf32>
    %708 = vector.shape_cast %707 : vector<1x1x32xf32> to vector<1x32xf32>
    %709 = vector.broadcast %708 : vector<1x32xf32> to vector<8x32xf32>
    %710 = arith.addf %706, %709 : vector<8x32xf32>
    %cst_383 = arith.constant 0.000000e+00 : f32
    %711 = vector.broadcast %cst_383 : f32 to vector<8x32xf32>
    %712 = arith.subf %711, %710 : vector<8x32xf32>
    %713 = math.exp %712 : vector<8x32xf32>
    %cst_384 = arith.constant 1.000000e+00 : f32
    %714 = vector.broadcast %cst_384 : f32 to vector<8x32xf32>
    %715 = arith.addf %714, %713 : vector<8x32xf32>
    %716 = tpu.reciprocal %715 {approx = true} : vector<8x32xf32> -> vector<8x32xf32>
    %717 = arith.mulf %710, %716 : vector<8x32xf32>
    %c5_385 = arith.constant 5 : index
    %c0_386 = arith.constant 0 : index
    %c0_387 = arith.constant 0 : index
    %718 = vector.load %arg25[%c5_385, %c0_386, %c0_387] : memref<6x32x32xf32, #tpu.memory_space<vmem>>, vector<1x32x32xf32>
    %719 = vector.shape_cast %718 : vector<1x32x32xf32> to vector<32x32xf32>
    %cst_388 = arith.constant dense<0.000000e+00> : vector<8x32xf32>
    %720 = tpu.matmul %717, %719, %cst_388 {dimension_numbers = #tpu.dot_dimension_numbers<[1], [0], [0], [1], [0, 0, 1, 1], [], []>} : vector<8x32xf32>, vector<32x32xf32>, vector<8x32xf32> -> vector<8x32xf32>
    %721 = arith.addf %648, %720 : vector<8x32xf32>
    %c5_389 = arith.constant 5 : index
    %c0_390 = arith.constant 0 : index
    %c0_391 = arith.constant 0 : index
    %722 = vector.load %arg26[%c5_389, %c0_390, %c0_391] : memref<6x1x32xf32, #tpu.memory_space<vmem>>, vector<1x1x32xf32>
    %723 = vector.shape_cast %722 : vector<1x1x32xf32> to vector<1x32xf32>
    %724 = vector.broadcast %723 : vector<1x32xf32> to vector<8x32xf32>
    %725 = arith.addf %721, %724 : vector<8x32xf32>
    %726 = vector.broadcast %22 : vector<8x1xf32> to vector<8x32xf32>
    %727 = arith.mulf %725, %726 : vector<8x32xf32>
    %c2_392 = arith.constant 2 : index
    %c0_393 = arith.constant 0 : index
    %c0_394 = arith.constant 0 : index
    %728 = vector.load %arg27[%c2_392, %c0_393, %c0_394] : memref<3x32x64xf32, #tpu.memory_space<vmem>>, vector<1x32x64xf32>
    %729 = vector.shape_cast %728 : vector<1x32x64xf32> to vector<32x64xf32>
    %cst_395 = arith.constant dense<0.000000e+00> : vector<8x64xf32>
    %730 = tpu.matmul %727, %729, %cst_395 {dimension_numbers = #tpu.dot_dimension_numbers<[1], [0], [0], [1], [0, 0, 1, 1], [], []>} : vector<8x32xf32>, vector<32x64xf32>, vector<8x64xf32> -> vector<8x64xf32>
    %c2_396 = arith.constant 2 : index
    %c0_397 = arith.constant 0 : index
    %c0_398 = arith.constant 0 : index
    %731 = vector.load %arg30[%c2_396, %c0_397, %c0_398] : memref<3x1x64xf32, #tpu.memory_space<vmem>>, vector<1x1x64xf32>
    %732 = vector.shape_cast %731 : vector<1x1x64xf32> to vector<1x64xf32>
    %733 = vector.broadcast %732 : vector<1x64xf32> to vector<8x64xf32>
    %734 = arith.addf %730, %733 : vector<8x64xf32>
    %735 = vector.extract_strided_slice %734 {offsets = [0, 0], sizes = [8, 32], strides = [1, 1]} : vector<8x64xf32> to vector<8x32xf32>
    %736 = vector.extract_strided_slice %734 {offsets = [0, 32], sizes = [8, 32], strides = [1, 1]} : vector<8x64xf32> to vector<8x32xf32>
    %737 = tpu.concatenate %735, %736 in 0 : vector<8x32xf32>, vector<8x32xf32> -> vector<16x32xf32>
    %738 = arith.truncf %737 : vector<16x32xf32> to vector<16x32xbf16>
    %cst_399 = arith.constant dense<0.000000e+00> : vector<56x32xf32>
    %739 = tpu.matmul %13, %738, %cst_399 {dimension_numbers = #tpu.dot_dimension_numbers<[1], [0], [0], [1], [0, 0, 1, 1], [], []>} : vector<56x16xbf16>, vector<16x32xbf16>, vector<56x32xf32> -> vector<56x32xf32>
    %c2_400 = arith.constant 2 : index
    %c0_401 = arith.constant 0 : index
    %c0_402 = arith.constant 0 : index
    %740 = vector.load %arg28[%c2_400, %c0_401, %c0_402] : memref<3x1x32xf32, #tpu.memory_space<vmem>>, vector<1x1x32xf32>
    %741 = vector.shape_cast %740 : vector<1x1x32xf32> to vector<1x32xf32>
    %742 = vector.broadcast %561 : vector<56x1xf32> to vector<56x32xf32>
    %743 = vector.broadcast %741 : vector<1x32xf32> to vector<56x32xf32>
    %744 = arith.mulf %742, %743 : vector<56x32xf32>
    %745 = arith.addf %739, %744 : vector<56x32xf32>
    %c2_403 = arith.constant 2 : index
    %c0_404 = arith.constant 0 : index
    %c0_405 = arith.constant 0 : index
    %746 = vector.load %arg29[%c2_403, %c0_404, %c0_405] : memref<3x1x32xf32, #tpu.memory_space<vmem>>, vector<1x1x32xf32>
    %747 = vector.shape_cast %746 : vector<1x1x32xf32> to vector<1x32xf32>
    %748 = vector.broadcast %24 : vector<56x1xf32> to vector<56x32xf32>
    %749 = vector.broadcast %747 : vector<1x32xf32> to vector<56x32xf32>
    %750 = arith.mulf %748, %749 : vector<56x32xf32>
    %751 = arith.addf %745, %750 : vector<56x32xf32>
    %cst_406 = arith.constant 0.000000e+00 : f32
    %752 = vector.broadcast %cst_406 : f32 to vector<56x32xf32>
    %753 = arith.subf %752, %751 : vector<56x32xf32>
    %754 = math.exp %753 : vector<56x32xf32>
    %cst_407 = arith.constant 1.000000e+00 : f32
    %755 = vector.broadcast %cst_407 : f32 to vector<56x32xf32>
    %756 = arith.addf %755, %754 : vector<56x32xf32>
    %757 = tpu.reciprocal %756 {approx = true} : vector<56x32xf32> -> vector<56x32xf32>
    %758 = arith.mulf %751, %757 : vector<56x32xf32>
    %c2_408 = arith.constant 2 : index
    %c0_409 = arith.constant 0 : index
    %c0_410 = arith.constant 0 : index
    %759 = vector.load %arg31[%c2_408, %c0_409, %c0_410] : memref<3x32x32xf32, #tpu.memory_space<vmem>>, vector<1x32x32xf32>
    %760 = vector.shape_cast %759 : vector<1x32x32xf32> to vector<32x32xf32>
    %cst_411 = arith.constant dense<0.000000e+00> : vector<56x32xf32>
    %761 = tpu.matmul %758, %760, %cst_411 {dimension_numbers = #tpu.dot_dimension_numbers<[1], [0], [0], [1], [0, 0, 1, 1], [], []>} : vector<56x32xf32>, vector<32x32xf32>, vector<56x32xf32> -> vector<56x32xf32>
    %c2_412 = arith.constant 2 : index
    %c0_413 = arith.constant 0 : index
    %c0_414 = arith.constant 0 : index
    %762 = vector.load %arg32[%c2_412, %c0_413, %c0_414] : memref<3x1x32xf32, #tpu.memory_space<vmem>>, vector<1x1x32xf32>
    %763 = vector.shape_cast %762 : vector<1x1x32xf32> to vector<1x32xf32>
    %764 = vector.broadcast %763 : vector<1x32xf32> to vector<56x32xf32>
    %765 = arith.addf %761, %764 : vector<56x32xf32>
    %cst_415 = arith.constant 0.000000e+00 : f32
    %766 = vector.broadcast %cst_415 : f32 to vector<56x32xf32>
    %767 = arith.subf %766, %765 : vector<56x32xf32>
    %768 = math.exp %767 : vector<56x32xf32>
    %cst_416 = arith.constant 1.000000e+00 : f32
    %769 = vector.broadcast %cst_416 : f32 to vector<56x32xf32>
    %770 = arith.addf %769, %768 : vector<56x32xf32>
    %771 = tpu.reciprocal %770 {approx = true} : vector<56x32xf32> -> vector<56x32xf32>
    %772 = arith.mulf %765, %771 : vector<56x32xf32>
    %c2_417 = arith.constant 2 : index
    %c0_418 = arith.constant 0 : index
    %c0_419 = arith.constant 0 : index
    %773 = vector.load %arg33[%c2_417, %c0_418, %c0_419] : memref<3x1x32xf32, #tpu.memory_space<vmem>>, vector<1x1x32xf32>
    %774 = vector.shape_cast %773 : vector<1x1x32xf32> to vector<1x32xf32>
    %775 = vector.broadcast %774 : vector<1x32xf32> to vector<56x32xf32>
    %776 = arith.mulf %772, %775 : vector<56x32xf32>
    %cst_420 = arith.constant dense<0.000000e+00> : vector<56xf32>
    %777 = vector.multi_reduction <add>, %776, %cst_420 [1] : vector<56x32xf32> to vector<56xf32>
    %778 = vector.shape_cast %777 : vector<56xf32> to vector<56x1xf32>
    %779 = vector.broadcast %778 : vector<56x1xf32> to vector<56x3xf32>
    %780 = arith.mulf %569, %779 : vector<56x3xf32>
    %781 = vector.broadcast %23 : vector<56x1xf32> to vector<56x3xf32>
    %782 = arith.mulf %780, %781 : vector<56x3xf32>
    %783 = arith.truncf %782 : vector<56x3xf32> to vector<56x3xbf16>
    %cst_421 = arith.constant dense<0.000000e+00> : vector<8x3xf32>
    %784 = tpu.matmul %21, %783, %cst_421 {dimension_numbers = #tpu.dot_dimension_numbers<[1], [0], [0], [1], [0, 0, 1, 1], [], []>} : vector<8x56xbf16>, vector<56x3xbf16>, vector<8x3xf32> -> vector<8x3xf32>
    %cst_422 = arith.constant 0.00999999977 : f32
    %785 = vector.broadcast %cst_422 : f32 to vector<8x3xf32>
    %786 = arith.mulf %784, %785 : vector<8x3xf32>
    %787 = arith.addf %542, %786 : vector<8x3xf32>
    %788 = vector.broadcast %22 : vector<8x1xf32> to vector<8x3xf32>
    %789 = arith.mulf %787, %788 : vector<8x3xf32>
    %790 = vector.broadcast %22 : vector<8x1xf32> to vector<8x32xf32>
    %791 = arith.mulf %727, %790 : vector<8x32xf32>
    %c0_423 = arith.constant 0 : index
    %c0_424 = arith.constant 0 : index
    %792 = vector.load %arg12[%c0_423, %c0_424] : memref<32x32xf32, #tpu.memory_space<vmem>>, vector<32x32xf32>
    %cst_425 = arith.constant dense<0.000000e+00> : vector<8x32xf32>
    %793 = tpu.matmul %791, %792, %cst_425 {dimension_numbers = #tpu.dot_dimension_numbers<[1], [0], [0], [1], [0, 0, 1, 1], [], []>} : vector<8x32xf32>, vector<32x32xf32>, vector<8x32xf32> -> vector<8x32xf32>
    %c0_426 = arith.constant 0 : index
    %c0_427 = arith.constant 0 : index
    %794 = vector.load %arg13[%c0_426, %c0_427] : memref<1x32xf32, #tpu.memory_space<vmem>>, vector<1x32xf32>
    %795 = vector.broadcast %794 : vector<1x32xf32> to vector<8x32xf32>
    %796 = arith.addf %793, %795 : vector<8x32xf32>
    %cst_428 = arith.constant 0.000000e+00 : f32
    %797 = vector.broadcast %cst_428 : f32 to vector<8x32xf32>
    %798 = arith.subf %797, %796 : vector<8x32xf32>
    %799 = math.exp %798 : vector<8x32xf32>
    %cst_429 = arith.constant 1.000000e+00 : f32
    %800 = vector.broadcast %cst_429 : f32 to vector<8x32xf32>
    %801 = arith.addf %800, %799 : vector<8x32xf32>
    %802 = tpu.reciprocal %801 {approx = true} : vector<8x32xf32> -> vector<8x32xf32>
    %803 = arith.mulf %796, %802 : vector<8x32xf32>
    %c0_430 = arith.constant 0 : index
    %c0_431 = arith.constant 0 : index
    %804 = vector.load %arg14[%c0_430, %c0_431] : memref<32x128xf32, #tpu.memory_space<vmem>>, vector<32x128xf32>
    %cst_432 = arith.constant dense<0.000000e+00> : vector<8x128xf32>
    %805 = tpu.matmul %803, %804, %cst_432 {dimension_numbers = #tpu.dot_dimension_numbers<[1], [0], [0], [1], [0, 0, 1, 1], [], []>} : vector<8x32xf32>, vector<32x128xf32>, vector<8x128xf32> -> vector<8x128xf32>
    %c0_433 = arith.constant 0 : index
    %c0_434 = arith.constant 0 : index
    %806 = vector.load %arg15[%c0_433, %c0_434] : memref<1x128xf32, #tpu.memory_space<vmem>>, vector<1x128xf32>
    %807 = vector.broadcast %806 : vector<1x128xf32> to vector<8x128xf32>
    %808 = arith.addf %805, %807 : vector<8x128xf32>
    %c0_435 = arith.constant 0 : index
    %c0_436 = arith.constant 0 : index
    %809 = vector.load %arg35[%c0_435, %c0_436] : memref<8x128xf32, #tpu.memory_space<vmem>>, vector<8x128xf32>
    tpu.vector_store %arg35[%c0_435, %c0_436], %808 {strides = array<i32>} : memref<8x128xf32, #tpu.memory_space<vmem>>, vector<8x128xf32>,
    %c0_437 = arith.constant 0 : index
    %c0_438 = arith.constant 0 : index
    %810 = vector.load %arg34[%c0_437, %c0_438] : memref<3x128xf32, #tpu.memory_space<vmem>>, vector<3x128xf32>
    %cst_439 = arith.constant dense<0.000000e+00> : vector<8x128xf32>
    %811 = tpu.matmul %789, %810, %cst_439 {dimension_numbers = #tpu.dot_dimension_numbers<[1], [0], [0], [1], [0, 0, 1, 1], [], []>} : vector<8x3xf32>, vector<3x128xf32>, vector<8x128xf32> -> vector<8x128xf32>
    %c0_440 = arith.constant 0 : index
    %c0_441 = arith.constant 0 : index
    %812 = vector.load %arg36[%c0_440, %c0_441] : memref<8x128xf32, #tpu.memory_space<vmem>>, vector<8x128xf32>
    tpu.vector_store %arg36[%c0_440, %c0_441], %811 {strides = array<i32>} : memref<8x128xf32, #tpu.memory_space<vmem>>, vector<8x128xf32>,
    return
  }
}

</mosaic_0001>

<bundles_post_ra>
// kernel: tpu_custom_call.1
= control target key start
LH: loop header
LB: loop body
LE: loop exit
PB: predicated region body
PF: predicated region fallthrough
CT: control target
= control target key end

     0   :  { %s10456_s6 = smov 1   ;;  %s10457_s10 = smov 2   ;;  %s12359_s0 = inlined_call_operand.smem [shape: u32[37], index: -1, kind: input, shape index: {}] }
   0x1   :  { %s10525_s5 = sld [smem:[%s12359_s0]]   ;;  %s10458_s14 = smov 3  }
   0x2   :  { %s10530_s9 = sld [smem:[%s12359_s0 + %s10456_s6]]   ;;  %s10459_s18 = smov 4  }
   0x3   :  { %s10535_s13 = sld [smem:[%s12359_s0 + %s10457_s10]]   ;;  %s10460_s22 = smov 5  }
   0x4   :  { %s10540_s17 = sld [smem:[%s12359_s0 + %s10458_s14]]   ;;  %s10461_s26 = smov 6  }
   0x5   :  { %s10545_s21 = sld [smem:[%s12359_s0 + %s10459_s18]]   ;;  %s10462_s30 = smov 7  }
   0x6   :  { %s10550_s25 = sld [smem:[%s12359_s0 + %s10460_s22]]   ;;  %s10463_s4 = smov 8  }
   0x7   :  { %12385 = sst [smem:[#allocation38_spill]] %s10525_s5  ;;  %s10464_s10 = smov 9  }
   0x8   :  { %s10555_s29 = sld [smem:[%s12359_s0 + %s10461_s26]]   ;;  %s10465_s15 = smov 10  }
   0x9   :  { %12386 = sst [smem:[#allocation39_spill]] %s10535_s13  ;;  %s10466_s20 = smov 11  }
   0xa   :  { %12387 = sst [smem:[#allocation40_spill]] %s10540_s17  ;;  %s10467_s26 = smov 12  }
   0xb   :  { %12388 = sst [smem:[#allocation41_spill]] %s10545_s21  ;;  %s10468_s1 = smov 13  }
   0xc   :  { %12389 = sst [smem:[#allocation42_spill]] %s10550_s25  ;;  %s10469_s7 = smov 14  }
   0xd   :  { %s10560_s3 = sld [smem:[%s12359_s0 + %s10462_s30]]   ;;  %s10471_s22 = smov 16  }
   0xe   :  { %12390 = sst [smem:[#allocation43_spill]] %s10555_s29  ;;  %s10472_s28 = smov 17  }
   0xf   :  { %s10565_s8 = sld [smem:[%s12359_s0 + %s10463_s4]]  }
  0x10   :  { %s10570_s14 = sld [smem:[%s12359_s0 + %s10464_s10]]  }
  0x11   :  { %s10575_s19 = sld [smem:[%s12359_s0 + %s10465_s15]]   ;;  %s10470_s15 = smov 15  }
  0x12   :  { %s10580_s24 = sld [smem:[%s12359_s0 + %s10466_s20]]  }
  0x13   :  { %12391 = sst [smem:[#allocation44_spill]] %s10560_s3 }
  0x14   :  { %s10585_s30 = sld [smem:[%s12359_s0 + %s10467_s26]]  }
  0x15   :  { %12392 = sst [smem:[#allocation45_spill]] %s10565_s8 }
  0x16   :  { %s10590_s6 = sld [smem:[%s12359_s0 + %s10468_s1]]  }
  0x17   :  { %s10595_s12 = sld [smem:[%s12359_s0 + %s10469_s7]]   ;;  %s10473_s7 = smov 18  }
  0x18   :  { %s10600_s20 = sld [smem:[%s12359_s0 + %s10470_s15]]   ;;  %s10474_s15 = smov 19  }
  0x19   :  { %s10605_s27 = sld [smem:[%s12359_s0 + %s10471_s22]]   ;;  %s10475_s22 = smov 20  }
  0x1a   :  { %s10610_s4 = sld [smem:[%s12359_s0 + %s10472_s28]]   ;;  %s10476_s28 = smov 21  }
  0x1b   :  { %s10615_s29 = sld [smem:[%s12359_s0 + %s10473_s7]]   ;;  %s10477_s7 = smov 22  }
  0x1c   :  { %s10620_s3 = sld [smem:[%s12359_s0 + %s10474_s15]]   ;;  %s10478_s15 = smov 23  }
  0x1d   :  { %s10625_s25 = sld [smem:[%s12359_s0 + %s10475_s22]]   ;;  %s10479_s22 = smov 24  }
  0x1e   :  { %s10645_s21 = sld [smem:[%s12359_s0 + %s10479_s22]]   ;;  %s10483_s22 = smov 28  }
  0x1f   :  { %12393 = sst [smem:[#allocation46_spill]] %s10605_s27 }
  0x20   :  { %12394 = sst [smem:[#allocation47_spill]] %s10610_s4 }
  0x21   :  { %12395 = sst [smem:[#allocation48_spill]] %s10615_s29 }
  0x22   :  { %s10630_s4 = sld [smem:[%s12359_s0 + %s10476_s28]]   ;;  %s10480_s28 = smov 25  }
  0x23   :  { %s10635_s29 = sld [smem:[%s12359_s0 + %s10477_s7]]   ;;  %s10481_s7 = smov 26  }
  0x24   :  { %s10640_s27 = sld [smem:[%s12359_s0 + %s10478_s15]]   ;;  %s10482_s15 = smov 27  }
  0x25   :  { %12397 = sst [smem:[#allocation50_spill]] %s10645_s21 }
  0x26   :  { %s10655_s17 = sld [smem:[%s12359_s0 + %s10481_s7]]   ;;  %s10485_s7 = smov 30  }
  0x27   :  { %s10660_s5 = sld [smem:[%s12359_s0 + %s10482_s15]]   ;;  %s10486_s15 = smov 31  }
  0x28   :  { %12396 = sst [smem:[#allocation49_spill]] %s10630_s4 }
  0x29   :  { %s10650_s4 = sld [smem:[%s12359_s0 + %s10480_s28]]   ;;  %s10484_s28 = smov 29  }
  0x2a   :  { %s10665_s21 = sld [smem:[%s12359_s0 + %s10483_s22]]   ;;  %s10487_s22 = smov 32  }
  0x2b   :  { %s10670_s13 = sld [smem:[%s12359_s0 + %s10484_s28]]   ;;  %s10488_s28 = smov 33  }
  0x2c   :  { %12398 = sst [smem:[#allocation51_spill]] %s10655_s17 }
  0x2d   :  { %12399 = sst [smem:[#allocation52_spill]] %s10660_s5 }
  0x2e   :  { %s10675_s17 = sld [smem:[%s12359_s0 + %s10485_s7]]   ;;  %s10489_s7 = smov 34  }
  0x2f   :  { %s10680_s5 = sld [smem:[%s12359_s0 + %s10486_s15]]   ;;  %s10490_s15 = smov 35  }
  0x30   :  { %12400 = sst [smem:[#allocation53_spill]] %s10665_s21 }
  0x31   :  { %12401 = sst [smem:[#allocation54_spill]] %s10670_s13 }
  0x32   :  { %s10685_s21 = sld [smem:[%s12359_s0 + %s10487_s22]]   ;;  %s10491_s22 = smov 36  }
  0x33   :  { %s10690_s13 = sld [smem:[%s12359_s0 + %s10488_s28]]  }
  0x34   :  { %12402 = sst [smem:[#allocation55_spill]] %s10675_s17 }
  0x35   :  { %s10695_s17 = sld [smem:[%s12359_s0 + %s10489_s7]]  }
  0x36   :  { %s10700_s8 = sld [smem:[%s12359_s0 + %s10490_s15]]  }
  0x38   :  { %12403 = sst [smem:[#allocation56_spill]] %s10685_s21 }
  0x39   :  { %s10705_s21 = sld [smem:[%s12359_s0 + %s10491_s22]]  }
  0x3a   :  { %79 = vsyncpa [#allocation3], 0 }
  0x3b   :  { %80 = vsyncpa [#allocation6], 0 }
  0x3c   :  { %81 = vsyncpa [#allocation9], 0 }
  0x3d   :  { %82 = vsyncpa [#allocation12], 0 }
  0x3e   :  { %83 = vsyncpa [#allocation15], 0 }
  0x3f   :  { %84 = vsyncpa [#allocation18], 0 }
  0x40   :  { %85 = vsyncpa [#allocation21], 0 }
  0x41   :  { %86 = vsyncpa [#allocation24], 0 }
  0x42   :  { %87 = vsyncpa [#allocation4], 0 }
  0x43   :  { %88 = vsyncpa [#allocation27], 0  ;;  %s10492_s28 = smov [#allocation5]   ;;  %s10493_s2 = smov [#allocation8]  }
  0x44   :  { %s121_s1 = sshll.u32 %s10492_s28, 4  ;;  %s143_s7 = sshll.u32 %s10493_s2, 4  ;;  %s122_s1 = int_to_ptr.vmem [resolvable:$true] %s121_s1  ;;  %s144_s7 = int_to_ptr.vmem [resolvable:$true] %s143_s7 }
  0x45   :  { %s10084_s0 = scalar_lea.hbm %s10570_s14, 16 }
  0x46   :  { %p10085_p0 = scmp.ne.s32.totalorder %s10570_s14, %s10084_s0  ;;  %p10088_p1 = scmp.lt.u32.totalorder %s10084_s0, %s10570_s14 }
  0x48   :  { %p10090_p2 = pnand %p10088_p1, %p10085_p0 }
  0x4a   :  { %10093 = shalt.err (!%p10090_p2)
}
  0x4b   :  { %s10094_s10 = scalar_lea.vmem %s122_s1, 16  ;;  %s10098_s11 = scalar_lea.vmem %s122_s1, 32 }
  0x4c   :  { %p10095_p3 = scmp.ne.s32.totalorder %s122_s1, %s10094_s10  ;;  %p10099_p4 = scmp.lt.s32.totalorder %s122_s1, %s122_s1 }
  0x4d   :  { %p10100_p5 = scmp.lt.s32.totalorder %s10098_s11, %s10094_s10 }
  0x4f   :  { %p10101_p6 = por %p10100_p5, %p10099_p4 }
  0x51   :  { %p10102_p7 = pnand %p10101_p6, %p10095_p3 }
  0x53   :  { %10105 = shalt.err (!%p10102_p7)
}
  0x54   :  { %124 = dma.hbm_to_vmem [thread:$0]  %s10570_s14, 16, %s122_s1, [#allocation6]  }
  0x55   :  { %s10106_s15 = scalar_lea.hbm %s10580_s24, 16 }
  0x56   :  { %p10107_p8 = scmp.ne.s32.totalorder %s10580_s24, %s10106_s15  ;;  %p10110_p9 = scmp.lt.u32.totalorder %s10106_s15, %s10580_s24 }
  0x58   :  { %p10112_p10 = pnand %p10110_p9, %p10107_p8 }
  0x5a   :  { %10115 = shalt.err (!%p10112_p10)
}
  0x5b   :  { %s10116_s16 = scalar_lea.vmem %s144_s7, 16  ;;  %s10120_s18 = scalar_lea.vmem %s144_s7, 32 }
  0x5c   :  { %p10117_p11 = scmp.ne.s32.totalorder %s144_s7, %s10116_s16  ;;  %p10121_p12 = scmp.lt.s32.totalorder %s144_s7, %s144_s7 }
  0x5d   :  { %p10122_p13 = scmp.lt.s32.totalorder %s10120_s18, %s10116_s16 }
  0x5f   :  { %p10123_p0 = por %p10122_p13, %p10121_p12 }
  0x61   :  { %p10124_p1 = pnand %p10123_p0, %p10117_p11 }
  0x63   :  { %10127 = shalt.err (!%p10124_p1)
}
  0x64   :  { %146 = dma.hbm_to_vmem [thread:$0]  %s10580_s24, 16, %s144_s7, [#allocation9]  }
  0x65   :  { %s10494_s22 = smov [#allocation11]   ;;  %s10495_s23 = smov [#allocation14]  }
  0x66   :  { %s165_s14 = sshll.u32 %s10494_s22, 4  ;;  %s187_s26 = sshll.u32 %s10495_s23, 4  ;;  %s166_s14 = int_to_ptr.vmem [resolvable:$true] %s165_s14  ;;  %s188_s26 = int_to_ptr.vmem [resolvable:$true] %s187_s26 }
  0x67   :  { %s10128_s28 = scalar_lea.hbm %s10590_s6, 16 }
  0x68   :  { %p10129_p2 = scmp.ne.s32.totalorder %s10590_s6, %s10128_s28  ;;  %p10132_p3 = scmp.lt.u32.totalorder %s10128_s28, %s10590_s6 }
  0x6a   :  { %p10134_p4 = pnand %p10132_p3, %p10129_p2 }
  0x6c   :  { %10137 = shalt.err (!%p10134_p4)
}
  0x6d   :  { %s10138_s1 = scalar_lea.vmem %s166_s14, 16  ;;  %s10142_s2 = scalar_lea.vmem %s166_s14, 32 }
  0x6e   :  { %p10139_p5 = scmp.ne.s32.totalorder %s166_s14, %s10138_s1  ;;  %p10143_p6 = scmp.lt.s32.totalorder %s166_s14, %s166_s14 }
  0x6f   :  { %p10144_p7 = scmp.lt.s32.totalorder %s10142_s2, %s10138_s1 }
  0x71   :  { %p10145_p8 = por %p10144_p7, %p10143_p6 }
  0x73   :  { %p10146_p9 = pnand %p10145_p8, %p10139_p5 }
  0x75   :  { %10149 = shalt.err (!%p10146_p9)
}
  0x76   :  { %168 = dma.hbm_to_vmem [thread:$0]  %s10590_s6, 16, %s166_s14, [#allocation12]  }
  0x77   :  { %s10150_s24 = scalar_lea.hbm %s10600_s20, 16 }
  0x78   :  { %p10151_p10 = scmp.ne.s32.totalorder %s10600_s20, %s10150_s24  ;;  %p10154_p11 = scmp.lt.u32.totalorder %s10150_s24, %s10600_s20 }
  0x7a   :  { %p10156_p12 = pnand %p10154_p11, %p10151_p10 }
  0x7c   :  { %10159 = shalt.err (!%p10156_p12)
}
  0x7d   :  { %s10160_s7 = scalar_lea.vmem %s188_s26, 16  ;;  %s10164_s0 = scalar_lea.vmem %s188_s26, 32 }
  0x7e   :  { %p10161_p13 = scmp.ne.s32.totalorder %s188_s26, %s10160_s7  ;;  %p10165_p0 = scmp.lt.s32.totalorder %s188_s26, %s188_s26 }
  0x7f   :  { %p10166_p1 = scmp.lt.s32.totalorder %s10164_s0, %s10160_s7 }
  0x81   :  { %p10167_p2 = por %p10166_p1, %p10165_p0 }
  0x83   :  { %p10168_p3 = pnand %p10167_p2, %p10161_p13 }
  0x85   :  { %10171 = shalt.err (!%p10168_p3)
}
  0x86   :  { %190 = dma.hbm_to_vmem [thread:$0]  %s10600_s20, 16, %s188_s26, [#allocation15]  }
  0x87   :  { %s10496_s10 = smov [#allocation17]   ;;  %s10497_s11 = smov [#allocation20]  }
  0x88   :  { %s214_s6 = sshll.u32 %s10496_s10, 4  ;;  %s240_s15 = sshll.u32 %s10497_s11, 4  ;;  %s215_s6 = int_to_ptr.vmem [resolvable:$true] %s214_s6  ;;  %s10723_s15 = int_to_ptr.vmem [resolvable:$true] %s240_s15 }
  0x89   :  { %s10172_s16 = scalar_lea.hbm %s10625_s25, 3072 }
  0x8a   :  { %p10173_p4 = scmp.ne.s32.totalorder %s10625_s25, %s10172_s16  ;;  %p10176_p5 = scmp.lt.u32.totalorder %s10172_s16, %s10625_s25 }
  0x8c   :  { %p10178_p6 = pnand %p10176_p5, %p10173_p4 }
  0x8e   :  { %10181 = shalt.err (!%p10178_p6)
}
  0x8f   :  { %s10182_s18 = scalar_lea.vmem %s215_s6, 3072  ;;  %p10187_p8 = scmp.lt.s32.totalorder %s215_s6, %s215_s6 }
  0x90   :  { %p10183_p7 = scmp.ne.s32.totalorder %s215_s6, %s10182_s18  ;;  %p10188_p9 = scmp.lt.s32.totalorder %s10182_s18, %s10182_s18 }
  0x92   :  { %p10189_p10 = por %p10188_p9, %p10187_p8 }
  0x94   :  { %p10190_p11 = pnand %p10189_p10, %p10183_p7 }
  0x96   :  { %10193 = shalt.err (!%p10190_p11)
}
  0x97   :  { %s10498_s20 = smov 128   ;;  %s10499_s22 = smov 8  }
  0x98   :  { %220 = dma.hbm_to_vmem [thread:$0]  %s10625_s25, 3072, %s215_s6, [#allocation18], %s10498_s20, %s10498_s20, %s10499_s22  }
  0x99   :  { %s10194_s14 = scalar_lea.hbm %s10640_s27, 3072 }
  0x9a   :  { %p10195_p12 = scmp.ne.s32.totalorder %s10640_s27, %s10194_s14  ;;  %p10198_p13 = scmp.lt.u32.totalorder %s10194_s14, %s10640_s27 }
  0x9c   :  { %p10200_p0 = pnand %p10198_p13, %p10195_p12 }
  0x9e   :  { %10203 = shalt.err (!%p10200_p0)
}
  0x9f   :  { %s10204_s23 = scalar_lea.vmem %s10723_s15, 3072  ;;  %p10209_p2 = scmp.lt.s32.totalorder %s10723_s15, %s10723_s15 }
  0xa0   :  { %p10205_p1 = scmp.ne.s32.totalorder %s10723_s15, %s10204_s23  ;;  %p10210_p3 = scmp.lt.s32.totalorder %s10204_s23, %s10204_s23 }
  0xa2   :  { %p10211_p4 = por %p10210_p3, %p10209_p2 }
  0xa4   :  { %p10212_p5 = pnand %p10211_p4, %p10205_p1 }
  0xa6   :  { %10215 = shalt.err (!%p10212_p5)
}
  0xa7   :  { %246 = dma.hbm_to_vmem [thread:$0]  %s10640_s27, 3072, %s10723_s15, [#allocation21], %s10498_s20, %s10498_s20, %s10499_s22  }
  0xa8   :  { %s10500_s25 = smov [#allocation2]   ;;  %s10501_s28 = smov [#allocation7]  }
  0xa9   :  { %s97_s26 = sshll.u32 %s10500_s25, 4  ;;  %s130_s1 = sshll.u32 %s10501_s28, 4  ;;  %s98_s26 = int_to_ptr.vmem [resolvable:$true] %s97_s26  ;;  %s10744_s1 = int_to_ptr.vmem [resolvable:$true] %s130_s1 }
  0xaa   :  { %s10216_s2 = scalar_lea.hbm %s10530_s9, 16 }
  0xab   :  { %p10217_p6 = scmp.ne.s32.totalorder %s10530_s9, %s10216_s2  ;;  %p10220_p7 = scmp.lt.u32.totalorder %s10216_s2, %s10530_s9 }
  0xad   :  { %p10222_p8 = pnand %p10220_p7, %p10217_p6 }
  0xaf   :  { %10225 = shalt.err (!%p10222_p8)
}
  0xb0   :  { %s10226_s24 = scalar_lea.vmem %s98_s26, 16  ;;  %s10230_s7 = scalar_lea.vmem %s98_s26, 32 }
  0xb1   :  { %p10227_p9 = scmp.ne.s32.totalorder %s98_s26, %s10226_s24  ;;  %p10231_p10 = scmp.lt.s32.totalorder %s98_s26, %s98_s26 }
  0xb2   :  { %p10232_p11 = scmp.lt.s32.totalorder %s10230_s7, %s10226_s24 }
  0xb4   :  { %p10233_p12 = por %p10232_p11, %p10231_p10 }
  0xb6   :  { %p10234_p13 = pnand %p10233_p12, %p10227_p9 }
  0xb8   :  { %10237 = shalt.err (!%p10234_p13)
}
  0xb9   :  { %100 = dma.hbm_to_vmem [thread:$0]  %s10530_s9, 16, %s98_s26, [#allocation3]  }
  0xba   :  { %s10238_s27 = scalar_lea.hbm %s10575_s19, 512 }
  0xbb   :  { %p10239_p0 = scmp.ne.s32.totalorder %s10575_s19, %s10238_s27  ;;  %p10242_p1 = scmp.lt.u32.totalorder %s10238_s27, %s10575_s19 }
  0xbd   :  { %p10244_p2 = pnand %p10242_p1, %p10239_p0 }
  0xbf   :  { %10247 = shalt.err (!%p10244_p2)
}
  0xc0   :  { %s10248_s0 = scalar_lea.vmem %s10744_s1, 512  ;;  %p10253_p4 = scmp.lt.s32.totalorder %s10744_s1, %s10744_s1 }
  0xc1   :  { %p10249_p3 = scmp.ne.s32.totalorder %s10744_s1, %s10248_s0  ;;  %p10254_p5 = scmp.lt.s32.totalorder %s10248_s0, %s10248_s0 }
  0xc3   :  { %p10255_p6 = por %p10254_p5, %p10253_p4 }
  0xc5   :  { %p10256_p7 = pnand %p10255_p6, %p10249_p3 }
  0xc7   :  { %10259 = shalt.err (!%p10256_p7)
}
  0xc8   :  { %136 = dma.hbm_to_vmem [thread:$0]  %s10575_s19, 512, %s10744_s1, [#allocation6], %s10498_s20, %s10498_s20, %s10499_s22  }
  0xc9   :  { %s10502_s9 = smov [#allocation10]   ;;  %s10503_s6 = smov [#allocation13]  }
  0xca   :  { %s152_s10 = sshll.u32 %s10502_s9, 4  ;;  %s174_s11 = sshll.u32 %s10503_s6, 4  ;;  %s153_s10 = int_to_ptr.vmem [resolvable:$true] %s152_s10  ;;  %s10762_s11 = int_to_ptr.vmem [resolvable:$true] %s174_s11 }
  0xcb   :  { %s10260_s15 = scalar_lea.hbm %s10585_s30, 512 }
  0xcc   :  { %p10261_p8 = scmp.ne.s32.totalorder %s10585_s30, %s10260_s15  ;;  %p10264_p9 = scmp.lt.u32.totalorder %s10260_s15, %s10585_s30 }
  0xce   :  { %p10266_p10 = pnand %p10264_p9, %p10261_p8 }
  0xd0   :  { %10269 = shalt.err (!%p10266_p10)
}
  0xd1   :  { %s10270_s16 = scalar_lea.vmem %s153_s10, 512  ;;  %p10275_p12 = scmp.lt.s32.totalorder %s153_s10, %s153_s10 }
  0xd2   :  { %p10271_p11 = scmp.ne.s32.totalorder %s153_s10, %s10270_s16  ;;  %p10276_p13 = scmp.lt.s32.totalorder %s10270_s16, %s10270_s16 }
  0xd4   :  { %p10277_p0 = por %p10276_p13, %p10275_p12 }
  0xd6   :  { %p10278_p1 = pnand %p10277_p0, %p10271_p11 }
  0xd8   :  { %10281 = shalt.err (!%p10278_p1)
}
  0xd9   :  { %158 = dma.hbm_to_vmem [thread:$0]  %s10585_s30, 512, %s153_s10, [#allocation9], %s10498_s20, %s10498_s20, %s10499_s22  }
  0xda   :  { %s10282_s19 = scalar_lea.hbm %s10595_s12, 512 }
  0xdb   :  { %p10283_p2 = scmp.ne.s32.totalorder %s10595_s12, %s10282_s19  ;;  %p10286_p3 = scmp.lt.u32.totalorder %s10282_s19, %s10595_s12 }
  0xdd   :  { %p10288_p4 = pnand %p10286_p3, %p10283_p2 }
  0xdf   :  { %10291 = shalt.err (!%p10288_p4)
}
  0xe0   :  { %s10292_s18 = scalar_lea.vmem %s10762_s11, 512  ;;  %p10297_p6 = scmp.lt.s32.totalorder %s10762_s11, %s10762_s11 }
  0xe1   :  { %p10293_p5 = scmp.ne.s32.totalorder %s10762_s11, %s10292_s18  ;;  %p10298_p7 = scmp.lt.s32.totalorder %s10292_s18, %s10292_s18 }
  0xe3   :  { %p10299_p8 = por %p10298_p7, %p10297_p6 }
  0xe5   :  { %p10300_p9 = pnand %p10299_p8, %p10293_p5 }
  0xe7   :  { %10303 = shalt.err (!%p10300_p9)
}
  0xe8   :  { %180 = dma.hbm_to_vmem [thread:$0]  %s10595_s12, 512, %s10762_s11, [#allocation12], %s10498_s20, %s10498_s20, %s10499_s22  }
  0xe9   :  { %s10504_s30 = smov [#allocation16]   ;;  %s10304_s23 = scalar_lea.hbm %s10620_s3, 96 }
  0xea   :  { %s202_s14 = sshll.u32 %s10504_s30, 4  ;;  %p10305_p10 = scmp.ne.s32.totalorder %s10620_s3, %s10304_s23  ;;  %s203_s14 = int_to_ptr.vmem [resolvable:$true] %s202_s14 }
  0xeb   :  { %p10308_p11 = scmp.lt.u32.totalorder %s10304_s23, %s10620_s3 }
  0xed   :  { %p10310_p12 = pnand %p10308_p11, %p10305_p10 }
  0xef   :  { %10313 = shalt.err (!%p10310_p12)
}
  0xf0   :  { %s10314_s25 = scalar_lea.vmem %s203_s14, 96  ;;  %p10319_p0 = scmp.lt.s32.totalorder %s203_s14, %s203_s14 }
  0xf1   :  { %p10315_p13 = scmp.ne.s32.totalorder %s203_s14, %s10314_s25  ;;  %p10320_p1 = scmp.lt.s32.totalorder %s10314_s25, %s10314_s25 }
  0xf3   :  { %p10321_p2 = por %p10320_p1, %p10319_p0 }
  0xf5   :  { %p10322_p3 = pnand %p10321_p2, %p10315_p13 }
  0xf7   :  { %10325 = shalt.err (!%p10322_p3)
}
  0xf8   :  { %s10505_s26 = smov 16   ;;  %s10506_s12 = smov 1  }
  0xf9   :  { %208 = dma.hbm_to_vmem [thread:$0]  %s10620_s3, 96, %s203_s14, [#allocation15], %s10505_s26, %s10505_s26, %s10506_s12  }
  0xfa   :  { %s10507_s28 = smov [#allocation19]   ;;  %s10508_s2 = smov [#allocation22]  }
  0xfb   :  { %s228_s1 = sshll.u32 %s10507_s28, 4  ;;  %s254_s24 = sshll.u32 %s10508_s2, 4  ;;  %s229_s1 = int_to_ptr.vmem [resolvable:$true] %s228_s1  ;;  %s255_s24 = int_to_ptr.vmem [resolvable:$true] %s254_s24 }
  0xfc   :  { %s10326_s7 = scalar_lea.hbm %s10635_s29, 3072 }
  0xfd   :  { %p10327_p4 = scmp.ne.s32.totalorder %s10635_s29, %s10326_s7  ;;  %p10330_p5 = scmp.lt.u32.totalorder %s10326_s7, %s10635_s29 }
  0xff   :  { %p10332_p6 = pnand %p10330_p5, %p10327_p4 }
 0x101   :  { %10335 = shalt.err (!%p10332_p6)
}
 0x102   :  { %s10336_s27 = scalar_lea.vmem %s229_s1, 3072  ;;  %p10341_p8 = scmp.lt.s32.totalorder %s229_s1, %s229_s1 }
 0x103   :  { %p10337_p7 = scmp.ne.s32.totalorder %s229_s1, %s10336_s27  ;;  %p10342_p9 = scmp.lt.s32.totalorder %s10336_s27, %s10336_s27 }
 0x105   :  { %p10343_p10 = por %p10342_p9, %p10341_p8 }
 0x107   :  { %p10344_p11 = pnand %p10343_p10, %p10337_p7 }
 0x109   :  { %10347 = shalt.err (!%p10344_p11)
}
 0x10a   :  { %234 = dma.hbm_to_vmem [thread:$0]  %s10635_s29, 3072, %s229_s1, [#allocation18], %s10498_s20, %s10498_s20, %s10499_s22  }
 0x10b   :  { %s10348_s3 = scalar_lea.hbm %s10650_s4, 3072 }
 0x10c   :  { %p10349_p12 = scmp.ne.s32.totalorder %s10650_s4, %s10348_s3  ;;  %p10352_p13 = scmp.lt.u32.totalorder %s10348_s3, %s10650_s4 }
 0x10e   :  { %p10354_p0 = pnand %p10352_p13, %p10349_p12 }
 0x110   :  { %10357 = shalt.err (!%p10354_p0)
}
 0x111   :  { %s10358_s0 = scalar_lea.vmem %s255_s24, 3072  ;;  %p10363_p2 = scmp.lt.s32.totalorder %s255_s24, %s255_s24 }
 0x112   :  { %p10359_p1 = scmp.ne.s32.totalorder %s255_s24, %s10358_s0  ;;  %p10364_p3 = scmp.lt.s32.totalorder %s10358_s0, %s10358_s0 }
 0x114   :  { %p10365_p4 = por %p10364_p3, %p10363_p2 }
 0x116   :  { %p10366_p5 = pnand %p10365_p4, %p10359_p1 }
 0x118   :  { %10369 = shalt.err (!%p10366_p5)
}
 0x119   :  { %260 = dma.hbm_to_vmem [thread:$0]  %s10650_s4, 3072, %s255_s24, [#allocation21], %s10498_s20, %s10498_s20, %s10499_s22  }
 0x11a   :  { %s10509_s29 = smov [#allocation23]   ;;  %s10370_s10 = scalar_lea.hbm %s10680_s5, 1536 }
 0x11b   :  { %s276_s9 = sshll.u32 %s10509_s29, 4  ;;  %p10371_p6 = scmp.ne.s32.totalorder %s10680_s5, %s10370_s10  ;;  %s277_s9 = int_to_ptr.vmem [resolvable:$true] %s276_s9 }
 0x11c   :  { %p10374_p7 = scmp.lt.u32.totalorder %s10370_s10, %s10680_s5 }
 0x11e   :  { %p10376_p8 = pnand %p10374_p7, %p10371_p6 }
 0x120   :  { %10379 = shalt.err (!%p10376_p8)
}
 0x121   :  { %s10380_s6 = scalar_lea.vmem %s277_s9, 1536  ;;  %p10385_p10 = scmp.lt.s32.totalorder %s277_s9, %s277_s9 }
 0x122   :  { %p10381_p9 = scmp.ne.s32.totalorder %s277_s9, %s10380_s6  ;;  %p10386_p11 = scmp.lt.s32.totalorder %s10380_s6, %s10380_s6 }
 0x124   :  { %p10387_p12 = por %p10386_p11, %p10385_p10 }
 0x126   :  { %p10388_p13 = pnand %p10387_p12, %p10381_p9 }
 0x128   :  { %10391 = shalt.err (!%p10388_p13)
}
 0x129   :  { %282 = dma.hbm_to_vmem [thread:$0]  %s10680_s5, 1536, %s277_s9, [#allocation24], %s10498_s20, %s10498_s20, %s10499_s22  }
 0x12a   :  { %10436 = dma.done.wait [#allocation3], 16  }
 0x12b   :  { %10437 = vsyncadd [#allocation3], 4294967280 }
 0x12c   :  { %10438 = dma.done.wait [#allocation6], 528  }
 0x12d   :  { %10439 = vsyncadd [#allocation6], 4294966768 }
 0x12e   :  { %10440 = dma.done.wait [#allocation9], 528  }
 0x12f   :  { %10441 = vsyncadd [#allocation9], 4294966768 }
 0x130   :  { %10442 = dma.done.wait [#allocation12], 528  }
 0x131   :  { %10443 = vsyncadd [#allocation12], 4294966768 }
 0x132   :  { %10444 = dma.done.wait [#allocation15], 112  }
 0x133   :  { %10445 = vsyncadd [#allocation15], 4294967184 }
 0x134   :  { %10446 = dma.done.wait [#allocation18], 6144  }
 0x135   :  { %10447 = vsyncadd [#allocation18], 4294961152 }
 0x136   :  { %10448 = dma.done.wait [#allocation21], 6144  }
 0x137   :  { %10449 = vsyncadd [#allocation21], 4294961152 }
 0x138   :  { %10450 = dma.done.wait [#allocation24], 1536  }
 0x139   :  { %10451 = vsyncadd [#allocation24], 4294965760  ;;  %s12404_s4 = sld [smem:[#allocation45_spill]]  ;;  %s12405_s11 = sld [smem:[#allocation39_spill]]  ;;  %v12378_v0 = vmov 0.0   ;;  %v10511_v1 = vmov 0   ;;  %v346_v33 = vlaneseq }
 0x13a   :  { %s12406_s15 = sld [smem:[#allocation38_spill]]  ;;  %s12407_s5 = sld [smem:[#allocation40_spill]]  ;;  %8279 = vmatprep.subr.mxu0 %v12378_v0  ;;  %9458 = vset.pattern.permute.xlu1 %v10511_v1  ;;  %vm10512_vm0 = vmmov 0   ;;  %vm461_vm1 = vcmask 1045504   ;;  %vm457_vm2 = vcmask 48128   ;;  %v541_v26 = vld [vmem:[#allocation7] sm:$0xff] }
 0x13b   :  { %9457 = vset.pattern.permute.xlu0 %v10511_v1  ;;  %8281 = vmatprep.mubr.msk.f32.mxu0 %vm10512_vm0, %v12378_v0  ;;  %s12408_s20 = sld [smem:[#allocation41_spill]]  ;;  %v542_v27 = vld [vmem:[#allocation7 + $0x8] sm:$0xff]  ;;  %v12376_v29 = vmov 0.0|0.0   ;;  %v543_v30 = vld [vmem:[#allocation7 + $0x10] sm:$0xff]  ;;  %v544_v31 = vld [vmem:[#allocation7 + $0x18] sm:$0xff]  ;;  %v347_v34 = vand.u32 127, %v346_v33 }
 0x13c   :  { %8292 = vmatprep.mubr.msk.f32.mxu1 %vm10512_vm0, %v12378_v0  ;;  %v9139_v28 = vpack.c.bf16 %v542_v27, %v541_v26  ;;  %9138 = vmatprep.subr.bf16.mxu1 %v12376_v29  ;;  %v9142_v32 = vpack.c.bf16 %v544_v31, %v543_v30  ;;  %vm640_vm9 = vcmask 130048   ;;  %s12409_s22 = sld [smem:[#allocation46_spill]]  ;;  %v7622_v61 = vld [vmem:[#allocation5] ss:$0 sm:$0xff]  ;;  %s12410_s16 = sld [smem:[#allocation42_spill]] }
 0x13d   :  { %v7620_v35 = vadd.s32 4294967288, %v347_v34  ;;  %s12411_s19 = sld [smem:[#allocation44_spill]]  ;;  %s10514_s18 = smov 96  }
 0x13e   :  { %9140 = vmatpush3.bf16.msra.mxu1 %v9139_v28  ;;  %v7625_v28 = vld [vmem:[#allocation8] ss:$0 sm:$0xff]  ;;  %s12412_s30 = sld [smem:[#allocation43_spill]]  ;;  %s12413_s14 = sld [smem:[#allocation47_spill]] }
 0x13f   :  { %v449_v2 = vld [vmem:[%s12404_s4] sm:$0x3f]  ;;  %v340_v6 = vld [vmem:[%s12405_s11 + $0x8] sm:$0xff]  ;;  %v342_v12 = vld [vmem:[%s12405_s11 + $0x18] sm:$0xff]  ;;  %9141 = vmatprep.subr.bf16.mxu1 %v12376_v29  ;;  %s12414_s23 = sld [smem:[#allocation48_spill]]  ;;  %s12415_s25 = sld [smem:[#allocation49_spill]] }
 0x140   :  { %v339_v3 = vld [vmem:[%s12405_s11] sm:$0xff]  ;;  %8280 = vmatpush3.msk.msra.mxu0 %vm461_vm1, %v449_v2  ;;  %v333_v7 = vld [vmem:[%s12406_s15 + $0x8] sm:$0xff]  ;;  %v335_v8 = vld [vmem:[%s12406_s15 + $0x18] sm:$0xff]  ;;  %s12416_s26 = sld [smem:[#allocation50_spill]]  ;;  %s12417_s12 = sld [smem:[#allocation51_spill]] }
 0x141   :  { %v332_v4 = vld [vmem:[%s12406_s15] sm:$0xff]  ;;  %378 = vperm.xlu1 %9458, %v339_v3   ;;  %v334_v9 = vld [vmem:[%s12406_s15 + $0x10] sm:$0xff]  ;;  %v337_v16 = vld [vmem:[%s12406_s15 + $0x28] sm:$0xff]  ;;  %s12418_s28 = sld [smem:[#allocation52_spill]]  ;;  %s12419_s1 = sld [smem:[#allocation55_spill]] }
 0x142   :  { %v448_v5 = vld [vmem:[%s12407_s5] sm:$0xff]  ;;  %349 = vperm.xlu0 %9457, %v332_v4   ;;  %v341_v13 = vld [vmem:[%s12405_s11 + $0x10] sm:$0xff]  ;;  %v344_v20 = vld [vmem:[%s12405_s11 + $0x28] sm:$0xff]  ;;  %9143 = vmatpush3.bf16.msra.mxu1 %v9142_v32  ;;  %s12420_s2 = sld [smem:[#allocation53_spill]]  ;;  %s12421_s24 = sld [smem:[#allocation54_spill]] }
 0x143   :  { %8282 = vmatmul.mubr.msk.f32.vlgmr.msra.gmra.mrb[0].mxu0 %vm457_vm2, %v448_v5  ;;  %v632_v10 = vld [vmem:[%s12408_s20] sm:$0xff]  ;;  %v345_v22 = vld [vmem:[%s12405_s11 + $0x30] sm:$0xff]  ;;  %9144 = vmatprep.subr.bf16.mxu1 %v12376_v29  ;;  %v444_v26 = vld [vmem:[%s12410_s16 + $0x18] sm:$0xff]  ;;  %s12422_s7 = sld [smem:[#allocation56_spill]]  ;;  %s10516_s3 = smov [#allocation26]  }
 0x144   :  { %v633_v11 = vpack.c.bf16 %v632_v10, %v632_v10  ;;  %v336_v17 = vld [vmem:[%s12406_s15 + $0x20] sm:$0xff]  ;;  %v338_v23 = vld [vmem:[%s12406_s15 + $0x30] sm:$0xff]  ;;  %v446_v27 = vld [vmem:[%s12410_s16 + $0x28] sm:$0xff]  ;;  %s7564_s0 = sshll.u32 %s10516_s3, 4  ;;  %s12344_s0 = int_to_ptr.vmem [resolvable:$true] %s7564_s0 }
 0x145   :  { %381 = vperm.xlu1 %9458, %v340_v6   ;;  %v343_v21 = vld [vmem:[%s12405_s11 + $0x20] sm:$0xff] }
 0x146   :  { %352 = vperm.xlu0 %9457, %v333_v7   ;;  %v634_v14 = vunpack.c.l.bf16 %v633_v11  ;;  %v889_v11 = vld [vmem:[%s12409_s22 + $0x10] sm:$0xff] }
 0x148   :  { %v635_v15 = vsub.f32 %v632_v10, %v634_v14  ;;  %v636_v24 = vsub.f32 0.0, %v634_v14 }
 0x149   :  { %358 = vperm.xlu1 %9458, %v335_v8   ;;  %v887_v8 = vld [vmem:[%s12409_s22] sm:$0xff] }
 0x14a   :  { %355 = vperm.xlu0 %9457, %v334_v9   ;;  %v638_v18 = vsub.f32 0.0, %v635_v15  ;;  %v637_v25 = vpack.c.bf16 %v636_v24, %v634_v14  ;;  %v888_v9 = vld [vmem:[%s12409_s22 + $0x8] sm:$0xff] }
 0x14b   :  { %v9145_v10 = vpack.c.bf16 %v888_v9, %v887_v8  ;;  %v439_v8 = vld [vmem:[%s12411_s19 + $0x28] sm:$0xff]  ;;  %v433_v9 = vld [vmem:[%s12412_s30] sm:$0xff] }
 0x14c   :  { %v639_v19 = vpack.c.bf16 %v638_v18, %v635_v15 }
 0x14d   :  { %387 = vperm.xlu1 %9458, %v342_v12   ;;  %v890_v12 = vld [vmem:[%s12409_s22 + $0x18] sm:$0xff] }
 0x14e   :  { %384 = vperm.xlu0 %9457, %v341_v13   ;;  %8295 = vmatprep.subr.bf16.mxu0 %v639_v19  ;;  %v9148_v13 = vpack.c.bf16 %v890_v12, %v889_v11 }
 0x14f   :  { %8296 = vmatpush3.bf16.msra.mxu0 %v639_v19 }
 0x150   :  { %8305 = vmatprep.subr.bf16.mxu0 %v637_v25 }
 0x151   :  { %364 = vperm.xlu1 %9458, %v337_v16  }
 0x152   :  { %361 = vperm.xlu0 %9457, %v336_v17  }
 0x155   :  { %393 = vperm.xlu1 %9458, %v344_v20  }
 0x156   :  { %390 = vperm.xlu0 %9457, %v343_v21  }
 0x159   :  { %396 = vperm.xlu1 %9458, %v345_v22  }
 0x15a   :  { %367 = vperm.xlu0 %9457, %v338_v23   ;;  %v441_v23 = vld [vmem:[%s12410_s16] sm:$0xff] }
 0x1c0   :  { %v379_v36 = vpop.permute.xlu1 %378 }
 0x1c1   :  { %vm398_vm3 = vcmp.eq.s32.totalorder %v379_v36, %v7620_v35  ;;  %v350_v37 = vpop.permute.xlu0 %349 }
 0x1c2   :  { %vm369_vm4 = vcmp.eq.s32.totalorder %v350_v37, %v347_v34  ;;  %v434_v37 = vld [vmem:[%s12411_s19] sm:$0xff] }
 0x1c3   :  { %vm405_vm5 = vmor %vm369_vm4, %vm398_vm3 }
 0x1c4   :  { %v382_v38 = vpop.permute.xlu1 %381  ;;  %v412_v40 = vsel %vm405_vm5, 1.0, %v12378_v0 }
 0x1c5   :  { %vm399_vm6 = vcmp.eq.s32.totalorder %v382_v38, %v7620_v35  ;;  %v353_v39 = vpop.permute.xlu0 %352  ;;  %v435_v38 = vld [vmem:[%s12411_s19 + $0x8] sm:$0xff] }
 0x1c6   :  { %vm370_vm7 = vcmp.eq.s32.totalorder %v353_v39, %v347_v34  ;;  %v436_v39 = vld [vmem:[%s12411_s19 + $0x10] sm:$0xff] }
 0x1c7   :  { %vm406_vm8 = vmor %vm370_vm7, %vm399_vm6 }
 0x1c8   :  { %v413_v41 = vsel %vm406_vm8, 1.0, %v12378_v0  ;;  %v359_v42 = vpop.permute.xlu1 %358 }
 0x1c9   :  { %v10836_v43 = vpack.c.bf16 %v413_v41, %v412_v40  ;;  %v356_v44 = vpop.permute.xlu0 %355  ;;  %vm372_vm10 = vcmp.eq.s32.totalorder %v359_v42, %v347_v34  ;;  %v438_v41 = vld [vmem:[%s12411_s19 + $0x20] sm:$0xff] }
 0x1ca   :  { %vm371_vm11 = vcmp.eq.s32.totalorder %v356_v44, %v347_v34  ;;  %v440_v44 = vld [vmem:[%s12411_s19 + $0x30] sm:$0xff] }
 0x1cb   :  { %8297 = vmatprep.mubr.msk.bf16.mxu0 %vm640_vm9, %v10836_v43 }
 0x1cc   :  { %v388_v45 = vpop.permute.xlu1 %387 }
 0x1cd   :  { %vm401_vm12 = vcmp.eq.s32.totalorder %v388_v45, %v7620_v35  ;;  %v385_v46 = vpop.permute.xlu0 %384 }
 0x1ce   :  { %vm408_vm13 = vmor %vm372_vm10, %vm401_vm12  ;;  %vm400_vm14 = vcmp.eq.s32.totalorder %v385_v46, %v7620_v35  ;;  %vm788_vm12 = vcmask 23552  }
 0x1cf   :  { %v415_v47 = vsel %vm408_vm13, 1.0, %v12378_v0  ;;  %vm407_vm15 = vmor %vm371_vm11, %vm400_vm14  ;;  %vm552_vm11 = vcmask 261120  }
 0x1d0   :  { %v414_v48 = vsel %vm407_vm15, 1.0, %v12378_v0  ;;  %v365_v49 = vpop.permute.xlu1 %364 }
 0x1d1   :  { %v10842_v50 = vpack.c.bf16 %v415_v47, %v414_v48  ;;  %v362_v51 = vpop.permute.xlu0 %361  ;;  %vm374_vm1 = vcmp.eq.s32.totalorder %v365_v49, %v347_v34  ;;  %v7635_v48 = vld [vmem:[#allocation16] ss:$0 sm:$0xff] }
 0x1d2   :  { %vm373_vm2 = vcmp.eq.s32.totalorder %v362_v51, %v347_v34 }
 0x1d3   :  { %8298 = vmatmul.mubr.msk.bf16.vlgmr.msra.gmra.mrb[4].mxu0 %vm640_vm9, %v10842_v50 }
 0x1d4   :  { %v394_v52 = vpop.permute.xlu1 %393  ;;  %8306 = vmatpush3.bf16.msra.mxu0 %v637_v25 }
 0x1d5   :  { %vm403_vm3 = vcmp.eq.s32.totalorder %v394_v52, %v7620_v35  ;;  %v391_v53 = vpop.permute.xlu0 %390  ;;  %8365 = vmatprep.subr.bf16.mxu0 %v12378_v0 }
 0x1d6   :  { %vm410_vm4 = vmor %vm374_vm1, %vm403_vm3  ;;  %vm402_vm5 = vcmp.eq.s32.totalorder %v391_v53, %v7620_v35 }
 0x1d7   :  { %v417_v54 = vsel %vm410_vm4, 1.0, %v12378_v0  ;;  %vm409_vm6 = vmor %vm373_vm2, %vm402_vm5 }
 0x1d8   :  { %v416_v55 = vsel %vm409_vm6, 1.0, %v12378_v0  ;;  %v397_v56 = vpop.permute.xlu1 %396 }
 0x1d9   :  { %v10849_v57 = vpack.c.bf16 %v417_v54, %v416_v55  ;;  %vm404_vm7 = vcmp.eq.s32.totalorder %v397_v56, %v7620_v35  ;;  %v368_v58 = vpop.permute.xlu0 %367 }
 0x1da   :  { %vm375_vm8 = vcmp.eq.s32.totalorder %v368_v58, %v347_v34  ;;  %v447_v34 = vld [vmem:[%s12410_s16 + $0x30] sm:$0xff] }
 0x1db   :  { %vm411_vm10 = vmor %vm375_vm8, %vm404_vm7  ;;  %8301 = vmatprep.mubr.msk.bf16.mxu0 %vm640_vm9, %v10849_v57 }
 0x1dc   :  { %v418_v59 = vsel %vm411_vm10, 1.0, %v12378_v0  ;;  %vm1376_vm10 = vcmask 1043456  }
 0x1dd   :  { %v10854_v60 = vpack.c.bf16 %v418_v59, %v418_v59 }
 0x1df   :  { %8302 = vmatmul.mubr.msk.bf16.gmra.mrb[8].mxu0 %vm640_vm9, %v10854_v60 }
 0x1e0   :  { %8307 = vmatprep.mubr.msk.bf16.mxu0 %vm640_vm9, %v10836_v43 }
 0x1e7   :  { %8308 = vmatmul.mubr.msk.bf16.vlgmr.msra.gmra.mrb[4].mxu0 %vm640_vm9, %v10842_v50 }
 0x1e8   :  { %8311 = vmatprep.mubr.msk.bf16.mxu0 %vm640_vm9, %v10849_v57 }
 0x1ef   :  { %8312 = vmatmul.mubr.msk.bf16.gmra.mrb[8].mxu0 %vm640_vm9, %v10854_v60 }
 0x1f0   :  { %8373 = vmatprep.mubr.msk.bf16.mxu0 %vm10512_vm0, %v12378_v0 }
 0x216   :  { %v531_v62 = vpop.f32.mrb[0].mxu0 }
 0x217   :  { %v532_v63 = vadd.f32 %v7622_v61, %v531_v62  ;;  %v8283_v1 = vpop.f32.mrb[1].mxu0  ;;  %v442_v61 = vld [vmem:[%s12410_s16 + $0x8] sm:$0xff]  ;;  %v443_v62 = vld [vmem:[%s12410_s16 + $0x10] sm:$0xff] }
 0x219   :  { %v535_v2 = vsub.f32 0.0, %v532_v63 }
 0x21b   :  { %v536_v3 = vmul.f32 1.442695, %v535_v2 }
 0x21d   :  { %9459 = vpow2.f32 %v536_v3 }
 0x227   :  { %v9460_v4 = vpop.eup %9459 }
 0x228   :  { %v538_v5 = vadd.f32 1.0, %v9460_v4 }
 0x22a   :  { %9461 = vrcp.f32 %v538_v5 }
 0x234   :  { %v9462_v6 = vpop.eup %9461 }
 0x235   :  { %v540_v7 = vmul.f32 %v9462_v6, %v532_v63  ;;  %v445_v6 = vld [vmem:[%s12410_s16 + $0x20] sm:$0xff] }
 0x237   :  { %8293 = vmatmul.mubr.msk.f32.vlgmr.msra.gmra.mrb[0].mxu1 %vm552_vm11, %v540_v7  ;;  %v437_v7 = vld [vmem:[%s12411_s19 + $0x18] sm:$0xff] }
 0x238   :  { %8323 = vmatprep.mubr.msk.f32.mxu1 %vm10512_vm0, %v12378_v0  ;;  %9146 = vmatpush3.bf16.msra.mxu1 %v9145_v10 }
 0x239   :  { %9147 = vmatprep.subr.bf16.mxu1 %v12376_v29 }
 0x23c   :  { %9149 = vmatpush3.bf16.msra.mxu1 %v9148_v13 }
 0x2ba   :  { %v10876_v14 = vpop.f32.mrb[4].mxu0 }
 0x2bb   :  { %v10878_v15 = vpop.f32.mrb[5].mxu0  ;;  %v783_v54 = vmul.f32 %v10876_v14, %v10876_v14 }
 0x2bc   :  { %v781_v16 = vmul.f32 %v10878_v15, %v10878_v15  ;;  %v10882_v17 = vpop.f32.mrb[6].mxu0 }
 0x2bd   :  { %v10884_v18 = vpop.f32.mrb[7].mxu0  ;;  %v784_v56 = vmul.f32 %v10882_v17, %v10882_v17  ;;  %v795_v58 = vsel %vm788_vm12, %v783_v54, 0.0  ;;  %v1153_v54 = vld [vmem:[#allocation17 + $0x8] sm:$0xff] }
 0x2be   :  { %v789_v19 = vsel %vm788_vm12, %v781_v16, 0.0  ;;  %v782_v53 = vmul.f32 %v10884_v18, %v10884_v18 }
 0x2bf   :  { %790 = vadd.xlane.f32.xlu1 %v789_v19  ;;  %v798_v59 = vsel %vm788_vm12, %v784_v56, 0.0 }
 0x2c0   :  { %v792_v55 = vsel %vm788_vm12, %v782_v53, 0.0  ;;  %v1152_v53 = vld [vmem:[#allocation17] sm:$0xff] }
 0x2c2   :  { %v10887_v20 = vpop.f32.mrb[8].mxu0 }
 0x2c3   :  { %v10889_v21 = vpop.f32.mrb[9].mxu0  ;;  %v787_v2 = vmul.f32 %v10887_v20, %v10887_v20 }
 0x2c4   :  { %v8314_v22 = vpop.f32.mrb[10].mxu0  ;;  %v785_v24 = vmul.f32 %v10889_v21, %v10889_v21 }
 0x2c5   :  { %v10909_v47 = vpop.f32.mrb[11].mxu0  ;;  %v807_v3 = vsel %vm788_vm12, %v787_v2, 0.0 }
 0x2c6   :  { %v801_v25 = vsel %vm788_vm12, %v785_v24, 0.0  ;;  %v786_v63 = vmul.f32 %v10909_v47, %v10909_v47 }
 0x2c8   :  { %v804_v1 = vsel %vm788_vm12, %v786_v63, 0.0 }
 0x2d0   :  { %1057 = vperm.xlu1 %9458, %v441_v23  }
 0x2f4   :  { %802 = vadd.xlane.f32.xlu1 %v801_v25 }
 0x305   :  { %1072 = vperm.xlu1 %9458, %v444_v26  }
 0x309   :  { %1082 = vperm.xlu1 %9458, %v446_v27  }
 0x30a   :  { %v622_v30 = vpop.f32.mrb[0].mxu1 }
 0x30b   :  { %v623_v31 = vadd.f32 %v7625_v28, %v622_v30  ;;  %v8294_v32 = vpop.f32.mrb[1].mxu1 }
 0x30d   :  { %v626_v35 = vsub.f32 0.0, %v623_v31  ;;  %1087 = vperm.xlu1 %9458, %v447_v34  }
 0x30f   :  { %v627_v36 = vmul.f32 1.442695, %v626_v35 }
 0x311   :  { %9463 = vpow2.f32 %v627_v36  ;;  %1328 = vperm.xlu1 %9458, %v434_v37  }
 0x315   :  { %1333 = vperm.xlu1 %9458, %v435_v38  }
 0x319   :  { %1338 = vperm.xlu1 %9458, %v436_v39  }
 0x31b   :  { %v9464_v40 = vpop.eup %9463 }
 0x31c   :  { %v629_v42 = vadd.f32 1.0, %v9464_v40 }
 0x31d   :  { %1348 = vperm.xlu1 %9458, %v438_v41  }
 0x31e   :  { %9465 = vrcp.f32 %v629_v42 }
 0x321   :  { %1358 = vperm.xlu1 %9458, %v440_v44  }
 0x328   :  { %v9466_v45 = vpop.eup %9465 }
 0x329   :  { %v10903_v46 = vmul.f32 %v9466_v45, %v623_v31 }
 0x32b   :  { %8324 = vmatmul.mubr.msk.f32.vlgmr.msra.gmra.mrb[2].mxu1 %vm552_vm11, %v10903_v46 }
 0x32c   :  { %8328 = vmatprep.mubr.msk.bf16.mxu1 %vm640_vm9, %v10836_v43 }
 0x3fe   :  { %v967_v49 = vpop.f32.mrb[2].mxu1 }
 0x3ff   :  { %v968_v51 = vadd.f32 %v7635_v48, %v967_v49  ;;  %v8325_v52 = vpop.f32.mrb[3].mxu1 }
 0x401   :  { %972 = vrot.lane.b32.xlu0 %v968_v51, %s10514_s18 }
 0x420   :  { %793 = vadd.xlane.f32.xlu0 %v792_v55  ;;  %v9151_v55 = vpack.c.bf16 %v1153_v54, %v1152_v53 }
 0x424   :  { %796 = vadd.xlane.f32.xlu0 %v795_v58  ;;  %v1155_v58 = vld [vmem:[#allocation17 + $0x18] sm:$0xff] }
 0x428   :  { %799 = vadd.xlane.f32.xlu0 %v798_v59 }
 0x43e   :  { %1062 = vperm.xlu0 %9457, %v442_v61  }
 0x442   :  { %1067 = vperm.xlu0 %9457, %v443_v62  }
 0x461   :  { %805 = vadd.xlane.f32.xlu0 %v804_v1 }
 0x465   :  { %808 = vadd.xlane.f32.xlu0 %v807_v3 }
 0x473   :  { %v973_v4 = vpop.permute.xlu0 %972 }
 0x474   :  { %v975_v5 = vpack.c.bf16 %v973_v4, %v968_v51 }
 0x476   :  { %8326 = vmatprep.subr.bf16.mxu1 %v975_v5 }
 0x477   :  { %8327 = vmatpush3.bf16.msra.mxu1 %v975_v5 }
 0x478   :  { %9150 = vmatprep.subr.bf16.mxu1 %v12376_v29 }
 0x47a   :  { %8329 = vmatmul.mubr.msk.bf16.vlgmr.msra.gmra.mrb[4].mxu1 %vm640_vm9, %v10842_v50 }
 0x47b   :  { %1077 = vperm.xlu0 %9457, %v445_v6   ;;  %8332 = vmatprep.mubr.msk.bf16.mxu1 %vm640_vm9, %v10849_v57 }
 0x47c   :  { %9152 = vmatpush3.bf16.msra.mxu1 %v9151_v55 }
 0x47d   :  { %9153 = vmatprep.subr.bf16.mxu1 %v12376_v29 }
 0x47f   :  { %1343 = vperm.xlu0 %9457, %v437_v7  }
 0x482   :  { %8333 = vmatmul.mubr.msk.bf16.gmra.mrb[8].mxu1 %vm640_vm9, %v10854_v60 }
 0x483   :  { %1353 = vperm.xlu0 %9457, %v439_v8   ;;  %8344 = vmatprep.mubr.msk.f32.mxu1 %vm10512_vm0, %v12378_v0 }
 0x487   :  { %1674 = vperm.xlu0 %9457, %v433_v9  }
 0x4ad   :  { %v10942_v10 = vpop.xlane.xlu0 %793 }
 0x4ae   :  { %v811_v11 = vadd.f32 1e-08, %v10942_v10 }
 0x4b0   :  { %9467 = vrsqrt.f32 %v811_v11  ;;  %vm826_vm13 = vcmp.eq.f32.partialorder %v811_v11, inf  ;;  %v829_v23 = vand.u32 2147483648, %v811_v11  ;;  %vm828_vm14 = vcmp.eq.f32.partialorder %v811_v11, 0.0 }
 0x4b1   :  { %v10945_v12 = vpop.xlane.xlu0 %796 }
 0x4b2   :  { %v812_v13 = vadd.f32 1e-08, %v10945_v12 }
 0x4b4   :  { %9469 = vrsqrt.f32 %v812_v13  ;;  %vm833_vm15 = vcmp.eq.f32.partialorder %v812_v13, inf  ;;  %v836_v28 = vand.u32 2147483648, %v812_v13  ;;  %vm835_vm1 = vcmp.eq.f32.partialorder %v812_v13, 0.0 }
 0x4b5   :  { %v10948_v16 = vpop.xlane.xlu0 %799 }
 0x4b6   :  { %v813_v19 = vadd.f32 1e-08, %v10948_v16 }
 0x4b8   :  { %9471 = vrsqrt.f32 %v813_v19  ;;  %vm840_vm2 = vcmp.eq.f32.partialorder %v813_v19, inf  ;;  %v843_v36 = vand.u32 2147483648, %v813_v19  ;;  %vm842_vm3 = vcmp.eq.f32.partialorder %v813_v19, 0.0 }
 0x4ba   :  { %v9468_v22 = vpop.eup %9467 }
 0x4bb   :  { %v825_v24 = vmul.f32 %v9468_v22, %v811_v11 }
 0x4bd   :  { %v827_v25 = vsel %vm826_vm13, %v811_v11, %v825_v24  ;;  %v10960_v52 = vpop.permute.xlu0 %1062  ;;  %vm1372_vm13 = vcmask 457728  }
 0x4be   :  { %v9470_v26 = vpop.eup %9469  ;;  %v830_v27 = vsel %vm828_vm14, %v829_v23, %v827_v25  ;;  %v10978_v25 = vpop.xlane.xlu1 %790 }
 0x4bf   :  { %v867_v30 = vadd.f32 1.0, %v830_v27  ;;  %v832_v31 = vmul.f32 %v9470_v26, %v812_v13 }
 0x4c1   :  { %9473 = vrcp.f32 %v867_v30  ;;  %v834_v32 = vsel %vm833_vm15, %v812_v13, %v832_v31  ;;  %v10962_v56 = vpop.permute.xlu0 %1067 }
 0x4c2   :  { %v9472_v34 = vpop.eup %9471  ;;  %v837_v35 = vsel %vm835_vm1, %v836_v28, %v834_v32  ;;  %v10980_v26 = vpop.permute.xlu1 %1057  ;;  %v7637_v28 = vld [vmem:[%s12413_s14] ss:$0 sm:$0xff] }
 0x4c3   :  { %v868_v37 = vadd.f32 1.0, %v837_v35  ;;  %v839_v38 = vmul.f32 %v9472_v34, %v813_v19  ;;  %v985_v31 = vmul.f32 %v7637_v28, %v10945_v12  ;;  %v7642_v32 = vld [vmem:[%s12414_s23] ss:$0 sm:$0xff] }
 0x4c5   :  { %9475 = vrcp.f32 %v868_v37  ;;  %v841_v39 = vsel %vm840_vm2, %v813_v19, %v839_v38  ;;  %v986_v37 = vmul.f32 %v7637_v28, %v10948_v16 }
 0x4c6   :  { %v844_v40 = vsel %vm842_vm3, %v843_v36, %v841_v39  ;;  %v10982_v27 = vpop.xlane.xlu1 %802  ;;  %v1098_v36 = vmul.f32 %v7642_v32, %v10962_v56  ;;  %v1096_v39 = vmul.f32 %v7642_v32, %v10980_v26 }
 0x4c7   :  { %v869_v41 = vadd.f32 1.0, %v844_v40 }
 0x4c9   :  { %9477 = vrcp.f32 %v869_v41  ;;  %v984_v41 = vmul.f32 %v7637_v28, %v10942_v10 }
 0x4ca   :  { %v10985_v30 = vpop.permute.xlu1 %1072 }
 0x4cb   :  { %v9474_v42 = vpop.eup %9473 }
 0x4cc   :  { %v10952_v44 = vmul.f32 %v9474_v42, %v10884_v18  ;;  %v1154_v18 = vld [vmem:[#allocation17 + $0x10] sm:$0xff] }
 0x4cd   :  { %v9154_v59 = vpack.c.bf16 %v1155_v58, %v1154_v18  ;;  %v1097_v18 = vmul.f32 %v7642_v32, %v10960_v52 }
 0x4ce   :  { %v10998_v58 = vpop.permute.xlu1 %1082 }
 0x4cf   :  { %v9476_v45 = vpop.eup %9475  ;;  %9155 = vmatpush3.bf16.msra.mxu1 %v9154_v59 }
 0x4d0   :  { %v10955_v48 = vmul.f32 %v9476_v45, %v10876_v14  ;;  %9174 = vmatprep.subr.bf16.mxu1 %v12376_v29 }
 0x4d3   :  { %v9478_v49 = vpop.eup %9477 }
 0x4d4   :  { %v10958_v51 = vmul.f32 %v9478_v49, %v10882_v17  ;;  %v1099_v49 = vmul.f32 %v7642_v32, %v10985_v30 }
 0x4ee   :  { %v10965_v61 = vpop.xlane.xlu0 %805 }
 0x4ef   :  { %v815_v14 = vadd.f32 1e-08, %v10965_v61 }
 0x4f1   :  { %9479 = vrsqrt.f32 %v815_v14  ;;  %vm854_vm4 = vcmp.eq.f32.partialorder %v815_v14, inf  ;;  %v857_v2 = vand.u32 2147483648, %v815_v14  ;;  %vm856_vm5 = vcmp.eq.f32.partialorder %v815_v14, 0.0 }
 0x4f2   :  { %v10969_v17 = vpop.xlane.xlu0 %808 }
 0x4f3   :  { %v816_v62 = vadd.f32 1e-08, %v10969_v17 }
 0x4f5   :  { %9481 = vrsqrt.f32 %v816_v62  ;;  %vm861_vm6 = vcmp.eq.f32.partialorder %v816_v62, inf  ;;  %v864_v8 = vand.u32 2147483648, %v816_v62  ;;  %vm863_vm7 = vcmp.eq.f32.partialorder %v816_v62, 0.0 }
 0x4fb   :  { %v9480_v63 = vpop.eup %9479 }
 0x4fc   :  { %v853_v1 = vmul.f32 %v9480_v63, %v815_v14 }
 0x4fe   :  { %v855_v3 = vsel %vm854_vm4, %v815_v14, %v853_v1  ;;  %v11003_v1 = vpop.permute.xlu0 %1077 }
 0x4ff   :  { %v9482_v4 = vpop.eup %9481  ;;  %v858_v5 = vsel %vm856_vm5, %v857_v2, %v855_v3 }
 0x500   :  { %v871_v6 = vadd.f32 1.0, %v858_v5  ;;  %v860_v7 = vmul.f32 %v9482_v4, %v816_v62 }
 0x502   :  { %9483 = vrcp.f32 %v871_v6  ;;  %v862_v9 = vsel %vm861_vm6, %v816_v62, %v860_v7  ;;  %v987_v7 = vmul.f32 %v7637_v28, %v10982_v27 }
 0x503   :  { %v865_v11 = vsel %vm863_vm7, %v864_v8, %v862_v9  ;;  %v989_v8 = vmul.f32 %v7637_v28, %v10969_v17 }
 0x504   :  { %v872_v13 = vadd.f32 1.0, %v865_v11  ;;  %v988_v11 = vmul.f32 %v7637_v28, %v10965_v61 }
 0x506   :  { %9485 = vrcp.f32 %v872_v13 }
 0x50c   :  { %v9484_v19 = vpop.eup %9483 }
 0x50d   :  { %v10973_v22 = vmul.f32 %v9484_v19, %v10909_v47  ;;  %v983_v47 = vmul.f32 %v7637_v28, %v10978_v25 }
 0x510   :  { %v9486_v23 = vpop.eup %9485 }
 0x511   :  { %v10976_v24 = vmul.f32 %v9486_v23, %v10887_v20  ;;  %v1100_v23 = vmul.f32 %v7642_v32, %v11003_v1 }
 0x54d   :  { %v8330_v34 = vpop.f32.mrb[4].mxu1 }
 0x54e   :  { %v1033_v35 = vadd.f32 %v8330_v34, %v985_v31  ;;  %v1024_v20 = vpop.f32.mrb[5].mxu1  ;;  %v11010_v34 = vpop.permute.xlu1 %1087 }
 0x54f   :  { %v1025_v38 = vadd.f32 %v1024_v20, %v983_v47  ;;  %v8331_v40 = vpop.f32.mrb[6].mxu1 }
 0x550   :  { %v10994_v42 = vadd.f32 %v1098_v36, %v1033_v35  ;;  %v1036_v45 = vadd.f32 %v8331_v40, %v986_v37  ;;  %v1027_v53 = vpop.f32.mrb[7].mxu1  ;;  %v1101_v36 = vmul.f32 %v7642_v32, %v10998_v58 }
 0x551   :  { %v1103_v54 = vadd.f32 %v1096_v39, %v1025_v38  ;;  %v1028_v55 = vadd.f32 %v1027_v53, %v984_v41  ;;  %v1102_v39 = vmul.f32 %v7642_v32, %v11010_v34 }
 0x552   :  { %v1112_v59 = vsub.f32 0.0, %v10994_v42  ;;  %v11001_v14 = vadd.f32 %v1099_v49, %v1036_v45 }
 0x553   :  { %v1110_v62 = vsub.f32 0.0, %v1103_v54  ;;  %v1104_v63 = vadd.f32 %v1097_v18, %v1028_v55 }
 0x554   :  { %v1121_v2 = vmul.f32 1.442695, %v1112_v59  ;;  %v1113_v3 = vsub.f32 0.0, %v11001_v14 }
 0x555   :  { %v1117_v4 = vmul.f32 1.442695, %v1110_v62  ;;  %v1111_v5 = vsub.f32 0.0, %v1104_v63  ;;  %v8334_v6 = vpop.f32.mrb[8].mxu1 }
 0x556   :  { %v1040_v9 = vpop.f32.mrb[9].mxu1  ;;  %v1123_v47 = vmul.f32 1.442695, %v1113_v3  ;;  %v1049_v20 = vadd.f32 %v8334_v6, %v989_v8 }
 0x557   :  { %9487 = vpow2.f32 %v1117_v4  ;;  %v1119_v13 = vmul.f32 1.442695, %v1111_v5  ;;  %v1041_v19 = vadd.f32 %v1040_v9, %v987_v7  ;;  %v8335_v31 = vpop.f32.mrb[10].mxu1 }
 0x558   :  { %9489 = vpow2.f32 %v1121_v2  ;;  %v1043_v35 = vpop.f32.mrb[11].mxu1  ;;  %v1109_v41 = vadd.f32 %v1102_v39, %v1049_v20 }
 0x559   :  { %9491 = vpow2.f32 %v1119_v13  ;;  %v1107_v37 = vadd.f32 %v1100_v23, %v1041_v19  ;;  %v1044_v38 = vadd.f32 %v1043_v35, %v988_v11 }
 0x55a   :  { %9493 = vpow2.f32 %v1123_v47  ;;  %v1116_v55 = vsub.f32 0.0, %v1109_v41 }
 0x55b   :  { %v1114_v28 = vsub.f32 0.0, %v1107_v37  ;;  %v1108_v40 = vadd.f32 %v1101_v36, %v1044_v38 }
 0x55c   :  { %v1129_v4 = vmul.f32 1.442695, %v1116_v55 }
 0x55d   :  { %v1125_v45 = vmul.f32 1.442695, %v1114_v28  ;;  %v1115_v49 = vsub.f32 0.0, %v1108_v40 }
 0x55f   :  { %9495 = vpow2.f32 %v1125_v45  ;;  %v1127_v18 = vmul.f32 1.442695, %v1115_v49 }
 0x561   :  { %v9488_v53 = vpop.eup %9487 }
 0x562   :  { %v9490_v59 = vpop.eup %9489  ;;  %v1131_v62 = vadd.f32 1.0, %v9488_v53 }
 0x563   :  { %v9492_v2 = vpop.eup %9491  ;;  %v1133_v5 = vadd.f32 1.0, %v9490_v59 }
 0x564   :  { %9497 = vrcp.f32 %v1131_v62  ;;  %v1132_v3 = vadd.f32 1.0, %v9492_v2  ;;  %v9494_v32 = vpop.eup %9493 }
 0x565   :  { %9499 = vpow2.f32 %v1127_v18  ;;  %v1134_v6 = vadd.f32 1.0, %v9494_v32 }
 0x566   :  { %9501 = vrcp.f32 %v1132_v3 }
 0x567   :  { %9503 = vpow2.f32 %v1129_v4 }
 0x568   :  { %9505 = vrcp.f32 %v1133_v5 }
 0x569   :  { %v9496_v7 = vpop.eup %9495  ;;  %9507 = vrcp.f32 %v1134_v6 }
 0x56a   :  { %v1135_v9 = vadd.f32 1.0, %v9496_v7 }
 0x56c   :  { %9509 = vrcp.f32 %v1135_v9 }
 0x56e   :  { %v9498_v8 = vpop.eup %9497 }
 0x56f   :  { %v9500_v11 = vpop.eup %9499  ;;  %v1145_v13 = vmul.f32 %v9498_v8, %v1103_v54 }
 0x570   :  { %v9502_v19 = vpop.eup %9501  ;;  %v1136_v23 = vadd.f32 1.0, %v9500_v11 }
 0x571   :  { %8345 = vmatmul.mubr.msk.f32.vlgmr.msra.gmra.mrb[12].mxu1 %vm552_vm11, %v1145_v13  ;;  %v9504_v31 = vpop.eup %9503  ;;  %v1146_v47 = vmul.f32 %v9502_v19, %v1104_v63 }
 0x572   :  { %8347 = vmatprep.mubr.msk.f32.mxu1 %vm10512_vm0, %v12378_v0  ;;  %v9506_v35 = vpop.eup %9505  ;;  %v1137_v36 = vadd.f32 1.0, %v9504_v31  ;;  %9511 = vrcp.f32 %v1136_v23 }
 0x573   :  { %v1147_v54 = vmul.f32 %v9506_v35, %v10994_v42  ;;  %v9508_v20 = vpop.eup %9507 }
 0x574   :  { %9513 = vrcp.f32 %v1137_v36  ;;  %v1148_v63 = vmul.f32 %v9508_v20, %v11001_v14 }
 0x575   :  { %8348 = vmatmul.mubr.msk.f32.gmra.mrb[14].mxu1 %vm552_vm11, %v1146_v47 }
 0x576   :  { %8350 = vmatprep.mubr.msk.f32.mxu1 %vm10512_vm0, %v12378_v0  ;;  %v9510_v38 = vpop.eup %9509 }
 0x577   :  { %v1149_v39 = vmul.f32 %v9510_v38, %v1107_v37  ;;  %v7643_v37 = vld [vmem:[%s12415_s25] ss:$0 sm:$0xff] }
 0x579   :  { %8351 = vmatmul.mubr.msk.f32.gmra.mrb[16].mxu1 %vm552_vm11, %v1147_v54 }
 0x57a   :  { %8353 = vmatprep.mubr.msk.f32.mxu1 %vm10512_vm0, %v12378_v0 }
 0x57c   :  { %v9512_v28 = vpop.eup %9511 }
 0x57d   :  { %8354 = vmatmul.mubr.msk.f32.gmra.mrb[18].mxu1 %vm552_vm11, %v1148_v63  ;;  %v1150_v42 = vmul.f32 %v9512_v28, %v1108_v40 }
 0x57e   :  { %8356 = vmatprep.mubr.msk.f32.mxu1 %vm10512_vm0, %v12378_v0  ;;  %v9514_v45 = vpop.eup %9513 }
 0x57f   :  { %v1151_v14 = vmul.f32 %v9514_v45, %v1109_v41 }
 0x581   :  { %8357 = vmatmul.mubr.msk.f32.gmra.mrb[20].mxu1 %vm552_vm11, %v1149_v39 }
 0x582   :  { %8359 = vmatprep.mubr.msk.f32.mxu1 %vm10512_vm0, %v12378_v0 }
 0x585   :  { %8360 = vmatmul.mubr.msk.f32.gmra.mrb[22].mxu1 %vm552_vm11, %v1150_v42 }
 0x586   :  { %8362 = vmatprep.mubr.msk.f32.mxu1 %vm10512_vm0, %v12378_v0 }
 0x589   :  { %8363 = vmatmul.mubr.msk.f32.gmra.mrb[24].mxu1 %vm552_vm11, %v1151_v14 }
 0x58a   :  { %8418 = vmatprep.mubr.msk.f32.mxu1 %vm10512_vm0, %v12378_v0 }
 0x644   :  { %v1250_v49 = vpop.f32.mrb[12].mxu1 }
 0x645   :  { %v1251_v53 = vadd.f32 %v7643_v37, %v1250_v49  ;;  %v8346_v55 = vpop.f32.mrb[13].mxu1 }
 0x647   :  { %v1284_v18 = vsub.f32 0.0, %v1251_v53 }
 0x648   :  { %v1255_v59 = vpop.f32.mrb[14].mxu1 }
 0x649   :  { %v1291_v62 = vmul.f32 1.442695, %v1284_v18  ;;  %v1256_v40 = vadd.f32 %v7643_v37, %v1255_v59  ;;  %v8349_v2 = vpop.f32.mrb[15].mxu1 }
 0x64b   :  { %9515 = vpow2.f32 %v1291_v62  ;;  %v1285_v3 = vsub.f32 0.0, %v1256_v40 }
 0x64c   :  { %v1260_v4 = vpop.f32.mrb[16].mxu1 }
 0x64d   :  { %v1293_v5 = vmul.f32 1.442695, %v1285_v3  ;;  %v1261_v32 = vadd.f32 %v7643_v37, %v1260_v4  ;;  %v8352_v41 = vpop.f32.mrb[17].mxu1 }
 0x64e   :  { %v11038_v41 = vpop.permute.xlu1 %1328 }
 0x64f   :  { %9517 = vpow2.f32 %v1293_v5  ;;  %v1286_v6 = vsub.f32 0.0, %v1261_v32 }
 0x650   :  { %v1265_v7 = vpop.f32.mrb[18].mxu1 }
 0x651   :  { %v1295_v8 = vmul.f32 1.442695, %v1286_v6  ;;  %v1266_v9 = vadd.f32 %v7643_v37, %v1265_v7  ;;  %v8355_v11 = vpop.f32.mrb[19].mxu1 }
 0x653   :  { %9519 = vpow2.f32 %v1295_v8  ;;  %v1287_v13 = vsub.f32 0.0, %v1266_v9 }
 0x654   :  { %v1270_v19 = vpop.f32.mrb[20].mxu1 }
 0x655   :  { %v9516_v23 = vpop.eup %9515  ;;  %v1297_v31 = vmul.f32 1.442695, %v1287_v13  ;;  %v1271_v47 = vadd.f32 %v7643_v37, %v1270_v19  ;;  %v8358_v35 = vpop.f32.mrb[21].mxu1 }
 0x656   :  { %v1305_v36 = vadd.f32 1.0, %v9516_v23  ;;  %v11040_v23 = vpop.permute.xlu1 %1333 }
 0x657   :  { %9521 = vpow2.f32 %v1297_v31  ;;  %v1288_v54 = vsub.f32 0.0, %v1271_v47 }
 0x658   :  { %9523 = vrcp.f32 %v1305_v36  ;;  %v1275_v20 = vpop.f32.mrb[22].mxu1 }
 0x659   :  { %v9518_v63 = vpop.eup %9517  ;;  %v1299_v38 = vmul.f32 1.442695, %v1288_v54  ;;  %v1276_v39 = vadd.f32 %v7643_v37, %v1275_v20  ;;  %v8361_v28 = vpop.f32.mrb[23].mxu1 }
 0x65a   :  { %v1306_v42 = vadd.f32 1.0, %v9518_v63 }
 0x65b   :  { %9525 = vpow2.f32 %v1299_v38  ;;  %v1289_v45 = vsub.f32 0.0, %v1276_v39 }
 0x65c   :  { %9527 = vrcp.f32 %v1306_v42  ;;  %v1280_v14 = vpop.f32.mrb[24].mxu1  ;;  %v11045_v42 = vpop.permute.xlu1 %1338 }
 0x65d   :  { %v9520_v49 = vpop.eup %9519  ;;  %v1301_v55 = vmul.f32 1.442695, %v1289_v45  ;;  %v1281_v18 = vadd.f32 %v7643_v37, %v1280_v14  ;;  %v8364_v59 = vpop.f32.mrb[25].mxu1 }
 0x65e   :  { %v1307_v62 = vadd.f32 1.0, %v9520_v49  ;;  %v11047_v45 = vpop.permute.xlu0 %1343 }
 0x65f   :  { %9529 = vpow2.f32 %v1301_v55  ;;  %v1290_v2 = vsub.f32 0.0, %v1281_v18 }
 0x660   :  { %9531 = vrcp.f32 %v1307_v62 }
 0x661   :  { %v9522_v3 = vpop.eup %9521  ;;  %v1303_v4 = vmul.f32 1.442695, %v1290_v2  ;;  %v11051_v2 = vpop.permute.xlu1 %1348 }
 0x662   :  { %v9524_v5 = vpop.eup %9523  ;;  %v1308_v6 = vadd.f32 1.0, %v9522_v3 }
 0x663   :  { %9533 = vpow2.f32 %v1303_v4  ;;  %v1319_v8 = vmul.f32 %v9524_v5, %v1251_v53  ;;  %v11055_v4 = vpop.permute.xlu0 %1353  ;;  %v7621_v5 = vld [vmem:[#allocation2] ss:$0 sm:$0xff] }
 0x664   :  { %9535 = vrcp.f32 %v1308_v6 }
 0x665   :  { %v9526_v7 = vpop.eup %9525  ;;  %v1361_v31 = vmul.f32 %v11038_v41, %v1319_v8 }
 0x666   :  { %v9528_v11 = vpop.eup %9527  ;;  %v1309_v13 = vadd.f32 1.0, %v9526_v7 }
 0x667   :  { %v1320_v19 = vmul.f32 %v9528_v11, %v1256_v40 }
 0x668   :  { %9537 = vrcp.f32 %v1309_v13 }
 0x669   :  { %v9530_v37 = vpop.eup %9529  ;;  %v1362_v35 = vmul.f32 %v11040_v23, %v1320_v19 }
 0x66a   :  { %v9532_v36 = vpop.eup %9531  ;;  %v1310_v54 = vadd.f32 1.0, %v9530_v37  ;;  %v1425_v37 = vld [vmem:[#allocation20] sm:$0xff] }
 0x66b   :  { %v1368_v20 = vpack.c.bf16 %v1362_v35, %v1361_v31  ;;  %v1321_v38 = vmul.f32 %v9532_v36, %v1261_v32  ;;  %v1426_v31 = vld [vmem:[#allocation20 + $0x8] sm:$0xff] }
 0x66c   :  { %9539 = vrcp.f32 %v1310_v54  ;;  %v1427_v54 = vld [vmem:[#allocation20 + $0x10] sm:$0xff] }
 0x66d   :  { %v9534_v63 = vpop.eup %9533  ;;  %8366 = vmatpush3.bf16.msra.mxu0 %v1368_v20  ;;  %v1363_v14 = vmul.f32 %v11045_v42, %v1321_v38  ;;  %v1428_v20 = vld [vmem:[#allocation20 + $0x18] sm:$0xff]  ;;  %v1421_v38 = vld [vmem:[#allocation19] sm:$0xff] }
 0x66e   :  { %v9536_v28 = vpop.eup %9535  ;;  %v1311_v53 = vadd.f32 1.0, %v9534_v63  ;;  %8367 = vmatprep.subr.bf16.mxu0 %v12378_v0  ;;  %v9160_v63 = vpack.c.bf16 %v1428_v20, %v1427_v54  ;;  %v7654_v20 = vld [vmem:[%s12416_s26] ss:$0 sm:$0xff] }
 0x66f   :  { %v1322_v40 = vmul.f32 %v9536_v28, %v1266_v9  ;;  %v424_v9 = vshrl.u32 %v346_v33, 7  ;;  %v1422_v28 = vld [vmem:[#allocation19 + $0x8] sm:$0xff] }
 0x670   :  { %9541 = vrcp.f32 %v1311_v53 }
 0x671   :  { %v1364_v49 = vmul.f32 %v11047_v45, %v1322_v40  ;;  %vm430_vm8 = vcmp.eq.s32.totalorder %v7621_v5, %v424_v9  ;;  %v9163_v40 = vpack.c.bf16 %v1422_v28, %v1421_v38  ;;  %v1586_v9 = vld [vmem:[#allocation22] sm:$0xff]  ;;  %v1587_v5 = vld [vmem:[#allocation22 + $0x8] sm:$0xff] }
 0x672   :  { %v9538_v55 = vpop.eup %9537  ;;  %v431_v33 = vsel %vm430_vm8, 1.0, %v12378_v0 }
 0x673   :  { %v1369_v59 = vpack.c.bf16 %v1364_v49, %v1363_v14  ;;  %v1323_v62 = vmul.f32 %v9538_v55, %v1271_v47  ;;  %v11059_v47 = vpop.permute.xlu1 %1358  ;;  %v11065_v36 = vpack.c.bf16 %v431_v33, %v431_v33  ;;  %v1423_v55 = vld [vmem:[#allocation19 + $0x10] sm:$0xff]  ;;  %v7659_v33 = vld [vmem:[%s12409_s22 + $0x30] sm:$0xff] }
 0x675   :  { %8368 = vmatpush3.bf16.msra.mxu0 %v1369_v59  ;;  %v1365_v6 = vmul.f32 %v11051_v2, %v1323_v62  ;;  %v1424_v59 = vld [vmem:[#allocation19 + $0x18] sm:$0xff] }
 0x676   :  { %v9540_v32 = vpop.eup %9539  ;;  %8369 = vmatprep.subr.bf16.mxu0 %v12378_v0 }
 0x677   :  { %v1324_v3 = vmul.f32 %v9540_v32, %v1276_v39 }
 0x679   :  { %v1366_v7 = vmul.f32 %v11055_v4, %v1324_v3  ;;  %v9166_v3 = vpack.c.bf16 %v1424_v59, %v1423_v55 }
 0x67a   :  { %v9542_v8 = vpop.eup %9541 }
 0x67b   :  { %v1370_v11 = vpack.c.bf16 %v1366_v7, %v1365_v6  ;;  %v1325_v13 = vmul.f32 %v9542_v8, %v1281_v18  ;;  %v9157_v18 = vpack.c.bf16 %v1426_v31, %v1425_v37  ;;  %v9169_v6 = vpack.c.bf16 %v1587_v5, %v1586_v9  ;;  %v1588_v7 = vld [vmem:[#allocation22 + $0x10] sm:$0xff]  ;;  %v1589_v8 = vld [vmem:[#allocation22 + $0x18] sm:$0xff]  ;;  %v7660_v37 = vld [vmem:[%s12409_s22 + $0x38] sm:$0xff] }
 0x67c   :  { %v9178_v31 = vpack.c.bf16 %v7660_v37, %v7659_v33  ;;  %v1914_v37 = vld [vmem:[#allocation17 + $0x28] sm:$0xff] }
 0x67d   :  { %v1367_v19 = vmul.f32 %v11059_v47, %v1325_v13  ;;  %8370 = vmatpush3.bf16.msra.mxu0 %v1370_v11  ;;  %v9172_v11 = vpack.c.bf16 %v1589_v8, %v1588_v7  ;;  %v7657_v13 = vld [vmem:[%s12409_s22 + $0x20] sm:$0xff]  ;;  %v7661_v8 = vld [vmem:[#allocation16 + $0x1] ss:$0 sm:$0xff] }
 0x67e   :  { %8371 = vmatprep.subr.bf16.mxu0 %v12378_v0 }
 0x67f   :  { %v1371_v39 = vpack.c.bf16 %v1367_v19, %v1367_v19  ;;  %v7658_v19 = vld [vmem:[%s12409_s22 + $0x28] sm:$0xff] }
 0x681   :  { %v1378_v35 = vsel %vm1376_vm10, %v1371_v39, 0  ;;  %v9175_v39 = vpack.c.bf16 %v7658_v19, %v7657_v13 }
 0x682   :  { %8372 = vmatpush3.bf16.msra.mxu0 %v1378_v35 }
 0x683   :  { %9156 = vmatprep.subr.bf16.mxu0 %v12376_v29  ;;  %9176 = vmatpush3.bf16.msra.mxu1 %v9175_v39  ;;  %v1913_v39 = vld [vmem:[#allocation17 + $0x20] sm:$0xff] }
 0x684   :  { %9177 = vmatprep.subr.bf16.mxu1 %v12376_v29 }
 0x685   :  { %8374 = vmatmul.mubr.msk.bf16.vlgmr.msra.gmra.mrb[12].mxu0 %vm1372_vm13, %v11065_v36 }
 0x686   :  { %9158 = vmatpush3.bf16.msra.mxu0 %v9157_v18  ;;  %8385 = vmatprep.mubr.msk.f32.mxu0 %vm10512_vm0, %v12378_v0 }
 0x687   :  { %9159 = vmatprep.subr.bf16.mxu0 %v12376_v29  ;;  %9179 = vmatpush3.bf16.msra.mxu1 %v9178_v31  ;;  %v9181_v31 = vpack.c.bf16 %v1914_v37, %v1913_v39 }
 0x688   :  { %9180 = vmatprep.subr.bf16.mxu1 %v12376_v29 }
 0x68a   :  { %9161 = vmatpush3.bf16.msra.mxu0 %v9160_v63 }
 0x68b   :  { %9162 = vmatprep.subr.bf16.mxu0 %v12376_v29 }
 0x758   :  { %v1414_v53 = vpop.f32.mrb[12].mxu0 }
 0x759   :  { %v1420_v14 = vmul.f32 0.01, %v1414_v53  ;;  %v8375_v49 = vpop.f32.mrb[13].mxu0 }
 0x75a   :  { %v1417_v62 = vpop.f32.mrb[14].mxu0 }
 0x75b   :  { %v8376_v32 = vpop.f32.mrb[15].mxu0  ;;  %8386 = vmatmul.mubr.msk.f32.vlgmr.msra.gmra.mrb[2].mxu0 %vm552_vm11, %v1420_v14 }
 0x75c   :  { %9164 = vmatpush3.bf16.msra.mxu0 %v9163_v40  ;;  %8396 = vmatprep.mubr.msk.f32.mxu0 %vm10512_vm0, %v12378_v0  ;;  %v7656_v32 = vld [vmem:[%s12417_s12] ss:$0 sm:$0xff] }
 0x75d   :  { %9165 = vmatprep.subr.bf16.mxu0 %v12376_v29 }
 0x760   :  { %9167 = vmatpush3.bf16.msra.mxu0 %v9166_v3 }
 0x761   :  { %9168 = vmatprep.subr.bf16.mxu0 %v12376_v29 }
 0x763   :  { %8397 = vmatmul.mubr.msk.f32.vlgmr.msra.gmra.mrb[16].mxu0 %vm552_vm11, %v10903_v46 }
 0x764   :  { %8407 = vmatprep.mubr.msk.f32.mxu0 %vm10512_vm0, %v12378_v0  ;;  %9170 = vmatpush3.bf16.msra.mxu0 %v9169_v6  ;;  %v11096_v6 = vpop.permute.xlu0 %1674 }
 0x765   :  { %9171 = vmatprep.subr.bf16.mxu0 %v12376_v29 }
 0x768   :  { %9173 = vmatpush3.bf16.msra.mxu0 %v9172_v11 }
 0x82e   :  { %v1498_v35 = vpop.f32.mrb[2].mxu0 }
 0x82f   :  { %v8387_v18 = vpop.f32.mrb[3].mxu0 }
 0x830   :  { %v1916_v18 = vld [vmem:[#allocation17 + $0x38] sm:$0xff] }
 0x836   :  { %v1568_v54 = vpop.f32.mrb[16].mxu0 }
 0x837   :  { %v1569_v63 = vadd.f32 %v1568_v54, %v1498_v35  ;;  %v8398_v38 = vpop.f32.mrb[17].mxu0  ;;  %v1915_v35 = vld [vmem:[#allocation17 + $0x30] sm:$0xff] }
 0x838   :  { %v9184_v54 = vpack.c.bf16 %v1916_v18, %v1915_v35  ;;  %v7670_v38 = vld [vmem:[%s12414_s23 + $0x1] ss:$0 sm:$0xff] }
 0x839   :  { %v1579_v28 = vadd.f32 %v7654_v20, %v1569_v63  ;;  %v7664_v20 = vld [vmem:[%s12413_s14 + $0x1] ss:$0 sm:$0xff] }
 0x83a   :  { %v1779_v63 = vmul.f32 %v7664_v20, %v10945_v12  ;;  %v1783_v18 = vmul.f32 %v7664_v20, %v10969_v17 }
 0x83b   :  { %v1580_v53 = vsub.f32 0.0, %v1579_v28 }
 0x83d   :  { %v1581_v40 = vmul.f32 1.442695, %v1580_v53  ;;  %v1777_v53 = vmul.f32 %v7664_v20, %v10978_v25 }
 0x83f   :  { %9543 = vpow2.f32 %v1581_v40 }
 0x849   :  { %v9544_v14 = vpop.eup %9543 }
 0x84a   :  { %v1583_v49 = vadd.f32 1.0, %v9544_v14  ;;  %v1858_v14 = vmul.f32 %v7670_v38, %v10962_v56 }
 0x84c   :  { %9545 = vrcp.f32 %v1583_v49 }
 0x856   :  { %v9546_v55 = vpop.eup %9545 }
 0x857   :  { %v1585_v59 = vmul.f32 %v9546_v55, %v1579_v28  ;;  %v1780_v55 = vmul.f32 %v7664_v20, %v10948_v16 }
 0x859   :  { %8408 = vmatmul.mubr.msk.f32.vlgmr.msra.gmra.mrb[18].mxu0 %vm552_vm11, %v1585_v59 }
 0x85a   :  { %8423 = vmatprep.mubr.msk.bf16.mxu0 %vm640_vm9, %v10836_v43 }
 0x92c   :  { %v1659_v62 = vpop.f32.mrb[18].mxu0 }
 0x92d   :  { %v1663_v3 = vadd.f32 %v1659_v62, %v10903_v46  ;;  %v8409_v9 = vpop.f32.mrb[19].mxu0  ;;  %v1856_v62 = vmul.f32 %v7670_v38, %v10980_v26 }
 0x92f   :  { %v1671_v5 = vadd.f32 %v7656_v32, %v1663_v3  ;;  %v1778_v3 = vmul.f32 %v7664_v20, %v10942_v10 }
 0x931   :  { %v11099_v7 = vmul.f32 %v11096_v6, %v1671_v5 }
 0x933   :  { %8419 = vmatmul.mubr.msk.f32.vlgmr.msra.gmra.mrb[26].mxu1 %vm552_vm11, %v11099_v7 }
 0x934   :  { %8439 = vmatprep.mubr.msk.f32.mxu1 %vm10512_vm0, %v12378_v0  ;;  %9182 = vmatpush3.bf16.msra.mxu1 %v9181_v31 }
 0x935   :  { %9183 = vmatprep.subr.bf16.mxu1 %v12376_v29 }
 0x938   :  { %9185 = vmatpush3.bf16.msra.mxu1 %v9184_v54 }
 0x939   :  { %9198 = vmatprep.subr.bf16.mxu1 %v12376_v29 }
 0xa06   :  { %v1760_v11 = vpop.f32.mrb[26].mxu1 }
 0xa07   :  { %v1761_v13 = vadd.f32 %v7661_v8, %v1760_v11  ;;  %v8420_v19 = vpop.f32.mrb[27].mxu1  ;;  %v1859_v8 = vmul.f32 %v7670_v38, %v10985_v30 }
 0xa09   :  { %1765 = vrot.lane.b32.xlu1 %v1761_v13, %s10514_s18 }
 0xa7b   :  { %v1766_v46 = vpop.permute.xlu1 %1765 }
 0xa7c   :  { %v1768_v33 = vpack.c.bf16 %v1766_v46, %v1761_v13  ;;  %v1857_v46 = vmul.f32 %v7670_v38, %v10960_v52 }
 0xa7e   :  { %8421 = vmatprep.subr.bf16.mxu0 %v1768_v33 }
 0xa7f   :  { %8422 = vmatpush3.bf16.msra.mxu0 %v1768_v33 }
 0xa80   :  { %8460 = vmatprep.subr.bf16.mxu0 %v12378_v0 }
 0xa82   :  { %8424 = vmatmul.mubr.msk.bf16.vlgmr.msra.gmra.mrb[20].mxu0 %vm640_vm9, %v10842_v50 }
 0xa83   :  { %8427 = vmatprep.mubr.msk.bf16.mxu0 %vm640_vm9, %v10849_v57 }
 0xa8a   :  { %8428 = vmatmul.mubr.msk.bf16.gmra.mrb[24].mxu0 %vm640_vm9, %v10854_v60 }
 0xa8b   :  { %8468 = vmatprep.mubr.msk.bf16.mxu0 %vm10512_vm0, %v12378_v0 }
 0xb55   :  { %v8425_v28 = vpop.f32.mrb[20].mxu0 }
 0xb56   :  { %v1827_v40 = vadd.f32 %v8425_v28, %v1779_v63  ;;  %v1818_v49 = vpop.f32.mrb[21].mxu0 }
 0xb57   :  { %v1819_v59 = vadd.f32 %v1818_v49, %v1777_v53  ;;  %v8426_v32 = vpop.f32.mrb[22].mxu0  ;;  %v1862_v49 = vmul.f32 %v7670_v38, %v11010_v34 }
 0xb58   :  { %v11125_v9 = vadd.f32 %v1858_v14, %v1827_v40  ;;  %v1830_v5 = vadd.f32 %v8426_v32, %v1780_v55  ;;  %v1821_v11 = vpop.f32.mrb[23].mxu0  ;;  %v1781_v40 = vmul.f32 %v7664_v20, %v10982_v27 }
 0xb59   :  { %v1863_v13 = vadd.f32 %v1856_v62, %v1819_v59  ;;  %v1822_v19 = vadd.f32 %v1821_v11, %v1778_v3  ;;  %v1782_v59 = vmul.f32 %v7664_v20, %v10965_v61  ;;  %v1860_v3 = vmul.f32 %v7670_v38, %v11003_v1 }
 0xb5a   :  { %v1872_v33 = vsub.f32 0.0, %v11125_v9  ;;  %v11130_v39 = vadd.f32 %v1859_v8, %v1830_v5 }
 0xb5b   :  { %v1870_v37 = vsub.f32 0.0, %v1863_v13  ;;  %v1864_v31 = vadd.f32 %v1857_v46, %v1822_v19  ;;  %v1861_v19 = vmul.f32 %v7670_v38, %v10998_v58 }
 0xb5c   :  { %v1881_v35 = vmul.f32 1.442695, %v1872_v33  ;;  %v1873_v63 = vsub.f32 0.0, %v11130_v39 }
 0xb5d   :  { %v1877_v54 = vmul.f32 1.442695, %v1870_v37  ;;  %v1871_v28 = vsub.f32 0.0, %v1864_v31  ;;  %v8429_v53 = vpop.f32.mrb[24].mxu0 }
 0xb5e   :  { %v1843_v14 = vadd.f32 %v8429_v53, %v1783_v18  ;;  %v1834_v55 = vpop.f32.mrb[25].mxu0  ;;  %v1883_v46 = vmul.f32 1.442695, %v1873_v63 }
 0xb5f   :  { %9547 = vpow2.f32 %v1877_v54  ;;  %v1879_v62 = vmul.f32 1.442695, %v1871_v28  ;;  %v1835_v32 = vadd.f32 %v1834_v55, %v1781_v40  ;;  %v8430_v5 = vpop.f32.mrb[26].mxu0 }
 0xb60   :  { %9549 = vpow2.f32 %v1881_v35  ;;  %v11138_v8 = vadd.f32 %v1862_v49, %v1843_v14  ;;  %v1837_v11 = vpop.f32.mrb[27].mxu0 }
 0xb61   :  { %9551 = vpow2.f32 %v1879_v62  ;;  %v1867_v33 = vadd.f32 %v1860_v3, %v1835_v32  ;;  %v1838_v37 = vadd.f32 %v1837_v11, %v1782_v59 }
 0xb62   :  { %9553 = vpow2.f32 %v1883_v46  ;;  %v1876_v40 = vsub.f32 0.0, %v11138_v8 }
 0xb63   :  { %v1874_v18 = vsub.f32 0.0, %v1867_v33  ;;  %v1868_v53 = vadd.f32 %v1861_v19, %v1838_v37 }
 0xb64   :  { %v1889_v38 = vmul.f32 1.442695, %v1876_v40 }
 0xb65   :  { %v1885_v20 = vmul.f32 1.442695, %v1874_v18  ;;  %v1875_v54 = vsub.f32 0.0, %v1868_v53 }
 0xb67   :  { %9555 = vpow2.f32 %v1885_v20  ;;  %v1887_v55 = vmul.f32 1.442695, %v1875_v54 }
 0xb69   :  { %v9548_v28 = vpop.eup %9547 }
 0xb6a   :  { %v9550_v35 = vpop.eup %9549  ;;  %v1891_v14 = vadd.f32 1.0, %v9548_v28 }
 0xb6b   :  { %v9552_v49 = vpop.eup %9551  ;;  %v1893_v63 = vadd.f32 1.0, %v9550_v35 }
 0xb6c   :  { %9557 = vrcp.f32 %v1891_v14  ;;  %v1892_v5 = vadd.f32 1.0, %v9552_v49  ;;  %v9554_v59 = vpop.eup %9553 }
 0xb6d   :  { %9559 = vpow2.f32 %v1887_v55  ;;  %v1894_v62 = vadd.f32 1.0, %v9554_v59 }
 0xb6e   :  { %9561 = vrcp.f32 %v1892_v5 }
 0xb6f   :  { %9563 = vpow2.f32 %v1889_v38 }
 0xb70   :  { %9565 = vrcp.f32 %v1893_v63 }
 0xb71   :  { %v9556_v32 = vpop.eup %9555  ;;  %9567 = vrcp.f32 %v1894_v62 }
 0xb72   :  { %v1895_v11 = vadd.f32 1.0, %v9556_v32 }
 0xb74   :  { %9569 = vrcp.f32 %v1895_v11 }
 0xb76   :  { %v9558_v3 = vpop.eup %9557 }
 0xb77   :  { %v9560_v19 = vpop.eup %9559  ;;  %v1905_v46 = vmul.f32 %v9558_v3, %v1863_v13 }
 0xb78   :  { %v9562_v37 = vpop.eup %9561  ;;  %v1896_v18 = vadd.f32 1.0, %v9560_v19 }
 0xb79   :  { %8440 = vmatmul.mubr.msk.f32.vlgmr.msra.gmra.mrb[28].mxu1 %vm552_vm11, %v1905_v46  ;;  %v9564_v20 = vpop.eup %9563  ;;  %v1906_v54 = vmul.f32 %v9562_v37, %v1864_v31 }
 0xb7a   :  { %8442 = vmatprep.mubr.msk.f32.mxu1 %vm10512_vm0, %v12378_v0  ;;  %v9566_v28 = vpop.eup %9565  ;;  %v1897_v40 = vadd.f32 1.0, %v9564_v20  ;;  %9571 = vrcp.f32 %v1896_v18 }
 0xb7b   :  { %v1907_v13 = vmul.f32 %v9566_v28, %v11125_v9  ;;  %v9568_v55 = vpop.eup %9567 }
 0xb7c   :  { %9573 = vrcp.f32 %v1897_v40  ;;  %v1908_v31 = vmul.f32 %v9568_v55, %v11130_v39 }
 0xb7d   :  { %8443 = vmatmul.mubr.msk.f32.gmra.mrb[30].mxu1 %vm552_vm11, %v1906_v54 }
 0xb7e   :  { %8445 = vmatprep.mubr.msk.f32.mxu1 %vm10512_vm0, %v12378_v0  ;;  %v9570_v35 = vpop.eup %9569 }
 0xb7f   :  { %v1909_v14 = vmul.f32 %v9570_v35, %v1867_v33  ;;  %v7672_v33 = vld [vmem:[%s12415_s25 + $0x1] ss:$0 sm:$0xff] }
 0xb81   :  { %8446 = vmatmul.mubr.msk.f32.gmra.mrb[32].mxu1 %vm552_vm11, %v1907_v13 }
 0xb82   :  { %8448 = vmatprep.mubr.msk.f32.mxu1 %vm10512_vm0, %v12378_v0 }
 0xb84   :  { %v9572_v49 = vpop.eup %9571 }
 0xb85   :  { %8449 = vmatmul.mubr.msk.f32.gmra.mrb[34].mxu1 %vm552_vm11, %v1908_v31  ;;  %v1910_v9 = vmul.f32 %v9572_v49, %v1868_v53 }
 0xb86   :  { %8451 = vmatprep.mubr.msk.f32.mxu1 %vm10512_vm0, %v12378_v0  ;;  %v9574_v5 = vpop.eup %9573 }
 0xb87   :  { %v1911_v39 = vmul.f32 %v9574_v5, %v11138_v8 }
 0xb89   :  { %8452 = vmatmul.mubr.msk.f32.gmra.mrb[36].mxu1 %vm552_vm11, %v1909_v14 }
 0xb8a   :  { %8454 = vmatprep.mubr.msk.f32.mxu1 %vm10512_vm0, %v12378_v0 }
 0xb8d   :  { %8455 = vmatmul.mubr.msk.f32.gmra.mrb[38].mxu1 %vm552_vm11, %v1910_v9 }
 0xb8e   :  { %8457 = vmatprep.mubr.msk.f32.mxu1 %vm10512_vm0, %v12378_v0 }
 0xb91   :  { %8458 = vmatmul.mubr.msk.f32.gmra.mrb[40].mxu1 %vm552_vm11, %v1911_v39 }
 0xb92   :  { %8502 = vmatprep.mubr.msk.f32.mxu1 %vm10512_vm0, %v12378_v0 }
 0xc4c   :  { %v2012_v38 = vpop.f32.mrb[28].mxu1 }
 0xc4d   :  { %v2013_v63 = vadd.f32 %v7672_v33, %v2012_v38  ;;  %v8441_v59 = vpop.f32.mrb[29].mxu1 }
 0xc4f   :  { %v2046_v62 = vsub.f32 0.0, %v2013_v63 }
 0xc50   :  { %v2017_v32 = vpop.f32.mrb[30].mxu1 }
 0xc51   :  { %v2053_v53 = vmul.f32 1.442695, %v2046_v62  ;;  %v2018_v3 = vadd.f32 %v7672_v33, %v2017_v32  ;;  %v8444_v11 = vpop.f32.mrb[31].mxu1 }
 0xc53   :  { %9575 = vpow2.f32 %v2053_v53  ;;  %v2047_v19 = vsub.f32 0.0, %v2018_v3 }
 0xc54   :  { %v2022_v46 = vpop.f32.mrb[32].mxu1 }
 0xc55   :  { %v2055_v37 = vmul.f32 1.442695, %v2047_v19  ;;  %v2023_v18 = vadd.f32 %v7672_v33, %v2022_v46  ;;  %v8447_v8 = vpop.f32.mrb[33].mxu1 }
 0xc57   :  { %9577 = vpow2.f32 %v2055_v37  ;;  %v2048_v20 = vsub.f32 0.0, %v2023_v18 }
 0xc58   :  { %v2027_v54 = vpop.f32.mrb[34].mxu1 }
 0xc59   :  { %v2057_v28 = vmul.f32 1.442695, %v2048_v20  ;;  %v2028_v40 = vadd.f32 %v7672_v33, %v2027_v54  ;;  %v8450_v13 = vpop.f32.mrb[35].mxu1 }
 0xc5b   :  { %9579 = vpow2.f32 %v2057_v28  ;;  %v2049_v55 = vsub.f32 0.0, %v2028_v40 }
 0xc5c   :  { %v2032_v31 = vpop.f32.mrb[36].mxu1 }
 0xc5d   :  { %v9576_v35 = vpop.eup %9575  ;;  %v2059_v14 = vmul.f32 1.442695, %v2049_v55  ;;  %v2033_v49 = vadd.f32 %v7672_v33, %v2032_v31  ;;  %v8453_v9 = vpop.f32.mrb[37].mxu1 }
 0xc5e   :  { %v2067_v5 = vadd.f32 1.0, %v9576_v35 }
 0xc5f   :  { %9581 = vpow2.f32 %v2059_v14  ;;  %v2050_v39 = vsub.f32 0.0, %v2033_v49 }
 0xc60   :  { %9583 = vrcp.f32 %v2067_v5  ;;  %v2037_v38 = vpop.f32.mrb[38].mxu1 }
 0xc61   :  { %v9578_v59 = vpop.eup %9577  ;;  %v2061_v62 = vmul.f32 1.442695, %v2050_v39  ;;  %v2038_v32 = vadd.f32 %v7672_v33, %v2037_v38  ;;  %v8456_v53 = vpop.f32.mrb[39].mxu1 }
 0xc62   :  { %v2068_v11 = vadd.f32 1.0, %v9578_v59 }
 0xc63   :  { %9585 = vpow2.f32 %v2061_v62  ;;  %v2051_v19 = vsub.f32 0.0, %v2038_v32 }
 0xc64   :  { %9587 = vrcp.f32 %v2068_v11  ;;  %v2042_v46 = vpop.f32.mrb[40].mxu1 }
 0xc65   :  { %v9580_v37 = vpop.eup %9579  ;;  %v2063_v8 = vmul.f32 1.442695, %v2051_v19  ;;  %v2043_v20 = vadd.f32 %v7672_v33, %v2042_v46  ;;  %v8459_v54 = vpop.f32.mrb[41].mxu1 }
 0xc66   :  { %v2069_v28 = vadd.f32 1.0, %v9580_v37 }
 0xc67   :  { %9589 = vpow2.f32 %v2063_v8  ;;  %v2052_v13 = vsub.f32 0.0, %v2043_v20 }
 0xc68   :  { %9591 = vrcp.f32 %v2069_v28 }
 0xc69   :  { %v9582_v55 = vpop.eup %9581  ;;  %v2065_v31 = vmul.f32 1.442695, %v2052_v13 }
 0xc6a   :  { %v9584_v35 = vpop.eup %9583  ;;  %v2070_v14 = vadd.f32 1.0, %v9582_v55 }
 0xc6b   :  { %9593 = vpow2.f32 %v2065_v31  ;;  %v2081_v5 = vmul.f32 %v9584_v35, %v2013_v63 }
 0xc6c   :  { %9595 = vrcp.f32 %v2070_v14 }
 0xc6d   :  { %v9586_v9 = vpop.eup %9585  ;;  %v2088_v33 = vmul.f32 %v2081_v5, %v11038_v41 }
 0xc6e   :  { %v9588_v39 = vpop.eup %9587  ;;  %v2071_v38 = vadd.f32 1.0, %v9586_v9 }
 0xc6f   :  { %v2082_v59 = vmul.f32 %v9588_v39, %v2018_v3 }
 0xc70   :  { %9597 = vrcp.f32 %v2071_v38 }
 0xc71   :  { %v9590_v62 = vpop.eup %9589  ;;  %v2089_v53 = vmul.f32 %v2082_v59, %v11040_v23 }
 0xc72   :  { %v9592_v11 = vpop.eup %9591  ;;  %v2072_v19 = vadd.f32 1.0, %v9590_v62 }
 0xc73   :  { %v2095_v46 = vpack.c.bf16 %v2089_v53, %v2088_v33  ;;  %v2083_v8 = vmul.f32 %v9592_v11, %v2023_v18  ;;  %v2149_v33 = vld [vmem:[#allocation20 + $0x20] sm:$0xff] }
 0xc74   :  { %9599 = vrcp.f32 %v2072_v19  ;;  %v2152_v19 = vld [vmem:[#allocation20 + $0x38] sm:$0xff] }
 0xc75   :  { %v9594_v37 = vpop.eup %9593  ;;  %8461 = vmatpush3.bf16.msra.mxu0 %v2095_v46  ;;  %v2090_v3 = vmul.f32 %v2083_v8, %v11045_v42  ;;  %v2144_v46 = vld [vmem:[#allocation19 + $0x20] sm:$0xff] }
 0xc76   :  { %v9596_v54 = vpop.eup %9595  ;;  %v2073_v28 = vadd.f32 1.0, %v9594_v37  ;;  %8462 = vmatprep.subr.bf16.mxu0 %v12378_v0  ;;  %v2145_v37 = vld [vmem:[#allocation19 + $0x28] sm:$0xff] }
 0xc77   :  { %v2084_v63 = vmul.f32 %v9596_v54, %v2028_v40  ;;  %v9193_v54 = vpack.c.bf16 %v2145_v37, %v2144_v46 }
 0xc78   :  { %9601 = vrcp.f32 %v2073_v28 }
 0xc79   :  { %v2091_v13 = vmul.f32 %v2084_v63, %v11047_v45 }
 0xc7a   :  { %v9598_v55 = vpop.eup %9597 }
 0xc7b   :  { %v2096_v31 = vpack.c.bf16 %v2091_v13, %v2090_v3  ;;  %v2085_v35 = vmul.f32 %v9598_v55, %v2033_v49  ;;  %v2150_v49 = vld [vmem:[#allocation20 + $0x28] sm:$0xff]  ;;  %v2146_v3 = vld [vmem:[#allocation19 + $0x30] sm:$0xff]  ;;  %v2147_v13 = vld [vmem:[#allocation19 + $0x38] sm:$0xff] }
 0xc7c   :  { %v9187_v11 = vpack.c.bf16 %v2150_v49, %v2149_v33  ;;  %v7684_v33 = vld [vmem:[%s12416_s26 + $0x1] ss:$0 sm:$0xff] }
 0xc7d   :  { %8463 = vmatpush3.bf16.msra.mxu0 %v2096_v31  ;;  %v2092_v18 = vmul.f32 %v2085_v35, %v11051_v2  ;;  %v9196_v35 = vpack.c.bf16 %v2147_v13, %v2146_v3  ;;  %v2402_v3 = vld [vmem:[%s12418_s28 + $0x10] sm:$0xff]  ;;  %v2403_v13 = vld [vmem:[%s12418_s28 + $0x18] sm:$0xff] }
 0xc7e   :  { %v9600_v14 = vpop.eup %9599  ;;  %8464 = vmatprep.subr.bf16.mxu0 %v12378_v0 }
 0xc7f   :  { %v2086_v9 = vmul.f32 %v9600_v14, %v2038_v32  ;;  %v2151_v32 = vld [vmem:[#allocation20 + $0x30] sm:$0xff]  ;;  %v2312_v14 = vld [vmem:[#allocation22 + $0x20] sm:$0xff] }
 0xc81   :  { %v2093_v5 = vmul.f32 %v2086_v9, %v11055_v4  ;;  %v2313_v9 = vld [vmem:[#allocation22 + $0x28] sm:$0xff] }
 0xc82   :  { %v9602_v39 = vpop.eup %9601 }
 0xc83   :  { %v2097_v38 = vpack.c.bf16 %v2093_v5, %v2092_v18  ;;  %v2087_v40 = vmul.f32 %v9602_v39, %v2043_v20  ;;  %v9190_v20 = vpack.c.bf16 %v2152_v19, %v2151_v32  ;;  %v9199_v18 = vpack.c.bf16 %v2313_v9, %v2312_v14  ;;  %v2314_v5 = vld [vmem:[#allocation22 + $0x30] sm:$0xff]  ;;  %v2315_v39 = vld [vmem:[#allocation22 + $0x38] sm:$0xff] }
 0xc85   :  { %v2094_v59 = vmul.f32 %v2087_v40, %v11059_v47  ;;  %8465 = vmatpush3.bf16.msra.mxu0 %v2097_v38  ;;  %9200 = vmatpush3.bf16.msra.mxu1 %v9199_v18  ;;  %v9202_v38 = vpack.c.bf16 %v2315_v39, %v2314_v5  ;;  %v7688_v39 = vld [vmem:[%s12419_s1] ss:$0 sm:$0xff] }
 0xc86   :  { %8466 = vmatprep.subr.bf16.mxu0 %v12378_v0  ;;  %9201 = vmatprep.subr.bf16.mxu1 %v12376_v29 }
 0xc87   :  { %v2098_v62 = vpack.c.bf16 %v2094_v59, %v2094_v59 }
 0xc89   :  { %v2100_v53 = vsel %vm1376_vm10, %v2098_v62, 0  ;;  %9203 = vmatpush3.bf16.msra.mxu1 %v9202_v38 }
 0xc8a   :  { %8467 = vmatpush3.bf16.msra.mxu0 %v2100_v53 }
 0xc8b   :  { %9186 = vmatprep.subr.bf16.mxu0 %v12376_v29 }
 0xc8d   :  { %8469 = vmatmul.mubr.msk.bf16.vlgmr.msra.gmra.mrb[28].mxu0 %vm1372_vm13, %v11065_v36 }
 0xc8e   :  { %9188 = vmatpush3.bf16.msra.mxu0 %v9187_v11  ;;  %8480 = vmatprep.mubr.msk.f32.mxu0 %vm10512_vm0, %v12378_v0 }
 0xc8f   :  { %9189 = vmatprep.subr.bf16.mxu0 %v12376_v29 }
 0xc92   :  { %9191 = vmatpush3.bf16.msra.mxu0 %v9190_v20 }
 0xc93   :  { %9192 = vmatprep.subr.bf16.mxu0 %v12376_v29 }
 0xd60   :  { %v2136_v8 = vpop.f32.mrb[28].mxu0 }
 0xd61   :  { %v2142_v28 = vmul.f32 0.01, %v2136_v8  ;;  %v8470_v63 = vpop.f32.mrb[29].mxu0 }
 0xd62   :  { %v2139_v55 = vpop.f32.mrb[30].mxu0 }
 0xd63   :  { %v8471_v31 = vpop.f32.mrb[31].mxu0  ;;  %8481 = vmatmul.mubr.msk.f32.vlgmr.msra.gmra.mrb[32].mxu0 %vm552_vm11, %v2142_v28  ;;  %v2401_v28 = vld [vmem:[%s12418_s28 + $0x8] sm:$0xff]  ;;  %v9208_v55 = vpack.c.bf16 %v2403_v13, %v2402_v3 }
 0xd64   :  { %9194 = vmatpush3.bf16.msra.mxu0 %v9193_v54  ;;  %8491 = vmatprep.mubr.msk.f32.mxu0 %vm10512_vm0, %v12378_v0  ;;  %v2400_v54 = vld [vmem:[%s12418_s28] sm:$0xff] }
 0xd65   :  { %9195 = vmatprep.subr.bf16.mxu0 %v12376_v29  ;;  %v9205_v63 = vpack.c.bf16 %v2401_v28, %v2400_v54 }
 0xd68   :  { %9197 = vmatpush3.bf16.msra.mxu0 %v9196_v35  ;;  %v7687_v35 = vld [vmem:[%s12417_s12 + $0x1] ss:$0 sm:$0xff] }
 0xd69   :  { %9204 = vmatprep.subr.bf16.mxu0 %v12376_v29 }
 0xd6b   :  { %8492 = vmatmul.mubr.msk.f32.vlgmr.msra.gmra.mrb[34].mxu0 %vm552_vm11, %v11099_v7 }
 0xd6c   :  { %8513 = vmatprep.mubr.msk.f32.mxu0 %vm10512_vm0, %v12378_v0  ;;  %9206 = vmatpush3.bf16.msra.mxu0 %v9205_v63 }
 0xd6d   :  { %9207 = vmatprep.subr.bf16.mxu0 %v12376_v29 }
 0xd70   :  { %9209 = vmatpush3.bf16.msra.mxu0 %v9208_v55 }
 0xd71   :  { %9210 = vmatprep.subr.bf16.mxu0 %v12376_v29 }
 0xe36   :  { %v2222_v40 = vpop.f32.mrb[32].mxu0 }
 0xe37   :  { %v8482_v59 = vpop.f32.mrb[33].mxu0 }
 0xe3e   :  { %v2292_v62 = vpop.f32.mrb[34].mxu0 }
 0xe3f   :  { %v2293_v49 = vadd.f32 %v2292_v62, %v2222_v40  ;;  %v8493_v53 = vpop.f32.mrb[35].mxu0 }
 0xe41   :  { %v2304_v11 = vadd.f32 %v7684_v33, %v2293_v49  ;;  %v2631_v49 = vld [vmem:[#allocation23 + $0x8] sm:$0xff] }
 0xe43   :  { %v2305_v32 = vsub.f32 0.0, %v2304_v11 }
 0xe45   :  { %v2306_v19 = vmul.f32 1.442695, %v2305_v32  ;;  %v2633_v32 = vld [vmem:[#allocation23 + $0x18] sm:$0xff] }
 0xe47   :  { %9603 = vpow2.f32 %v2306_v19 }
 0xe51   :  { %v9604_v20 = vpop.eup %9603 }
 0xe52   :  { %v2308_v46 = vadd.f32 1.0, %v9604_v20  ;;  %v7690_v20 = vld [vmem:[%s12420_s2] ss:$0 sm:$0xff] }
 0xe53   :  { %v2496_v54 = vmul.f32 %v7690_v20, %v10978_v25  ;;  %v2499_v13 = vmul.f32 %v7690_v20, %v10948_v16 }
 0xe54   :  { %9605 = vrcp.f32 %v2308_v46  ;;  %v2498_v46 = vmul.f32 %v7690_v20, %v10945_v12 }
 0xe5e   :  { %v9606_v37 = vpop.eup %9605 }
 0xe5f   :  { %v2310_v8 = vmul.f32 %v9606_v37, %v2304_v11  ;;  %v2632_v11 = vld [vmem:[#allocation23 + $0x10] sm:$0xff] }
 0xe60   :  { %v9214_v19 = vpack.c.bf16 %v2633_v32, %v2632_v11  ;;  %v7695_v37 = vld [vmem:[%s12421_s24] ss:$0 sm:$0xff] }
 0xe61   :  { %8503 = vmatmul.mubr.msk.f32.vlgmr.msra.gmra.mrb[42].mxu1 %vm552_vm11, %v2310_v8  ;;  %v2576_v63 = vmul.f32 %v7695_v37, %v10962_v56  ;;  %v2577_v12 = vmul.f32 %v7695_v37, %v10985_v30 }
 0xe62   :  { %8518 = vmatprep.mubr.msk.bf16.mxu1 %vm640_vm9, %v10836_v43 }
 0xf34   :  { %v2385_v31 = vpop.f32.mrb[42].mxu1 }
 0xf35   :  { %v2389_v14 = vadd.f32 %v2385_v31, %v11099_v7  ;;  %v8504_v9 = vpop.f32.mrb[43].mxu1  ;;  %v2630_v7 = vld [vmem:[#allocation23] sm:$0xff]  ;;  %v2574_v31 = vmul.f32 %v7695_v37, %v10980_v26 }
 0xf36   :  { %v9211_v53 = vpack.c.bf16 %v2631_v49, %v2630_v7 }
 0xf37   :  { %v2398_v18 = vadd.f32 %v7687_v35, %v2389_v14  ;;  %v2497_v14 = vmul.f32 %v7690_v20, %v10942_v10  ;;  %v2502_v10 = vmul.f32 %v7690_v20, %v10969_v17 }
 0xf39   :  { %v11208_v5 = vmul.f32 %v2398_v18, %v11096_v6 }
 0xf3b   :  { %8514 = vmatmul.mubr.msk.f32.vlgmr.msra.gmra.mrb[36].mxu0 %vm552_vm11, %v11208_v5 }
 0xf3c   :  { %8534 = vmatprep.mubr.msk.f32.mxu0 %vm10512_vm0, %v12378_v0  ;;  %9212 = vmatpush3.bf16.msra.mxu0 %v9211_v53 }
 0xf3d   :  { %9213 = vmatprep.subr.bf16.mxu0 %v12376_v29 }
 0xf40   :  { %9215 = vmatpush3.bf16.msra.mxu0 %v9214_v19 }
 0xf41   :  { %9216 = vmatprep.subr.bf16.mxu0 %v12376_v29 }
0x100e   :  { %v2480_v38 = vpop.f32.mrb[36].mxu0 }
0x100f   :  { %v2481_v40 = vadd.f32 %v7688_v39, %v2480_v38  ;;  %v8515_v59 = vpop.f32.mrb[37].mxu0 }
0x1010   :  { %v2575_v59 = vmul.f32 %v7695_v37, %v10960_v52 }
0x1011   :  { %2485 = vrot.lane.b32.xlu0 %v2481_v40, %s10514_s18 }
0x1083   :  { %v2486_v62 = vpop.permute.xlu0 %2485 }
0x1084   :  { %v2488_v33 = vpack.c.bf16 %v2486_v62, %v2481_v40 }
0x1086   :  { %8516 = vmatprep.subr.bf16.mxu1 %v2488_v33 }
0x1087   :  { %8517 = vmatpush3.bf16.msra.mxu1 %v2488_v33 }
0x1088   :  { %8555 = vmatprep.subr.bf16.mxu1 %v12378_v0 }
0x108a   :  { %8519 = vmatmul.mubr.msk.bf16.vlgmr.msra.gmra.mrb[44].mxu1 %vm640_vm9, %v10842_v50 }
0x108b   :  { %8522 = vmatprep.mubr.msk.bf16.mxu1 %vm640_vm9, %v10849_v57 }
0x1092   :  { %8523 = vmatmul.mubr.msk.bf16.gmra.mrb[48].mxu1 %vm640_vm9, %v10854_v60 }
0x1093   :  { %8563 = vmatprep.mubr.msk.bf16.mxu1 %vm10512_vm0, %v12378_v0 }
0x115d   :  { %v8520_v8 = vpop.f32.mrb[44].mxu1 }
0x115e   :  { %v2546_v28 = vadd.f32 %v8520_v8, %v2498_v46  ;;  %v2537_v3 = vpop.f32.mrb[45].mxu1  ;;  %v2500_v46 = vmul.f32 %v7690_v20, %v10982_v27 }
0x115f   :  { %v2538_v55 = vadd.f32 %v2537_v3, %v2496_v54  ;;  %v8521_v35 = vpop.f32.mrb[46].mxu1  ;;  %v2580_v54 = vmul.f32 %v7695_v37, %v11010_v34 }
0x1160   :  { %v11235_v9 = vadd.f32 %v2576_v63, %v2546_v28  ;;  %v2549_v18 = vadd.f32 %v8521_v35, %v2499_v13  ;;  %v2540_v39 = vpop.f32.mrb[47].mxu1  ;;  %v2501_v63 = vmul.f32 %v7690_v20, %v10965_v61 }
0x1161   :  { %v2581_v38 = vadd.f32 %v2574_v31, %v2538_v55  ;;  %v2541_v40 = vadd.f32 %v2540_v39, %v2497_v14  ;;  %v2578_v55 = vmul.f32 %v7695_v37, %v11003_v1  ;;  %v2579_v14 = vmul.f32 %v7695_v37, %v10998_v58 }
0x1162   :  { %v2590_v62 = vsub.f32 0.0, %v11235_v9  ;;  %v11240_v33 = vadd.f32 %v2577_v12, %v2549_v18 }
0x1163   :  { %v2588_v16 = vsub.f32 0.0, %v2581_v38  ;;  %v11242_v7 = vadd.f32 %v2575_v59, %v2541_v40 }
0x1164   :  { %v2599_v49 = vmul.f32 1.442695, %v2590_v62  ;;  %v2591_v11 = vsub.f32 0.0, %v11240_v33 }
0x1165   :  { %v2595_v53 = vmul.f32 1.442695, %v2588_v16  ;;  %v2589_v32 = vsub.f32 0.0, %v11242_v7  ;;  %v8524_v19 = vpop.f32.mrb[48].mxu1 }
0x1166   :  { %v2562_v8 = vadd.f32 %v8524_v19, %v2502_v10  ;;  %v2553_v28 = vpop.f32.mrb[49].mxu1  ;;  %v2601_v18 = vmul.f32 1.442695, %v2591_v11 }
0x1167   :  { %9607 = vpow2.f32 %v2595_v53  ;;  %v2597_v3 = vmul.f32 1.442695, %v2589_v32  ;;  %v2554_v13 = vadd.f32 %v2553_v28, %v2500_v46  ;;  %v8525_v17 = vpop.f32.mrb[50].mxu1  ;;  %v7714_v28 = vld [vmem:[%s12409_s22 + $0x40] sm:$0xff] }
0x1168   :  { %9609 = vpow2.f32 %v2599_v49  ;;  %v11251_v31 = vadd.f32 %v2580_v54, %v2562_v8  ;;  %v2556_v35 = vpop.f32.mrb[51].mxu1 }
0x1169   :  { %9611 = vpow2.f32 %v2597_v3  ;;  %v2585_v12 = vadd.f32 %v2578_v55, %v2554_v13  ;;  %v2557_v39 = vadd.f32 %v2556_v35, %v2501_v63  ;;  %v7715_v63 = vld [vmem:[%s12409_s22 + $0x48] sm:$0xff] }
0x116a   :  { %9613 = vpow2.f32 %v2601_v18  ;;  %v2594_v16 = vsub.f32 0.0, %v11251_v31  ;;  %v9217_v55 = vpack.c.bf16 %v7715_v63, %v7714_v28  ;;  %v7717_v18 = vld [vmem:[%s12409_s22 + $0x58] sm:$0xff] }
0x116b   :  { %v2592_v40 = vsub.f32 0.0, %v2585_v12  ;;  %v2586_v59 = vadd.f32 %v2579_v14, %v2557_v39  ;;  %v7716_v14 = vld [vmem:[%s12409_s22 + $0x50] sm:$0xff] }
0x116c   :  { %v2607_v11 = vmul.f32 1.442695, %v2594_v16 }
0x116d   :  { %v2603_v61 = vmul.f32 1.442695, %v2592_v40  ;;  %v2593_v20 = vsub.f32 0.0, %v2586_v59 }
0x116f   :  { %9615 = vpow2.f32 %v2603_v61  ;;  %v2605_v49 = vmul.f32 1.442695, %v2593_v20  ;;  %v9220_v61 = vpack.c.bf16 %v7717_v18, %v7716_v14 }
0x1171   :  { %v9608_v62 = vpop.eup %9607 }
0x1172   :  { %v9610_v10 = vpop.eup %9609  ;;  %v2609_v53 = vadd.f32 1.0, %v9608_v62 }
0x1173   :  { %v9612_v32 = vpop.eup %9611  ;;  %v2611_v19 = vadd.f32 1.0, %v9610_v10 }
0x1174   :  { %9617 = vrcp.f32 %v2609_v53  ;;  %v2610_v37 = vadd.f32 1.0, %v9612_v32  ;;  %v9614_v46 = vpop.eup %9613 }
0x1175   :  { %9619 = vpow2.f32 %v2605_v49  ;;  %v2612_v8 = vadd.f32 1.0, %v9614_v46 }
0x1176   :  { %9621 = vrcp.f32 %v2610_v37 }
0x1177   :  { %9623 = vpow2.f32 %v2607_v11 }
0x1178   :  { %9625 = vrcp.f32 %v2611_v19 }
0x1179   :  { %v9616_v54 = vpop.eup %9615  ;;  %9627 = vrcp.f32 %v2612_v8 }
0x117a   :  { %v2613_v13 = vadd.f32 1.0, %v9616_v54 }
0x117c   :  { %9629 = vrcp.f32 %v2613_v13 }
0x117e   :  { %v9618_v3 = vpop.eup %9617 }
0x117f   :  { %v9620_v17 = vpop.eup %9619  ;;  %v2623_v35 = vmul.f32 %v9618_v3, %v2581_v38 }
0x1180   :  { %v9622_v39 = vpop.eup %9621  ;;  %v2614_v40 = vadd.f32 1.0, %v9620_v17 }
0x1181   :  { %8535 = vmatmul.mubr.msk.f32.vlgmr.msra.gmra.mrb[38].mxu0 %vm552_vm11, %v2623_v35  ;;  %v9624_v20 = vpop.eup %9623  ;;  %v2624_v62 = vmul.f32 %v9622_v39, %v11242_v7 }
0x1182   :  { %8537 = vmatprep.mubr.msk.f32.mxu0 %vm10512_vm0, %v12378_v0  ;;  %9218 = vmatpush3.bf16.msra.mxu0 %v9217_v55  ;;  %v9626_v16 = vpop.eup %9625  ;;  %v2615_v38 = vadd.f32 1.0, %v9624_v20  ;;  %9631 = vrcp.f32 %v2614_v40 }
0x1183   :  { %9219 = vmatprep.subr.bf16.mxu0 %v12376_v29  ;;  %v2625_v49 = vmul.f32 %v9626_v16, %v11235_v9  ;;  %v9628_v10 = vpop.eup %9627 }
0x1184   :  { %9633 = vrcp.f32 %v2615_v38  ;;  %v2626_v7 = vmul.f32 %v9628_v10, %v11240_v33 }
0x1185   :  { %8538 = vmatmul.mubr.msk.f32.gmra.mrb[40].mxu0 %vm552_vm11, %v2624_v62 }
0x1186   :  { %8540 = vmatprep.mubr.msk.f32.mxu0 %vm10512_vm0, %v12378_v0  ;;  %9221 = vmatpush3.bf16.msra.mxu0 %v9220_v61  ;;  %v9630_v53 = vpop.eup %9629 }
0x1187   :  { %v2627_v32 = vmul.f32 %v9630_v53, %v2585_v12  ;;  %v11287_v12 = vmul.f32 %v11208_v5, %v11096_v6 }
0x1189   :  { %8541 = vmatmul.mubr.msk.f32.gmra.mrb[42].mxu0 %vm552_vm11, %v2625_v49 }
0x118a   :  { %8543 = vmatprep.mubr.msk.f32.mxu0 %vm10512_vm0, %v12378_v0 }
0x118c   :  { %v9632_v37 = vpop.eup %9631 }
0x118d   :  { %8544 = vmatmul.mubr.msk.f32.gmra.mrb[44].mxu0 %vm552_vm11, %v2626_v7  ;;  %v2628_v9 = vmul.f32 %v9632_v37, %v2586_v59  ;;  %v7696_v59 = vld [vmem:[%s12422_s7] ss:$0 sm:$0xff] }
0x118e   :  { %8546 = vmatprep.mubr.msk.f32.mxu0 %vm10512_vm0, %v12378_v0  ;;  %v9634_v11 = vpop.eup %9633 }
0x118f   :  { %v2629_v33 = vmul.f32 %v9634_v11, %v11251_v31 }
0x1191   :  { %8547 = vmatmul.mubr.msk.f32.gmra.mrb[46].mxu0 %vm552_vm11, %v2627_v32 }
0x1192   :  { %8549 = vmatprep.mubr.msk.f32.mxu0 %vm10512_vm0, %v12378_v0 }
0x1195   :  { %8550 = vmatmul.mubr.msk.f32.gmra.mrb[48].mxu0 %vm552_vm11, %v2628_v9 }
0x1196   :  { %8552 = vmatprep.mubr.msk.f32.mxu0 %vm10512_vm0, %v12378_v0 }
0x1199   :  { %8553 = vmatmul.mubr.msk.f32.gmra.mrb[50].mxu0 %vm552_vm11, %v2629_v33 }
0x119a   :  { %8595 = vmatprep.mubr.msk.f32.mxu0 %vm10512_vm0, %v12378_v0 }
0x119d   :  { %8596 = vmatmul.mubr.msk.f32.vlgmr.msra.gmra.mrb[52].mxu0 %vm552_vm11, %v11287_v12 }
0x119e   :  { %8600 = vmatprep.mubr.msk.bf16.mxu0 %vm640_vm9, %v10836_v43 }
0x1254   :  { %v2728_v19 = vpop.f32.mrb[38].mxu0 }
0x1255   :  { %v2729_v46 = vadd.f32 %v7696_v59, %v2728_v19  ;;  %v8536_v8 = vpop.f32.mrb[39].mxu0 }
0x1257   :  { %v2762_v31 = vsub.f32 0.0, %v2729_v46 }
0x1258   :  { %v2733_v54 = vpop.f32.mrb[40].mxu0 }
0x1259   :  { %v2769_v28 = vmul.f32 1.442695, %v2762_v31  ;;  %v2734_v63 = vadd.f32 %v7696_v59, %v2733_v54  ;;  %v8539_v3 = vpop.f32.mrb[41].mxu0 }
0x125b   :  { %9635 = vpow2.f32 %v2769_v28  ;;  %v2763_v13 = vsub.f32 0.0, %v2734_v63 }
0x125c   :  { %v2738_v55 = vpop.f32.mrb[42].mxu0 }
0x125d   :  { %v2771_v5 = vmul.f32 1.442695, %v2763_v13  ;;  %v2739_v17 = vadd.f32 %v7696_v59, %v2738_v55  ;;  %v8542_v35 = vpop.f32.mrb[43].mxu0 }
0x125f   :  { %9637 = vpow2.f32 %v2771_v5  ;;  %v2764_v14 = vsub.f32 0.0, %v2739_v17 }
0x1260   :  { %v2743_v18 = vpop.f32.mrb[44].mxu0 }
0x1261   :  { %v2773_v39 = vmul.f32 1.442695, %v2764_v14  ;;  %v2744_v40 = vadd.f32 %v7696_v59, %v2743_v18  ;;  %v8545_v61 = vpop.f32.mrb[45].mxu0 }
0x1263   :  { %9639 = vpow2.f32 %v2773_v39  ;;  %v2765_v20 = vsub.f32 0.0, %v2744_v40 }
0x1264   :  { %v2748_v62 = vpop.f32.mrb[46].mxu0 }
0x1265   :  { %v9636_v16 = vpop.eup %9635  ;;  %v2775_v38 = vmul.f32 1.442695, %v2765_v20  ;;  %v2749_v49 = vadd.f32 %v7696_v59, %v2748_v62  ;;  %v8548_v10 = vpop.f32.mrb[47].mxu0  ;;  %v7704_v62 = vld [vmem:[%s10690_s13] ss:$0 sm:$0xff] }
0x1266   :  { %v2783_v7 = vadd.f32 1.0, %v9636_v16 }
0x1267   :  { %9641 = vpow2.f32 %v2775_v38  ;;  %v2766_v53 = vsub.f32 0.0, %v2749_v49 }
0x1268   :  { %9643 = vrcp.f32 %v2783_v7  ;;  %v2753_v32 = vpop.f32.mrb[48].mxu0 }
0x1269   :  { %v9638_v37 = vpop.eup %9637  ;;  %v2777_v9 = vmul.f32 1.442695, %v2766_v53  ;;  %v2754_v11 = vadd.f32 %v7696_v59, %v2753_v32  ;;  %v8551_v33 = vpop.f32.mrb[49].mxu0 }
0x126a   :  { %v2784_v19 = vadd.f32 1.0, %v9638_v37 }
0x126b   :  { %9645 = vpow2.f32 %v2777_v9  ;;  %v2767_v8 = vsub.f32 0.0, %v2754_v11 }
0x126c   :  { %9647 = vrcp.f32 %v2784_v19  ;;  %v2758_v31 = vpop.f32.mrb[50].mxu0 }
0x126d   :  { %v9640_v54 = vpop.eup %9639  ;;  %v2779_v28 = vmul.f32 1.442695, %v2767_v8  ;;  %v2759_v3 = vadd.f32 %v7696_v59, %v2758_v31  ;;  %v8554_v13 = vpop.f32.mrb[51].mxu0 }
0x126e   :  { %v2785_v55 = vadd.f32 1.0, %v9640_v54 }
0x126f   :  { %9649 = vpow2.f32 %v2779_v28  ;;  %v2768_v5 = vsub.f32 0.0, %v2759_v3 }
0x1270   :  { %9651 = vrcp.f32 %v2785_v55  ;;  %v3226_v35 = vpop.f32.mrb[52].mxu0 }
0x1271   :  { %v9642_v14 = vpop.eup %9641  ;;  %v2781_v18 = vmul.f32 1.442695, %v2768_v5  ;;  %v8597_v39 = vpop.f32.mrb[53].mxu0 }
0x1272   :  { %v9644_v61 = vpop.eup %9643  ;;  %v2786_v20 = vadd.f32 1.0, %v9642_v14 }
0x1273   :  { %v2797_v16 = vmul.f32 %v9644_v61, %v2729_v46  ;;  %9653 = vpow2.f32 %v2781_v18 }
0x1274   :  { %9655 = vrcp.f32 %v2786_v20 }
0x1275   :  { %v9646_v38 = vpop.eup %9645  ;;  %v2811_v10 = vmul.f32 %v7704_v62, %v2797_v16 }
0x1276   :  { %v9648_v7 = vpop.eup %9647  ;;  %v2787_v53 = vadd.f32 1.0, %v9646_v38 }
0x1277   :  { %v2798_v59 = vmul.f32 %v9648_v7, %v2734_v63  ;;  %v2818_v32 = vsel %vm552_vm11, %v2811_v10, 0.0 }
0x1278   :  { %9657 = vrcp.f32 %v2787_v53  ;;  %2819 = vadd.xlane.f32.xlu1 %v2818_v32 }
0x1279   :  { %v9650_v37 = vpop.eup %9649  ;;  %v2812_v9 = vmul.f32 %v7704_v62, %v2798_v59 }
0x127a   :  { %v9652_v33 = vpop.eup %9651  ;;  %v2788_v19 = vadd.f32 1.0, %v9650_v37  ;;  %v810_v37 = vadd.f32 1e-08, %v10978_v25 }
0x127b   :  { %v2799_v8 = vmul.f32 %v9652_v33, %v2739_v17  ;;  %v2821_v31 = vsel %vm552_vm11, %v2812_v9, 0.0  ;;  %v814_v9 = vadd.f32 1e-08, %v10982_v27 }
0x127c   :  { %9659 = vrcp.f32 %v2788_v19  ;;  %2822 = vadd.xlane.f32.xlu0 %v2821_v31  ;;  %vm819_vm14 = vcmp.eq.f32.partialorder %v810_v37, inf  ;;  %vm821_vm15 = vcmp.eq.f32.partialorder %v810_v37, 0.0 }
0x127d   :  { %v9654_v46 = vpop.eup %9653  ;;  %v2813_v54 = vmul.f32 %v7704_v62, %v2799_v8  ;;  %vm847_vm1 = vcmp.eq.f32.partialorder %v814_v9, inf  ;;  %vm849_vm2 = vcmp.eq.f32.partialorder %v814_v9, 0.0 }
0x127e   :  { %v9656_v28 = vpop.eup %9655  ;;  %v2789_v13 = vadd.f32 1.0, %v9654_v46 }
0x127f   :  { %v2800_v55 = vmul.f32 %v9656_v28, %v2744_v40  ;;  %v2824_v63 = vsel %vm552_vm11, %v2813_v54, 0.0 }
0x1280   :  { %9661 = vrcp.f32 %v2789_v13  ;;  %2825 = vadd.xlane.f32.xlu0 %v2824_v63 }
0x1281   :  { %v2814_v5 = vmul.f32 %v7704_v62, %v2800_v55  ;;  %9663 = vrsqrt.f32 %v810_v37 }
0x1282   :  { %v9658_v14 = vpop.eup %9657  ;;  %9665 = vrsqrt.f32 %v814_v9 }
0x1283   :  { %v2801_v18 = vmul.f32 %v9658_v14, %v2749_v49  ;;  %v2827_v39 = vsel %vm552_vm11, %v2814_v5, 0.0  ;;  %v7718_v49 = vld [vmem:[#allocation16 + $0x2] ss:$0 sm:$0xff] }
0x1284   :  { %2828 = vadd.xlane.f32.xlu1 %v2827_v39  ;;  %v3227_v32 = vadd.f32 %v7718_v49, %v3226_v35  ;;  %v850_v35 = vand.u32 2147483648, %v814_v9 }
0x1285   :  { %v2815_v17 = vmul.f32 %v7704_v62, %v2801_v18 }
0x1286   :  { %v9660_v61 = vpop.eup %9659 }
0x1287   :  { %v2802_v20 = vmul.f32 %v9660_v61, %v2754_v11  ;;  %v2830_v16 = vsel %vm552_vm11, %v2815_v17, 0.0 }
0x1288   :  { %2831 = vadd.xlane.f32.xlu0 %v2830_v16 }
0x1289   :  { %v2816_v38 = vmul.f32 %v7704_v62, %v2802_v20 }
0x128a   :  { %v9662_v10 = vpop.eup %9661 }
0x128b   :  { %v2803_v7 = vmul.f32 %v9662_v10, %v2759_v3  ;;  %v2833_v40 = vsel %vm552_vm11, %v2816_v38, 0.0  ;;  %v9664_v11 = vpop.eup %9663  ;;  %v822_v3 = vand.u32 2147483648, %v810_v37 }
0x128c   :  { %2834 = vadd.xlane.f32.xlu1 %v2833_v40  ;;  %v818_v33 = vmul.f32 %v9664_v11, %v810_v37  ;;  %v9666_v31 = vpop.eup %9665 }
0x128d   :  { %v2817_v53 = vmul.f32 %v7704_v62, %v2803_v7  ;;  %v846_v46 = vmul.f32 %v9666_v31, %v814_v9 }
0x128e   :  { %v820_v19 = vsel %vm819_vm14, %v810_v37, %v818_v33 }
0x128f   :  { %v2836_v59 = vsel %vm552_vm11, %v2817_v53, 0.0  ;;  %v823_v62 = vsel %vm821_vm15, %v822_v3, %v820_v19  ;;  %v848_v54 = vsel %vm847_vm1, %v814_v9, %v846_v46 }
0x1290   :  { %2837 = vadd.xlane.f32.xlu0 %v2836_v59  ;;  %v866_v8 = vadd.f32 1.0, %v823_v62  ;;  %v851_v25 = vsel %vm849_vm2, %v850_v35, %v848_v54 }
0x1291   :  { %v870_v55 = vadd.f32 1.0, %v851_v25 }
0x1292   :  { %9667 = vrcp.f32 %v866_v8 }
0x1293   :  { %9669 = vrcp.f32 %v870_v55 }
0x129c   :  { %v9668_v28 = vpop.eup %9667 }
0x129d   :  { %3231 = vrot.lane.b32.xlu1 %v3227_v32, %s10514_s18  ;;  %v880_v27 = vmul.f32 %v9668_v28, %v10878_v15  ;;  %v9670_v15 = vpop.eup %9669  ;;  %v10083_v28 = vld [vmem:[%s12408_s20] sm:$0xff] }
0x129e   :  { %v884_v53 = vmul.f32 %v9670_v15, %v10889_v21 }
0x1305   :  { %v2820_v13 = vpop.xlane.xlu1 %2819 }
0x1306   :  { %v2839_v63 = vmul.f32 %v2820_v13, %v880_v27 }
0x1308   :  { %v2846_v18 = vmul.f32 %v2839_v63, %v11038_v41 }
0x1309   :  { %v2823_v5 = vpop.xlane.xlu0 %2822 }
0x130a   :  { %v2840_v14 = vmul.f32 %v2823_v5, %v10952_v44 }
0x130c   :  { %v2847_v39 = vmul.f32 %v2840_v14, %v11040_v23 }
0x130d   :  { %v2826_v17 = vpop.xlane.xlu0 %2825 }
0x130e   :  { %v2853_v61 = vpack.c.bf16 %v2847_v39, %v2846_v18  ;;  %v2841_v20 = vmul.f32 %v2826_v17, %v10955_v48 }
0x1310   :  { %8556 = vmatpush3.bf16.msra.mxu1 %v2853_v61  ;;  %v2848_v10 = vmul.f32 %v2841_v20, %v11045_v42 }
0x1311   :  { %v2829_v16 = vpop.xlane.xlu1 %2828  ;;  %8557 = vmatprep.subr.bf16.mxu1 %v12378_v0 }
0x1312   :  { %v2842_v38 = vmul.f32 %v2829_v16, %v10958_v51 }
0x1314   :  { %v2849_v7 = vmul.f32 %v2842_v38, %v11047_v45 }
0x1315   :  { %v2832_v44 = vpop.xlane.xlu0 %2831 }
0x1316   :  { %v2854_v40 = vpack.c.bf16 %v2849_v7, %v2848_v10  ;;  %v2843_v59 = vmul.f32 %v2832_v44, %v884_v53 }
0x1318   :  { %8558 = vmatpush3.bf16.msra.mxu1 %v2854_v40  ;;  %v2850_v37 = vmul.f32 %v2843_v59, %v11051_v2 }
0x1319   :  { %v2835_v49 = vpop.xlane.xlu1 %2834  ;;  %8559 = vmatprep.subr.bf16.mxu1 %v12378_v0 }
0x131a   :  { %v2844_v48 = vmul.f32 %v2835_v49, %v10973_v22 }
0x131c   :  { %v2851_v51 = vmul.f32 %v2844_v48, %v11055_v4 }
0x131d   :  { %v2838_v11 = vpop.xlane.xlu0 %2837  ;;  %v3232_v9 = vpop.permute.xlu1 %3231 }
0x131e   :  { %v2855_v33 = vpack.c.bf16 %v2851_v51, %v2850_v37  ;;  %v2845_v3 = vmul.f32 %v2838_v11, %v10976_v24  ;;  %v3234_v19 = vpack.c.bf16 %v3232_v9, %v3227_v32 }
0x1320   :  { %v2852_v62 = vmul.f32 %v2845_v3, %v11059_v47  ;;  %8560 = vmatpush3.bf16.msra.mxu1 %v2855_v33  ;;  %8598 = vmatprep.subr.bf16.mxu0 %v3234_v19 }
0x1321   :  { %8599 = vmatpush3.bf16.msra.mxu0 %v3234_v19  ;;  %8561 = vmatprep.subr.bf16.mxu1 %v12378_v0 }
0x1322   :  { %v2856_v21 = vpack.c.bf16 %v2852_v62, %v2852_v62  ;;  %8637 = vmatprep.subr.bf16.mxu0 %v12378_v0 }
0x1324   :  { %8601 = vmatmul.mubr.msk.bf16.vlgmr.msra.gmra.mrb[56].mxu0 %vm640_vm9, %v10842_v50  ;;  %v2858_v22 = vsel %vm1376_vm10, %v2856_v21, 0 }
0x1325   :  { %8562 = vmatpush3.bf16.msra.mxu1 %v2858_v22  ;;  %8604 = vmatprep.mubr.msk.bf16.mxu0 %vm640_vm9, %v10849_v57 }
0x1328   :  { %8564 = vmatmul.mubr.msk.bf16.vlgmr.msra.gmra.mrb[52].mxu1 %vm1372_vm13, %v11065_v36 }
0x1329   :  { %8569 = vmatprep.mubr.msk.bf16.mxu1 %vm640_vm9, %v10836_v43 }
0x132c   :  { %8605 = vmatmul.mubr.msk.bf16.gmra.mrb[60].mxu0 %vm640_vm9, %v10854_v60 }
0x132d   :  { %8645 = vmatprep.mubr.msk.bf16.mxu0 %vm10512_vm0, %v12378_v0 }
0x13f7   :  { %v11336_v24 = vpop.f32.mrb[56].mxu0 }
0x13f8   :  { %v11338_v32 = vpop.f32.mrb[57].mxu0 }
0x13f9   :  { %v11340_v8 = vpop.f32.mrb[58].mxu0 }
0x13fa   :  { %v11342_v31 = vpop.f32.mrb[59].mxu0 }
0x13fb   :  { %v2894_v46 = vpop.f32.mrb[52].mxu1 }
0x13fc   :  { %v2900_v35 = vmul.f32 0.01, %v2894_v46  ;;  %v8565_v54 = vpop.f32.mrb[53].mxu1 }
0x13fd   :  { %v2897_v25 = vpop.f32.mrb[54].mxu1 }
0x13fe   :  { %v2901_v13 = vadd.f32 %v10083_v28, %v2900_v35  ;;  %v8566_v55 = vpop.f32.mrb[55].mxu1  ;;  %v3379_v28 = vld [vmem:[#allocation17 + $0x40] sm:$0xff] }
0x13ff   :  { %v11345_v27 = vpop.f32.mrb[60].mxu0 }
0x1400   :  { %v11348_v63 = vmul.f32 %v2901_v13, %v11096_v6  ;;  %v11350_v5 = vpop.f32.mrb[61].mxu0  ;;  %v3380_v13 = vld [vmem:[#allocation17 + $0x48] sm:$0xff] }
0x1401   :  { %v8607_v14 = vpop.f32.mrb[62].mxu0  ;;  %v9223_v55 = vpack.c.bf16 %v3380_v13, %v3379_v28 }
0x1402   :  { %12423 = vst [vmem:[#allocation57_spill] sm:$0xff] %v11348_v63  ;;  %v2904_v18 = vpack.c.bf16 %v11348_v63, %v11348_v63  ;;  %v11354_v39 = vpop.f32.mrb[63].mxu0  ;;  %v3381_v14 = vld [vmem:[#allocation17 + $0x50] sm:$0xff] }
0x1404   :  { %v2905_v17 = vunpack.c.l.bf16 %v2904_v18  ;;  %v3382_v18 = vld [vmem:[#allocation17 + $0x58] sm:$0xff] }
0x1406   :  { %v2906_v61 = vsub.f32 %v11348_v63, %v2905_v17  ;;  %v2907_v16 = vsub.f32 0.0, %v2905_v17 }
0x1408   :  { %v2909_v20 = vsub.f32 0.0, %v2906_v61  ;;  %v2908_v15 = vpack.c.bf16 %v2907_v16, %v2905_v17  ;;  %v9226_v17 = vpack.c.bf16 %v3382_v18, %v3381_v14 }
0x140a   :  { %v2910_v38 = vpack.c.bf16 %v2909_v20, %v2906_v61  ;;  %v11412_v61 = vld [vmem:[%s12413_s14 + $0x2] ss:$0 sm:$0xff] }
0x140b   :  { %v7727_v20 = vld [vmem:[%s12414_s23 + $0x2] ss:$0 sm:$0xff] }
0x140c   :  { %8567 = vmatprep.subr.bf16.mxu1 %v2910_v38  ;;  %v3324_v28 = vmul.f32 %v7727_v20, %v10962_v56  ;;  %v3326_v18 = vmul.f32 %v7727_v20, %v11003_v1 }
0x140d   :  { %8568 = vmatpush3.bf16.msra.mxu1 %v2910_v38 }
0x140e   :  { %8577 = vmatprep.subr.bf16.mxu1 %v2908_v15 }
0x1410   :  { %8570 = vmatmul.mubr.msk.bf16.vlgmr.msra.gmra.mrb[56].mxu1 %vm640_vm9, %v10842_v50 }
0x1411   :  { %8573 = vmatprep.mubr.msk.bf16.mxu1 %vm640_vm9, %v10849_v57  ;;  %8578 = vmatpush3.bf16.msra.mxu1 %v2908_v15 }
0x1412   :  { %9222 = vmatprep.subr.bf16.mxu1 %v12376_v29 }
0x1418   :  { %8574 = vmatmul.mubr.msk.bf16.gmra.mrb[60].mxu1 %vm640_vm9, %v10854_v60 }
0x1419   :  { %8579 = vmatprep.mubr.msk.bf16.mxu1 %vm640_vm9, %v10836_v43 }
0x1420   :  { %8580 = vmatmul.mubr.msk.bf16.vlgmr.msra.gmra.mrb[56].mxu1 %vm640_vm9, %v10842_v50 }
0x1421   :  { %8583 = vmatprep.mubr.msk.bf16.mxu1 %vm640_vm9, %v10849_v57  ;;  %9224 = vmatpush3.bf16.msra.mxu1 %v9223_v55 }
0x1422   :  { %9225 = vmatprep.subr.bf16.mxu1 %v12376_v29 }
0x1425   :  { %9227 = vmatpush3.bf16.msra.mxu1 %v9226_v17 }
0x1426   :  { %9246 = vmatprep.subr.bf16.mxu1 %v12376_v29 }
0x1428   :  { %8584 = vmatmul.mubr.msk.bf16.gmra.mrb[60].mxu1 %vm640_vm9, %v10854_v60 }
0x1429   :  { %8616 = vmatprep.mubr.msk.f32.mxu1 %vm10512_vm0, %v12378_v0 }
0x14f3   :  { %v11374_v10 = vpop.f32.mrb[56].mxu1 }
0x14f4   :  { %v11376_v7 = vpop.f32.mrb[57].mxu1  ;;  %v3041_v48 = vmul.f32 %v11374_v10, %v11374_v10 }
0x14f5   :  { %v3039_v44 = vmul.f32 %v11376_v7, %v11376_v7  ;;  %v11380_v40 = vpop.f32.mrb[58].mxu1 }
0x14f6   :  { %v11382_v53 = vpop.f32.mrb[59].mxu1  ;;  %v3042_v19 = vmul.f32 %v11380_v40, %v11380_v40  ;;  %v3052_v62 = vsel %vm788_vm12, %v3041_v48, 0.0 }
0x14f7   :  { %v3040_v59 = vmul.f32 %v11382_v53, %v11382_v53  ;;  %v3046_v49 = vsel %vm788_vm12, %v3039_v44, 0.0  ;;  %v3322_v44 = vmul.f32 %v7727_v20, %v10980_v26 }
0x14f8   :  { %3047 = vadd.xlane.f32.xlu0 %v3046_v49  ;;  %v3055_v46 = vsel %vm788_vm12, %v3042_v19, 0.0 }
0x14f9   :  { %v3049_v51 = vsel %vm788_vm12, %v3040_v59, 0.0 }
0x14fb   :  { %v11389_v37 = vpop.f32.mrb[60].mxu1 }
0x14fc   :  { %12424 = vst [vmem:[#allocation58_spill] sm:$0xff] %v11389_v37  ;;  %3050 = vadd.xlane.f32.xlu0 %v3049_v51  ;;  %v11392_v11 = vpop.f32.mrb[61].mxu1  ;;  %v3045_v35 = vmul.f32 %v11389_v37, %v11389_v37 }
0x14fd   :  { %v3043_v9 = vmul.f32 %v11392_v11, %v11392_v11  ;;  %v8586_v33 = vpop.f32.mrb[62].mxu1 }
0x14fe   :  { %v11396_v3 = vpop.f32.mrb[63].mxu1  ;;  %v3064_v25 = vsel %vm788_vm12, %v3045_v35, 0.0 }
0x14ff   :  { %v3058_v21 = vsel %vm788_vm12, %v3043_v9, 0.0  ;;  %v3044_v22 = vmul.f32 %v11396_v3, %v11396_v3 }
0x1500   :  { %3053 = vadd.xlane.f32.xlu0 %v3052_v62  ;;  %3059 = vadd.xlane.f32.xlu1 %v3058_v21 }
0x1501   :  { %v3061_v54 = vsel %vm788_vm12, %v3044_v22, 0.0 }
0x1504   :  { %3056 = vadd.xlane.f32.xlu0 %v3055_v46 }
0x1508   :  { %3062 = vadd.xlane.f32.xlu0 %v3061_v54 }
0x150c   :  { %3065 = vadd.xlane.f32.xlu0 %v3064_v25 }
0x1585   :  { %v11415_v16 = vpop.xlane.xlu0 %3047 }
0x1586   :  { %v3067_v38 = vadd.f32 1e-08, %v11415_v16  ;;  %v3243_v15 = vmul.f32 %v11412_v61, %v11415_v16 }
0x1588   :  { %9671 = vrsqrt.f32 %v3067_v38  ;;  %v3285_v59 = vadd.f32 %v11338_v32, %v3243_v15  ;;  %v3323_v32 = vmul.f32 %v7727_v20, %v10960_v52  ;;  %vm3076_vm3 = vcmp.eq.f32.partialorder %v3067_v38, inf }
0x1589   :  { %v11422_v49 = vpop.xlane.xlu0 %3050  ;;  %vm3078_vm4 = vcmp.eq.f32.partialorder %v3067_v38, 0.0 }
0x158a   :  { %v11424_v48 = vadd.f32 %v3322_v44, %v3285_v59  ;;  %v11427_v51 = vadd.f32 1e-08, %v11422_v49  ;;  %v3244_v9 = vmul.f32 %v11412_v61, %v11422_v49  ;;  %v3325_v59 = vmul.f32 %v7727_v20, %v10985_v30 }
0x158c   :  { %v3336_v33 = vsub.f32 0.0, %v11424_v48  ;;  %9673 = vrsqrt.f32 %v11427_v51  ;;  %v3288_v19 = vadd.f32 %v11342_v31, %v3244_v9  ;;  %vm3083_vm5 = vcmp.eq.f32.partialorder %v11427_v51, inf }
0x158d   :  { %v11434_v62 = vpop.xlane.xlu0 %3053  ;;  %v11436_v21 = vpop.xlane.xlu1 %3059  ;;  %vm3085_vm6 = vcmp.eq.f32.partialorder %v11427_v51, 0.0 }
0x158e   :  { %v3343_v22 = vmul.f32 1.442695, %v3336_v33  ;;  %v11440_v46 = vadd.f32 1e-08, %v11434_v62  ;;  %v3245_v35 = vmul.f32 %v11412_v61, %v11434_v62  ;;  %v3247_v54 = vmul.f32 %v11412_v61, %v11436_v21 }
0x158f   :  { %v11446_v25 = vadd.f32 %v3323_v32, %v3288_v19  ;;  %v3328_v19 = vmul.f32 %v7727_v20, %v11010_v34 }
0x1590   :  { %9675 = vpow2.f32 %v3343_v22  ;;  %v3293_v31 = vadd.f32 %v11336_v24, %v3245_v35  ;;  %v3301_v13 = vadd.f32 %v11350_v5, %v3247_v54  ;;  %v3327_v5 = vmul.f32 %v7727_v20, %v10998_v58 }
0x1591   :  { %9677 = vrsqrt.f32 %v11440_v46  ;;  %v11452_v55 = vpop.xlane.xlu0 %3056  ;;  %v3337_v14 = vsub.f32 0.0, %v11446_v25  ;;  %vm3090_vm7 = vcmp.eq.f32.partialorder %v11440_v46, inf  ;;  %vm3092_vm8 = vcmp.eq.f32.partialorder %v11440_v46, 0.0 }
0x1592   :  { %v9672_v17 = vpop.eup %9671  ;;  %v11457_v15 = vadd.f32 1e-08, %v11452_v55  ;;  %v3246_v44 = vmul.f32 %v11412_v61, %v11452_v55  ;;  %v11461_v24 = vadd.f32 %v3324_v28, %v3293_v31  ;;  %v11464_v33 = vadd.f32 %v3326_v18, %v3301_v13 }
0x1593   :  { %v3345_v9 = vmul.f32 1.442695, %v3337_v14  ;;  %v3075_v35 = vmul.f32 %v9672_v17, %v3067_v38  ;;  %v3079_v28 = vand.u32 2147483648, %v3067_v38 }
0x1594   :  { %9679 = vrsqrt.f32 %v11457_v15  ;;  %v3296_v32 = vadd.f32 %v11340_v8, %v3246_v44  ;;  %v3338_v22 = vsub.f32 0.0, %v11461_v24  ;;  %v3340_v31 = vsub.f32 0.0, %v11464_v33 }
0x1595   :  { %v11471_v54 = vpop.xlane.xlu0 %3062  ;;  %9681 = vpow2.f32 %v3345_v9  ;;  %v3077_v44 = vsel %vm3076_vm3, %v3067_v38, %v3075_v35  ;;  %vm3097_vm14 = vcmp.eq.f32.partialorder %v11457_v15, inf  ;;  %vm3099_vm15 = vcmp.eq.f32.partialorder %v11457_v15, 0.0 }
0x1596   :  { %v9674_v13 = vpop.eup %9673  ;;  %v11475_v14 = vadd.f32 1e-08, %v11471_v54  ;;  %v3248_v20 = vmul.f32 %v11412_v61, %v11471_v54  ;;  %v3347_v18 = vmul.f32 1.442695, %v3338_v22  ;;  %v11479_v29 = vadd.f32 %v3325_v59, %v3296_v32 }
0x1597   :  { %v3351_v8 = vmul.f32 1.442695, %v3340_v31  ;;  %v3080_v0 = vsel %vm3078_vm4, %v3079_v28, %v3077_v44  ;;  %v3082_v37 = vmul.f32 %v9674_v13, %v11427_v51  ;;  %v3086_v59 = vand.u32 2147483648, %v11427_v51 }
0x1598   :  { %9683 = vrsqrt.f32 %v11475_v14  ;;  %v3304_v17 = vadd.f32 %v11354_v39, %v3248_v20  ;;  %v3339_v9 = vsub.f32 0.0, %v11479_v29  ;;  %v3123_v28 = vadd.f32 1.0, %v3080_v0 }
0x1599   :  { %v11485_v63 = vpop.xlane.xlu0 %3065  ;;  %9685 = vpow2.f32 %v3347_v18  ;;  %v3093_v13 = vand.u32 2147483648, %v11440_v46  ;;  %v3084_v18 = vsel %vm3083_vm5, %v11427_v51, %v3082_v37  ;;  %vm3111_vm1 = vcmp.eq.f32.partialorder %v11475_v14, inf }
0x159a   :  { %v9676_v32 = vpop.eup %9675  ;;  %v3249_v38 = vmul.f32 %v11412_v61, %v11485_v63  ;;  %v3349_v22 = vmul.f32 1.442695, %v3339_v9  ;;  %v11494_v31 = vadd.f32 %v3327_v5, %v3304_v17  ;;  %9687 = vpow2.f32 %v3351_v8 }
0x159b   :  { %v9678_v39 = vpop.eup %9677  ;;  %v3357_v35 = vadd.f32 1.0, %v9676_v32  ;;  %v3087_v9 = vsel %vm3085_vm6, %v3086_v59, %v3084_v18  ;;  %vm3113_vm2 = vcmp.eq.f32.partialorder %v11475_v14, 0.0 }
0x159c   :  { %v3309_v20 = vadd.f32 %v11345_v27, %v3249_v38  ;;  %v3089_v61 = vmul.f32 %v9678_v39, %v11440_v46  ;;  %v3341_v44 = vsub.f32 0.0, %v11494_v31  ;;  %v3124_v27 = vadd.f32 1.0, %v3087_v9 }
0x159d   :  { %9689 = vrcp.f32 %v3357_v35  ;;  %v3100_v39 = vand.u32 2147483648, %v11457_v15 }
0x159e   :  { %v9680_v0 = vpop.eup %9679  ;;  %9691 = vpow2.f32 %v3349_v22  ;;  %v11506_v5 = vadd.f32 %v3328_v19, %v3309_v20  ;;  %v3091_v8 = vsel %vm3090_vm7, %v11440_v46, %v3089_v61  ;;  %v3353_v17 = vmul.f32 1.442695, %v3341_v44 }
0x159f   :  { %v9682_v37 = vpop.eup %9681  ;;  %9693 = vrcp.f32 %v3123_v28  ;;  %v3094_v32 = vsel %vm3092_vm8, %v3093_v13, %v3091_v8  ;;  %v3096_v51 = vmul.f32 %v9680_v0, %v11457_v15  ;;  %v3114_v0 = vand.u32 2147483648, %v11475_v14 }
0x15a0   :  { %v3358_v59 = vadd.f32 1.0, %v9682_v37  ;;  %v3342_v38 = vsub.f32 0.0, %v11506_v5  ;;  %9695 = vrcp.f32 %v3124_v27  ;;  %v3125_v22 = vadd.f32 1.0, %v3094_v32 }
0x15a1   :  { %9697 = vpow2.f32 %v3353_v17  ;;  %v3098_v19 = vsel %vm3097_vm14, %v11457_v15, %v3096_v51 }
0x15a2   :  { %v9684_v35 = vpop.eup %9683  ;;  %9699 = vrcp.f32 %v3358_v59  ;;  %v3355_v28 = vmul.f32 1.442695, %v3342_v38  ;;  %v3101_v13 = vsel %vm3099_vm15, %v3100_v39, %v3098_v19  ;;  %v12425_v39 = vmov 0.0  }
0x15a3   :  { %v9686_v46 = vpop.eup %9685  ;;  %9701 = vrcp.f32 %v3125_v22  ;;  %v3126_v18 = vadd.f32 1.0, %v3101_v13  ;;  %v3110_v61 = vmul.f32 %v9684_v35, %v11475_v14 }
0x15a4   :  { %v3359_v20 = vadd.f32 1.0, %v9686_v46  ;;  %9703 = vpow2.f32 %v3355_v28  ;;  %v9688_v44 = vpop.eup %9687 }
0x15a5   :  { %v3112_v9 = vsel %vm3111_vm1, %v11475_v14, %v3110_v61  ;;  %v3361_v51 = vadd.f32 1.0, %v9688_v44 }
0x15a6   :  { %9705 = vrcp.f32 %v3359_v20  ;;  %v3115_v37 = vsel %vm3113_vm2, %v3114_v0, %v3112_v9 }
0x15a7   :  { %v9690_v27 = vpop.eup %9689  ;;  %9707 = vrcp.f32 %v3126_v18  ;;  %v3128_v59 = vadd.f32 1.0, %v3115_v37 }
0x15a8   :  { %v9692_v15 = vpop.eup %9691  ;;  %v3371_v8 = vmul.f32 %v9690_v27, %v11424_v48 }
0x15a9   :  { %v9694_v17 = vpop.eup %9693  ;;  %v3360_v32 = vadd.f32 1.0, %v9692_v15 }
0x15aa   :  { %v9696_v38 = vpop.eup %9695  ;;  %8617 = vmatmul.mubr.msk.f32.vlgmr.msra.gmra.mrb[64].mxu1 %vm552_vm11, %v3371_v8  ;;  %v11528_v22 = vmul.f32 %v9694_v17, %v11376_v7 }
0x15ab   :  { %v9698_v19 = vpop.eup %9697  ;;  %8619 = vmatprep.mubr.msk.f32.mxu1 %vm10512_vm0, %v12425_v39  ;;  %9709 = vrcp.f32 %v3360_v32  ;;  %v11533_v14 = vmul.f32 %v9696_v38, %v11382_v53 }
0x15ac   :  { %v9700_v48 = vpop.eup %9699  ;;  %9711 = vrcp.f32 %v3128_v59  ;;  %v3362_v46 = vadd.f32 1.0, %v9698_v19 }
0x15ad   :  { %v9702_v35 = vpop.eup %9701  ;;  %v3372_v28 = vmul.f32 %v9700_v48, %v11446_v25  ;;  %9713 = vrcp.f32 %v3361_v51 }
0x15ae   :  { %v9704_v13 = vpop.eup %9703  ;;  %v11537_v20 = vmul.f32 %v9702_v35, %v11374_v10  ;;  %9715 = vrcp.f32 %v3362_v46 }
0x15af   :  { %8620 = vmatmul.mubr.msk.f32.gmra.mrb[66].mxu1 %vm552_vm11, %v3372_v28  ;;  %v3363_v18 = vadd.f32 1.0, %v9704_v13 }
0x15b0   :  { %v9706_v7 = vpop.eup %9705  ;;  %8622 = vmatprep.mubr.msk.f32.mxu1 %vm10512_vm0, %v12425_v39 }
0x15b1   :  { %v3373_v53 = vmul.f32 %v9706_v7, %v11461_v24  ;;  %v9708_v61 = vpop.eup %9707  ;;  %9717 = vrcp.f32 %v3363_v18 }
0x15b2   :  { %v11545_v25 = vmul.f32 %v9708_v61, %v11380_v40 }
0x15b3   :  { %8623 = vmatmul.mubr.msk.f32.gmra.mrb[68].mxu1 %vm552_vm11, %v3373_v53 }
0x15b4   :  { %8625 = vmatprep.mubr.msk.f32.mxu1 %vm10512_vm0, %v12425_v39 }
0x15b5   :  { %v9710_v10 = vpop.eup %9709 }
0x15b6   :  { %v9712_v44 = vpop.eup %9711  ;;  %v3374_v9 = vmul.f32 %v9710_v10, %v11479_v29 }
0x15b7   :  { %v9714_v0 = vpop.eup %9713  ;;  %v11551_v24 = vmul.f32 %v9712_v44, %v11396_v3 }
0x15b8   :  { %8626 = vmatmul.mubr.msk.f32.gmra.mrb[70].mxu1 %vm552_vm11, %v3374_v9  ;;  %v3375_v40 = vmul.f32 %v9714_v0, %v11464_v33  ;;  %v9716_v27 = vpop.eup %9715  ;;  %v7729_v33 = vld [vmem:[%s12415_s25 + $0x2] ss:$0 sm:$0xff] }
0x15b9   :  { %8628 = vmatprep.mubr.msk.f32.mxu1 %vm10512_vm0, %v12425_v39  ;;  %v3376_v29 = vmul.f32 %v9716_v27, %v11494_v31 }
0x15bb   :  { %v9718_v15 = vpop.eup %9717 }
0x15bc   :  { %8629 = vmatmul.mubr.msk.f32.gmra.mrb[72].mxu1 %vm552_vm11, %v3375_v40  ;;  %v3377_v3 = vmul.f32 %v9718_v15, %v11506_v5 }
0x15bd   :  { %8631 = vmatprep.mubr.msk.f32.mxu1 %vm10512_vm0, %v12425_v39 }
0x15c0   :  { %8632 = vmatmul.mubr.msk.f32.gmra.mrb[74].mxu1 %vm552_vm11, %v3376_v29 }
0x15c1   :  { %8634 = vmatprep.mubr.msk.f32.mxu1 %vm10512_vm0, %v12425_v39 }
0x15c4   :  { %8635 = vmatmul.mubr.msk.f32.gmra.mrb[76].mxu1 %vm552_vm11, %v3377_v3 }
0x15c5   :  { %8690 = vmatprep.mubr.msk.f32.mxu1 %vm10512_vm0, %v12425_v39 }
0x167d   :  { %v3478_v8 = vpop.f32.mrb[64].mxu1 }
0x167e   :  { %v3479_v37 = vadd.f32 %v7729_v33, %v3478_v8  ;;  %v8618_v17 = vpop.f32.mrb[65].mxu1 }
0x1680   :  { %v3512_v32 = vsub.f32 0.0, %v3479_v37 }
0x1682   :  { %v3519_v51 = vmul.f32 1.442695, %v3512_v32  ;;  %v3483_v31 = vpop.f32.mrb[66].mxu1 }
0x1683   :  { %v3484_v59 = vadd.f32 %v7729_v33, %v3483_v31  ;;  %v8621_v38 = vpop.f32.mrb[67].mxu1 }
0x1684   :  { %9719 = vpow2.f32 %v3519_v51 }
0x1685   :  { %v3513_v19 = vsub.f32 0.0, %v3484_v59 }
0x1686   :  { %v3488_v48 = vpop.f32.mrb[68].mxu1 }
0x1687   :  { %v3521_v35 = vmul.f32 1.442695, %v3513_v19  ;;  %v3489_v28 = vadd.f32 %v7729_v33, %v3488_v48  ;;  %v8624_v5 = vpop.f32.mrb[69].mxu1 }
0x1689   :  { %9721 = vpow2.f32 %v3521_v35  ;;  %v3514_v46 = vsub.f32 0.0, %v3489_v28 }
0x168b   :  { %v3523_v13 = vmul.f32 1.442695, %v3514_v46  ;;  %v3493_v7 = vpop.f32.mrb[70].mxu1 }
0x168c   :  { %v3494_v53 = vadd.f32 %v7729_v33, %v3493_v7  ;;  %v8627_v18 = vpop.f32.mrb[71].mxu1 }
0x168d   :  { %9723 = vpow2.f32 %v3523_v13 }
0x168e   :  { %v9720_v61 = vpop.eup %9719  ;;  %v3515_v10 = vsub.f32 0.0, %v3494_v53 }
0x168f   :  { %v3533_v44 = vadd.f32 1.0, %v9720_v61  ;;  %v3498_v9 = vpop.f32.mrb[72].mxu1 }
0x1690   :  { %v3525_v0 = vmul.f32 1.442695, %v3515_v10  ;;  %v3499_v40 = vadd.f32 %v7729_v33, %v3498_v9  ;;  %v8630_v27 = vpop.f32.mrb[73].mxu1 }
0x1691   :  { %9725 = vrcp.f32 %v3533_v44 }
0x1692   :  { %9727 = vpow2.f32 %v3525_v0  ;;  %v3516_v29 = vsub.f32 0.0, %v3499_v40 }
0x1693   :  { %v9722_v15 = vpop.eup %9721  ;;  %v3503_v3 = vpop.f32.mrb[74].mxu1 }
0x1694   :  { %v3534_v8 = vadd.f32 1.0, %v9722_v15  ;;  %v3527_v17 = vmul.f32 1.442695, %v3516_v29  ;;  %v3504_v32 = vadd.f32 %v7729_v33, %v3503_v3  ;;  %v8633_v51 = vpop.f32.mrb[75].mxu1 }
0x1696   :  { %9729 = vrcp.f32 %v3534_v8  ;;  %v3517_v31 = vsub.f32 0.0, %v3504_v32 }
0x1697   :  { %v9724_v38 = vpop.eup %9723  ;;  %9731 = vpow2.f32 %v3527_v17  ;;  %v3508_v19 = vpop.f32.mrb[76].mxu1 }
0x1698   :  { %v3535_v48 = vadd.f32 1.0, %v9724_v38  ;;  %v3529_v35 = vmul.f32 1.442695, %v3517_v31  ;;  %v3509_v5 = vadd.f32 %v7729_v33, %v3508_v19  ;;  %v8636_v46 = vpop.f32.mrb[77].mxu1 }
0x169a   :  { %9733 = vrcp.f32 %v3535_v48  ;;  %v3518_v13 = vsub.f32 0.0, %v3509_v5 }
0x169b   :  { %v9726_v7 = vpop.eup %9725  ;;  %9735 = vpow2.f32 %v3529_v35 }
0x169c   :  { %v9728_v18 = vpop.eup %9727  ;;  %v3531_v61 = vmul.f32 1.442695, %v3518_v13  ;;  %v3547_v44 = vmul.f32 %v9726_v7, %v3479_v37 }
0x169d   :  { %v3536_v10 = vadd.f32 1.0, %v9728_v18 }
0x169e   :  { %9737 = vpow2.f32 %v3531_v61  ;;  %v3554_v15 = vmul.f32 %v3547_v44, %v11038_v41 }
0x169f   :  { %9739 = vrcp.f32 %v3536_v10 }
0x16a0   :  { %v9730_v9 = vpop.eup %9729 }
0x16a1   :  { %v9732_v0 = vpop.eup %9731  ;;  %v3548_v27 = vmul.f32 %v9730_v9, %v3484_v59 }
0x16a2   :  { %v3537_v29 = vadd.f32 1.0, %v9732_v0 }
0x16a3   :  { %v3555_v3 = vmul.f32 %v3548_v27, %v11040_v23 }
0x16a4   :  { %v9734_v33 = vpop.eup %9733  ;;  %9741 = vrcp.f32 %v3537_v29  ;;  %v3615_v29 = vld [vmem:[#allocation20 + $0x40] sm:$0xff] }
0x16a5   :  { %v9736_v8 = vpop.eup %9735  ;;  %v3561_v17 = vpack.c.bf16 %v3555_v3, %v3554_v15  ;;  %v3549_v38 = vmul.f32 %v9734_v33, %v3489_v28  ;;  %v3616_v15 = vld [vmem:[#allocation20 + $0x48] sm:$0xff]  ;;  %v3617_v33 = vld [vmem:[#allocation20 + $0x50] sm:$0xff] }
0x16a6   :  { %v3538_v51 = vadd.f32 1.0, %v9736_v8  ;;  %v9229_v3 = vpack.c.bf16 %v3616_v15, %v3615_v29  ;;  %v3618_v8 = vld [vmem:[#allocation20 + $0x58] sm:$0xff]  ;;  %v7748_v29 = vld [vmem:[%s12409_s22 + $0x78] sm:$0xff] }
0x16a7   :  { %8638 = vmatpush3.bf16.msra.mxu0 %v3561_v17  ;;  %v3556_v59 = vmul.f32 %v3549_v38, %v11045_v42  ;;  %v3610_v17 = vld [vmem:[#allocation19 + $0x40] sm:$0xff] }
0x16a8   :  { %v9738_v31 = vpop.eup %9737  ;;  %9743 = vrcp.f32 %v3538_v51  ;;  %8639 = vmatprep.subr.bf16.mxu0 %v12425_v39  ;;  %v3611_v51 = vld [vmem:[#allocation19 + $0x48] sm:$0xff] }
0x16a9   :  { %v9740_v37 = vpop.eup %9739  ;;  %v3539_v19 = vadd.f32 1.0, %v9738_v31  ;;  %v9235_v38 = vpack.c.bf16 %v3611_v51, %v3610_v17 }
0x16aa   :  { %v3550_v48 = vmul.f32 %v9740_v37, %v3494_v53 }
0x16ab   :  { %9745 = vrcp.f32 %v3539_v19 }
0x16ac   :  { %v3557_v35 = vmul.f32 %v3550_v48, %v11047_v45  ;;  %v3612_v48 = vld [vmem:[#allocation19 + $0x50] sm:$0xff] }
0x16ae   :  { %v9742_v46 = vpop.eup %9741  ;;  %v3562_v13 = vpack.c.bf16 %v3557_v35, %v3556_v59  ;;  %v3613_v59 = vld [vmem:[#allocation19 + $0x58] sm:$0xff] }
0x16af   :  { %v3551_v7 = vmul.f32 %v9742_v46, %v3499_v40 }
0x16b0   :  { %8640 = vmatpush3.bf16.msra.mxu0 %v3562_v13  ;;  %v9238_v13 = vpack.c.bf16 %v3613_v59, %v3612_v48 }
0x16b1   :  { %8641 = vmatprep.subr.bf16.mxu0 %v12425_v39  ;;  %v3558_v10 = vmul.f32 %v3551_v7, %v11051_v2  ;;  %v3778_v7 = vld [vmem:[#allocation22 + $0x40] sm:$0xff] }
0x16b2   :  { %v9744_v18 = vpop.eup %9743 }
0x16b3   :  { %v3552_v61 = vmul.f32 %v9744_v18, %v3504_v32  ;;  %v12426_v32 = vmov 0.0|0.0   ;;  %v3779_v18 = vld [vmem:[#allocation22 + $0x48] sm:$0xff] }
0x16b5   :  { %v9746_v28 = vpop.eup %9745  ;;  %v3559_v44 = vmul.f32 %v3552_v61, %v11055_v4  ;;  %v9241_v61 = vpack.c.bf16 %v3779_v18, %v3778_v7 }
0x16b6   :  { %v3553_v9 = vmul.f32 %v9746_v28, %v3509_v5  ;;  %v9232_v5 = vpack.c.bf16 %v3618_v8, %v3617_v33  ;;  %v3780_v28 = vld [vmem:[#allocation22 + $0x50] sm:$0xff] }
0x16b7   :  { %v3563_v53 = vpack.c.bf16 %v3559_v44, %v3558_v10  ;;  %v3781_v10 = vld [vmem:[#allocation22 + $0x58] sm:$0xff]  ;;  %v7741_v8 = vld [vmem:[%s12416_s26 + $0x2] ss:$0 sm:$0xff] }
0x16b8   :  { %v3560_v0 = vmul.f32 %v3553_v9, %v11059_v47  ;;  %v9244_v44 = vpack.c.bf16 %v3781_v10, %v3780_v28  ;;  %v7745_v9 = vld [vmem:[%s12409_s22 + $0x60] sm:$0xff]  ;;  %v7749_v28 = vld [vmem:[#allocation16 + $0x3] ss:$0 sm:$0xff] }
0x16b9   :  { %8642 = vmatpush3.bf16.msra.mxu0 %v3563_v53  ;;  %v7746_v53 = vld [vmem:[%s12409_s22 + $0x68] sm:$0xff] }
0x16ba   :  { %v3564_v27 = vpack.c.bf16 %v3560_v0, %v3560_v0  ;;  %8643 = vmatprep.subr.bf16.mxu0 %v12425_v39  ;;  %v7747_v0 = vld [vmem:[%s12409_s22 + $0x70] sm:$0xff] }
0x16bb   :  { %v9250_v15 = vpack.c.bf16 %v7748_v29, %v7747_v0 }
0x16bc   :  { %v3566_v40 = vsel %vm1376_vm10, %v3564_v27, 0  ;;  %v9247_v27 = vpack.c.bf16 %v7746_v53, %v7745_v9 }
0x16bd   :  { %8644 = vmatpush3.bf16.msra.mxu0 %v3566_v40 }
0x16be   :  { %9228 = vmatprep.subr.bf16.mxu0 %v12426_v32  ;;  %9248 = vmatpush3.bf16.msra.mxu1 %v9247_v27  ;;  %v4102_v27 = vld [vmem:[#allocation17 + $0x68] sm:$0xff] }
0x16bf   :  { %9249 = vmatprep.subr.bf16.mxu1 %v12426_v32 }
0x16c0   :  { %8646 = vmatmul.mubr.msk.bf16.vlgmr.msra.gmra.mrb[64].mxu0 %vm1372_vm13, %v11065_v36 }
0x16c1   :  { %9230 = vmatpush3.bf16.msra.mxu0 %v9229_v3  ;;  %8657 = vmatprep.mubr.msk.f32.mxu0 %vm10512_vm0, %v12425_v39 }
0x16c2   :  { %9231 = vmatprep.subr.bf16.mxu0 %v12426_v32  ;;  %9251 = vmatpush3.bf16.msra.mxu1 %v9250_v15  ;;  %v4103_v15 = vld [vmem:[#allocation17 + $0x70] sm:$0xff] }
0x16c3   :  { %9252 = vmatprep.subr.bf16.mxu1 %v12426_v32 }
0x16c5   :  { %9233 = vmatpush3.bf16.msra.mxu0 %v9232_v5 }
0x16c6   :  { %9234 = vmatprep.subr.bf16.mxu0 %v12426_v32 }
0x1793   :  { %v3602_v31 = vpop.f32.mrb[64].mxu0 }
0x1794   :  { %v3608_v37 = vmul.f32 0.01, %v3602_v31  ;;  %v8647_v19 = vpop.f32.mrb[65].mxu0 }
0x1795   :  { %v3605_v35 = vpop.f32.mrb[66].mxu0 }
0x1796   :  { %v8648_v46 = vpop.f32.mrb[67].mxu0  ;;  %8658 = vmatmul.mubr.msk.f32.vlgmr.msra.gmra.mrb[54].mxu0 %vm552_vm11, %v3608_v37 }
0x1797   :  { %9236 = vmatpush3.bf16.msra.mxu0 %v9235_v38  ;;  %8668 = vmatprep.mubr.msk.f32.mxu0 %vm10512_vm0, %v12425_v39  ;;  %v7744_v46 = vld [vmem:[%s12417_s12 + $0x2] ss:$0 sm:$0xff] }
0x1798   :  { %9237 = vmatprep.subr.bf16.mxu0 %v12426_v32 }
0x179b   :  { %9239 = vmatpush3.bf16.msra.mxu0 %v9238_v13 }
0x179c   :  { %9240 = vmatprep.subr.bf16.mxu0 %v12426_v32 }
0x179e   :  { %8669 = vmatmul.mubr.msk.f32.vlgmr.msra.gmra.mrb[68].mxu0 %vm552_vm11, %v11287_v12 }
0x179f   :  { %8679 = vmatprep.mubr.msk.f32.mxu0 %vm10512_vm0, %v12425_v39  ;;  %9242 = vmatpush3.bf16.msra.mxu0 %v9241_v61 }
0x17a0   :  { %9243 = vmatprep.subr.bf16.mxu0 %v12426_v32 }
0x17a3   :  { %9245 = vmatpush3.bf16.msra.mxu0 %v9244_v44 }
0x1869   :  { %v3688_v40 = vpop.f32.mrb[54].mxu0 }
0x186a   :  { %v8659_v3 = vpop.f32.mrb[55].mxu0 }
0x1871   :  { %v3758_v33 = vpop.f32.mrb[68].mxu0 }
0x1872   :  { %v3759_v5 = vadd.f32 %v3758_v33, %v3688_v40  ;;  %v8670_v17 = vpop.f32.mrb[69].mxu0  ;;  %v4104_v40 = vld [vmem:[#allocation17 + $0x78] sm:$0xff]  ;;  %v7752_v33 = vld [vmem:[%s12413_s14 + $0x3] ss:$0 sm:$0xff] }
0x1873   :  { %v9256_v3 = vpack.c.bf16 %v4104_v40, %v4103_v15  ;;  %v3971_v15 = vmul.f32 %v7752_v33, %v11485_v63 }
0x1874   :  { %v3770_v51 = vadd.f32 %v7741_v8, %v3759_v5  ;;  %v3967_v8 = vmul.f32 %v7752_v33, %v11434_v62  ;;  %v7758_v5 = vld [vmem:[%s12414_s23 + $0x3] ss:$0 sm:$0xff] }
0x1876   :  { %v3771_v31 = vsub.f32 0.0, %v3770_v51 }
0x1878   :  { %v3772_v38 = vmul.f32 1.442695, %v3771_v31 }
0x187a   :  { %9747 = vpow2.f32 %v3772_v38  ;;  %v4046_v38 = vmul.f32 %v7758_v5, %v10962_v56 }
0x1884   :  { %v9748_v37 = vpop.eup %9747 }
0x1885   :  { %v3774_v19 = vadd.f32 1.0, %v9748_v37 }
0x1887   :  { %9749 = vrcp.f32 %v3774_v19  ;;  %v3968_v19 = vmul.f32 %v7752_v33, %v11452_v55 }
0x1891   :  { %v9750_v48 = vpop.eup %9749 }
0x1892   :  { %v3776_v59 = vmul.f32 %v9750_v48, %v3770_v51  ;;  %v3965_v51 = vmul.f32 %v7752_v33, %v11415_v16 }
0x1894   :  { %8680 = vmatmul.mubr.msk.f32.vlgmr.msra.gmra.mrb[70].mxu0 %vm552_vm11, %v3776_v59  ;;  %v4044_v59 = vmul.f32 %v7758_v5, %v10980_v26 }
0x1895   :  { %8695 = vmatprep.mubr.msk.bf16.mxu0 %vm640_vm9, %v10836_v43 }
0x1967   :  { %v3851_v35 = vpop.f32.mrb[70].mxu0 }
0x1968   :  { %v3855_v13 = vadd.f32 %v3851_v35, %v11287_v12  ;;  %v8681_v7 = vpop.f32.mrb[71].mxu0  ;;  %v4101_v12 = vld [vmem:[#allocation17 + $0x60] sm:$0xff] }
0x1969   :  { %v9253_v29 = vpack.c.bf16 %v4102_v27, %v4101_v12 }
0x196a   :  { %v3864_v18 = vadd.f32 %v7744_v46, %v3855_v13  ;;  %v3966_v46 = vmul.f32 %v7752_v33, %v11422_v49 }
0x196c   :  { %v11610_v61 = vmul.f32 %v3864_v18, %v11096_v6  ;;  %v4047_v18 = vmul.f32 %v7758_v5, %v10985_v30 }
0x196e   :  { %8691 = vmatmul.mubr.msk.f32.vlgmr.msra.gmra.mrb[78].mxu1 %vm552_vm11, %v11610_v61 }
0x196f   :  { %8711 = vmatprep.mubr.msk.f32.mxu1 %vm10512_vm0, %v12425_v39  ;;  %9254 = vmatpush3.bf16.msra.mxu1 %v9253_v29 }
0x1970   :  { %9255 = vmatprep.subr.bf16.mxu1 %v12426_v32 }
0x1973   :  { %9257 = vmatpush3.bf16.msra.mxu1 %v9256_v3 }
0x1974   :  { %9270 = vmatprep.subr.bf16.mxu1 %v12426_v32 }
0x1a41   :  { %v3948_v10 = vpop.f32.mrb[78].mxu1 }
0x1a42   :  { %v3949_v44 = vadd.f32 %v7749_v28, %v3948_v10  ;;  %v8692_v9 = vpop.f32.mrb[79].mxu1 }
0x1a43   :  { %v4045_v9 = vmul.f32 %v7758_v5, %v10960_v52 }
0x1a44   :  { %3953 = vrot.lane.b32.xlu0 %v3949_v44, %s10514_s18 }
0x1ab6   :  { %v3954_v53 = vpop.permute.xlu0 %3953 }
0x1ab7   :  { %v3956_v0 = vpack.c.bf16 %v3954_v53, %v3949_v44 }
0x1ab9   :  { %8693 = vmatprep.subr.bf16.mxu0 %v3956_v0 }
0x1aba   :  { %8694 = vmatpush3.bf16.msra.mxu0 %v3956_v0 }
0x1abb   :  { %8732 = vmatprep.subr.bf16.mxu0 %v12425_v39 }
0x1abd   :  { %8696 = vmatmul.mubr.msk.bf16.vlgmr.msra.gmra.mrb[72].mxu0 %vm640_vm9, %v10842_v50 }
0x1abe   :  { %8699 = vmatprep.mubr.msk.bf16.mxu0 %vm640_vm9, %v10849_v57 }
0x1ac5   :  { %8700 = vmatmul.mubr.msk.bf16.gmra.mrb[76].mxu0 %vm640_vm9, %v10854_v60 }
0x1ac6   :  { %8740 = vmatprep.mubr.msk.bf16.mxu0 %vm10512_vm0, %v12425_v39 }
0x1b90   :  { %v8697_v17 = vpop.f32.mrb[72].mxu0 }
0x1b91   :  { %v4015_v31 = vadd.f32 %v8697_v17, %v3967_v8  ;;  %v4006_v37 = vpop.f32.mrb[73].mxu0 }
0x1b92   :  { %v4007_v48 = vadd.f32 %v4006_v37, %v3965_v51  ;;  %v8698_v35 = vpop.f32.mrb[74].mxu0  ;;  %v3969_v51 = vmul.f32 %v7752_v33, %v11436_v21 }
0x1b93   :  { %v11636_v13 = vadd.f32 %v4046_v38, %v4015_v31  ;;  %v4018_v7 = vadd.f32 %v8698_v35, %v3968_v19  ;;  %v4009_v28 = vpop.f32.mrb[75].mxu0  ;;  %v4050_v38 = vmul.f32 %v7758_v5, %v11010_v34  ;;  %v4048_v19 = vmul.f32 %v7758_v5, %v11003_v1 }
0x1b94   :  { %v4051_v10 = vadd.f32 %v4044_v59, %v4007_v48  ;;  %v4010_v44 = vadd.f32 %v4009_v28, %v3966_v46  ;;  %v3970_v46 = vmul.f32 %v7752_v33, %v11471_v54  ;;  %v4049_v28 = vmul.f32 %v7758_v5, %v10998_v58 }
0x1b95   :  { %v4060_v53 = vsub.f32 0.0, %v11636_v13  ;;  %v11641_v0 = vadd.f32 %v4047_v18, %v4018_v7 }
0x1b96   :  { %v4058_v12 = vsub.f32 0.0, %v4051_v10  ;;  %v4052_v27 = vadd.f32 %v4045_v9, %v4010_v44 }
0x1b97   :  { %v4069_v29 = vmul.f32 1.442695, %v4060_v53  ;;  %v4061_v3 = vsub.f32 0.0, %v11641_v0 }
0x1b98   :  { %v4065_v40 = vmul.f32 1.442695, %v4058_v12  ;;  %v4059_v8 = vsub.f32 0.0, %v4052_v27  ;;  %v8701_v17 = vpop.f32.mrb[76].mxu0 }
0x1b99   :  { %v4031_v31 = vadd.f32 %v8701_v17, %v3971_v15  ;;  %v4022_v37 = vpop.f32.mrb[77].mxu0  ;;  %v4071_v44 = vmul.f32 1.442695, %v4061_v3 }
0x1b9a   :  { %9751 = vpow2.f32 %v4065_v40  ;;  %v4067_v48 = vmul.f32 1.442695, %v4059_v8  ;;  %v4023_v59 = vadd.f32 %v4022_v37, %v3969_v51  ;;  %v8702_v35 = vpop.f32.mrb[78].mxu0 }
0x1b9b   :  { %9753 = vpow2.f32 %v4069_v29  ;;  %v11649_v7 = vadd.f32 %v4050_v38, %v4031_v31  ;;  %v4025_v18 = vpop.f32.mrb[79].mxu0 }
0x1b9c   :  { %9755 = vpow2.f32 %v4067_v48  ;;  %v4055_v9 = vadd.f32 %v4048_v19, %v4023_v59  ;;  %v4026_v53 = vadd.f32 %v4025_v18, %v3970_v46 }
0x1b9d   :  { %9757 = vpow2.f32 %v4071_v44  ;;  %v4064_v51 = vsub.f32 0.0, %v11649_v7 }
0x1b9e   :  { %v4062_v12 = vsub.f32 0.0, %v4055_v9  ;;  %v4056_v15 = vadd.f32 %v4049_v28, %v4026_v53 }
0x1b9f   :  { %v4077_v5 = vmul.f32 1.442695, %v4064_v51 }
0x1ba0   :  { %v4073_v17 = vmul.f32 1.442695, %v4062_v12  ;;  %v4063_v40 = vsub.f32 0.0, %v4056_v15 }
0x1ba2   :  { %9759 = vpow2.f32 %v4073_v17  ;;  %v4075_v33 = vmul.f32 1.442695, %v4063_v40 }
0x1ba4   :  { %v9752_v8 = vpop.eup %9751 }
0x1ba5   :  { %v9754_v29 = vpop.eup %9753  ;;  %v4079_v31 = vadd.f32 1.0, %v9752_v8 }
0x1ba6   :  { %v9756_v38 = vpop.eup %9755  ;;  %v4081_v3 = vadd.f32 1.0, %v9754_v29 }
0x1ba7   :  { %9761 = vrcp.f32 %v4079_v31  ;;  %v4080_v37 = vadd.f32 1.0, %v9756_v38  ;;  %v9758_v19 = vpop.eup %9757 }
0x1ba8   :  { %9763 = vpow2.f32 %v4075_v33  ;;  %v4082_v48 = vadd.f32 1.0, %v9758_v19 }
0x1ba9   :  { %9765 = vrcp.f32 %v4080_v37 }
0x1baa   :  { %9767 = vpow2.f32 %v4077_v5 }
0x1bab   :  { %9769 = vrcp.f32 %v4081_v3 }
0x1bac   :  { %v9760_v59 = vpop.eup %9759  ;;  %9771 = vrcp.f32 %v4082_v48 }
0x1bad   :  { %v4083_v46 = vadd.f32 1.0, %v9760_v59 }
0x1baf   :  { %9773 = vrcp.f32 %v4083_v46 }
0x1bb1   :  { %v9762_v35 = vpop.eup %9761 }
0x1bb2   :  { %v9764_v18 = vpop.eup %9763  ;;  %v4093_v28 = vmul.f32 %v9762_v35, %v4051_v10 }
0x1bb3   :  { %v9766_v44 = vpop.eup %9765  ;;  %v4084_v53 = vadd.f32 1.0, %v9764_v18 }
0x1bb4   :  { %8712 = vmatmul.mubr.msk.f32.vlgmr.msra.gmra.mrb[80].mxu1 %vm552_vm11, %v4093_v28  ;;  %v9768_v12 = vpop.eup %9767  ;;  %v4094_v17 = vmul.f32 %v9766_v44, %v4052_v27 }
0x1bb5   :  { %8714 = vmatprep.mubr.msk.f32.mxu1 %vm10512_vm0, %v12425_v39  ;;  %v9770_v40 = vpop.eup %9769  ;;  %v4085_v8 = vadd.f32 1.0, %v9768_v12  ;;  %9775 = vrcp.f32 %v4084_v53 }
0x1bb6   :  { %v4095_v10 = vmul.f32 %v9770_v40, %v11636_v13  ;;  %v9772_v51 = vpop.eup %9771 }
0x1bb7   :  { %9777 = vrcp.f32 %v4085_v8  ;;  %v4096_v27 = vmul.f32 %v9772_v51, %v11641_v0 }
0x1bb8   :  { %8715 = vmatmul.mubr.msk.f32.gmra.mrb[82].mxu1 %vm552_vm11, %v4094_v17 }
0x1bb9   :  { %8717 = vmatprep.mubr.msk.f32.mxu1 %vm10512_vm0, %v12425_v39  ;;  %v9774_v33 = vpop.eup %9773 }
0x1bba   :  { %v4097_v29 = vmul.f32 %v9774_v33, %v4055_v9  ;;  %v7760_v9 = vld [vmem:[%s12415_s25 + $0x3] ss:$0 sm:$0xff] }
0x1bbc   :  { %8718 = vmatmul.mubr.msk.f32.gmra.mrb[84].mxu1 %vm552_vm11, %v4095_v10 }
0x1bbd   :  { %8720 = vmatprep.mubr.msk.f32.mxu1 %vm10512_vm0, %v12425_v39 }
0x1bbf   :  { %v9776_v31 = vpop.eup %9775 }
0x1bc0   :  { %8721 = vmatmul.mubr.msk.f32.gmra.mrb[86].mxu1 %vm552_vm11, %v4096_v27  ;;  %v4098_v13 = vmul.f32 %v9776_v31, %v4056_v15 }
0x1bc1   :  { %8723 = vmatprep.mubr.msk.f32.mxu1 %vm10512_vm0, %v12425_v39  ;;  %v9778_v38 = vpop.eup %9777 }
0x1bc2   :  { %v4099_v0 = vmul.f32 %v9778_v38, %v11649_v7 }
0x1bc4   :  { %8724 = vmatmul.mubr.msk.f32.gmra.mrb[88].mxu1 %vm552_vm11, %v4097_v29 }
0x1bc5   :  { %8726 = vmatprep.mubr.msk.f32.mxu1 %vm10512_vm0, %v12425_v39 }
0x1bc8   :  { %8727 = vmatmul.mubr.msk.f32.gmra.mrb[90].mxu1 %vm552_vm11, %v4098_v13 }
0x1bc9   :  { %8729 = vmatprep.mubr.msk.f32.mxu1 %vm10512_vm0, %v12425_v39 }
0x1bcc   :  { %8730 = vmatmul.mubr.msk.f32.gmra.mrb[92].mxu1 %vm552_vm11, %v4099_v0 }
0x1bcd   :  { %8774 = vmatprep.mubr.msk.f32.mxu1 %vm10512_vm0, %v12425_v39 }
0x1c87   :  { %v4200_v37 = vpop.f32.mrb[80].mxu1 }
0x1c88   :  { %v4201_v5 = vadd.f32 %v7760_v9, %v4200_v37  ;;  %v8713_v3 = vpop.f32.mrb[81].mxu1 }
0x1c8a   :  { %v4234_v19 = vsub.f32 0.0, %v4201_v5 }
0x1c8b   :  { %v4205_v48 = vpop.f32.mrb[82].mxu1 }
0x1c8c   :  { %v4241_v15 = vmul.f32 1.442695, %v4234_v19  ;;  %v4206_v59 = vadd.f32 %v7760_v9, %v4205_v48  ;;  %v8716_v35 = vpop.f32.mrb[83].mxu1 }
0x1c8e   :  { %9779 = vpow2.f32 %v4241_v15  ;;  %v4235_v46 = vsub.f32 0.0, %v4206_v59 }
0x1c8f   :  { %v4210_v18 = vpop.f32.mrb[84].mxu1 }
0x1c90   :  { %v4243_v28 = vmul.f32 1.442695, %v4235_v46  ;;  %v4211_v44 = vadd.f32 %v7760_v9, %v4210_v18  ;;  %v8719_v7 = vpop.f32.mrb[85].mxu1 }
0x1c92   :  { %9781 = vpow2.f32 %v4243_v28  ;;  %v4236_v53 = vsub.f32 0.0, %v4211_v44 }
0x1c93   :  { %v4215_v12 = vpop.f32.mrb[86].mxu1 }
0x1c94   :  { %v4245_v17 = vmul.f32 1.442695, %v4236_v53  ;;  %v4216_v40 = vadd.f32 %v7760_v9, %v4215_v12  ;;  %v8722_v8 = vpop.f32.mrb[87].mxu1 }
0x1c96   :  { %9783 = vpow2.f32 %v4245_v17  ;;  %v4237_v10 = vsub.f32 0.0, %v4216_v40 }
0x1c97   :  { %v4220_v51 = vpop.f32.mrb[88].mxu1 }
0x1c98   :  { %v9780_v27 = vpop.eup %9779  ;;  %v4247_v33 = vmul.f32 1.442695, %v4237_v10  ;;  %v4221_v29 = vadd.f32 %v7760_v9, %v4220_v51  ;;  %v8725_v31 = vpop.f32.mrb[89].mxu1 }
0x1c99   :  { %v4255_v13 = vadd.f32 1.0, %v9780_v27 }
0x1c9a   :  { %9785 = vpow2.f32 %v4247_v33  ;;  %v4238_v38 = vsub.f32 0.0, %v4221_v29 }
0x1c9b   :  { %9787 = vrcp.f32 %v4255_v13  ;;  %v4225_v0 = vpop.f32.mrb[90].mxu1 }
0x1c9c   :  { %v9782_v37 = vpop.eup %9781  ;;  %v4249_v3 = vmul.f32 1.442695, %v4238_v38  ;;  %v4226_v19 = vadd.f32 %v7760_v9, %v4225_v0  ;;  %v8728_v48 = vpop.f32.mrb[91].mxu1 }
0x1c9d   :  { %v4256_v15 = vadd.f32 1.0, %v9782_v37 }
0x1c9e   :  { %9789 = vpow2.f32 %v4249_v3  ;;  %v4239_v35 = vsub.f32 0.0, %v4226_v19 }
0x1c9f   :  { %9791 = vrcp.f32 %v4256_v15  ;;  %v4230_v46 = vpop.f32.mrb[92].mxu1 }
0x1ca0   :  { %v9784_v18 = vpop.eup %9783  ;;  %v4251_v28 = vmul.f32 1.442695, %v4239_v35  ;;  %v4231_v7 = vadd.f32 %v7760_v9, %v4230_v46  ;;  %v8731_v53 = vpop.f32.mrb[93].mxu1 }
0x1ca1   :  { %v4257_v12 = vadd.f32 1.0, %v9784_v18 }
0x1ca2   :  { %9793 = vpow2.f32 %v4251_v28  ;;  %v4240_v17 = vsub.f32 0.0, %v4231_v7 }
0x1ca3   :  { %9795 = vrcp.f32 %v4257_v12 }
0x1ca4   :  { %v9786_v8 = vpop.eup %9785  ;;  %v4253_v10 = vmul.f32 1.442695, %v4240_v17 }
0x1ca5   :  { %v9788_v51 = vpop.eup %9787  ;;  %v4258_v27 = vadd.f32 1.0, %v9786_v8 }
0x1ca6   :  { %9797 = vpow2.f32 %v4253_v10  ;;  %v4269_v31 = vmul.f32 %v9788_v51, %v4201_v5 }
0x1ca7   :  { %9799 = vrcp.f32 %v4258_v27 }
0x1ca8   :  { %v9790_v33 = vpop.eup %9789  ;;  %v4276_v9 = vmul.f32 %v4269_v31, %v11038_v41 }
0x1ca9   :  { %v9792_v13 = vpop.eup %9791  ;;  %v4259_v38 = vadd.f32 1.0, %v9790_v33 }
0x1caa   :  { %v4270_v0 = vmul.f32 %v9792_v13, %v4206_v59 }
0x1cab   :  { %9801 = vrcp.f32 %v4259_v38 }
0x1cac   :  { %v9794_v37 = vpop.eup %9793  ;;  %v4277_v3 = vmul.f32 %v4270_v0, %v11040_v23 }
0x1cad   :  { %v9796_v48 = vpop.eup %9795  ;;  %v4260_v15 = vadd.f32 1.0, %v9794_v37  ;;  %v4337_v37 = vld [vmem:[#allocation20 + $0x60] sm:$0xff] }
0x1cae   :  { %v4283_v35 = vpack.c.bf16 %v4277_v3, %v4276_v9  ;;  %v4271_v18 = vmul.f32 %v9796_v48, %v4211_v44  ;;  %v4340_v48 = vld [vmem:[#allocation20 + $0x78] sm:$0xff] }
0x1caf   :  { %9803 = vrcp.f32 %v4260_v15  ;;  %v4332_v15 = vld [vmem:[#allocation19 + $0x60] sm:$0xff] }
0x1cb0   :  { %v9798_v46 = vpop.eup %9797  ;;  %8733 = vmatpush3.bf16.msra.mxu0 %v4283_v35  ;;  %v4278_v59 = vmul.f32 %v4271_v18, %v11045_v42  ;;  %v4333_v35 = vld [vmem:[#allocation19 + $0x68] sm:$0xff] }
0x1cb1   :  { %v9800_v28 = vpop.eup %9799  ;;  %v4261_v53 = vadd.f32 1.0, %v9798_v46  ;;  %8734 = vmatprep.subr.bf16.mxu0 %v12425_v39  ;;  %v9265_v18 = vpack.c.bf16 %v4333_v35, %v4332_v15 }
0x1cb2   :  { %v4272_v5 = vmul.f32 %v9800_v28, %v4216_v40 }
0x1cb3   :  { %9805 = vrcp.f32 %v4261_v53 }
0x1cb4   :  { %v4279_v12 = vmul.f32 %v4272_v5, %v11047_v45  ;;  %v4334_v5 = vld [vmem:[#allocation19 + $0x70] sm:$0xff] }
0x1cb5   :  { %v9802_v17 = vpop.eup %9801 }
0x1cb6   :  { %v4284_v8 = vpack.c.bf16 %v4279_v12, %v4278_v59  ;;  %v4273_v10 = vmul.f32 %v9802_v17, %v4221_v29  ;;  %v4338_v29 = vld [vmem:[#allocation20 + $0x68] sm:$0xff]  ;;  %v4335_v59 = vld [vmem:[#allocation19 + $0x78] sm:$0xff] }
0x1cb7   :  { %v9259_v3 = vpack.c.bf16 %v4338_v29, %v4337_v37 }
0x1cb8   :  { %8735 = vmatpush3.bf16.msra.mxu0 %v4284_v8  ;;  %v4280_v44 = vmul.f32 %v4273_v10, %v11051_v2  ;;  %v9268_v8 = vpack.c.bf16 %v4335_v59, %v4334_v5  ;;  %v4500_v10 = vld [vmem:[#allocation22 + $0x60] sm:$0xff]  ;;  %v7779_v5 = vld [vmem:[%s12418_s28 + $0x38] sm:$0xff] }
0x1cb9   :  { %v9804_v51 = vpop.eup %9803  ;;  %8736 = vmatprep.subr.bf16.mxu0 %v12425_v39 }
0x1cba   :  { %v4274_v27 = vmul.f32 %v9804_v51, %v4226_v19  ;;  %v4339_v19 = vld [vmem:[#allocation20 + $0x70] sm:$0xff]  ;;  %v4501_v51 = vld [vmem:[#allocation22 + $0x68] sm:$0xff] }
0x1cbc   :  { %v4281_v33 = vmul.f32 %v4274_v27, %v11055_v4  ;;  %v9271_v27 = vpack.c.bf16 %v4501_v51, %v4500_v10 }
0x1cbd   :  { %v9806_v31 = vpop.eup %9805 }
0x1cbe   :  { %v4285_v13 = vpack.c.bf16 %v4281_v33, %v4280_v44  ;;  %v4275_v40 = vmul.f32 %v9806_v31, %v4231_v7  ;;  %v9262_v7 = vpack.c.bf16 %v4340_v48, %v4339_v19  ;;  %9272 = vmatpush3.bf16.msra.mxu1 %v9271_v27  ;;  %v4502_v44 = vld [vmem:[#allocation22 + $0x70] sm:$0xff]  ;;  %v4503_v33 = vld [vmem:[#allocation22 + $0x78] sm:$0xff] }
0x1cbf   :  { %9273 = vmatprep.subr.bf16.mxu1 %v12426_v32  ;;  %v9274_v31 = vpack.c.bf16 %v4503_v33, %v4502_v44  ;;  %v7781_v44 = vld [vmem:[%s12419_s1 + $0x1] ss:$0 sm:$0xff] }
0x1cc0   :  { %v4282_v38 = vmul.f32 %v4275_v40, %v11059_v47  ;;  %8737 = vmatpush3.bf16.msra.mxu0 %v4285_v13 }
0x1cc1   :  { %8738 = vmatprep.subr.bf16.mxu0 %v12425_v39 }
0x1cc2   :  { %v4286_v0 = vpack.c.bf16 %v4282_v38, %v4282_v38  ;;  %9275 = vmatpush3.bf16.msra.mxu1 %v9274_v31 }
0x1cc4   :  { %v4288_v9 = vsel %vm1376_vm10, %v4286_v0, 0  ;;  %v7772_v0 = vld [vmem:[%s12416_s26 + $0x3] ss:$0 sm:$0xff] }
0x1cc5   :  { %8739 = vmatpush3.bf16.msra.mxu0 %v4288_v9 }
0x1cc6   :  { %9258 = vmatprep.subr.bf16.mxu0 %v12426_v32 }
0x1cc8   :  { %8741 = vmatmul.mubr.msk.bf16.vlgmr.msra.gmra.mrb[80].mxu0 %vm1372_vm13, %v11065_v36 }
0x1cc9   :  { %9260 = vmatpush3.bf16.msra.mxu0 %v9259_v3  ;;  %8752 = vmatprep.mubr.msk.f32.mxu0 %vm10512_vm0, %v12425_v39 }
0x1cca   :  { %9261 = vmatprep.subr.bf16.mxu0 %v12426_v32 }
0x1ccd   :  { %9263 = vmatpush3.bf16.msra.mxu0 %v9262_v7 }
0x1cce   :  { %9264 = vmatprep.subr.bf16.mxu0 %v12426_v32 }
0x1d9b   :  { %v4324_v46 = vpop.f32.mrb[80].mxu0 }
0x1d9c   :  { %v4330_v28 = vmul.f32 0.01, %v4324_v46  ;;  %v8742_v53 = vpop.f32.mrb[81].mxu0  ;;  %v7776_v46 = vld [vmem:[%s12418_s28 + $0x20] sm:$0xff] }
0x1d9d   :  { %v4327_v12 = vpop.f32.mrb[82].mxu0  ;;  %v7778_v53 = vld [vmem:[%s12418_s28 + $0x30] sm:$0xff] }
0x1d9e   :  { %v8743_v17 = vpop.f32.mrb[83].mxu0  ;;  %8753 = vmatmul.mubr.msk.f32.vlgmr.msra.gmra.mrb[84].mxu0 %vm552_vm11, %v4330_v28  ;;  %v9280_v59 = vpack.c.bf16 %v7779_v5, %v7778_v53 }
0x1d9f   :  { %9266 = vmatpush3.bf16.msra.mxu0 %v9265_v18  ;;  %8763 = vmatprep.mubr.msk.f32.mxu0 %vm10512_vm0, %v12425_v39  ;;  %v7777_v18 = vld [vmem:[%s12418_s28 + $0x28] sm:$0xff]  ;;  %v7775_v17 = vld [vmem:[%s12417_s12 + $0x3] ss:$0 sm:$0xff] }
0x1da0   :  { %9267 = vmatprep.subr.bf16.mxu0 %v12426_v32  ;;  %v9277_v28 = vpack.c.bf16 %v7777_v18, %v7776_v46 }
0x1da3   :  { %9269 = vmatpush3.bf16.msra.mxu0 %v9268_v8 }
0x1da4   :  { %9276 = vmatprep.subr.bf16.mxu0 %v12426_v32 }
0x1da6   :  { %8764 = vmatmul.mubr.msk.f32.vlgmr.msra.gmra.mrb[86].mxu0 %vm552_vm11, %v11610_v61 }
0x1da7   :  { %8785 = vmatprep.mubr.msk.f32.mxu0 %vm10512_vm0, %v12425_v39  ;;  %9278 = vmatpush3.bf16.msra.mxu0 %v9277_v28 }
0x1da8   :  { %9279 = vmatprep.subr.bf16.mxu0 %v12426_v32 }
0x1dab   :  { %9281 = vmatpush3.bf16.msra.mxu0 %v9280_v59 }
0x1dac   :  { %9282 = vmatprep.subr.bf16.mxu0 %v12426_v32 }
0x1e71   :  { %v4410_v13 = vpop.f32.mrb[84].mxu0 }
0x1e72   :  { %v8754_v40 = vpop.f32.mrb[85].mxu0 }
0x1e79   :  { %v4480_v38 = vpop.f32.mrb[86].mxu0 }
0x1e7a   :  { %v4481_v37 = vadd.f32 %v4480_v38, %v4410_v13  ;;  %v8765_v29 = vpop.f32.mrb[87].mxu0 }
0x1e7b   :  { %v4825_v29 = vld [vmem:[#allocation23 + $0x30] sm:$0xff] }
0x1e7c   :  { %v4492_v9 = vadd.f32 %v7772_v0, %v4481_v37  ;;  %v4824_v0 = vld [vmem:[#allocation23 + $0x28] sm:$0xff] }
0x1e7e   :  { %v4493_v3 = vsub.f32 0.0, %v4492_v9 }
0x1e80   :  { %v4494_v19 = vmul.f32 1.442695, %v4493_v3 }
0x1e82   :  { %9807 = vpow2.f32 %v4494_v19  ;;  %v7784_v19 = vld [vmem:[%s12420_s2 + $0x1] ss:$0 sm:$0xff] }
0x1e83   :  { %v4690_v53 = vmul.f32 %v7784_v19, %v11452_v55 }
0x1e8c   :  { %v9808_v48 = vpop.eup %9807 }
0x1e8d   :  { %v4496_v7 = vadd.f32 1.0, %v9808_v48  ;;  %v4689_v48 = vmul.f32 %v7784_v19, %v11434_v62 }
0x1e8f   :  { %9809 = vrcp.f32 %v4496_v7  ;;  %v7790_v7 = vld [vmem:[%s12421_s24 + $0x1] ss:$0 sm:$0xff] }
0x1e90   :  { %v4768_v18 = vmul.f32 %v7790_v7, %v10962_v56  ;;  %v4766_v59 = vmul.f32 %v7790_v7, %v10980_v26  ;;  %v4769_v62 = vmul.f32 %v7790_v7, %v10985_v30 }
0x1e99   :  { %v9810_v15 = vpop.eup %9809 }
0x1e9a   :  { %v4498_v35 = vmul.f32 %v9810_v15, %v4492_v9  ;;  %v4826_v9 = vld [vmem:[#allocation23 + $0x38] sm:$0xff] }
0x1e9b   :  { %v9286_v3 = vpack.c.bf16 %v4826_v9, %v4825_v29  ;;  %v4691_v9 = vmul.f32 %v7784_v19, %v11436_v21 }
0x1e9c   :  { %8775 = vmatmul.mubr.msk.f32.vlgmr.msra.gmra.mrb[94].mxu1 %vm552_vm11, %v4498_v35  ;;  %v4687_v35 = vmul.f32 %v7784_v19, %v11415_v16 }
0x1e9d   :  { %8790 = vmatprep.mubr.msk.bf16.mxu1 %vm640_vm9, %v10836_v43 }
0x1f6f   :  { %v4573_v12 = vpop.f32.mrb[94].mxu1 }
0x1f70   :  { %v4577_v8 = vadd.f32 %v4573_v12, %v11610_v61  ;;  %v8776_v10 = vpop.f32.mrb[95].mxu1  ;;  %v4823_v61 = vld [vmem:[#allocation23 + $0x20] sm:$0xff] }
0x1f71   :  { %v9283_v37 = vpack.c.bf16 %v4824_v0, %v4823_v61 }
0x1f72   :  { %v4586_v51 = vadd.f32 %v7775_v17, %v4577_v8  ;;  %v4688_v17 = vmul.f32 %v7784_v19, %v11422_v49  ;;  %v4693_v49 = vmul.f32 %v7784_v19, %v11485_v63 }
0x1f74   :  { %v11719_v27 = vmul.f32 %v4586_v51, %v11096_v6 }
0x1f76   :  { %8786 = vmatmul.mubr.msk.f32.vlgmr.msra.gmra.mrb[88].mxu0 %vm552_vm11, %v11719_v27 }
0x1f77   :  { %8806 = vmatprep.mubr.msk.f32.mxu0 %vm10512_vm0, %v12425_v39  ;;  %9284 = vmatpush3.bf16.msra.mxu0 %v9283_v37 }
0x1f78   :  { %9285 = vmatprep.subr.bf16.mxu0 %v12426_v32 }
0x1f7b   :  { %9287 = vmatpush3.bf16.msra.mxu0 %v9286_v3 }
0x1f7c   :  { %9288 = vmatprep.subr.bf16.mxu0 %v12426_v32 }
0x2049   :  { %v4670_v33 = vpop.f32.mrb[88].mxu0 }
0x204a   :  { %v4671_v31 = vadd.f32 %v7781_v44, %v4670_v33  ;;  %v8787_v13 = vpop.f32.mrb[89].mxu0  ;;  %v4767_v33 = vmul.f32 %v7790_v7, %v10960_v52 }
0x204c   :  { %4675 = vrot.lane.b32.xlu0 %v4671_v31, %s10514_s18 }
0x20be   :  { %v4676_v40 = vpop.permute.xlu0 %4675 }
0x20bf   :  { %v4678_v38 = vpack.c.bf16 %v4676_v40, %v4671_v31 }
0x20c1   :  { %8788 = vmatprep.subr.bf16.mxu1 %v4678_v38 }
0x20c2   :  { %8789 = vmatpush3.bf16.msra.mxu1 %v4678_v38 }
0x20c3   :  { %8827 = vmatprep.subr.bf16.mxu1 %v12425_v39 }
0x20c5   :  { %8791 = vmatmul.mubr.msk.bf16.vlgmr.msra.gmra.mrb[96].mxu1 %vm640_vm9, %v10842_v50 }
0x20c6   :  { %8794 = vmatprep.mubr.msk.bf16.mxu1 %vm640_vm9, %v10849_v57 }
0x20cd   :  { %8795 = vmatmul.mubr.msk.bf16.gmra.mrb[100].mxu1 %vm640_vm9, %v10854_v60 }
0x20ce   :  { %8835 = vmatprep.mubr.msk.bf16.mxu1 %vm10512_vm0, %v12425_v39 }
0x2198   :  { %v8792_v15 = vpop.f32.mrb[96].mxu1 }
0x2199   :  { %v4737_v46 = vadd.f32 %v8792_v15, %v4689_v48  ;;  %v4728_v28 = vpop.f32.mrb[97].mxu1  ;;  %v4772_v48 = vmul.f32 %v7790_v7, %v11010_v34 }
0x219a   :  { %v4729_v5 = vadd.f32 %v4728_v28, %v4687_v35  ;;  %v8793_v12 = vpop.f32.mrb[98].mxu1  ;;  %v4770_v35 = vmul.f32 %v7790_v7, %v11003_v1 }
0x219b   :  { %v11746_v8 = vadd.f32 %v4768_v18, %v4737_v46  ;;  %v4740_v10 = vadd.f32 %v8793_v12, %v4690_v53  ;;  %v4731_v51 = vpop.f32.mrb[99].mxu1  ;;  %v4692_v53 = vmul.f32 %v7784_v19, %v11471_v54  ;;  %v4771_v12 = vmul.f32 %v7790_v7, %v10998_v58 }
0x219c   :  { %v4773_v44 = vadd.f32 %v4766_v59, %v4729_v5  ;;  %v4732_v16 = vadd.f32 %v4731_v51, %v4688_v17 }
0x219d   :  { %v4782_v31 = vsub.f32 0.0, %v11746_v8  ;;  %v11751_v13 = vadd.f32 %v4769_v62, %v4740_v10 }
0x219e   :  { %v4780_v55 = vsub.f32 0.0, %v4773_v44  ;;  %v11753_v40 = vadd.f32 %v4767_v33, %v4732_v16 }
0x219f   :  { %v4791_v38 = vmul.f32 1.442695, %v4782_v31  ;;  %v4783_v0 = vsub.f32 0.0, %v11751_v13 }
0x21a0   :  { %v4787_v61 = vmul.f32 1.442695, %v4780_v55  ;;  %v4781_v37 = vsub.f32 0.0, %v11753_v40  ;;  %v8796_v29 = vpop.f32.mrb[100].mxu1 }
0x21a1   :  { %v4753_v3 = vadd.f32 %v8796_v29, %v4693_v49  ;;  %v4744_v15 = vpop.f32.mrb[101].mxu1  ;;  %v4793_v17 = vmul.f32 1.442695, %v4783_v0 }
0x21a2   :  { %9811 = vpow2.f32 %v4787_v61  ;;  %v4789_v46 = vmul.f32 1.442695, %v4781_v37  ;;  %v4745_v18 = vadd.f32 %v4744_v15, %v4691_v9  ;;  %v8797_v28 = vpop.f32.mrb[102].mxu1  ;;  %v7812_v15 = vld [vmem:[%s12409_s22 + $0x88] sm:$0xff] }
0x21a3   :  { %9813 = vpow2.f32 %v4791_v38  ;;  %v11762_v5 = vadd.f32 %v4772_v48, %v4753_v3  ;;  %v4747_v59 = vpop.f32.mrb[103].mxu1  ;;  %v7811_v48 = vld [vmem:[%s12409_s22 + $0x80] sm:$0xff] }
0x21a4   :  { %9815 = vpow2.f32 %v4789_v46  ;;  %v4777_v10 = vadd.f32 %v4770_v35, %v4745_v18  ;;  %v4748_v62 = vadd.f32 %v4747_v59, %v4692_v53  ;;  %v9289_v18 = vpack.c.bf16 %v7812_v15, %v7811_v48  ;;  %v7813_v59 = vld [vmem:[%s12409_s22 + $0x90] sm:$0xff] }
0x21a5   :  { %9817 = vpow2.f32 %v4793_v17  ;;  %v4786_v49 = vsub.f32 0.0, %v11762_v5 }
0x21a6   :  { %v4784_v51 = vsub.f32 0.0, %v4777_v10  ;;  %v4778_v16 = vadd.f32 %v4771_v12, %v4748_v62  ;;  %v7814_v12 = vld [vmem:[%s12409_s22 + $0x98] sm:$0xff] }
0x21a7   :  { %v4799_v0 = vmul.f32 1.442695, %v4786_v49 }
0x21a8   :  { %v4795_v33 = vmul.f32 1.442695, %v4784_v51  ;;  %v4785_v31 = vsub.f32 0.0, %v4778_v16  ;;  %v9292_v51 = vpack.c.bf16 %v7814_v12, %v7813_v59 }
0x21aa   :  { %9819 = vpow2.f32 %v4795_v33  ;;  %v4797_v54 = vmul.f32 1.442695, %v4785_v31 }
0x21ac   :  { %v9812_v55 = vpop.eup %9811 }
0x21ad   :  { %v9814_v19 = vpop.eup %9813  ;;  %v4801_v38 = vadd.f32 1.0, %v9812_v55 }
0x21ae   :  { %v9816_v61 = vpop.eup %9815  ;;  %v4803_v37 = vadd.f32 1.0, %v9814_v19 }
0x21af   :  { %9821 = vrcp.f32 %v4801_v38  ;;  %v4802_v7 = vadd.f32 1.0, %v9816_v61  ;;  %v9818_v29 = vpop.eup %9817 }
0x21b0   :  { %9823 = vpow2.f32 %v4797_v54  ;;  %v4804_v9 = vadd.f32 1.0, %v9818_v29 }
0x21b1   :  { %9825 = vrcp.f32 %v4802_v7 }
0x21b2   :  { %9827 = vpow2.f32 %v4799_v0 }
0x21b3   :  { %9829 = vrcp.f32 %v4803_v37 }
0x21b4   :  { %v9820_v3 = vpop.eup %9819  ;;  %9831 = vrcp.f32 %v4804_v9 }
0x21b5   :  { %v4805_v46 = vadd.f32 1.0, %v9820_v3 }
0x21b7   :  { %9833 = vrcp.f32 %v4805_v46 }
0x21b9   :  { %v9822_v35 = vpop.eup %9821 }
0x21ba   :  { %v9824_v28 = vpop.eup %9823  ;;  %v4815_v53 = vmul.f32 %v9822_v35, %v4773_v44 }
0x21bb   :  { %v9826_v17 = vpop.eup %9825  ;;  %v4806_v62 = vadd.f32 1.0, %v9824_v28 }
0x21bc   :  { %8807 = vmatmul.mubr.msk.f32.vlgmr.msra.gmra.mrb[90].mxu0 %vm552_vm11, %v4815_v53  ;;  %v9828_v33 = vpop.eup %9827  ;;  %v4816_v31 = vmul.f32 %v9826_v17, %v11753_v40 }
0x21bd   :  { %8809 = vmatprep.mubr.msk.f32.mxu0 %vm10512_vm0, %v12425_v39  ;;  %9290 = vmatpush3.bf16.msra.mxu0 %v9289_v18  ;;  %v9830_v55 = vpop.eup %9829  ;;  %v4807_v44 = vadd.f32 1.0, %v9828_v33  ;;  %9835 = vrcp.f32 %v4806_v62 }
0x21be   :  { %9291 = vmatprep.subr.bf16.mxu0 %v12426_v32  ;;  %v4817_v49 = vmul.f32 %v9830_v55, %v11746_v8  ;;  %v9832_v54 = vpop.eup %9831 }
0x21bf   :  { %9837 = vrcp.f32 %v4807_v44  ;;  %v4818_v40 = vmul.f32 %v9832_v54, %v11751_v13 }
0x21c0   :  { %8810 = vmatmul.mubr.msk.f32.gmra.mrb[92].mxu0 %vm552_vm11, %v4816_v31 }
0x21c1   :  { %8812 = vmatprep.mubr.msk.f32.mxu0 %vm10512_vm0, %v12425_v39  ;;  %9293 = vmatpush3.bf16.msra.mxu0 %v9292_v51  ;;  %v9834_v19 = vpop.eup %9833 }
0x21c2   :  { %v4819_v38 = vmul.f32 %v9834_v19, %v4777_v10  ;;  %v11798_v10 = vmul.f32 %v11719_v27, %v11096_v6 }
0x21c4   :  { %8813 = vmatmul.mubr.msk.f32.gmra.mrb[94].mxu0 %vm552_vm11, %v4817_v49 }
0x21c5   :  { %8815 = vmatprep.mubr.msk.f32.mxu0 %vm10512_vm0, %v12425_v39 }
0x21c7   :  { %v9836_v61 = vpop.eup %9835 }
0x21c8   :  { %8816 = vmatmul.mubr.msk.f32.gmra.mrb[96].mxu0 %vm552_vm11, %v4818_v40  ;;  %v4820_v8 = vmul.f32 %v9836_v61, %v4778_v16  ;;  %v7792_v16 = vld [vmem:[%s12422_s7 + $0x1] ss:$0 sm:$0xff] }
0x21c9   :  { %8818 = vmatprep.mubr.msk.f32.mxu0 %vm10512_vm0, %v12425_v39  ;;  %v9838_v7 = vpop.eup %9837 }
0x21ca   :  { %v4821_v13 = vmul.f32 %v9838_v7, %v11762_v5 }
0x21cc   :  { %8819 = vmatmul.mubr.msk.f32.gmra.mrb[98].mxu0 %vm552_vm11, %v4819_v38 }
0x21cd   :  { %8821 = vmatprep.mubr.msk.f32.mxu0 %vm10512_vm0, %v12425_v39 }
0x21d0   :  { %8822 = vmatmul.mubr.msk.f32.gmra.mrb[100].mxu0 %vm552_vm11, %v4820_v8 }
0x21d1   :  { %8824 = vmatprep.mubr.msk.f32.mxu0 %vm10512_vm0, %v12425_v39 }
0x21d4   :  { %8825 = vmatmul.mubr.msk.f32.gmra.mrb[102].mxu0 %vm552_vm11, %v4821_v13 }
0x21d5   :  { %8867 = vmatprep.mubr.msk.f32.mxu0 %vm10512_vm0, %v12425_v39 }
0x21d8   :  { %8868 = vmatmul.mubr.msk.f32.vlgmr.msra.gmra.mrb[104].mxu0 %vm552_vm11, %v11798_v10 }
0x21d9   :  { %8872 = vmatprep.mubr.msk.bf16.mxu0 %vm640_vm9, %v10836_v43 }
0x228f   :  { %v4922_v0 = vpop.f32.mrb[90].mxu0 }
0x2290   :  { %v4923_v37 = vadd.f32 %v7792_v16, %v4922_v0  ;;  %v8808_v29 = vpop.f32.mrb[91].mxu0 }
0x2292   :  { %v4956_v5 = vsub.f32 0.0, %v4923_v37 }
0x2293   :  { %v4927_v9 = vpop.f32.mrb[92].mxu0 }
0x2294   :  { %v4963_v3 = vmul.f32 1.442695, %v4956_v5  ;;  %v4928_v48 = vadd.f32 %v7792_v16, %v4927_v9  ;;  %v8811_v15 = vpop.f32.mrb[93].mxu0 }
0x2296   :  { %9839 = vpow2.f32 %v4963_v3  ;;  %v4957_v35 = vsub.f32 0.0, %v4928_v48 }
0x2297   :  { %v4932_v46 = vpop.f32.mrb[94].mxu0 }
0x2298   :  { %v4965_v27 = vmul.f32 1.442695, %v4957_v35  ;;  %v4933_v18 = vadd.f32 %v7792_v16, %v4932_v46  ;;  %v8814_v28 = vpop.f32.mrb[95].mxu0 }
0x229a   :  { %9841 = vpow2.f32 %v4965_v27  ;;  %v4958_v53 = vsub.f32 0.0, %v4933_v18 }
0x229b   :  { %v4937_v59 = vpop.f32.mrb[96].mxu0 }
0x229c   :  { %v4967_v12 = vmul.f32 1.442695, %v4958_v53  ;;  %v4938_v17 = vadd.f32 %v7792_v16, %v4937_v59  ;;  %v8817_v62 = vpop.f32.mrb[97].mxu0 }
0x229e   :  { %9843 = vpow2.f32 %v4967_v12  ;;  %v4959_v51 = vsub.f32 0.0, %v4938_v17 }
0x229f   :  { %v4942_v33 = vpop.f32.mrb[98].mxu0 }
0x22a0   :  { %v9840_v31 = vpop.eup %9839  ;;  %v4969_v55 = vmul.f32 1.442695, %v4959_v51  ;;  %v4943_v44 = vadd.f32 %v7792_v16, %v4942_v33  ;;  %v8820_v49 = vpop.f32.mrb[99].mxu0  ;;  %v7801_v51 = vld [vmem:[%s10690_s13 + $0x1] ss:$0 sm:$0xff] }
0x22a1   :  { %v4977_v54 = vadd.f32 1.0, %v9840_v31 }
0x22a2   :  { %9845 = vpow2.f32 %v4969_v55  ;;  %v4960_v40 = vsub.f32 0.0, %v4943_v44 }
0x22a3   :  { %9847 = vrcp.f32 %v4977_v54  ;;  %v4947_v19 = vpop.f32.mrb[100].mxu0 }
0x22a4   :  { %v9842_v38 = vpop.eup %9841  ;;  %v4971_v61 = vmul.f32 1.442695, %v4960_v40  ;;  %v4948_v8 = vadd.f32 %v7792_v16, %v4947_v19  ;;  %v8823_v7 = vpop.f32.mrb[101].mxu0 }
0x22a5   :  { %v4978_v13 = vadd.f32 1.0, %v9842_v38 }
0x22a6   :  { %9849 = vpow2.f32 %v4971_v61  ;;  %v4961_v0 = vsub.f32 0.0, %v4948_v8 }
0x22a7   :  { %9851 = vrcp.f32 %v4978_v13  ;;  %v4952_v29 = vpop.f32.mrb[102].mxu0 }
0x22a8   :  { %v9844_v5 = vpop.eup %9843  ;;  %v4973_v9 = vmul.f32 1.442695, %v4961_v0  ;;  %v4953_v3 = vadd.f32 %v7792_v16, %v4952_v29  ;;  %v8826_v15 = vpop.f32.mrb[103].mxu0 }
0x22a9   :  { %v4979_v35 = vadd.f32 1.0, %v9844_v5 }
0x22aa   :  { %9853 = vpow2.f32 %v4973_v9  ;;  %v4962_v46 = vsub.f32 0.0, %v4953_v3 }
0x22ab   :  { %9855 = vrcp.f32 %v4979_v35  ;;  %v5421_v27 = vpop.f32.mrb[104].mxu0 }
0x22ac   :  { %v9846_v28 = vpop.eup %9845  ;;  %v4975_v53 = vmul.f32 1.442695, %v4962_v46  ;;  %v8869_v59 = vpop.f32.mrb[105].mxu0 }
0x22ad   :  { %v9848_v12 = vpop.eup %9847  ;;  %v4980_v62 = vadd.f32 1.0, %v9846_v28 }
0x22ae   :  { %v4991_v33 = vmul.f32 %v9848_v12, %v4923_v37  ;;  %9857 = vpow2.f32 %v4975_v53 }
0x22af   :  { %9859 = vrcp.f32 %v4980_v62 }
0x22b0   :  { %v9850_v31 = vpop.eup %9849  ;;  %v5006_v55 = vmul.f32 %v7801_v51, %v4991_v33 }
0x22b1   :  { %v9852_v49 = vpop.eup %9851  ;;  %v4981_v54 = vadd.f32 1.0, %v9850_v31 }
0x22b2   :  { %v4992_v16 = vmul.f32 %v9852_v49, %v4928_v48  ;;  %v5013_v40 = vsel %vm552_vm11, %v5006_v55, 0.0 }
0x22b3   :  { %9861 = vrcp.f32 %v4981_v54  ;;  %5014 = vadd.xlane.f32.xlu0 %v5013_v40  ;;  %v3071_v40 = vadd.f32 1e-08, %v11436_v21 }
0x22b4   :  { %v9854_v19 = vpop.eup %9853  ;;  %v5007_v38 = vmul.f32 %v7801_v51, %v4992_v16 }
0x22b5   :  { %v9856_v61 = vpop.eup %9855  ;;  %v4982_v7 = vadd.f32 1.0, %v9854_v19  ;;  %vm3104_vm3 = vcmp.eq.f32.partialorder %v3071_v40, inf  ;;  %vm3106_vm4 = vcmp.eq.f32.partialorder %v3071_v40, 0.0 }
0x22b6   :  { %v4993_v13 = vmul.f32 %v9856_v61, %v4933_v18  ;;  %v5016_v0 = vsel %vm552_vm11, %v5007_v38, 0.0 }
0x22b7   :  { %9863 = vrcp.f32 %v4982_v7  ;;  %5017 = vadd.xlane.f32.xlu1 %v5016_v0  ;;  %v3107_v7 = vand.u32 2147483648, %v3071_v40 }
0x22b8   :  { %v9858_v37 = vpop.eup %9857  ;;  %v5008_v29 = vmul.f32 %v7801_v51, %v4993_v13 }
0x22b9   :  { %v9860_v5 = vpop.eup %9859  ;;  %v4983_v9 = vadd.f32 1.0, %v9858_v37 }
0x22ba   :  { %v4994_v15 = vmul.f32 %v9860_v5, %v4938_v17  ;;  %v5019_v48 = vsel %vm552_vm11, %v5008_v29, 0.0 }
0x22bb   :  { %9865 = vrcp.f32 %v4983_v9  ;;  %5020 = vadd.xlane.f32.xlu1 %v5019_v48 }
0x22bc   :  { %v5009_v35 = vmul.f32 %v7801_v51, %v4994_v15  ;;  %9867 = vrsqrt.f32 %v3071_v40 }
0x22bd   :  { %v9862_v46 = vpop.eup %9861 }
0x22be   :  { %v4995_v28 = vmul.f32 %v9862_v46, %v4943_v44  ;;  %v5022_v53 = vsel %vm552_vm11, %v5009_v35, 0.0  ;;  %v7815_v44 = vld [vmem:[#allocation16 + $0x4] ss:$0 sm:$0xff] }
0x22bf   :  { %5023 = vadd.xlane.f32.xlu1 %v5022_v53  ;;  %v5422_v16 = vadd.f32 %v7815_v44, %v5421_v27  ;;  %v12427_v44 = vld [vmem:[#allocation58_spill] sm:$0xff] }
0x22c0   :  { %v5010_v18 = vmul.f32 %v7801_v51, %v4995_v28 }
0x22c1   :  { %v9864_v59 = vpop.eup %9863 }
0x22c2   :  { %v4996_v12 = vmul.f32 %v9864_v59, %v4948_v8  ;;  %v5025_v62 = vsel %vm552_vm11, %v5010_v18, 0.0  ;;  %v3073_v8 = vadd.f32 1e-08, %v11485_v63 }
0x22c3   :  { %5026 = vadd.xlane.f32.xlu1 %v5025_v62 }
0x22c4   :  { %v5011_v33 = vmul.f32 %v7801_v51, %v4996_v12  ;;  %9869 = vrsqrt.f32 %v3073_v8  ;;  %vm3118_vm5 = vcmp.eq.f32.partialorder %v3073_v8, inf  ;;  %v3121_v29 = vand.u32 2147483648, %v3073_v8 }
0x22c5   :  { %v9866_v31 = vpop.eup %9865  ;;  %vm3120_vm6 = vcmp.eq.f32.partialorder %v3073_v8, 0.0 }
0x22c6   :  { %v4997_v55 = vmul.f32 %v9866_v31, %v4953_v3  ;;  %v5028_v17 = vsel %vm552_vm11, %v5011_v33, 0.0  ;;  %v9868_v19 = vpop.eup %9867 }
0x22c7   :  { %5029 = vadd.xlane.f32.xlu1 %v5028_v17  ;;  %v3103_v38 = vmul.f32 %v9868_v19, %v3071_v40 }
0x22c8   :  { %v5012_v49 = vmul.f32 %v7801_v51, %v4997_v55 }
0x22c9   :  { %v3105_v61 = vsel %vm3104_vm3, %v3071_v40, %v3103_v38 }
0x22ca   :  { %v5031_v54 = vsel %vm552_vm11, %v5012_v49, 0.0  ;;  %v3108_v13 = vsel %vm3106_vm4, %v3107_v7, %v3105_v61 }
0x22cb   :  { %5032 = vadd.xlane.f32.xlu1 %v5031_v54  ;;  %v3127_v27 = vadd.f32 1.0, %v3108_v13 }
0x22cd   :  { %9871 = vrcp.f32 %v3127_v27 }
0x22ce   :  { %v9870_v3 = vpop.eup %9869 }
0x22cf   :  { %v3117_v51 = vmul.f32 %v9870_v3, %v3073_v8 }
0x22d1   :  { %v3119_v37 = vsel %vm3118_vm5, %v3073_v8, %v3117_v51 }
0x22d2   :  { %v3122_v5 = vsel %vm3120_vm6, %v3121_v29, %v3119_v37 }
0x22d3   :  { %v3129_v15 = vadd.f32 1.0, %v3122_v5 }
0x22d5   :  { %9873 = vrcp.f32 %v3129_v15 }
0x22d7   :  { %v9872_v59 = vpop.eup %9871 }
0x22d8   :  { %v3141_v31 = vmul.f32 %v9872_v59, %v11392_v11 }
0x22dc   :  { %5426 = vrot.lane.b32.xlu1 %v5422_v16, %s10514_s18 }
0x22df   :  { %v9874_v17 = vpop.eup %9873 }
0x22e0   :  { %v3143_v40 = vmul.f32 %v9874_v17, %v12427_v44 }
0x2340   :  { %v5015_v0 = vpop.xlane.xlu0 %5014 }
0x2341   :  { %v5034_v21 = vmul.f32 %v5015_v0, %v11528_v22 }
0x2343   :  { %v5041_v48 = vmul.f32 %v5034_v21, %v11038_v41  ;;  %v12428_v21 = vld [vmem:[#allocation57_spill] sm:$0xff] }
0x2344   :  { %v5018_v63 = vpop.xlane.xlu1 %5017 }
0x2345   :  { %v5035_v9 = vmul.f32 %v5018_v63, %v11533_v14 }
0x2347   :  { %v5042_v35 = vmul.f32 %v5035_v9, %v11040_v23 }
0x2348   :  { %v5021_v46 = vpop.xlane.xlu1 %5020 }
0x2349   :  { %v5048_v28 = vpack.c.bf16 %v5042_v35, %v5041_v48  ;;  %v5036_v53 = vmul.f32 %v5021_v46, %v11537_v20 }
0x234b   :  { %8828 = vmatpush3.bf16.msra.mxu1 %v5048_v28  ;;  %v5043_v12 = vmul.f32 %v5036_v53, %v11045_v42 }
0x234c   :  { %v5024_v18 = vpop.xlane.xlu1 %5023  ;;  %8829 = vmatprep.subr.bf16.mxu1 %v12425_v39 }
0x234d   :  { %v5037_v22 = vmul.f32 %v5024_v18, %v11545_v25 }
0x234f   :  { %v5044_v14 = vmul.f32 %v5037_v22, %v11047_v45 }
0x2350   :  { %v5027_v62 = vpop.xlane.xlu1 %5026 }
0x2351   :  { %v5049_v33 = vpack.c.bf16 %v5044_v14, %v5043_v12  ;;  %v5038_v55 = vmul.f32 %v5027_v62, %v3141_v31 }
0x2353   :  { %8830 = vmatpush3.bf16.msra.mxu1 %v5049_v33  ;;  %v5045_v54 = vmul.f32 %v5038_v55, %v11051_v2 }
0x2354   :  { %v5030_v49 = vpop.xlane.xlu1 %5029  ;;  %8831 = vmatprep.subr.bf16.mxu1 %v12425_v39 }
0x2355   :  { %v5039_v20 = vmul.f32 %v5030_v49, %v11551_v24 }
0x2357   :  { %v5046_v25 = vmul.f32 %v5039_v20, %v11055_v4 }
0x2358   :  { %v5033_v8 = vpop.xlane.xlu1 %5032 }
0x2359   :  { %v5050_v19 = vpack.c.bf16 %v5046_v25, %v5045_v54  ;;  %v5040_v38 = vmul.f32 %v5033_v8, %v3143_v40 }
0x235b   :  { %v5047_v3 = vmul.f32 %v5040_v38, %v11059_v47  ;;  %8832 = vmatpush3.bf16.msra.mxu1 %v5050_v19 }
0x235c   :  { %v5427_v11 = vpop.permute.xlu1 %5426  ;;  %8833 = vmatprep.subr.bf16.mxu1 %v12425_v39 }
0x235d   :  { %v5051_v61 = vpack.c.bf16 %v5047_v3, %v5047_v3  ;;  %v5429_v7 = vpack.c.bf16 %v5427_v11, %v5422_v16 }
0x235f   :  { %8870 = vmatprep.subr.bf16.mxu0 %v5429_v7  ;;  %v5053_v24 = vsel %vm1376_vm10, %v5051_v61, 0 }
0x2360   :  { %8834 = vmatpush3.bf16.msra.mxu1 %v5053_v24  ;;  %8871 = vmatpush3.bf16.msra.mxu0 %v5429_v7 }
0x2361   :  { %8909 = vmatprep.subr.bf16.mxu0 %v12425_v39 }
0x2363   :  { %8836 = vmatmul.mubr.msk.bf16.vlgmr.msra.gmra.mrb[104].mxu1 %vm1372_vm13, %v11065_v36  ;;  %8873 = vmatmul.mubr.msk.bf16.vlgmr.msra.gmra.mrb[108].mxu0 %vm640_vm9, %v10842_v50 }
0x2364   :  { %8841 = vmatprep.mubr.msk.bf16.mxu1 %vm640_vm9, %v10836_v43  ;;  %8876 = vmatprep.mubr.msk.bf16.mxu0 %vm640_vm9, %v10849_v57 }
0x236b   :  { %8877 = vmatmul.mubr.msk.bf16.gmra.mrb[112].mxu0 %vm640_vm9, %v10854_v60 }
0x236c   :  { %8917 = vmatprep.mubr.msk.bf16.mxu0 %vm10512_vm0, %v12425_v39 }
0x2436   :  { %v5089_v16 = vpop.f32.mrb[104].mxu1  ;;  %v11847_v51 = vpop.f32.mrb[108].mxu0 }
0x2437   :  { %v5095_v13 = vmul.f32 0.01, %v5089_v16  ;;  %v8837_v0 = vpop.f32.mrb[105].mxu1  ;;  %v11849_v27 = vpop.f32.mrb[109].mxu0 }
0x2438   :  { %v5092_v37 = vpop.f32.mrb[106].mxu1  ;;  %v11851_v29 = vpop.f32.mrb[110].mxu0 }
0x2439   :  { %v5096_v5 = vadd.f32 %v5095_v13, %v12428_v21  ;;  %v8838_v63 = vpop.f32.mrb[107].mxu1  ;;  %v11854_v9 = vpop.f32.mrb[111].mxu0  ;;  %v5574_v21 = vld [vmem:[#allocation17 + $0x80] sm:$0xff] }
0x243a   :  { %v5576_v63 = vld [vmem:[#allocation17 + $0x90] sm:$0xff] }
0x243b   :  { %v11857_v15 = vmul.f32 %v5096_v5, %v11096_v6  ;;  %v5575_v5 = vld [vmem:[#allocation17 + $0x88] sm:$0xff] }
0x243d   :  { %12429 = vst [vmem:[#allocation58_spill] sm:$0xff] %v11857_v15  ;;  %v5099_v48 = vpack.c.bf16 %v11857_v15, %v11857_v15 }
0x243e   :  { %v11861_v35 = vpop.f32.mrb[112].mxu0 }
0x243f   :  { %v5100_v46 = vunpack.c.l.bf16 %v5099_v48  ;;  %v11863_v28 = vpop.f32.mrb[113].mxu0  ;;  %v9295_v48 = vpack.c.bf16 %v5575_v5, %v5574_v21 }
0x2440   :  { %v8879_v53 = vpop.f32.mrb[114].mxu0 }
0x2441   :  { %v11865_v18 = vpop.f32.mrb[115].mxu0  ;;  %v5101_v22 = vsub.f32 %v11857_v15, %v5100_v46  ;;  %v5102_v12 = vsub.f32 0.0, %v5100_v46 }
0x2443   :  { %v5104_v59 = vsub.f32 0.0, %v5101_v22  ;;  %v5103_v62 = vpack.c.bf16 %v5102_v12, %v5100_v46  ;;  %v5577_v46 = vld [vmem:[#allocation17 + $0x98] sm:$0xff] }
0x2444   :  { %v9298_v53 = vpack.c.bf16 %v5577_v46, %v5576_v63 }
0x2445   :  { %v5105_v14 = vpack.c.bf16 %v5104_v59, %v5101_v22  ;;  %v11923_v22 = vld [vmem:[%s12413_s14 + $0x4] ss:$0 sm:$0xff] }
0x2446   :  { %v11926_v59 = vld [vmem:[%s12414_s23 + $0x4] ss:$0 sm:$0xff] }
0x2447   :  { %8839 = vmatprep.subr.bf16.mxu1 %v5105_v14 }
0x2448   :  { %8840 = vmatpush3.bf16.msra.mxu1 %v5105_v14 }
0x2449   :  { %8849 = vmatprep.subr.bf16.mxu1 %v5103_v62 }
0x244b   :  { %8842 = vmatmul.mubr.msk.bf16.vlgmr.msra.gmra.mrb[108].mxu1 %vm640_vm9, %v10842_v50 }
0x244c   :  { %8845 = vmatprep.mubr.msk.bf16.mxu1 %vm640_vm9, %v10849_v57  ;;  %8850 = vmatpush3.bf16.msra.mxu1 %v5103_v62 }
0x244d   :  { %9294 = vmatprep.subr.bf16.mxu1 %v12426_v32 }
0x2453   :  { %8846 = vmatmul.mubr.msk.bf16.gmra.mrb[112].mxu1 %vm640_vm9, %v10854_v60 }
0x2454   :  { %8851 = vmatprep.mubr.msk.bf16.mxu1 %vm640_vm9, %v10836_v43 }
0x245b   :  { %8852 = vmatmul.mubr.msk.bf16.vlgmr.msra.gmra.mrb[108].mxu1 %vm640_vm9, %v10842_v50 }
0x245c   :  { %8855 = vmatprep.mubr.msk.bf16.mxu1 %vm640_vm9, %v10849_v57  ;;  %9296 = vmatpush3.bf16.msra.mxu1 %v9295_v48 }
0x245d   :  { %9297 = vmatprep.subr.bf16.mxu1 %v12426_v32 }
0x2460   :  { %9299 = vmatpush3.bf16.msra.mxu1 %v9298_v53  ;;  %v5519_v53 = vmul.f32 %v11926_v59, %v10962_v56 }
0x2461   :  { %9318 = vmatprep.subr.bf16.mxu1 %v12426_v32 }
0x2463   :  { %8856 = vmatmul.mubr.msk.bf16.gmra.mrb[112].mxu1 %vm640_vm9, %v10854_v60 }
0x2464   :  { %8888 = vmatprep.mubr.msk.f32.mxu1 %vm10512_vm0, %v12425_v39 }
0x252e   :  { %v11885_v33 = vpop.f32.mrb[108].mxu1 }
0x252f   :  { %v11887_v31 = vpop.f32.mrb[109].mxu1  ;;  %v5236_v40 = vmul.f32 %v11885_v33, %v11885_v33 }
0x2530   :  { %v5234_v55 = vmul.f32 %v11887_v31, %v11887_v31  ;;  %v11891_v17 = vpop.f32.mrb[110].mxu1 }
0x2531   :  { %12430 = vst [vmem:[#allocation57_spill] sm:$0xff] %v11891_v17  ;;  %v5237_v49 = vmul.f32 %v11891_v17, %v11891_v17  ;;  %v11895_v20 = vpop.f32.mrb[111].mxu1  ;;  %v5247_v7 = vsel %vm788_vm12, %v5236_v40, 0.0 }
0x2532   :  { %v5235_v54 = vmul.f32 %v11895_v20, %v11895_v20  ;;  %v5241_v25 = vsel %vm788_vm12, %v5234_v55, 0.0 }
0x2533   :  { %5242 = vadd.xlane.f32.xlu0 %v5241_v25  ;;  %v5250_v44 = vsel %vm788_vm12, %v5237_v49, 0.0 }
0x2534   :  { %5251 = vadd.xlane.f32.xlu1 %v5250_v44  ;;  %v5244_v19 = vsel %vm788_vm12, %v5235_v54, 0.0  ;;  %v5517_v54 = vmul.f32 %v11926_v59, %v10980_v26 }
0x2536   :  { %v11903_v8 = vpop.f32.mrb[112].mxu1 }
0x2537   :  { %12431 = vst [vmem:[#allocation59_spill] sm:$0xff] %v11903_v8  ;;  %5245 = vadd.xlane.f32.xlu0 %v5244_v19  ;;  %v11906_v38 = vpop.f32.mrb[113].mxu1  ;;  %v5240_v13 = vmul.f32 %v11903_v8, %v11903_v8  ;;  %v5520_v19 = vmul.f32 %v11926_v59, %v10985_v30 }
0x2538   :  { %v8858_v3 = vpop.f32.mrb[114].mxu1  ;;  %v5238_v61 = vmul.f32 %v11906_v38, %v11906_v38 }
0x2539   :  { %v11908_v11 = vpop.f32.mrb[115].mxu1  ;;  %v5259_v37 = vsel %vm788_vm12, %v5240_v13, 0.0 }
0x253a   :  { %v5239_v24 = vmul.f32 %v11908_v11, %v11908_v11  ;;  %v5253_v16 = vsel %vm788_vm12, %v5238_v61, 0.0 }
0x253b   :  { %5248 = vadd.xlane.f32.xlu0 %v5247_v7 }
0x253c   :  { %v5256_v0 = vsel %vm788_vm12, %v5239_v24, 0.0 }
0x253f   :  { %5254 = vadd.xlane.f32.xlu0 %v5253_v16 }
0x2543   :  { %5257 = vadd.xlane.f32.xlu0 %v5256_v0 }
0x2547   :  { %5260 = vadd.xlane.f32.xlu0 %v5259_v37 }
0x25c0   :  { %v11928_v12 = vpop.xlane.xlu0 %5242 }
0x25c1   :  { %v5262_v14 = vadd.f32 1e-08, %v11928_v12  ;;  %v5438_v62 = vmul.f32 %v11923_v22, %v11928_v12  ;;  %v11933_v55 = vpop.xlane.xlu1 %5251 }
0x25c2   :  { %v5441_v49 = vmul.f32 %v11923_v22, %v11933_v55 }
0x25c3   :  { %9875 = vrsqrt.f32 %v5262_v14  ;;  %v5480_v25 = vadd.f32 %v11849_v27, %v5438_v62  ;;  %vm5271_vm7 = vcmp.eq.f32.partialorder %v5262_v14, inf  ;;  %vm5273_vm8 = vcmp.eq.f32.partialorder %v5262_v14, 0.0 }
0x25c4   :  { %v5491_v44 = vadd.f32 %v11851_v29, %v5441_v49  ;;  %v11941_v40 = vpop.xlane.xlu0 %5245  ;;  %v5518_v29 = vmul.f32 %v11926_v59, %v10960_v52 }
0x25c5   :  { %v11945_v3 = vadd.f32 %v5517_v54, %v5480_v25  ;;  %v11948_v61 = vadd.f32 1e-08, %v11941_v40  ;;  %v5439_v7 = vmul.f32 %v11923_v22, %v11941_v40 }
0x25c6   :  { %v11952_v24 = vadd.f32 %v5520_v19, %v5491_v44 }
0x25c7   :  { %v5531_v16 = vsub.f32 0.0, %v11945_v3  ;;  %9877 = vrsqrt.f32 %v11948_v61  ;;  %v5483_v27 = vadd.f32 %v11854_v9, %v5439_v7  ;;  %vm5278_vm14 = vcmp.eq.f32.partialorder %v11948_v61, inf }
0x25c8   :  { %v11959_v13 = vpop.xlane.xlu0 %5248  ;;  %v5534_v0 = vsub.f32 0.0, %v11952_v24  ;;  %vm5280_vm15 = vcmp.eq.f32.partialorder %v11948_v61, 0.0 }
0x25c9   :  { %v5538_v37 = vmul.f32 1.442695, %v5531_v16  ;;  %v11963_v21 = vadd.f32 1e-08, %v11959_v13  ;;  %v5440_v5 = vmul.f32 %v11923_v22, %v11959_v13  ;;  %v11967_v63 = vadd.f32 %v5518_v29, %v5483_v27 }
0x25ca   :  { %v5544_v48 = vmul.f32 1.442695, %v5534_v0 }
0x25cb   :  { %9879 = vpow2.f32 %v5538_v37  ;;  %v5488_v9 = vadd.f32 %v11847_v51, %v5440_v5  ;;  %v5532_v46 = vsub.f32 0.0, %v11967_v63  ;;  %v5521_v51 = vmul.f32 %v11926_v59, %v11003_v1 }
0x25cc   :  { %9881 = vrsqrt.f32 %v11963_v21  ;;  %v11974_v62 = vpop.xlane.xlu0 %5254  ;;  %v5274_v37 = vand.u32 2147483648, %v5262_v14  ;;  %vm5285_vm1 = vcmp.eq.f32.partialorder %v11963_v21, inf  ;;  %vm5287_vm2 = vcmp.eq.f32.partialorder %v11963_v21, 0.0 }
0x25cd   :  { %v9876_v49 = vpop.eup %9875  ;;  %v11977_v54 = vadd.f32 1e-08, %v11974_v62  ;;  %v5442_v25 = vmul.f32 %v11923_v22, %v11974_v62  ;;  %v5540_v44 = vmul.f32 1.442695, %v5532_v46  ;;  %v11981_v19 = vadd.f32 %v5519_v53, %v5488_v9 }
0x25ce   :  { %9883 = vpow2.f32 %v5544_v48  ;;  %v5270_v7 = vmul.f32 %v9876_v49, %v5262_v14 }
0x25cf   :  { %9885 = vrsqrt.f32 %v11977_v54  ;;  %v5496_v16 = vadd.f32 %v11863_v28, %v5442_v25  ;;  %v5533_v27 = vsub.f32 0.0, %v11981_v19  ;;  %v5522_v28 = vmul.f32 %v11926_v59, %v10998_v58 }
0x25d0   :  { %v11988_v29 = vpop.xlane.xlu0 %5257  ;;  %9887 = vpow2.f32 %v5540_v44  ;;  %v5272_v0 = vsel %vm5271_vm7, %v5262_v14, %v5270_v7  ;;  %vm5299_vm3 = vcmp.eq.f32.partialorder %v11977_v54, inf  ;;  %vm5301_vm4 = vcmp.eq.f32.partialorder %v11977_v54, 0.0 }
0x25d1   :  { %v9878_v5 = vpop.eup %9877  ;;  %v11991_v48 = vadd.f32 1e-08, %v11988_v29  ;;  %v5443_v9 = vmul.f32 %v11923_v22, %v11988_v29  ;;  %v5542_v46 = vmul.f32 1.442695, %v5533_v27  ;;  %v11995_v53 = vadd.f32 %v5521_v51, %v5496_v16 }
0x25d2   :  { %v5275_v49 = vsel %vm5273_vm8, %v5274_v37, %v5272_v0  ;;  %v5277_v25 = vmul.f32 %v9878_v5, %v11948_v61  ;;  %v5281_v5 = vand.u32 2147483648, %v11948_v61 }
0x25d3   :  { %9889 = vrsqrt.f32 %v11991_v48  ;;  %v5499_v14 = vadd.f32 %v11865_v18, %v5443_v9  ;;  %v5535_v44 = vsub.f32 0.0, %v11995_v53  ;;  %v5318_v7 = vadd.f32 1.0, %v5275_v49 }
0x25d4   :  { %v12004_v15 = vpop.xlane.xlu0 %5260  ;;  %9891 = vpow2.f32 %v5542_v46  ;;  %v5279_v51 = vsel %vm5278_vm14, %v11948_v61, %v5277_v25  ;;  %v5523_v18 = vmul.f32 %v11926_v59, %v11010_v34  ;;  %v5288_v61 = vand.u32 2147483648, %v11963_v21 }
0x25d5   :  { %v9880_v16 = vpop.eup %9879  ;;  %v5444_v27 = vmul.f32 %v11923_v22, %v12004_v15  ;;  %v5546_v0 = vmul.f32 1.442695, %v5535_v44  ;;  %v12009_v37 = vadd.f32 %v5522_v28, %v5499_v14  ;;  %9893 = vrcp.f32 %v5318_v7 }
0x25d6   :  { %v9882_v8 = vpop.eup %9881  ;;  %v5552_v17 = vadd.f32 1.0, %v9880_v16  ;;  %v5282_v49 = vsel %vm5280_vm15, %v5281_v5, %v5279_v51  ;;  %vm5306_vm5 = vcmp.eq.f32.partialorder %v11991_v48, inf  ;;  %vm5308_vm6 = vcmp.eq.f32.partialorder %v11991_v48, 0.0 }
0x25d7   :  { %v5504_v9 = vadd.f32 %v11861_v35, %v5444_v27  ;;  %v5536_v46 = vsub.f32 0.0, %v12009_v37  ;;  %v5319_v28 = vadd.f32 1.0, %v5282_v49  ;;  %v5284_v25 = vmul.f32 %v9882_v8, %v11963_v21 }
0x25d8   :  { %v9884_v22 = vpop.eup %9883  ;;  %9895 = vrcp.f32 %v5552_v17  ;;  %v5302_v27 = vand.u32 2147483648, %v11977_v54 }
0x25d9   :  { %v9886_v14 = vpop.eup %9885  ;;  %9897 = vpow2.f32 %v5546_v0  ;;  %v5548_v59 = vmul.f32 1.442695, %v5536_v46  ;;  %v12020_v44 = vadd.f32 %v5523_v18, %v5504_v9  ;;  %v5286_v7 = vsel %vm5285_vm1, %v11963_v21, %v5284_v25 }
0x25da   :  { %v9888_v35 = vpop.eup %9887  ;;  %9899 = vrcp.f32 %v5319_v28  ;;  %v5298_v51 = vmul.f32 %v9886_v14, %v11977_v54  ;;  %v5289_v16 = vsel %vm5287_vm2, %v5288_v61, %v5286_v7  ;;  %v5555_v49 = vadd.f32 1.0, %v9884_v22 }
0x25db   :  { %v5553_v17 = vadd.f32 1.0, %v9888_v35  ;;  %v5537_v8 = vsub.f32 0.0, %v12020_v44  ;;  %9901 = vpow2.f32 %v5548_v59  ;;  %v5320_v0 = vadd.f32 1.0, %v5289_v16 }
0x25dc   :  { %v5300_v5 = vsel %vm5299_vm3, %v11977_v54, %v5298_v51  ;;  %v5309_v59 = vand.u32 2147483648, %v11991_v48 }
0x25dd   :  { %v9890_v18 = vpop.eup %9889  ;;  %9903 = vrcp.f32 %v5553_v17  ;;  %v5550_v9 = vmul.f32 1.442695, %v5537_v8  ;;  %v5303_v21 = vsel %vm5301_vm4, %v5302_v27, %v5300_v5 }
0x25de   :  { %v9892_v46 = vpop.eup %9891  ;;  %9905 = vrcp.f32 %v5320_v0  ;;  %v5322_v28 = vadd.f32 1.0, %v5303_v21  ;;  %v5305_v25 = vmul.f32 %v9890_v18, %v11991_v48 }
0x25df   :  { %v5554_v14 = vadd.f32 1.0, %v9892_v46  ;;  %9907 = vpow2.f32 %v5550_v9  ;;  %v9894_v61 = vpop.eup %9893 }
0x25e0   :  { %v5307_v35 = vsel %vm5306_vm5, %v11991_v48, %v5305_v25  ;;  %v12036_v54 = vmul.f32 %v9894_v61, %v11887_v31 }
0x25e1   :  { %9909 = vrcp.f32 %v5554_v14  ;;  %v5310_v22 = vsel %vm5308_vm6, %v5309_v59, %v5307_v35 }
0x25e2   :  { %v9896_v7 = vpop.eup %9895  ;;  %9911 = vrcp.f32 %v5322_v28  ;;  %v5323_v51 = vadd.f32 1.0, %v5310_v22 }
0x25e3   :  { %v9898_v17 = vpop.eup %9897  ;;  %v5566_v8 = vmul.f32 %v9896_v7, %v11945_v3  ;;  %9913 = vrcp.f32 %v5555_v49 }
0x25e4   :  { %v9900_v16 = vpop.eup %9899  ;;  %v5556_v27 = vadd.f32 1.0, %v9898_v17  ;;  %9915 = vrcp.f32 %v5323_v51 }
0x25e5   :  { %8889 = vmatmul.mubr.msk.f32.vlgmr.msra.gmra.mrb[116].mxu1 %vm552_vm11, %v5566_v8  ;;  %v12041_v0 = vmul.f32 %v9900_v16, %v11895_v20  ;;  %v9902_v48 = vpop.eup %9901 }
0x25e6   :  { %8891 = vmatprep.mubr.msk.f32.mxu1 %vm10512_vm0, %v12425_v39  ;;  %9917 = vrcp.f32 %v5556_v27  ;;  %v5557_v5 = vadd.f32 1.0, %v9902_v48 }
0x25e7   :  { %v9904_v31 = vpop.eup %9903 }
0x25e8   :  { %v9906_v18 = vpop.eup %9905  ;;  %v5567_v9 = vmul.f32 %v9904_v31, %v11967_v63  ;;  %9919 = vrcp.f32 %v5557_v5 }
0x25e9   :  { %v9908_v3 = vpop.eup %9907  ;;  %v12047_v21 = vmul.f32 %v9906_v18, %v11885_v33 }
0x25ea   :  { %8892 = vmatmul.mubr.msk.f32.gmra.mrb[118].mxu1 %vm552_vm11, %v5567_v9  ;;  %v5558_v20 = vadd.f32 1.0, %v9908_v3 }
0x25eb   :  { %v9910_v46 = vpop.eup %9909  ;;  %8894 = vmatprep.mubr.msk.f32.mxu1 %vm10512_vm0, %v12425_v39 }
0x25ec   :  { %v9912_v49 = vpop.eup %9911  ;;  %v5568_v28 = vmul.f32 %v9910_v46, %v11981_v19  ;;  %9921 = vrcp.f32 %v5558_v20 }
0x25ed   :  { %v9914_v25 = vpop.eup %9913  ;;  %v12054_v14 = vmul.f32 %v9912_v49, %v11906_v38 }
0x25ee   :  { %v9916_v63 = vpop.eup %9915  ;;  %8895 = vmatmul.mubr.msk.f32.gmra.mrb[120].mxu1 %vm552_vm11, %v5568_v28  ;;  %v5569_v59 = vmul.f32 %v9914_v25, %v11952_v24 }
0x25ef   :  { %8897 = vmatprep.mubr.msk.f32.mxu1 %vm10512_vm0, %v12425_v39  ;;  %v12060_v33 = vmul.f32 %v9916_v63, %v11908_v11 }
0x25f0   :  { %v9918_v61 = vpop.eup %9917 }
0x25f1   :  { %v5570_v38 = vmul.f32 %v9918_v61, %v11995_v53  ;;  %v7826_v53 = vld [vmem:[%s12415_s25 + $0x4] ss:$0 sm:$0xff] }
0x25f2   :  { %8898 = vmatmul.mubr.msk.f32.gmra.mrb[122].mxu1 %vm552_vm11, %v5569_v59  ;;  %v9920_v19 = vpop.eup %9919 }
0x25f3   :  { %8900 = vmatprep.mubr.msk.f32.mxu1 %vm10512_vm0, %v12425_v39  ;;  %v5571_v11 = vmul.f32 %v9920_v19, %v12009_v37 }
0x25f6   :  { %8901 = vmatmul.mubr.msk.f32.gmra.mrb[124].mxu1 %vm552_vm11, %v5570_v38  ;;  %v9922_v35 = vpop.eup %9921 }
0x25f7   :  { %8903 = vmatprep.mubr.msk.f32.mxu1 %vm10512_vm0, %v12425_v39  ;;  %v5572_v24 = vmul.f32 %v9922_v35, %v12020_v44 }
0x25fa   :  { %8904 = vmatmul.mubr.msk.f32.gmra.mrb[126].mxu1 %vm552_vm11, %v5571_v11 }
0x25fb   :  { %8906 = vmatprep.mubr.msk.f32.mxu1 %vm10512_vm0, %v12425_v39 }
0x25fe   :  { %8907 = vmatmul.mubr.msk.f32.gmra.mrb[128].mxu1 %vm552_vm11, %v5572_v24 }
0x25ff   :  { %8962 = vmatprep.mubr.msk.f32.mxu1 %vm10512_vm0, %v12425_v39 }
0x26b8   :  { %v5673_v22 = vpop.f32.mrb[116].mxu1 }
0x26b9   :  { %v5674_v7 = vadd.f32 %v7826_v53, %v5673_v22  ;;  %v8890_v51 = vpop.f32.mrb[117].mxu1 }
0x26bb   :  { %v5707_v17 = vsub.f32 0.0, %v5674_v7 }
0x26bd   :  { %v5714_v8 = vmul.f32 1.442695, %v5707_v17  ;;  %v5678_v37 = vpop.f32.mrb[118].mxu1 }
0x26be   :  { %v5679_v16 = vadd.f32 %v7826_v53, %v5678_v37  ;;  %v8893_v27 = vpop.f32.mrb[119].mxu1 }
0x26bf   :  { %9923 = vpow2.f32 %v5714_v8 }
0x26c0   :  { %v5708_v48 = vsub.f32 0.0, %v5679_v16 }
0x26c1   :  { %v5683_v31 = vpop.f32.mrb[120].mxu1 }
0x26c2   :  { %v5716_v5 = vmul.f32 1.442695, %v5708_v48  ;;  %v5684_v18 = vadd.f32 %v7826_v53, %v5683_v31  ;;  %v8896_v44 = vpop.f32.mrb[121].mxu1 }
0x26c4   :  { %9925 = vpow2.f32 %v5716_v5  ;;  %v5709_v9 = vsub.f32 0.0, %v5684_v18 }
0x26c5   :  { %v5688_v3 = vpop.f32.mrb[122].mxu1 }
0x26c6   :  { %v5718_v46 = vmul.f32 1.442695, %v5709_v9  ;;  %v5689_v20 = vadd.f32 %v7826_v53, %v5688_v3  ;;  %v8899_v49 = vpop.f32.mrb[123].mxu1 }
0x26c8   :  { %9927 = vpow2.f32 %v5718_v46  ;;  %v5710_v28 = vsub.f32 0.0, %v5689_v20 }
0x26c9   :  { %v9924_v25 = vpop.eup %9923  ;;  %v5693_v63 = vpop.f32.mrb[124].mxu1 }
0x26ca   :  { %v5728_v59 = vadd.f32 1.0, %v9924_v25  ;;  %v5720_v61 = vmul.f32 1.442695, %v5710_v28  ;;  %v5694_v38 = vadd.f32 %v7826_v53, %v5693_v63  ;;  %v8902_v19 = vpop.f32.mrb[125].mxu1 }
0x26cc   :  { %9929 = vrcp.f32 %v5728_v59  ;;  %v5711_v11 = vsub.f32 0.0, %v5694_v38 }
0x26cd   :  { %9931 = vpow2.f32 %v5720_v61  ;;  %v5698_v35 = vpop.f32.mrb[126].mxu1 }
0x26ce   :  { %v9926_v24 = vpop.eup %9925  ;;  %v5722_v22 = vmul.f32 1.442695, %v5711_v11  ;;  %v5699_v51 = vadd.f32 %v7826_v53, %v5698_v35  ;;  %v8905_v17 = vpop.f32.mrb[127].mxu1 }
0x26cf   :  { %v5729_v8 = vadd.f32 1.0, %v9926_v24 }
0x26d0   :  { %9933 = vpow2.f32 %v5722_v22  ;;  %v5712_v37 = vsub.f32 0.0, %v5699_v51 }
0x26d1   :  { %9935 = vrcp.f32 %v5729_v8  ;;  %v5703_v27 = vpop.f32.mrb[128].mxu1 }
0x26d2   :  { %v9928_v48 = vpop.eup %9927  ;;  %v5724_v31 = vmul.f32 1.442695, %v5712_v37  ;;  %v5704_v5 = vadd.f32 %v7826_v53, %v5703_v27  ;;  %v8908_v44 = vpop.f32.mrb[129].mxu1 }
0x26d3   :  { %v5730_v9 = vadd.f32 1.0, %v9928_v48 }
0x26d4   :  { %9937 = vpow2.f32 %v5724_v31  ;;  %v5713_v3 = vsub.f32 0.0, %v5704_v5 }
0x26d5   :  { %9939 = vrcp.f32 %v5730_v9 }
0x26d6   :  { %v9930_v46 = vpop.eup %9929  ;;  %v5726_v49 = vmul.f32 1.442695, %v5713_v3 }
0x26d7   :  { %v9932_v28 = vpop.eup %9931  ;;  %v5742_v59 = vmul.f32 %v9930_v46, %v5674_v7 }
0x26d8   :  { %v5731_v25 = vadd.f32 1.0, %v9932_v28  ;;  %9941 = vpow2.f32 %v5726_v49 }
0x26d9   :  { %v5749_v53 = vmul.f32 %v5742_v59, %v11038_v41 }
0x26da   :  { %v9934_v63 = vpop.eup %9933  ;;  %9943 = vrcp.f32 %v5731_v25 }
0x26db   :  { %v9936_v61 = vpop.eup %9935  ;;  %v5732_v19 = vadd.f32 1.0, %v9934_v63 }
0x26dc   :  { %v5743_v11 = vmul.f32 %v9936_v61, %v5679_v16 }
0x26dd   :  { %9945 = vrcp.f32 %v5732_v19 }
0x26de   :  { %v9938_v35 = vpop.eup %9937  ;;  %v5750_v24 = vmul.f32 %v5743_v11, %v11040_v23  ;;  %v5810_v11 = vld [vmem:[#allocation20 + $0x80] sm:$0xff] }
0x26df   :  { %v5733_v22 = vadd.f32 1.0, %v9938_v35  ;;  %v9940_v17 = vpop.eup %9939 }
0x26e0   :  { %v5756_v8 = vpack.c.bf16 %v5750_v24, %v5749_v53  ;;  %v5744_v27 = vmul.f32 %v9940_v17, %v5684_v18  ;;  %v5812_v53 = vld [vmem:[#allocation20 + $0x90] sm:$0xff]  ;;  %v5813_v24 = vld [vmem:[#allocation20 + $0x98] sm:$0xff]  ;;  %v5806_v17 = vld [vmem:[#allocation19 + $0x88] sm:$0xff] }
0x26e1   :  { %9947 = vrcp.f32 %v5733_v22  ;;  %v5805_v22 = vld [vmem:[#allocation19 + $0x80] sm:$0xff] }
0x26e2   :  { %v9942_v37 = vpop.eup %9941  ;;  %8910 = vmatpush3.bf16.msra.mxu0 %v5756_v8  ;;  %v5751_v44 = vmul.f32 %v5744_v27, %v11045_v42 }
0x26e3   :  { %v5734_v48 = vadd.f32 1.0, %v9942_v37  ;;  %8911 = vmatprep.subr.bf16.mxu0 %v12425_v39  ;;  %v9307_v37 = vpack.c.bf16 %v5806_v17, %v5805_v22 }
0x26e4   :  { %v9944_v7 = vpop.eup %9943 }
0x26e5   :  { %v5745_v31 = vmul.f32 %v9944_v7, %v5689_v20  ;;  %9949 = vrcp.f32 %v5734_v48  ;;  %v5807_v7 = vld [vmem:[#allocation19 + $0x90] sm:$0xff] }
0x26e7   :  { %v9946_v16 = vpop.eup %9945  ;;  %v5752_v9 = vmul.f32 %v5745_v31, %v11047_v45  ;;  %v5808_v31 = vld [vmem:[#allocation19 + $0x98] sm:$0xff] }
0x26e8   :  { %v5746_v46 = vmul.f32 %v9946_v16, %v5694_v38  ;;  %v5811_v38 = vld [vmem:[#allocation20 + $0x88] sm:$0xff] }
0x26e9   :  { %v5757_v3 = vpack.c.bf16 %v5752_v9, %v5751_v44  ;;  %v9310_v9 = vpack.c.bf16 %v5808_v31, %v5807_v7 }
0x26ea   :  { %v5753_v18 = vmul.f32 %v5746_v46, %v11051_v2  ;;  %v5974_v46 = vld [vmem:[#allocation22 + $0x88] sm:$0xff] }
0x26eb   :  { %v9948_v49 = vpop.eup %9947  ;;  %8912 = vmatpush3.bf16.msra.mxu0 %v5757_v3  ;;  %v5973_v3 = vld [vmem:[#allocation22 + $0x80] sm:$0xff] }
0x26ec   :  { %v5747_v28 = vmul.f32 %v9948_v49, %v5699_v51  ;;  %8913 = vmatprep.subr.bf16.mxu0 %v12425_v39  ;;  %v9301_v51 = vpack.c.bf16 %v5811_v38, %v5810_v11  ;;  %v5975_v49 = vld [vmem:[#allocation22 + $0x90] sm:$0xff] }
0x26ee   :  { %v5754_v25 = vmul.f32 %v5747_v28, %v11055_v4  ;;  %v9313_v28 = vpack.c.bf16 %v5974_v46, %v5973_v3 }
0x26ef   :  { %v9950_v63 = vpop.eup %9949 }
0x26f0   :  { %v5758_v59 = vpack.c.bf16 %v5754_v25, %v5753_v18  ;;  %v5748_v20 = vmul.f32 %v9950_v63, %v5704_v5  ;;  %v9304_v5 = vpack.c.bf16 %v5813_v24, %v5812_v53  ;;  %v5976_v18 = vld [vmem:[#allocation22 + $0x98] sm:$0xff]  ;;  %v7842_v63 = vld [vmem:[%s12409_s22 + $0xa0] sm:$0xff] }
0x26f1   :  { %v9316_v25 = vpack.c.bf16 %v5976_v18, %v5975_v49  ;;  %v7838_v53 = vld [vmem:[%s12416_s26 + $0x4] ss:$0 sm:$0xff]  ;;  %v7846_v49 = vld [vmem:[#allocation16 + $0x5] ss:$0 sm:$0xff] }
0x26f2   :  { %v5755_v61 = vmul.f32 %v5748_v20, %v11059_v47  ;;  %8914 = vmatpush3.bf16.msra.mxu0 %v5758_v59  ;;  %v7843_v59 = vld [vmem:[%s12409_s22 + $0xa8] sm:$0xff]  ;;  %v7844_v20 = vld [vmem:[%s12409_s22 + $0xb0] sm:$0xff] }
0x26f3   :  { %8915 = vmatprep.subr.bf16.mxu0 %v12425_v39 }
0x26f4   :  { %v5759_v19 = vpack.c.bf16 %v5755_v61, %v5755_v61  ;;  %v9319_v61 = vpack.c.bf16 %v7843_v59, %v7842_v63 }
0x26f6   :  { %v5761_v35 = vsel %vm1376_vm10, %v5759_v19, 0  ;;  %v7845_v19 = vld [vmem:[%s12409_s22 + $0xb8] sm:$0xff]  ;;  %9320 = vmatpush3.bf16.msra.mxu1 %v9319_v61 }
0x26f7   :  { %8916 = vmatpush3.bf16.msra.mxu0 %v5761_v35  ;;  %v9322_v11 = vpack.c.bf16 %v7845_v19, %v7844_v20  ;;  %9321 = vmatprep.subr.bf16.mxu1 %v12426_v32  ;;  %v6297_v20 = vld [vmem:[#allocation17 + $0xa8] sm:$0xff]  ;;  %v6298_v19 = vld [vmem:[#allocation17 + $0xb0] sm:$0xff] }
0x26f8   :  { %9300 = vmatprep.subr.bf16.mxu0 %v12426_v32 }
0x26fa   :  { %8918 = vmatmul.mubr.msk.bf16.vlgmr.msra.gmra.mrb[116].mxu0 %vm1372_vm13, %v11065_v36  ;;  %9323 = vmatpush3.bf16.msra.mxu1 %v9322_v11  ;;  %v6299_v11 = vld [vmem:[#allocation17 + $0xb8] sm:$0xff] }
0x26fb   :  { %9302 = vmatpush3.bf16.msra.mxu0 %v9301_v51  ;;  %8929 = vmatprep.mubr.msk.f32.mxu0 %vm10512_vm0, %v12425_v39 }
0x26fc   :  { %9303 = vmatprep.subr.bf16.mxu0 %v12426_v32  ;;  %9324 = vmatprep.subr.bf16.mxu1 %v12426_v32 }
0x26ff   :  { %9305 = vmatpush3.bf16.msra.mxu0 %v9304_v5 }
0x2700   :  { %9306 = vmatprep.subr.bf16.mxu0 %v12426_v32 }
0x27cd   :  { %v5797_v8 = vpop.f32.mrb[116].mxu0 }
0x27ce   :  { %v5803_v27 = vmul.f32 0.01, %v5797_v8  ;;  %v8919_v48 = vpop.f32.mrb[117].mxu0 }
0x27cf   :  { %v5800_v16 = vpop.f32.mrb[118].mxu0 }
0x27d0   :  { %8930 = vmatmul.mubr.msk.f32.vlgmr.msra.gmra.mrb[106].mxu0 %vm552_vm11, %v5803_v27  ;;  %v8920_v44 = vpop.f32.mrb[119].mxu0  ;;  %v7841_v16 = vld [vmem:[%s12417_s12 + $0x4] ss:$0 sm:$0xff] }
0x27d1   :  { %9308 = vmatpush3.bf16.msra.mxu0 %v9307_v37  ;;  %8940 = vmatprep.mubr.msk.f32.mxu0 %vm10512_vm0, %v12425_v39 }
0x27d2   :  { %9309 = vmatprep.subr.bf16.mxu0 %v12426_v32 }
0x27d5   :  { %9311 = vmatpush3.bf16.msra.mxu0 %v9310_v9 }
0x27d6   :  { %9312 = vmatprep.subr.bf16.mxu0 %v12426_v32 }
0x27d8   :  { %8941 = vmatmul.mubr.msk.f32.vlgmr.msra.gmra.mrb[120].mxu0 %vm552_vm11, %v11798_v10 }
0x27d9   :  { %8951 = vmatprep.mubr.msk.f32.mxu0 %vm10512_vm0, %v12425_v39  ;;  %9314 = vmatpush3.bf16.msra.mxu0 %v9313_v28 }
0x27da   :  { %9315 = vmatprep.subr.bf16.mxu0 %v12426_v32 }
0x27dd   :  { %9317 = vmatpush3.bf16.msra.mxu0 %v9316_v25 }
0x28a3   :  { %v5883_v38 = vpop.f32.mrb[106].mxu0 }
0x28a4   :  { %v8931_v35 = vpop.f32.mrb[107].mxu0 }
0x28a5   :  { %v7849_v35 = vld [vmem:[%s12413_s14 + $0x5] ss:$0 sm:$0xff] }
0x28ab   :  { %v5953_v51 = vpop.f32.mrb[120].mxu0 }
0x28ac   :  { %v5954_v24 = vadd.f32 %v5953_v51, %v5883_v38  ;;  %v8942_v5 = vpop.f32.mrb[121].mxu0  ;;  %v9328_v38 = vpack.c.bf16 %v6299_v11, %v6298_v19  ;;  %v6162_v51 = vmul.f32 %v7849_v35, %v11959_v13 }
0x28ad   :  { %v6160_v5 = vmul.f32 %v7849_v35, %v11928_v12 }
0x28ae   :  { %v5965_v22 = vadd.f32 %v7838_v53, %v5954_v24  ;;  %v7855_v53 = vld [vmem:[%s12414_s23 + $0x5] ss:$0 sm:$0xff] }
0x28b0   :  { %v5966_v17 = vsub.f32 0.0, %v5965_v22 }
0x28b2   :  { %v5967_v8 = vmul.f32 1.442695, %v5966_v17  ;;  %v6241_v17 = vmul.f32 %v7855_v53, %v10962_v56 }
0x28b4   :  { %9951 = vpow2.f32 %v5967_v8 }
0x28be   :  { %v9952_v37 = vpop.eup %9951 }
0x28bf   :  { %v5969_v27 = vadd.f32 1.0, %v9952_v37  ;;  %v6163_v37 = vmul.f32 %v7849_v35, %v11933_v55 }
0x28c1   :  { %9953 = vrcp.f32 %v5969_v27 }
0x28cb   :  { %v9954_v48 = vpop.eup %9953 }
0x28cc   :  { %v5971_v7 = vmul.f32 %v9954_v48, %v5965_v22  ;;  %v6239_v48 = vmul.f32 %v7855_v53, %v10980_v26 }
0x28ce   :  { %8952 = vmatmul.mubr.msk.f32.vlgmr.msra.gmra.mrb[122].mxu0 %vm552_vm11, %v5971_v7 }
0x28cf   :  { %8967 = vmatprep.mubr.msk.bf16.mxu0 %vm640_vm9, %v10836_v43 }
0x29a1   :  { %v6046_v31 = vpop.f32.mrb[122].mxu0 }
0x29a2   :  { %v6050_v44 = vadd.f32 %v6046_v31, %v11798_v10  ;;  %v8953_v9 = vpop.f32.mrb[123].mxu0  ;;  %v6296_v10 = vld [vmem:[#allocation17 + $0xa0] sm:$0xff]  ;;  %v6161_v31 = vmul.f32 %v7849_v35, %v11941_v40 }
0x29a3   :  { %v9325_v61 = vpack.c.bf16 %v6297_v20, %v6296_v10  ;;  %v6242_v9 = vmul.f32 %v7855_v53, %v10985_v30 }
0x29a4   :  { %v6059_v3 = vadd.f32 %v7841_v16, %v6050_v44 }
0x29a6   :  { %v12120_v46 = vmul.f32 %v6059_v3, %v11096_v6 }
0x29a8   :  { %8963 = vmatmul.mubr.msk.f32.vlgmr.msra.gmra.mrb[130].mxu1 %vm552_vm11, %v12120_v46 }
0x29a9   :  { %8983 = vmatprep.mubr.msk.f32.mxu1 %vm10512_vm0, %v12425_v39  ;;  %9326 = vmatpush3.bf16.msra.mxu1 %v9325_v61  ;;  %v6166_v61 = vmul.f32 %v7849_v35, %v12004_v15 }
0x29aa   :  { %9327 = vmatprep.subr.bf16.mxu1 %v12426_v32 }
0x29ad   :  { %9329 = vmatpush3.bf16.msra.mxu1 %v9328_v38 }
0x29ae   :  { %9342 = vmatprep.subr.bf16.mxu1 %v12426_v32 }
0x2a7b   :  { %v6143_v28 = vpop.f32.mrb[130].mxu1 }
0x2a7c   :  { %v6144_v18 = vadd.f32 %v7846_v49, %v6143_v28  ;;  %v8964_v25 = vpop.f32.mrb[131].mxu1 }
0x2a7e   :  { %6148 = vrot.lane.b32.xlu0 %v6144_v18, %s10514_s18 }
0x2af0   :  { %v6149_v63 = vpop.permute.xlu0 %6148 }
0x2af1   :  { %v6151_v59 = vpack.c.bf16 %v6149_v63, %v6144_v18  ;;  %v6240_v18 = vmul.f32 %v7855_v53, %v10960_v52 }
0x2af3   :  { %8965 = vmatprep.subr.bf16.mxu0 %v6151_v59 }
0x2af4   :  { %8966 = vmatpush3.bf16.msra.mxu0 %v6151_v59 }
0x2af5   :  { %9004 = vmatprep.subr.bf16.mxu0 %v12425_v39 }
0x2af7   :  { %8968 = vmatmul.mubr.msk.bf16.vlgmr.msra.gmra.mrb[124].mxu0 %vm640_vm9, %v10842_v50 }
0x2af8   :  { %8971 = vmatprep.mubr.msk.bf16.mxu0 %vm640_vm9, %v10849_v57 }
0x2aff   :  { %8972 = vmatmul.mubr.msk.bf16.gmra.mrb[128].mxu0 %vm640_vm9, %v10854_v60 }
0x2b00   :  { %9012 = vmatprep.mubr.msk.bf16.mxu0 %vm10512_vm0, %v12425_v39 }
0x2bca   :  { %v8969_v24 = vpop.f32.mrb[124].mxu0 }
0x2bcb   :  { %v6210_v22 = vadd.f32 %v8969_v24, %v6162_v51  ;;  %v6201_v8 = vpop.f32.mrb[125].mxu0  ;;  %v6164_v24 = vmul.f32 %v7849_v35, %v11974_v62 }
0x2bcc   :  { %v6202_v27 = vadd.f32 %v6201_v8, %v6160_v5  ;;  %v8970_v7 = vpop.f32.mrb[126].mxu0  ;;  %v6243_v8 = vmul.f32 %v7855_v53, %v11003_v1 }
0x2bcd   :  { %v12146_v16 = vadd.f32 %v6241_v17, %v6210_v22  ;;  %v6213_v44 = vadd.f32 %v8970_v7, %v6163_v37  ;;  %v6204_v3 = vpop.f32.mrb[127].mxu0  ;;  %v6245_v22 = vmul.f32 %v7855_v53, %v11010_v34  ;;  %v6165_v7 = vmul.f32 %v7849_v35, %v11988_v29 }
0x2bce   :  { %v6246_v49 = vadd.f32 %v6239_v48, %v6202_v27  ;;  %v6205_v28 = vadd.f32 %v6204_v3, %v6161_v31 }
0x2bcf   :  { %v6255_v25 = vsub.f32 0.0, %v12146_v16  ;;  %v12151_v63 = vadd.f32 %v6242_v9, %v6213_v44  ;;  %v6244_v9 = vmul.f32 %v7855_v53, %v10998_v58 }
0x2bd0   :  { %v6253_v59 = vsub.f32 0.0, %v6246_v49  ;;  %v6247_v10 = vadd.f32 %v6240_v18, %v6205_v28 }
0x2bd1   :  { %v6264_v20 = vmul.f32 1.442695, %v6255_v25  ;;  %v6256_v11 = vsub.f32 0.0, %v12151_v63 }
0x2bd2   :  { %v6260_v19 = vmul.f32 1.442695, %v6253_v59  ;;  %v6254_v38 = vsub.f32 0.0, %v6247_v10  ;;  %v8973_v51 = vpop.f32.mrb[128].mxu0 }
0x2bd3   :  { %v6226_v5 = vadd.f32 %v8973_v51, %v6166_v61  ;;  %v6217_v17 = vpop.f32.mrb[129].mxu0  ;;  %v6266_v3 = vmul.f32 1.442695, %v6256_v11 }
0x2bd4   :  { %9955 = vpow2.f32 %v6260_v19  ;;  %v6262_v37 = vmul.f32 1.442695, %v6254_v38  ;;  %v6218_v27 = vadd.f32 %v6217_v17, %v6164_v24  ;;  %v8974_v48 = vpop.f32.mrb[130].mxu0 }
0x2bd5   :  { %9957 = vpow2.f32 %v6264_v20  ;;  %v12159_v31 = vadd.f32 %v6245_v22, %v6226_v5  ;;  %v6220_v44 = vpop.f32.mrb[131].mxu0 }
0x2bd6   :  { %9959 = vpow2.f32 %v6262_v37  ;;  %v6250_v28 = vadd.f32 %v6243_v8, %v6218_v27  ;;  %v6221_v18 = vadd.f32 %v6220_v44, %v6165_v7 }
0x2bd7   :  { %9961 = vpow2.f32 %v6266_v3  ;;  %v6259_v51 = vsub.f32 0.0, %v12159_v31 }
0x2bd8   :  { %v6257_v25 = vsub.f32 0.0, %v6250_v28  ;;  %v6251_v59 = vadd.f32 %v6244_v9, %v6221_v18 }
0x2bd9   :  { %v6272_v53 = vmul.f32 1.442695, %v6259_v51 }
0x2bda   :  { %v6268_v61 = vmul.f32 1.442695, %v6257_v25  ;;  %v6258_v19 = vsub.f32 0.0, %v6251_v59 }
0x2bdc   :  { %9963 = vpow2.f32 %v6268_v61  ;;  %v6270_v35 = vmul.f32 1.442695, %v6258_v19 }
0x2bde   :  { %v9956_v38 = vpop.eup %9955 }
0x2bdf   :  { %v9958_v20 = vpop.eup %9957  ;;  %v6274_v24 = vadd.f32 1.0, %v9956_v38 }
0x2be0   :  { %v9960_v5 = vpop.eup %9959  ;;  %v6276_v11 = vadd.f32 1.0, %v9958_v20 }
0x2be1   :  { %9965 = vrcp.f32 %v6274_v24  ;;  %v6275_v22 = vadd.f32 1.0, %v9960_v5  ;;  %v9962_v17 = vpop.eup %9961 }
0x2be2   :  { %9967 = vpow2.f32 %v6270_v35  ;;  %v6277_v8 = vadd.f32 1.0, %v9962_v17 }
0x2be3   :  { %9969 = vrcp.f32 %v6275_v22 }
0x2be4   :  { %9971 = vpow2.f32 %v6272_v53 }
0x2be5   :  { %9973 = vrcp.f32 %v6276_v11 }
0x2be6   :  { %v9964_v37 = vpop.eup %9963  ;;  %9975 = vrcp.f32 %v6277_v8 }
0x2be7   :  { %v6278_v48 = vadd.f32 1.0, %v9964_v37 }
0x2be9   :  { %9977 = vrcp.f32 %v6278_v48 }
0x2beb   :  { %v9966_v27 = vpop.eup %9965 }
0x2bec   :  { %v9968_v7 = vpop.eup %9967  ;;  %v6288_v44 = vmul.f32 %v9966_v27, %v6246_v49 }
0x2bed   :  { %v9970_v9 = vpop.eup %9969  ;;  %v6279_v3 = vadd.f32 1.0, %v9968_v7 }
0x2bee   :  { %8984 = vmatmul.mubr.msk.f32.vlgmr.msra.gmra.mrb[132].mxu1 %vm552_vm11, %v6288_v44  ;;  %v9972_v18 = vpop.eup %9971  ;;  %v6289_v25 = vmul.f32 %v9970_v9, %v6247_v10 }
0x2bef   :  { %8986 = vmatprep.mubr.msk.f32.mxu1 %vm10512_vm0, %v12425_v39  ;;  %v9974_v61 = vpop.eup %9973  ;;  %v6280_v19 = vadd.f32 1.0, %v9972_v18  ;;  %9979 = vrcp.f32 %v6279_v3 }
0x2bf0   :  { %v6290_v49 = vmul.f32 %v9974_v61, %v12146_v16  ;;  %v9976_v38 = vpop.eup %9975 }
0x2bf1   :  { %9981 = vrcp.f32 %v6280_v19  ;;  %v6291_v10 = vmul.f32 %v9976_v38, %v12151_v63 }
0x2bf2   :  { %8987 = vmatmul.mubr.msk.f32.gmra.mrb[134].mxu1 %vm552_vm11, %v6289_v25 }
0x2bf3   :  { %8989 = vmatprep.mubr.msk.f32.mxu1 %vm10512_vm0, %v12425_v39  ;;  %v9978_v51 = vpop.eup %9977 }
0x2bf4   :  { %v6292_v35 = vmul.f32 %v9978_v51, %v6250_v28  ;;  %v7857_v28 = vld [vmem:[%s12415_s25 + $0x5] ss:$0 sm:$0xff] }
0x2bf6   :  { %8990 = vmatmul.mubr.msk.f32.gmra.mrb[136].mxu1 %vm552_vm11, %v6290_v49 }
0x2bf7   :  { %8992 = vmatprep.mubr.msk.f32.mxu1 %vm10512_vm0, %v12425_v39 }
0x2bf9   :  { %v9980_v20 = vpop.eup %9979 }
0x2bfa   :  { %8993 = vmatmul.mubr.msk.f32.gmra.mrb[138].mxu1 %vm552_vm11, %v6291_v10  ;;  %v6293_v16 = vmul.f32 %v9980_v20, %v6251_v59 }
0x2bfb   :  { %8995 = vmatprep.mubr.msk.f32.mxu1 %vm10512_vm0, %v12425_v39  ;;  %v9982_v24 = vpop.eup %9981 }
0x2bfc   :  { %v6294_v63 = vmul.f32 %v9982_v24, %v12159_v31 }
0x2bfe   :  { %8996 = vmatmul.mubr.msk.f32.gmra.mrb[140].mxu1 %vm552_vm11, %v6292_v35 }
0x2bff   :  { %8998 = vmatprep.mubr.msk.f32.mxu1 %vm10512_vm0, %v12425_v39 }
0x2c02   :  { %8999 = vmatmul.mubr.msk.f32.gmra.mrb[142].mxu1 %vm552_vm11, %v6293_v16 }
0x2c03   :  { %9001 = vmatprep.mubr.msk.f32.mxu1 %vm10512_vm0, %v12425_v39 }
0x2c06   :  { %9002 = vmatmul.mubr.msk.f32.gmra.mrb[144].mxu1 %vm552_vm11, %v6294_v63 }
0x2c07   :  { %9046 = vmatprep.mubr.msk.f32.mxu1 %vm10512_vm0, %v12425_v39 }
0x2cc1   :  { %v6395_v5 = vpop.f32.mrb[132].mxu1 }
0x2cc2   :  { %v6396_v22 = vadd.f32 %v7857_v28, %v6395_v5  ;;  %v8985_v53 = vpop.f32.mrb[133].mxu1 }
0x2cc4   :  { %v6429_v11 = vsub.f32 0.0, %v6396_v22 }
0x2cc5   :  { %v6400_v17 = vpop.f32.mrb[134].mxu1 }
0x2cc6   :  { %v6436_v59 = vmul.f32 1.442695, %v6429_v11  ;;  %v6401_v8 = vadd.f32 %v7857_v28, %v6400_v17  ;;  %v8988_v37 = vpop.f32.mrb[135].mxu1 }
0x2cc8   :  { %9983 = vpow2.f32 %v6436_v59  ;;  %v6430_v27 = vsub.f32 0.0, %v6401_v8 }
0x2cc9   :  { %v6405_v48 = vpop.f32.mrb[136].mxu1 }
0x2cca   :  { %v6438_v7 = vmul.f32 1.442695, %v6430_v27  ;;  %v6406_v44 = vadd.f32 %v7857_v28, %v6405_v48  ;;  %v8991_v31 = vpop.f32.mrb[137].mxu1 }
0x2ccc   :  { %9985 = vpow2.f32 %v6438_v7  ;;  %v6431_v9 = vsub.f32 0.0, %v6406_v44 }
0x2ccd   :  { %v6410_v3 = vpop.f32.mrb[138].mxu1 }
0x2cce   :  { %v6440_v18 = vmul.f32 1.442695, %v6431_v9  ;;  %v6411_v25 = vadd.f32 %v7857_v28, %v6410_v3  ;;  %v8994_v61 = vpop.f32.mrb[139].mxu1 }
0x2cd0   :  { %9987 = vpow2.f32 %v6440_v18  ;;  %v6432_v19 = vsub.f32 0.0, %v6411_v25 }
0x2cd1   :  { %v6415_v49 = vpop.f32.mrb[140].mxu1 }
0x2cd2   :  { %v9984_v38 = vpop.eup %9983  ;;  %v6442_v10 = vmul.f32 1.442695, %v6432_v19  ;;  %v6416_v51 = vadd.f32 %v7857_v28, %v6415_v49  ;;  %v8997_v35 = vpop.f32.mrb[141].mxu1 }
0x2cd3   :  { %v6450_v20 = vadd.f32 1.0, %v9984_v38 }
0x2cd4   :  { %9989 = vpow2.f32 %v6442_v10  ;;  %v6433_v16 = vsub.f32 0.0, %v6416_v51 }
0x2cd5   :  { %9991 = vrcp.f32 %v6450_v20  ;;  %v6420_v24 = vpop.f32.mrb[142].mxu1 }
0x2cd6   :  { %v9986_v63 = vpop.eup %9985  ;;  %v6444_v5 = vmul.f32 1.442695, %v6433_v16  ;;  %v6421_v53 = vadd.f32 %v7857_v28, %v6420_v24  ;;  %v9000_v11 = vpop.f32.mrb[143].mxu1 }
0x2cd7   :  { %v6451_v17 = vadd.f32 1.0, %v9986_v63 }
0x2cd8   :  { %9993 = vpow2.f32 %v6444_v5  ;;  %v6434_v59 = vsub.f32 0.0, %v6421_v53 }
0x2cd9   :  { %9995 = vrcp.f32 %v6451_v17  ;;  %v6425_v37 = vpop.f32.mrb[144].mxu1 }
0x2cda   :  { %v9988_v27 = vpop.eup %9987  ;;  %v6446_v48 = vmul.f32 1.442695, %v6434_v59  ;;  %v6426_v7 = vadd.f32 %v7857_v28, %v6425_v37  ;;  %v9003_v31 = vpop.f32.mrb[145].mxu1 }
0x2cdb   :  { %v6452_v9 = vadd.f32 1.0, %v9988_v27 }
0x2cdc   :  { %9997 = vpow2.f32 %v6446_v48  ;;  %v6435_v3 = vsub.f32 0.0, %v6426_v7 }
0x2cdd   :  { %9999 = vrcp.f32 %v6452_v9 }
0x2cde   :  { %v9990_v18 = vpop.eup %9989  ;;  %v6448_v61 = vmul.f32 1.442695, %v6435_v3 }
0x2cdf   :  { %v9992_v19 = vpop.eup %9991  ;;  %v6453_v49 = vadd.f32 1.0, %v9990_v18 }
0x2ce0   :  { %10001 = vpow2.f32 %v6448_v61  ;;  %v6464_v10 = vmul.f32 %v9992_v19, %v6396_v22 }
0x2ce1   :  { %10003 = vrcp.f32 %v6453_v49 }
0x2ce2   :  { %v9994_v38 = vpop.eup %9993  ;;  %v6471_v28 = vmul.f32 %v6464_v10, %v11038_v41 }
0x2ce3   :  { %v9996_v35 = vpop.eup %9995  ;;  %v6454_v20 = vadd.f32 1.0, %v9994_v38 }
0x2ce4   :  { %v6465_v16 = vmul.f32 %v9996_v35, %v6401_v8 }
0x2ce5   :  { %10005 = vrcp.f32 %v6454_v20 }
0x2ce6   :  { %v9998_v24 = vpop.eup %9997  ;;  %v6472_v63 = vmul.f32 %v6465_v16, %v11040_v23  ;;  %v6532_v16 = vld [vmem:[#allocation20 + $0xa0] sm:$0xff] }
0x2ce7   :  { %v10000_v5 = vpop.eup %9999  ;;  %v6455_v11 = vadd.f32 1.0, %v9998_v24 }
0x2ce8   :  { %v6478_v17 = vpack.c.bf16 %v6472_v63, %v6471_v28  ;;  %v6466_v37 = vmul.f32 %v10000_v5, %v6406_v44  ;;  %v6535_v63 = vld [vmem:[#allocation20 + $0xb8] sm:$0xff]  ;;  %v6527_v5 = vld [vmem:[#allocation19 + $0xa0] sm:$0xff] }
0x2ce9   :  { %10007 = vrcp.f32 %v6455_v11  ;;  %v6528_v11 = vld [vmem:[#allocation19 + $0xa8] sm:$0xff] }
0x2cea   :  { %v10002_v59 = vpop.eup %10001  ;;  %9005 = vmatpush3.bf16.msra.mxu0 %v6478_v17  ;;  %v6473_v8 = vmul.f32 %v6466_v37, %v11045_v42 }
0x2ceb   :  { %v10004_v27 = vpop.eup %10003  ;;  %v6456_v48 = vadd.f32 1.0, %v10002_v59  ;;  %9006 = vmatprep.subr.bf16.mxu0 %v12425_v39  ;;  %v9337_v59 = vpack.c.bf16 %v6528_v11, %v6527_v5  ;;  %v7873_v11 = vld [vmem:[%s12418_s28 + $0x40] sm:$0xff] }
0x2cec   :  { %v6467_v22 = vmul.f32 %v10004_v27, %v6411_v25 }
0x2ced   :  { %10009 = vrcp.f32 %v6456_v48  ;;  %v6529_v48 = vld [vmem:[#allocation19 + $0xb0] sm:$0xff] }
0x2cee   :  { %v6474_v31 = vmul.f32 %v6467_v22, %v11047_v45  ;;  %v6530_v22 = vld [vmem:[#allocation19 + $0xb8] sm:$0xff] }
0x2cef   :  { %v10006_v9 = vpop.eup %10005 }
0x2cf0   :  { %v6479_v3 = vpack.c.bf16 %v6474_v31, %v6473_v8  ;;  %v6468_v18 = vmul.f32 %v10006_v9, %v6416_v51  ;;  %v6533_v51 = vld [vmem:[#allocation20 + $0xa8] sm:$0xff]  ;;  %v9340_v9 = vpack.c.bf16 %v6530_v22, %v6529_v48 }
0x2cf1   :  { %v9331_v28 = vpack.c.bf16 %v6533_v51, %v6532_v16 }
0x2cf2   :  { %9007 = vmatpush3.bf16.msra.mxu0 %v6479_v3  ;;  %v6475_v44 = vmul.f32 %v6468_v18, %v11051_v2  ;;  %v6695_v3 = vld [vmem:[#allocation22 + $0xa0] sm:$0xff]  ;;  %v6696_v18 = vld [vmem:[#allocation22 + $0xa8] sm:$0xff] }
0x2cf3   :  { %v10008_v61 = vpop.eup %10007  ;;  %9008 = vmatprep.subr.bf16.mxu0 %v12425_v39 }
0x2cf4   :  { %v6469_v19 = vmul.f32 %v10008_v61, %v6421_v53  ;;  %v6534_v53 = vld [vmem:[#allocation20 + $0xb0] sm:$0xff] }
0x2cf5   :  { %v6697_v61 = vld [vmem:[#allocation22 + $0xb0] sm:$0xff] }
0x2cf6   :  { %v6476_v49 = vmul.f32 %v6469_v19, %v11055_v4  ;;  %v9343_v19 = vpack.c.bf16 %v6696_v18, %v6695_v3  ;;  %v7878_v18 = vld [vmem:[%s12419_s1 + $0x2] ss:$0 sm:$0xff] }
0x2cf7   :  { %v10010_v38 = vpop.eup %10009 }
0x2cf8   :  { %v6480_v10 = vpack.c.bf16 %v6476_v49, %v6475_v44  ;;  %v6470_v25 = vmul.f32 %v10010_v38, %v6426_v7  ;;  %v9334_v7 = vpack.c.bf16 %v6535_v63, %v6534_v53  ;;  %v6698_v44 = vld [vmem:[#allocation22 + $0xb8] sm:$0xff]  ;;  %9344 = vmatpush3.bf16.msra.mxu1 %v9343_v19 }
0x2cf9   :  { %v9346_v49 = vpack.c.bf16 %v6698_v44, %v6697_v61  ;;  %9345 = vmatprep.subr.bf16.mxu1 %v12426_v32 }
0x2cfa   :  { %v6477_v35 = vmul.f32 %v6470_v25, %v11059_v47  ;;  %9009 = vmatpush3.bf16.msra.mxu0 %v6480_v10 }
0x2cfb   :  { %9010 = vmatprep.subr.bf16.mxu0 %v12425_v39 }
0x2cfc   :  { %v6481_v20 = vpack.c.bf16 %v6477_v35, %v6477_v35  ;;  %9347 = vmatpush3.bf16.msra.mxu1 %v9346_v49  ;;  %v7869_v35 = vld [vmem:[%s12416_s26 + $0x5] ss:$0 sm:$0xff] }
0x2cfe   :  { %v6483_v24 = vsel %vm1376_vm10, %v6481_v20, 0 }
0x2cff   :  { %9011 = vmatpush3.bf16.msra.mxu0 %v6483_v24 }
0x2d00   :  { %9330 = vmatprep.subr.bf16.mxu0 %v12426_v32 }
0x2d02   :  { %9013 = vmatmul.mubr.msk.bf16.vlgmr.msra.gmra.mrb[132].mxu0 %vm1372_vm13, %v11065_v36 }
0x2d03   :  { %9332 = vmatpush3.bf16.msra.mxu0 %v9331_v28  ;;  %9024 = vmatprep.mubr.msk.f32.mxu0 %vm10512_vm0, %v12425_v39 }
0x2d04   :  { %9333 = vmatprep.subr.bf16.mxu0 %v12426_v32 }
0x2d07   :  { %9335 = vmatpush3.bf16.msra.mxu0 %v9334_v7 }
0x2d08   :  { %9336 = vmatprep.subr.bf16.mxu0 %v12426_v32 }
0x2dd5   :  { %v6519_v17 = vpop.f32.mrb[132].mxu0 }
0x2dd6   :  { %v6525_v37 = vmul.f32 0.01, %v6519_v17  ;;  %v9014_v27 = vpop.f32.mrb[133].mxu0  ;;  %v7874_v17 = vld [vmem:[%s12418_s28 + $0x48] sm:$0xff] }
0x2dd7   :  { %v6522_v8 = vpop.f32.mrb[134].mxu0  ;;  %v7876_v27 = vld [vmem:[%s12418_s28 + $0x58] sm:$0xff] }
0x2dd8   :  { %9025 = vmatmul.mubr.msk.f32.vlgmr.msra.gmra.mrb[136].mxu0 %vm552_vm11, %v6525_v37  ;;  %v9015_v31 = vpop.f32.mrb[135].mxu0  ;;  %v9349_v37 = vpack.c.bf16 %v7874_v17, %v7873_v11  ;;  %v7872_v8 = vld [vmem:[%s12417_s12 + $0x5] ss:$0 sm:$0xff] }
0x2dd9   :  { %9338 = vmatpush3.bf16.msra.mxu0 %v9337_v59  ;;  %9035 = vmatprep.mubr.msk.f32.mxu0 %vm10512_vm0, %v12425_v39  ;;  %v7875_v59 = vld [vmem:[%s12418_s28 + $0x50] sm:$0xff] }
0x2dda   :  { %9339 = vmatprep.subr.bf16.mxu0 %v12426_v32  ;;  %v9352_v48 = vpack.c.bf16 %v7876_v27, %v7875_v59 }
0x2ddd   :  { %9341 = vmatpush3.bf16.msra.mxu0 %v9340_v9 }
0x2dde   :  { %9348 = vmatprep.subr.bf16.mxu0 %v12426_v32 }
0x2de0   :  { %9036 = vmatmul.mubr.msk.f32.vlgmr.msra.gmra.mrb[138].mxu0 %vm552_vm11, %v12120_v46 }
0x2de1   :  { %9057 = vmatprep.mubr.msk.f32.mxu0 %vm10512_vm0, %v12425_v39  ;;  %9350 = vmatpush3.bf16.msra.mxu0 %v9349_v37 }
0x2de2   :  { %9351 = vmatprep.subr.bf16.mxu0 %v12426_v32 }
0x2de5   :  { %9353 = vmatpush3.bf16.msra.mxu0 %v9352_v48 }
0x2de6   :  { %9354 = vmatprep.subr.bf16.mxu0 %v12426_v32 }
0x2eab   :  { %v6605_v38 = vpop.f32.mrb[136].mxu0 }
0x2eac   :  { %v9026_v10 = vpop.f32.mrb[137].mxu0 }
0x2ead   :  { %v7019_v10 = vld [vmem:[#allocation23 + $0x48] sm:$0xff] }
0x2eb3   :  { %v6675_v25 = vpop.f32.mrb[138].mxu0 }
0x2eb4   :  { %v6676_v20 = vadd.f32 %v6675_v25, %v6605_v38  ;;  %v9037_v16 = vpop.f32.mrb[139].mxu0 }
0x2eb6   :  { %v6687_v51 = vadd.f32 %v7869_v35, %v6676_v20  ;;  %v7020_v35 = vld [vmem:[#allocation23 + $0x50] sm:$0xff]  ;;  %v7021_v20 = vld [vmem:[#allocation23 + $0x58] sm:$0xff] }
0x2eb7   :  { %v9358_v16 = vpack.c.bf16 %v7021_v20, %v7020_v35 }
0x2eb8   :  { %v6688_v24 = vsub.f32 0.0, %v6687_v51 }
0x2eba   :  { %v6689_v28 = vmul.f32 1.442695, %v6688_v24 }
0x2ebc   :  { %10011 = vpow2.f32 %v6689_v28 }
0x2ec6   :  { %v10012_v53 = vpop.eup %10011 }
0x2ec7   :  { %v6691_v63 = vadd.f32 1.0, %v10012_v53 }
0x2ec9   :  { %10013 = vrcp.f32 %v6691_v63 }
0x2ed3   :  { %v10014_v7 = vpop.eup %10013 }
0x2ed4   :  { %v6693_v5 = vmul.f32 %v10014_v7, %v6687_v51 }
0x2ed6   :  { %9047 = vmatmul.mubr.msk.f32.vlgmr.msra.gmra.mrb[146].mxu1 %vm552_vm11, %v6693_v5 }
0x2ed7   :  { %9062 = vmatprep.mubr.msk.bf16.mxu1 %vm640_vm9, %v10836_v43 }
0x2fa9   :  { %v6768_v22 = vpop.f32.mrb[146].mxu1 }
0x2faa   :  { %v6772_v31 = vadd.f32 %v6768_v22, %v12120_v46  ;;  %v9048_v9 = vpop.f32.mrb[147].mxu1  ;;  %v7018_v46 = vld [vmem:[#allocation23 + $0x40] sm:$0xff] }
0x2fab   :  { %v9355_v25 = vpack.c.bf16 %v7019_v10, %v7018_v46 }
0x2fac   :  { %v6781_v3 = vadd.f32 %v7872_v8, %v6772_v31 }
0x2fae   :  { %v12229_v43 = vmul.f32 %v6781_v3, %v11096_v6 }
0x2fb0   :  { %9058 = vmatmul.mubr.msk.f32.vlgmr.msra.gmra.mrb[140].mxu0 %vm552_vm11, %v12229_v43 }
0x2fb1   :  { %9078 = vmatprep.mubr.msk.f32.mxu0 %vm10512_vm0, %v12425_v39  ;;  %9356 = vmatpush3.bf16.msra.mxu0 %v9355_v25 }
0x2fb2   :  { %9357 = vmatprep.subr.bf16.mxu0 %v12426_v32 }
0x2fb5   :  { %9359 = vmatpush3.bf16.msra.mxu0 %v9358_v16 }
0x3083   :  { %v6865_v61 = vpop.f32.mrb[140].mxu0 }
0x3084   :  { %v6866_v19 = vadd.f32 %v7878_v18, %v6865_v61  ;;  %v9059_v44 = vpop.f32.mrb[141].mxu0 }
0x3086   :  { %6870 = vrot.lane.b32.xlu0 %v6866_v19, %s10514_s18 }
0x30f8   :  { %v6871_v49 = vpop.permute.xlu0 %6870 }
0x30f9   :  { %v6873_v38 = vpack.c.bf16 %v6871_v49, %v6866_v19 }
0x30fb   :  { %9060 = vmatprep.subr.bf16.mxu1 %v6873_v38 }
0x30fc   :  { %9061 = vmatpush3.bf16.msra.mxu1 %v6873_v38 }
0x30fd   :  { %9099 = vmatprep.subr.bf16.mxu1 %v12425_v39 }
0x30ff   :  { %9063 = vmatmul.mubr.msk.bf16.vlgmr.msra.gmra.mrb[148].mxu1 %vm640_vm9, %v10842_v50  ;;  %v7881_v50 = vld [vmem:[%s12420_s2 + $0x2] ss:$0 sm:$0xff] }
0x3100   :  { %9066 = vmatprep.mubr.msk.bf16.mxu1 %vm640_vm9, %v10849_v57  ;;  %v6884_v51 = vmul.f32 %v7881_v50, %v11959_v13  ;;  %v7887_v57 = vld [vmem:[%s12421_s24 + $0x2] ss:$0 sm:$0xff]  ;;  %v6885_v7 = vmul.f32 %v7881_v50, %v11933_v55  ;;  %v6883_v59 = vmul.f32 %v7881_v50, %v11941_v40  ;;  %v6888_v18 = vmul.f32 %v7881_v50, %v12004_v15 }
0x3101   :  { %v6963_v53 = vmul.f32 %v7887_v57, %v10962_v56  ;;  %v6961_v11 = vmul.f32 %v7887_v57, %v10980_v26  ;;  %v6964_v13 = vmul.f32 %v7887_v57, %v10985_v30  ;;  %v6962_v8 = vmul.f32 %v7887_v57, %v10960_v52 }
0x3102   :  { %v6886_v30 = vmul.f32 %v7881_v50, %v11974_v62  ;;  %v6967_v38 = vmul.f32 %v7887_v57, %v11010_v34  ;;  %v6965_v46 = vmul.f32 %v7887_v57, %v11003_v1  ;;  %v6887_v20 = vmul.f32 %v7881_v50, %v11988_v29 }
0x3107   :  { %9067 = vmatmul.mubr.msk.bf16.gmra.mrb[152].mxu1 %vm640_vm9, %v10854_v60  ;;  %v6882_v60 = vmul.f32 %v7881_v50, %v11928_v12 }
0x3108   :  { %9107 = vmatprep.mubr.msk.bf16.mxu1 %vm10512_vm0, %v12425_v39 }
0x31d2   :  { %v9064_v24 = vpop.f32.mrb[148].mxu1 }
0x31d3   :  { %v6932_v28 = vadd.f32 %v9064_v24, %v6884_v51  ;;  %v6923_v63 = vpop.f32.mrb[149].mxu1  ;;  %v6966_v24 = vmul.f32 %v7887_v57, %v10998_v58 }
0x31d4   :  { %v6924_v5 = vadd.f32 %v6923_v63, %v6882_v60  ;;  %v9065_v17 = vpop.f32.mrb[150].mxu1 }
0x31d5   :  { %v12255_v37 = vadd.f32 %v6963_v53, %v6932_v28  ;;  %v6935_v27 = vadd.f32 %v9065_v17, %v6885_v7  ;;  %v6926_v48 = vpop.f32.mrb[151].mxu1 }
0x31d6   :  { %v6968_v22 = vadd.f32 %v6961_v11, %v6924_v5  ;;  %v6927_v12 = vadd.f32 %v6926_v48, %v6883_v59 }
0x31d7   :  { %v6977_v56 = vsub.f32 0.0, %v12255_v37  ;;  %v12260_v31 = vadd.f32 %v6964_v13, %v6935_v27 }
0x31d8   :  { %v6975_v9 = vsub.f32 0.0, %v6968_v22  ;;  %v6969_v3 = vadd.f32 %v6962_v8, %v6927_v12 }
0x31d9   :  { %v6986_v26 = vmul.f32 1.442695, %v6977_v56  ;;  %v6978_v61 = vsub.f32 0.0, %v12260_v31 }
0x31da   :  { %v6982_v40 = vmul.f32 1.442695, %v6975_v9  ;;  %v6976_v19 = vsub.f32 0.0, %v6969_v3  ;;  %v9068_v44 = vpop.f32.mrb[152].mxu1 }
0x31db   :  { %v6948_v49 = vadd.f32 %v9068_v44, %v6888_v18  ;;  %v6939_v52 = vpop.f32.mrb[153].mxu1  ;;  %v6988_v60 = vmul.f32 1.442695, %v6978_v61 }
0x31dc   :  { %10015 = vpow2.f32 %v6982_v40  ;;  %v6984_v10 = vmul.f32 1.442695, %v6976_v19  ;;  %v6940_v25 = vadd.f32 %v6939_v52, %v6886_v30  ;;  %v9069_v35 = vpop.f32.mrb[154].mxu1 }
0x31dd   :  { %10017 = vpow2.f32 %v6986_v26  ;;  %v12268_v16 = vadd.f32 %v6967_v38, %v6948_v49  ;;  %v6942_v51 = vpop.f32.mrb[155].mxu1 }
0x31de   :  { %10019 = vpow2.f32 %v6984_v10  ;;  %v6972_v62 = vadd.f32 %v6965_v46, %v6940_v25  ;;  %v6943_v28 = vadd.f32 %v6942_v51, %v6887_v20  ;;  %v7889_v10 = vld [vmem:[%s12422_s7 + $0x2] ss:$0 sm:$0xff] }
0x31df   :  { %10021 = vpow2.f32 %v6988_v60  ;;  %v6981_v5 = vsub.f32 0.0, %v12268_v16 }
0x31e0   :  { %v6979_v34 = vsub.f32 0.0, %v6972_v62  ;;  %v6973_v53 = vadd.f32 %v6966_v24, %v6943_v28 }
0x31e1   :  { %v6994_v58 = vmul.f32 1.442695, %v6981_v5 }
0x31e2   :  { %v6990_v1 = vmul.f32 1.442695, %v6979_v34  ;;  %v6980_v63 = vsub.f32 0.0, %v6973_v53 }
0x31e4   :  { %10023 = vpow2.f32 %v6990_v1  ;;  %v6992_v29 = vmul.f32 1.442695, %v6980_v63 }
0x31e6   :  { %v10016_v7 = vpop.eup %10015 }
0x31e7   :  { %v10018_v50 = vpop.eup %10017  ;;  %v6996_v11 = vadd.f32 1.0, %v10016_v7 }
0x31e8   :  { %v10020_v17 = vpop.eup %10019  ;;  %v6998_v57 = vadd.f32 1.0, %v10018_v50 }
0x31e9   :  { %10025 = vrcp.f32 %v6996_v11  ;;  %v6997_v59 = vadd.f32 1.0, %v10020_v17  ;;  %v10022_v27 = vpop.eup %10021 }
0x31ea   :  { %10027 = vpow2.f32 %v6992_v29  ;;  %v6999_v13 = vadd.f32 1.0, %v10022_v27 }
0x31eb   :  { %10029 = vrcp.f32 %v6997_v59 }
0x31ec   :  { %10031 = vpow2.f32 %v6994_v58 }
0x31ed   :  { %10033 = vrcp.f32 %v6998_v57 }
0x31ee   :  { %v10024_v48 = vpop.eup %10023  ;;  %10035 = vrcp.f32 %v6999_v13 }
0x31ef   :  { %v7000_v8 = vadd.f32 1.0, %v10024_v48 }
0x31f1   :  { %10037 = vrcp.f32 %v7000_v8 }
0x31f3   :  { %v10026_v12 = vpop.eup %10025 }
0x31f4   :  { %v10028_v56 = vpop.eup %10027  ;;  %v7010_v9 = vmul.f32 %v10026_v12, %v6968_v22 }
0x31f5   :  { %v10030_v26 = vpop.eup %10029  ;;  %v7001_v18 = vadd.f32 1.0, %v10028_v56 }
0x31f6   :  { %9079 = vmatmul.mubr.msk.f32.vlgmr.msra.gmra.mrb[142].mxu0 %vm552_vm11, %v7010_v9  ;;  %v10032_v40 = vpop.eup %10031  ;;  %v7011_v61 = vmul.f32 %v10030_v26, %v6969_v3 }
0x31f7   :  { %9081 = vmatprep.mubr.msk.f32.mxu0 %vm10512_vm0, %v12425_v39  ;;  %v10034_v19 = vpop.eup %10033  ;;  %v7002_v44 = vadd.f32 1.0, %v10032_v40  ;;  %10039 = vrcp.f32 %v7001_v18 }
0x31f8   :  { %v7012_v22 = vmul.f32 %v10034_v19, %v12255_v37  ;;  %v10036_v30 = vpop.eup %10035 }
0x31f9   :  { %10041 = vrcp.f32 %v7002_v44  ;;  %v7013_v3 = vmul.f32 %v10036_v30, %v12260_v31 }
0x31fa   :  { %9082 = vmatmul.mubr.msk.f32.gmra.mrb[144].mxu0 %vm552_vm11, %v7011_v61 }
0x31fb   :  { %9084 = vmatprep.mubr.msk.f32.mxu0 %vm10512_vm0, %v12425_v39  ;;  %v10038_v49 = vpop.eup %10037 }
0x31fc   :  { %v7014_v38 = vmul.f32 %v10038_v49, %v6972_v62 }
0x31fe   :  { %9085 = vmatmul.mubr.msk.f32.gmra.mrb[146].mxu0 %vm552_vm11, %v7012_v22 }
0x31ff   :  { %9087 = vmatprep.mubr.msk.f32.mxu0 %vm10512_vm0, %v12425_v39 }
0x3201   :  { %v10040_v52 = vpop.eup %10039 }
0x3202   :  { %9088 = vmatmul.mubr.msk.f32.gmra.mrb[148].mxu0 %vm552_vm11, %v7013_v3  ;;  %v7015_v37 = vmul.f32 %v10040_v52, %v6973_v53 }
0x3203   :  { %9090 = vmatprep.mubr.msk.f32.mxu0 %vm10512_vm0, %v12425_v39  ;;  %v10042_v46 = vpop.eup %10041 }
0x3204   :  { %v7016_v31 = vmul.f32 %v10042_v46, %v12268_v16 }
0x3206   :  { %9091 = vmatmul.mubr.msk.f32.gmra.mrb[150].mxu0 %vm552_vm11, %v7014_v38 }
0x3207   :  { %9093 = vmatprep.mubr.msk.f32.mxu0 %vm10512_vm0, %v12425_v39 }
0x320a   :  { %9094 = vmatmul.mubr.msk.f32.gmra.mrb[152].mxu0 %vm552_vm11, %v7015_v37 }
0x320b   :  { %9096 = vmatprep.mubr.msk.f32.mxu0 %vm10512_vm0, %v12425_v39 }
0x320e   :  { %9097 = vmatmul.mubr.msk.f32.gmra.mrb[154].mxu0 %vm552_vm11, %v7016_v31 }
0x32c9   :  { %v7117_v25 = vpop.f32.mrb[142].mxu0 }
0x32ca   :  { %v7118_v35 = vadd.f32 %v7889_v10, %v7117_v25  ;;  %v9080_v20 = vpop.f32.mrb[143].mxu0  ;;  %v7898_v25 = vld [vmem:[%s10690_s13 + $0x2] ss:$0 sm:$0xff]  ;;  %s10515_s13 = smov [#allocation25]  }
0x32cb   :  { %s7554_s27 = sshll.u32 %s10515_s13, 4  ;;  %s7555_s27 = int_to_ptr.vmem [resolvable:$true] %s7554_s27 }
0x32cc   :  { %v7151_v51 = vsub.f32 0.0, %v7118_v35  ;;  %p10397_p1 = scmp.lt.s32.totalorder %s7555_s27, %s7555_s27 }
0x32cd   :  { %v7122_v24 = vpop.f32.mrb[144].mxu0 }
0x32ce   :  { %v7158_v60 = vmul.f32 1.442695, %v7151_v51  ;;  %v7123_v62 = vadd.f32 %v7889_v10, %v7122_v24  ;;  %v9083_v28 = vpop.f32.mrb[145].mxu0 }
0x32d0   :  { %10043 = vpow2.f32 %v7158_v60  ;;  %v7152_v34 = vsub.f32 0.0, %v7123_v62 }
0x32d1   :  { %v7127_v53 = vpop.f32.mrb[146].mxu0 }
0x32d2   :  { %v7160_v1 = vmul.f32 1.442695, %v7152_v34  ;;  %v7128_v63 = vadd.f32 %v7889_v10, %v7127_v53  ;;  %v9086_v7 = vpop.f32.mrb[147].mxu0 }
0x32d4   :  { %10045 = vpow2.f32 %v7160_v1  ;;  %v7153_v5 = vsub.f32 0.0, %v7128_v63 }
0x32d5   :  { %v7132_v16 = vpop.f32.mrb[148].mxu0 }
0x32d6   :  { %v7162_v29 = vmul.f32 1.442695, %v7153_v5  ;;  %v7133_v50 = vadd.f32 %v7889_v10, %v7132_v16  ;;  %v9089_v11 = vpop.f32.mrb[149].mxu0 }
0x32d8   :  { %10047 = vpow2.f32 %v7162_v29  ;;  %v7154_v17 = vsub.f32 0.0, %v7133_v50 }
0x32d9   :  { %v7137_v59 = vpop.f32.mrb[150].mxu0 }
0x32da   :  { %v10044_v58 = vpop.eup %10043  ;;  %v7164_v57 = vmul.f32 1.442695, %v7154_v17  ;;  %v7138_v27 = vadd.f32 %v7889_v10, %v7137_v59  ;;  %v9092_v13 = vpop.f32.mrb[151].mxu0 }
0x32db   :  { %v7172_v48 = vadd.f32 1.0, %v10044_v58 }
0x32dc   :  { %10049 = vpow2.f32 %v7164_v57  ;;  %v7155_v12 = vsub.f32 0.0, %v7138_v27 }
0x32dd   :  { %10051 = vrcp.f32 %v7172_v48  ;;  %v7142_v8 = vpop.f32.mrb[152].mxu0 }
0x32de   :  { %v10046_v56 = vpop.eup %10045  ;;  %v7166_v9 = vmul.f32 1.442695, %v7155_v12  ;;  %v7143_v26 = vadd.f32 %v7889_v10, %v7142_v8  ;;  %v9095_v18 = vpop.f32.mrb[153].mxu0 }
0x32df   :  { %v7173_v40 = vadd.f32 1.0, %v10046_v56 }
0x32e0   :  { %10053 = vpow2.f32 %v7166_v9  ;;  %v7156_v61 = vsub.f32 0.0, %v7143_v26 }
0x32e1   :  { %10055 = vrcp.f32 %v7173_v40  ;;  %v7147_v19 = vpop.f32.mrb[154].mxu0 }
0x32e2   :  { %v10048_v44 = vpop.eup %10047  ;;  %v7168_v22 = vmul.f32 1.442695, %v7156_v61  ;;  %v7148_v30 = vadd.f32 %v7889_v10, %v7147_v19  ;;  %v9098_v3 = vpop.f32.mrb[155].mxu0 }
0x32e3   :  { %v7174_v49 = vadd.f32 1.0, %v10048_v44 }
0x32e4   :  { %10057 = vpow2.f32 %v7168_v22  ;;  %v7157_v38 = vsub.f32 0.0, %v7148_v30  ;;  %v5268_v22 = vadd.f32 1e-08, %v12004_v15 }
0x32e5   :  { %10059 = vrcp.f32 %v7174_v49 }
0x32e6   :  { %v10050_v52 = vpop.eup %10049  ;;  %v7170_v37 = vmul.f32 1.442695, %v7157_v38  ;;  %vm5313_vm8 = vcmp.eq.f32.partialorder %v5268_v22, inf  ;;  %vm5315_vm14 = vcmp.eq.f32.partialorder %v5268_v22, 0.0 }
0x32e7   :  { %v10052_v46 = vpop.eup %10051  ;;  %v7175_v31 = vadd.f32 1.0, %v10050_v52 }
0x32e8   :  { %v7186_v20 = vmul.f32 %v10052_v46, %v7118_v35  ;;  %10061 = vpow2.f32 %v7170_v37 }
0x32e9   :  { %10063 = vrcp.f32 %v7175_v31 }
0x32ea   :  { %v10054_v51 = vpop.eup %10053  ;;  %v7201_v24 = vmul.f32 %v7898_v25, %v7186_v20  ;;  %v5316_v20 = vand.u32 2147483648, %v5268_v22 }
0x32eb   :  { %v10056_v60 = vpop.eup %10055  ;;  %v7176_v28 = vadd.f32 1.0, %v10054_v51 }
0x32ec   :  { %v7187_v34 = vmul.f32 %v10056_v60, %v7123_v62  ;;  %v7208_v10 = vsel %vm552_vm11, %v7201_v24, 0.0 }
0x32ed   :  { %10065 = vrcp.f32 %v7176_v28  ;;  %7209 = vadd.xlane.f32.xlu1 %v7208_v10 }
0x32ee   :  { %v10058_v53 = vpop.eup %10057  ;;  %v7202_v1 = vmul.f32 %v7898_v25, %v7187_v34 }
0x32ef   :  { %v10060_v7 = vpop.eup %10059  ;;  %v7177_v5 = vadd.f32 1.0, %v10058_v53 }
0x32f0   :  { %v7188_v16 = vmul.f32 %v10060_v7, %v7128_v63  ;;  %v7211_v29 = vsel %vm552_vm11, %v7202_v1, 0.0 }
0x32f1   :  { %10067 = vrcp.f32 %v7177_v5  ;;  %7212 = vadd.xlane.f32.xlu0 %v7211_v29  ;;  %v12432_v5 = vld [vmem:[#allocation57_spill] sm:$0xff] }
0x32f2   :  { %v10062_v35 = vpop.eup %10061  ;;  %v7203_v11 = vmul.f32 %v7898_v25, %v7188_v16 }
0x32f3   :  { %v10064_v17 = vpop.eup %10063  ;;  %v7178_v59 = vadd.f32 1.0, %v10062_v35 }
0x32f4   :  { %v7189_v58 = vmul.f32 %v10064_v17, %v7133_v50  ;;  %v7214_v62 = vsel %vm552_vm11, %v7203_v11, 0.0 }
0x32f5   :  { %10069 = vrcp.f32 %v7178_v59  ;;  %7215 = vadd.xlane.f32.xlu1 %v7214_v62 }
0x32f6   :  { %v7204_v57 = vmul.f32 %v7898_v25, %v7189_v58 }
0x32f7   :  { %v10066_v13 = vpop.eup %10065 }
0x32f8   :  { %v7190_v48 = vmul.f32 %v10066_v13, %v7138_v27  ;;  %v7217_v12 = vsel %vm552_vm11, %v7204_v57, 0.0  ;;  %v5265_v27 = vadd.f32 1e-08, %v11933_v55  ;;  %v12433_v57 = vld [vmem:[#allocation59_spill] sm:$0xff] }
0x32f9   :  { %7218 = vadd.xlane.f32.xlu1 %v7217_v12 }
0x32fa   :  { %v7205_v63 = vmul.f32 %v7898_v25, %v7190_v48  ;;  %10071 = vrsqrt.f32 %v5265_v27  ;;  %vm5292_vm9 = vcmp.eq.f32.partialorder %v5265_v27, inf  ;;  %v5295_v38 = vand.u32 2147483648, %v5265_v27 }
0x32fb   :  { %v10068_v8 = vpop.eup %10067  ;;  %10073 = vrsqrt.f32 %v5268_v22  ;;  %vm5294_vm7 = vcmp.eq.f32.partialorder %v5265_v27, 0.0 }
0x32fc   :  { %v7191_v56 = vmul.f32 %v10068_v8, %v7143_v26  ;;  %v7220_v9 = vsel %vm552_vm11, %v7205_v63, 0.0  ;;  %v7294_v63 = vld [vmem:[#allocation10] sm:$0xff]  ;;  %v7295_v8 = vld [vmem:[#allocation10 + $0x8] sm:$0xff] }
0x32fd   :  { %7221 = vadd.xlane.f32.xlu1 %v7220_v9 }
0x32fe   :  { %v7206_v18 = vmul.f32 %v7898_v25, %v7191_v56 }
0x32ff   :  { %v10070_v40 = vpop.eup %10069 }
0x3300   :  { %v7192_v61 = vmul.f32 %v10070_v40, %v7148_v30  ;;  %v7223_v50 = vsel %vm552_vm11, %v7206_v18, 0.0  ;;  %v7384_v18 = vld [vmem:[#allocation13] sm:$0xff]  ;;  %v7386_v40 = vld [vmem:[#allocation13 + $0x10] sm:$0xff] }
0x3301   :  { %7224 = vadd.xlane.f32.xlu1 %v7223_v50  ;;  %v7387_v50 = vld [vmem:[#allocation13 + $0x18] sm:$0xff] }
0x3302   :  { %v7207_v19 = vmul.f32 %v7898_v25, %v7192_v61 }
0x3304   :  { %v7226_v44 = vsel %vm552_vm11, %v7207_v19, 0.0  ;;  %v10072_v3 = vpop.eup %10071  ;;  %v9370_v19 = vpack.c.bf16 %v7387_v50, %v7386_v40 }
0x3305   :  { %7227 = vadd.xlane.f32.xlu1 %v7226_v44  ;;  %v5291_v26 = vmul.f32 %v10072_v3, %v5265_v27  ;;  %v10074_v52 = vpop.eup %10073  ;;  %v7900_v3 = vld [vmem:[#allocation11] ss:$0 sm:$0xff] }
0x3306   :  { %v5312_v46 = vmul.f32 %v10074_v52, %v5268_v22 }
0x3307   :  { %v5293_v49 = vsel %vm5292_vm9, %v5265_v27, %v5291_v26 }
0x3308   :  { %v5296_v30 = vsel %vm5294_vm7, %v5295_v38, %v5293_v49  ;;  %v5314_v25 = vsel %vm5313_vm8, %v5268_v22, %v5312_v46 }
0x3309   :  { %v5321_v37 = vadd.f32 1.0, %v5296_v30  ;;  %v5317_v15 = vsel %vm5315_vm14, %v5316_v20, %v5314_v25  ;;  %v12434_v25 = vld [vmem:[#allocation58_spill] sm:$0xff] }
0x330a   :  { %v5324_v60 = vadd.f32 1.0, %v5317_v15  ;;  %v7469_v15 = vld [vmem:[%s10695_s17] sm:$0x7]  ;;  %s10392_s17 = scalar_lea.vmem %s7555_s27, 128 }
0x330b   :  { %10075 = vrcp.f32 %v5321_v37  ;;  %p10393_p0 = scmp.ne.s32.totalorder %s7555_s27, %s10392_s17  ;;  %p10398_p2 = scmp.lt.s32.totalorder %s10392_s17, %s10392_s17 }
0x330c   :  { %10077 = vrcp.f32 %v5324_v60 }
0x330d   :  { %p10399_p3 = por %p10398_p2, %p10397_p1 }
0x330f   :  { %p10400_p4 = pnand %p10399_p3, %p10393_p0 }
0x3315   :  { %v10076_v10 = vpop.eup %10075 }
0x3316   :  { %v5335_v16 = vmul.f32 %v10076_v10, %v12432_v5  ;;  %v10078_v17 = vpop.eup %10077 }
0x3317   :  { %v5338_v13 = vmul.f32 %v10078_v17, %v12433_v57 }
0x337a   :  { %v7210_v31 = vpop.xlane.xlu1 %7209 }
0x337b   :  { %v7229_v55 = vmul.f32 %v7210_v31, %v12036_v54 }
0x337d   :  { %v7236_v28 = vmul.f32 %v7229_v55, %v11038_v41 }
0x337e   :  { %v7213_v51 = vpop.xlane.xlu0 %7212 }
0x337f   :  { %v7230_v24 = vmul.f32 %v7213_v51, %v12041_v0 }
0x3381   :  { %v7237_v34 = vmul.f32 %v7230_v24, %v11040_v23  ;;  %v7902_v24 = vld [vmem:[#allocation14] ss:$0 sm:$0xff] }
0x3382   :  { %v7216_v53 = vpop.xlane.xlu1 %7215 }
0x3383   :  { %v7243_v1 = vpack.c.bf16 %v7237_v34, %v7236_v28  ;;  %v7231_v7 = vmul.f32 %v7216_v53, %v12047_v21 }
0x3385   :  { %9100 = vmatpush3.bf16.msra.mxu1 %v7243_v1  ;;  %v7238_v0 = vmul.f32 %v7231_v7, %v11045_v42 }
0x3386   :  { %v7219_v29 = vpop.xlane.xlu1 %7218  ;;  %9101 = vmatprep.subr.bf16.mxu1 %v12425_v39 }
0x3387   :  { %v7232_v54 = vmul.f32 %v7219_v29, %v5335_v16 }
0x3389   :  { %v7239_v35 = vmul.f32 %v7232_v54, %v11047_v45 }
0x338a   :  { %v7222_v41 = vpop.xlane.xlu1 %7221 }
0x338b   :  { %v7244_v11 = vpack.c.bf16 %v7239_v35, %v7238_v0  ;;  %v7233_v23 = vmul.f32 %v7222_v41, %v12054_v14 }
0x338d   :  { %9102 = vmatpush3.bf16.msra.mxu1 %v7244_v11  ;;  %v7240_v58 = vmul.f32 %v7233_v23, %v11051_v2  ;;  %v7296_v2 = vld [vmem:[#allocation10 + $0x10] sm:$0xff] }
0x338e   :  { %v7225_v59 = vpop.xlane.xlu1 %7224  ;;  %9103 = vmatprep.subr.bf16.mxu1 %v12425_v39 }
0x338f   :  { %v7234_v21 = vmul.f32 %v7225_v59, %v12060_v33  ;;  %v9361_v33 = vpack.c.bf16 %v7295_v8, %v7294_v63 }
0x3391   :  { %v7241_v62 = vmul.f32 %v7234_v21, %v11055_v4  ;;  %v7297_v4 = vld [vmem:[#allocation10 + $0x18] sm:$0xff] }
0x3392   :  { %v7228_v42 = vpop.xlane.xlu1 %7227  ;;  %v9364_v9 = vpack.c.bf16 %v7297_v4, %v7296_v2 }
0x3393   :  { %v7245_v48 = vpack.c.bf16 %v7241_v62, %v7240_v58  ;;  %v7235_v45 = vmul.f32 %v7228_v42, %v5338_v13 }
0x3395   :  { %v7242_v12 = vmul.f32 %v7235_v45, %v11059_v47  ;;  %9104 = vmatpush3.bf16.msra.mxu1 %v7245_v48  ;;  %v7293_v47 = vmul.f32 %v12229_v43, %v11096_v6 }
0x3396   :  { %9105 = vmatprep.subr.bf16.mxu1 %v12425_v39 }
0x3397   :  { %v7246_v14 = vpack.c.bf16 %v7242_v12, %v7242_v12 }
0x3399   :  { %v7248_v56 = vsel %vm1376_vm10, %v7246_v14, 0  ;;  %vm7473_vm10 = vcmask 1042432  }
0x339a   :  { %9106 = vmatpush3.bf16.msra.mxu1 %v7248_v56 }
0x339b   :  { %9360 = vmatprep.subr.bf16.mxu1 %v12426_v32 }
0x339d   :  { %9108 = vmatmul.mubr.msk.bf16.vlgmr.msra.gmra.mrb[156].mxu1 %vm1372_vm13, %v11065_v36  ;;  %v7385_v36 = vld [vmem:[#allocation13 + $0x8] sm:$0xff] }
0x339e   :  { %9362 = vmatpush3.bf16.msra.mxu1 %v9361_v33  ;;  %9119 = vmatprep.mubr.msk.f32.mxu1 %vm10512_vm0, %v12425_v39  ;;  %v9367_v61 = vpack.c.bf16 %v7385_v36, %v7384_v18 }
0x339f   :  { %9363 = vmatprep.subr.bf16.mxu1 %v12426_v32 }
0x33a2   :  { %9365 = vmatpush3.bf16.msra.mxu1 %v9364_v9 }
0x33a3   :  { %9366 = vmatprep.subr.bf16.mxu1 %v12426_v32 }
0x33a5   :  { %9120 = vmatmul.mubr.msk.f32.vlgmr.msra.gmra.mrb[160].mxu1 %vm552_vm11, %v7293_v47 }
0x33a6   :  { %9130 = vmatprep.mubr.msk.f32.mxu1 %vm10512_vm0, %v12425_v39  ;;  %9368 = vmatpush3.bf16.msra.mxu1 %v9367_v61 }
0x33a7   :  { %9369 = vmatprep.subr.bf16.mxu1 %v12426_v32 }
0x33aa   :  { %9371 = vmatpush3.bf16.msra.mxu1 %v9370_v19 }
0x33ab   :  { %9133 = vmatprep.subr.mxu1 %v12425_v39 }
0x3470   :  { %v7284_v43 = vpop.f32.mrb[156].mxu1 }
0x3471   :  { %v9109_v44 = vpop.f32.mrb[157].mxu1  ;;  %v7290_v31 = vmul.f32 0.01, %v7284_v43 }
0x3472   :  { %v7287_v27 = vpop.f32.mrb[158].mxu1 }
0x3473   :  { %v9110_v22 = vpop.f32.mrb[159].mxu1  ;;  %v7291_v20 = vadd.f32 %v7290_v31, %v12434_v25 }
0x3475   :  { %v7292_v51 = vmul.f32 %v7291_v20, %v11096_v6 }
0x3478   :  { %v7374_v26 = vpop.f32.mrb[160].mxu1 }
0x3479   :  { %v7375_v49 = vadd.f32 %v7900_v3, %v7374_v26  ;;  %v9121_v38 = vpop.f32.mrb[161].mxu1 }
0x347b   :  { %v7378_v30 = vsub.f32 0.0, %v7375_v49 }
0x347d   :  { %v7379_v52 = vmul.f32 1.442695, %v7378_v30 }
0x347f   :  { %10079 = vpow2.f32 %v7379_v52 }
0x3489   :  { %v10080_v37 = vpop.eup %10079 }
0x348a   :  { %v7381_v46 = vadd.f32 1.0, %v10080_v37 }
0x348c   :  { %10081 = vrcp.f32 %v7381_v46 }
0x3496   :  { %v10082_v32 = vpop.eup %10081 }
0x3497   :  { %v7383_v55 = vmul.f32 %v10082_v32, %v7375_v49 }
0x3499   :  { %9131 = vmatmul.mubr.msk.f32.vlgmr.msra.gmra.mrb[162].mxu1 %vm552_vm11, %v7383_v55 }
0x349a   :  { %9134 = vmatpush3.msk.msra.mxu1 %vm7473_vm10, %v7469_v15  ;;  %9135 = vmatprep.mubr.msk.f32.mxu1 %vm10512_vm0, %v12425_v39 }
0x349d   :  { %9136 = vmatmul.mubr.msk.f32.vlgmr.msra.gmra.mrb[164].mxu1 %vm788_vm12, %v7292_v51 }
0x356c   :  { %v7464_v60 = vpop.f32.mrb[162].mxu1 }
0x356d   :  { %v7465_v28 = vadd.f32 %v7902_v24, %v7464_v60  ;;  %v9132_v34 = vpop.f32.mrb[163].mxu1 }
0x356f   :  { %7468 = vst [vmem:[#allocation25] sm:$0xff] %v7465_v28 }
0x3570   :  { %v7543_v10 = vpop.f32.mrb[164].mxu1 }
0x3571   :  { %10403 = shalt.err (!%p10400_p4)
}
0x3572   :  { %s10404_s29 = scalar_lea.hbm %s10700_s8, 128 }
0x3573   :  { %p10405_p5 = scmp.ne.s32.totalorder %s10700_s8, %s10404_s29  ;;  %p10408_p6 = scmp.lt.u32.totalorder %s10404_s29, %s10700_s8 }
0x3575   :  { %p10410_p7 = pnand %p10408_p6, %p10405_p5 }
0x3577   :  { %10413 = shalt.err (!%p10410_p7)
}
0x3578   :  { %7557 = dma.vmem_to_hbm [thread:$0]  %s7555_s27, 128, %s10700_s8, [#allocation4]   ;;  %7547 = vst [vmem:[#allocation26] sm:$0xff] %v7543_v10  ;;  %v9137_v6 = vpop.f32.mrb[165].mxu1 }
0x3579   :  { %s10414_s9 = scalar_lea.vmem %s12344_s0, 128  ;;  %p10419_p9 = scmp.lt.s32.totalorder %s12344_s0, %s12344_s0 }
0x357a   :  { %p10415_p8 = scmp.ne.s32.totalorder %s12344_s0, %s10414_s9  ;;  %p10420_p10 = scmp.lt.s32.totalorder %s10414_s9, %s10414_s9 }
0x357c   :  { %p10421_p11 = por %p10420_p10, %p10419_p9 }
0x357e   :  { %p10422_p12 = pnand %p10421_p11, %p10415_p8 }
0x3580   :  { %10425 = shalt.err (!%p10422_p12)
}
0x3581   :  { %s10426_s10 = scalar_lea.hbm %s10705_s21, 128 }
0x3582   :  { %p10427_p13 = scmp.ne.s32.totalorder %s10705_s21, %s10426_s10  ;;  %p10430_p0 = scmp.lt.u32.totalorder %s10426_s10, %s10705_s21 }
0x3584   :  { %p10432_p1 = pnand %p10430_p0, %p10427_p13 }
0x3586   :  { %10435 = shalt.err (!%p10432_p1)
}
0x3587   :  { %7567 = dma.vmem_to_hbm [thread:$0]  %s12344_s0, 128, %s10705_s21, [#allocation27]  }
0x3588   :  { %10452 = dma.done.wait [#allocation4], 128  }
0x3589   :  { %10453 = vsyncadd [#allocation4], 4294967168 }
0x358a   :  { %10454 = dma.done.wait [#allocation27], 128  }
0x358b   :  { %10455 = vsyncadd [#allocation27], 4294967168 }
0x358c   :  { %7574 = vsyncpa [#allocation3], 1 }
0x358d   :  { %7575 = vsyncpa [#allocation6], 1 }
0x358e   :  { %7576 = vsyncpa [#allocation9], 1 }
0x358f   :  { %7577 = vsyncpa [#allocation12], 1 }
0x3590   :  { %7578 = vsyncpa [#allocation15], 1 }
0x3591   :  { %7579 = vsyncpa [#allocation18], 1 }
0x3592   :  { %7580 = vsyncpa [#allocation21], 1 }
0x3593   :  { %7581 = vsyncpa [#allocation24], 1 }
0x3594   :  { %7582 = vsyncpa [#allocation4], 1 }
0x3595   :  { %7583 = vsyncpa [#allocation27], 1 }

</bundles_post_ra>
